<compile_context>
chip_gen: v5e
topology: v5e:2x2
jax: 0.10.0
libtpu: 0.0.40
codegen_flags: <defaults>
</compile_context>

<pallas_src>
import jax
import jax.numpy as jnp
from jax.experimental import pallas as pl
from jax.experimental.pallas import tpu as pltpu

HIDDEN = 1024          # hardcoded in the PyTorch module
LANE = 128             # TPU lane width
NEG_BIG = -1e30        # finite "-inf" for padded logit columns (exp -> 0 exactly)


def _mlp_softmax_kernel(x_ref, w1_ref, b1_ref, w2_ref, b2_ref,
                        w3_ref, b3_ref, w4_ref, b4_ref, o_ref):
    # Weights arrive as bf16; accumulate in f32 on the MXU. Bias/ReLU in f32.
    x = x_ref[...].astype(jnp.bfloat16)

    h = jnp.dot(x, w1_ref[...], preferred_element_type=jnp.float32) + b1_ref[...]
    h = jnp.maximum(h, 0.0)

    h = jnp.dot(h.astype(jnp.bfloat16), w2_ref[...],
                preferred_element_type=jnp.float32) + b2_ref[...]
    h = jnp.maximum(h, 0.0)

    h = jnp.dot(h.astype(jnp.bfloat16), w3_ref[...],
                preferred_element_type=jnp.float32) + b3_ref[...]
    h = jnp.maximum(h, 0.0)

    logits = jnp.dot(h.astype(jnp.bfloat16), w4_ref[...],
                     preferred_element_type=jnp.float32) + b4_ref[...]

    # Numerically-stable softmax over the (lane-padded) action axis.
    m = jnp.max(logits, axis=-1, keepdims=True)
    e = jnp.exp(logits - m)                  # padded cols: exp(NEG_BIG - m) == 0
    denom = jnp.sum(e, axis=-1, keepdims=True)
    o_ref[...] = (e * pl.reciprocal(denom, approx=True)).astype(o_ref.dtype)


def policy_estimator_forward(x, kparams, n_outputs):
    """x: (B, n_inputs) f32. kparams: bf16 weights (in,out) + f32 biases (1,out),
    with w4/b4 lane-padded. Returns (B, n_outputs) f32 action probabilities."""
    B, n_in = x.shape
    H = kparams["w1"].shape[1]
    n_out_pad = kparams["w4"].shape[1]

    # Batch tiling: one tile for small batches, 256-row tiles for large ones
    # (the batch grid axis is "parallel" so megacore / v7x's 2 TCs both work).
    if B <= 256:
        b_tile = max(8, ((B + 7) // 8) * 8)
    else:
        b_tile = 256
    b_pad = ((B + b_tile - 1) // b_tile) * b_tile
    if b_pad != B:
        x = jnp.pad(x, ((0, b_pad - B), (0, 0)))

    grid = (b_pad // b_tile,)

    def resident(a):
        # Full-array block, constant index across the grid -> DMA'd once and
        # kept resident in VMEM across all batch tiles.
        return pl.BlockSpec(a.shape, lambda i: (0,) * a.ndim)

    args = (x,
            kparams["w1"], kparams["b1"],
            kparams["w2"], kparams["b2"],
            kparams["w3"], kparams["b3"],
            kparams["w4"], kparams["b4"])

    in_specs = [pl.BlockSpec((b_tile, n_in), lambda i: (i, 0))]
    in_specs += [resident(a) for a in args[1:]]

    weight_bytes = sum(int(a.size) * a.dtype.itemsize for a in args[1:])
    cost = pl.CostEstimate(
        flops=2 * b_pad * (n_in * H + 2 * H * H + H * n_out_pad),
        transcendentals=b_pad * n_out_pad,
        bytes_accessed=weight_bytes + int(x.size) * 4 + b_pad * n_out_pad * 4,
    )

    out = pl.pallas_call(
        _mlp_softmax_kernel,
        out_shape=jax.ShapeDtypeStruct((b_pad, n_out_pad), jnp.float32),
        grid=grid,
        in_specs=in_specs,
        out_specs=pl.BlockSpec((b_tile, n_out_pad), lambda i: (i, 0)),
        compiler_params=pltpu.CompilerParams(
            dimension_semantics=("parallel",),
            # <= 64 MiB physical VMEM on v7x; plenty for ~4.5 MiB bf16 weights
            # (double-buffered) + batch-tile activations.
            vmem_limit_bytes=32 * 1024 * 1024,
        ),
        cost_estimate=cost,
    )(*args)

    return out[:B, :n_outputs]


def init_params(key, n_inputs, n_outputs, hidden=HIDDEN):
    """Deterministic synthetic init (PyTorch-Linear-style uniform), f32, (in,out)."""
    def linear(key, fan_in, fan_out):
        kw, kb = jax.random.split(key)
        bound = 1.0 / jnp.sqrt(jnp.float32(fan_in))
        w = jax.random.uniform(kw, (fan_in, fan_out), jnp.float32, -bound, bound)
        b = jax.random.uniform(kb, (1, fan_out), jnp.float32, -bound, bound)
        return w, b

    k1, k2, k3, k4 = jax.random.split(key, 4)
    w1, b1 = linear(k1, n_inputs, hidden)
    w2, b2 = linear(k2, hidden, hidden)
    w3, b3 = linear(k3, hidden, hidden)
    w4, b4 = linear(k4, hidden, n_outputs)
    return dict(w1=w1, b1=b1, w2=w2, b2=b2, w3=w3, b3=b3, w4=w4, b4=b4)


def prepare_kernel_params(params):
    """One-time conversion: weights -> bf16, biases -> f32, last layer lane-padded."""
    n_out = params["w4"].shape[1]
    n_out_pad = ((n_out + LANE - 1) // LANE) * LANE
    pad = n_out_pad - n_out

    kp = {k: params[k].astype(jnp.bfloat16) for k in ("w1", "w2", "w3")}
    kp.update({k: params[k].astype(jnp.float32) for k in ("b1", "b2", "b3")})

    w4 = params["w4"].astype(jnp.bfloat16)
    b4 = params["b4"].astype(jnp.float32)
    if pad:
        w4 = jnp.pad(w4, ((0, 0), (0, pad)))
        b4 = jnp.pad(b4, ((0, 0), (0, pad)), constant_values=NEG_BIG)
    kp["w4"] = w4
    kp["b4"] = b4
    return kp


if __name__ == "__main__":
    key = jax.random.PRNGKey(0)
    k_params, k_x = jax.random.split(key)

    observation_space = 32   # n_inputs
    action_space = 8         # n_outputs
    batch = 8

    params = init_params(k_params, observation_space, action_space)
    kparams = prepare_kernel_params(params)
    x = jax.random.normal(k_x, (batch, observation_space), jnp.float32)

    probs = policy_estimator_forward(x, kparams, action_space)
    probs = jax.block_until_ready(probs)

    # Pure-JAX reference using the same bf16-rounded weights/activations.
    def reference(xr, p):
        def lin(h, w, b):
            h16 = h.astype(jnp.bfloat16).astype(jnp.float32)
            return h16 @ w.astype(jnp.float32) + b
        h = jnp.maximum(lin(xr, p["w1"], p["b1"]), 0.0)
        h = jnp.maximum(lin(h, p["w2"], p["b2"]), 0.0)
        h = jnp.maximum(lin(h, p["w3"], p["b3"]), 0.0)
        logits = lin(h, p["w4"], p["b4"])
        return jax.nn.softmax(logits, axis=-1)

    ref_probs = reference(x, kparams)[:, :action_space]

    assert probs.shape == (batch, action_space)
    assert jnp.allclose(jnp.sum(probs, axis=-1), 1.0, atol=2e-3)
    assert jnp.allclose(probs, ref_probs, atol=2e-3, rtol=2e-3)

    print("KERNEL_OK")
</pallas_src>

<mosaic_0001>
module attributes {stable_mosaic.version = 11 : i64} {
  func.func @_mlp_softmax_kernel(%arg0: i32, %arg1: memref<8x32xf32, #tpu.memory_space<vmem>>, %arg2: memref<32x1024xbf16, #tpu.memory_space<vmem>>, %arg3: memref<1x1024xf32, #tpu.memory_space<vmem>>, %arg4: memref<1024x1024xbf16, #tpu.memory_space<vmem>>, %arg5: memref<1x1024xf32, #tpu.memory_space<vmem>>, %arg6: memref<1024x1024xbf16, #tpu.memory_space<vmem>>, %arg7: memref<1x1024xf32, #tpu.memory_space<vmem>>, %arg8: memref<1024x128xbf16, #tpu.memory_space<vmem>>, %arg9: memref<1x128xf32, #tpu.memory_space<vmem>>, %arg10: memref<8x128xf32, #tpu.memory_space<vmem>>) attributes {dimension_semantics = [#tpu.dimension_semantics<parallel>], iteration_bounds = array<i64: 1>, scalar_prefetch = 0 : i64, scratch_operands = 0 : i64, tpu.core_type = #tpu.core_type<tc>, window_params = [{transform_indices = @transform_0, window_bounds = array<i64: 8, 32>}, {pipeline_mode = #tpu.pipeline_mode<synchronous>, transform_indices = @transform_1, window_bounds = array<i64: 32, 1024>}, {pipeline_mode = #tpu.pipeline_mode<synchronous>, transform_indices = @transform_2, window_bounds = array<i64: 1, 1024>}, {pipeline_mode = #tpu.pipeline_mode<synchronous>, transform_indices = @transform_3, window_bounds = array<i64: 1024, 1024>}, {pipeline_mode = #tpu.pipeline_mode<synchronous>, transform_indices = @transform_4, window_bounds = array<i64: 1, 1024>}, {pipeline_mode = #tpu.pipeline_mode<synchronous>, transform_indices = @transform_5, window_bounds = array<i64: 1024, 1024>}, {pipeline_mode = #tpu.pipeline_mode<synchronous>, transform_indices = @transform_6, window_bounds = array<i64: 1, 1024>}, {pipeline_mode = #tpu.pipeline_mode<synchronous>, transform_indices = @transform_7, window_bounds = array<i64: 1024, 128>}, {pipeline_mode = #tpu.pipeline_mode<synchronous>, transform_indices = @transform_8, window_bounds = array<i64: 1, 128>}, {transform_indices = @transform_9, window_bounds = array<i64: 8, 128>}]} {
    %c0 = arith.constant 0 : index
    %c0_0 = arith.constant 0 : index
    %0 = vector.load %arg1[%c0, %c0_0] : memref<8x32xf32, #tpu.memory_space<vmem>>, vector<8x32xf32>
    %1 = arith.truncf %0 : vector<8x32xf32> to vector<8x32xbf16>
    %c0_1 = arith.constant 0 : index
    %c0_2 = arith.constant 0 : index
    %2 = vector.load %arg2[%c0_1, %c0_2] : memref<32x1024xbf16, #tpu.memory_space<vmem>>, vector<32x1024xbf16>
    %cst = arith.constant dense<0.000000e+00> : vector<8x1024xf32>
    %3 = tpu.matmul %1, %2, %cst {dimension_numbers = #tpu.dot_dimension_numbers<[1], [0], [0], [1], [0, 0, 1, 1], [], []>} : vector<8x32xbf16>, vector<32x1024xbf16>, vector<8x1024xf32> -> vector<8x1024xf32>
    %c0_3 = arith.constant 0 : index
    %c0_4 = arith.constant 0 : index
    %4 = vector.load %arg3[%c0_3, %c0_4] : memref<1x1024xf32, #tpu.memory_space<vmem>>, vector<1x1024xf32>
    %5 = vector.broadcast %4 : vector<1x1024xf32> to vector<8x1024xf32>
    %6 = arith.addf %3, %5 : vector<8x1024xf32>
    %cst_5 = arith.constant 0.000000e+00 : f32
    %7 = vector.broadcast %cst_5 : f32 to vector<8x1024xf32>
    %8 = arith.maximumf %6, %7 : vector<8x1024xf32>
    %9 = arith.truncf %8 : vector<8x1024xf32> to vector<8x1024xbf16>
    %c0_6 = arith.constant 0 : index
    %c0_7 = arith.constant 0 : index
    %10 = vector.load %arg4[%c0_6, %c0_7] : memref<1024x1024xbf16, #tpu.memory_space<vmem>>, vector<1024x1024xbf16>
    %cst_8 = arith.constant dense<0.000000e+00> : vector<8x1024xf32>
    %11 = tpu.matmul %9, %10, %cst_8 {dimension_numbers = #tpu.dot_dimension_numbers<[1], [0], [0], [1], [0, 0, 1, 1], [], []>} : vector<8x1024xbf16>, vector<1024x1024xbf16>, vector<8x1024xf32> -> vector<8x1024xf32>
    %c0_9 = arith.constant 0 : index
    %c0_10 = arith.constant 0 : index
    %12 = vector.load %arg5[%c0_9, %c0_10] : memref<1x1024xf32, #tpu.memory_space<vmem>>, vector<1x1024xf32>
    %13 = vector.broadcast %12 : vector<1x1024xf32> to vector<8x1024xf32>
    %14 = arith.addf %11, %13 : vector<8x1024xf32>
    %cst_11 = arith.constant 0.000000e+00 : f32
    %15 = vector.broadcast %cst_11 : f32 to vector<8x1024xf32>
    %16 = arith.maximumf %14, %15 : vector<8x1024xf32>
    %17 = arith.truncf %16 : vector<8x1024xf32> to vector<8x1024xbf16>
    %c0_12 = arith.constant 0 : index
    %c0_13 = arith.constant 0 : index
    %18 = vector.load %arg6[%c0_12, %c0_13] : memref<1024x1024xbf16, #tpu.memory_space<vmem>>, vector<1024x1024xbf16>
    %cst_14 = arith.constant dense<0.000000e+00> : vector<8x1024xf32>
    %19 = tpu.matmul %17, %18, %cst_14 {dimension_numbers = #tpu.dot_dimension_numbers<[1], [0], [0], [1], [0, 0, 1, 1], [], []>} : vector<8x1024xbf16>, vector<1024x1024xbf16>, vector<8x1024xf32> -> vector<8x1024xf32>
    %c0_15 = arith.constant 0 : index
    %c0_16 = arith.constant 0 : index
    %20 = vector.load %arg7[%c0_15, %c0_16] : memref<1x1024xf32, #tpu.memory_space<vmem>>, vector<1x1024xf32>
    %21 = vector.broadcast %20 : vector<1x1024xf32> to vector<8x1024xf32>
    %22 = arith.addf %19, %21 : vector<8x1024xf32>
    %cst_17 = arith.constant 0.000000e+00 : f32
    %23 = vector.broadcast %cst_17 : f32 to vector<8x1024xf32>
    %24 = arith.maximumf %22, %23 : vector<8x1024xf32>
    %25 = arith.truncf %24 : vector<8x1024xf32> to vector<8x1024xbf16>
    %c0_18 = arith.constant 0 : index
    %c0_19 = arith.constant 0 : index
    %26 = vector.load %arg8[%c0_18, %c0_19] : memref<1024x128xbf16, #tpu.memory_space<vmem>>, vector<1024x128xbf16>
    %cst_20 = arith.constant dense<0.000000e+00> : vector<8x128xf32>
    %27 = tpu.matmul %25, %26, %cst_20 {dimension_numbers = #tpu.dot_dimension_numbers<[1], [0], [0], [1], [0, 0, 1, 1], [], []>} : vector<8x1024xbf16>, vector<1024x128xbf16>, vector<8x128xf32> -> vector<8x128xf32>
    %c0_21 = arith.constant 0 : index
    %c0_22 = arith.constant 0 : index
    %28 = vector.load %arg9[%c0_21, %c0_22] : memref<1x128xf32, #tpu.memory_space<vmem>>, vector<1x128xf32>
    %29 = vector.broadcast %28 : vector<1x128xf32> to vector<8x128xf32>
    %30 = arith.addf %27, %29 : vector<8x128xf32>
    %cst_23 = arith.constant dense<0xFF800000> : vector<8xf32>
    %31 = vector.multi_reduction <maximumf>, %30, %cst_23 [1] : vector<8x128xf32> to vector<8xf32>
    %32 = vector.shape_cast %31 : vector<8xf32> to vector<8x1xf32>
    %33 = vector.broadcast %32 : vector<8x1xf32> to vector<8x128xf32>
    %34 = arith.subf %30, %33 : vector<8x128xf32>
    %35 = math.exp %34 : vector<8x128xf32>
    %cst_24 = arith.constant dense<0.000000e+00> : vector<8xf32>
    %36 = vector.multi_reduction <add>, %35, %cst_24 [1] : vector<8x128xf32> to vector<8xf32>
    %37 = vector.shape_cast %36 : vector<8xf32> to vector<8x1xf32>
    %38 = tpu.reciprocal %37 {approx = true} : vector<8x1xf32> -> vector<8x1xf32>
    %39 = vector.broadcast %38 : vector<8x1xf32> to vector<8x128xf32>
    %40 = arith.mulf %35, %39 : vector<8x128xf32>
    %c0_25 = arith.constant 0 : index
    %c0_26 = arith.constant 0 : index
    %41 = vector.load %arg10[%c0_25, %c0_26] : memref<8x128xf32, #tpu.memory_space<vmem>>, vector<8x128xf32>
    tpu.vector_store %arg10[%c0_25, %c0_26], %40 {strides = array<i32>} : memref<8x128xf32, #tpu.memory_space<vmem>>, vector<8x128xf32>,
    return
  }
  func.func @transform_0(%arg0: i32) -> (i32, i32) {
    %c0_i32 = arith.constant 0 : i32
    %c0_i32_0 = arith.constant 0 : i32
    return %arg0, %c0_i32 : i32, i32
  }
  func.func @transform_1(%arg0: i32) -> (i32, i32) {
    %c0_i32 = arith.constant 0 : i32
    %c0_i32_0 = arith.constant 0 : i32
    %c0_i32_1 = arith.constant 0 : i32
    return %c0_i32, %c0_i32_0 : i32, i32
  }
  func.func @transform_2(%arg0: i32) -> (i32, i32) {
    %c0_i32 = arith.constant 0 : i32
    %c0_i32_0 = arith.constant 0 : i32
    %c0_i32_1 = arith.constant 0 : i32
    return %c0_i32, %c0_i32_0 : i32, i32
  }
  func.func @transform_3(%arg0: i32) -> (i32, i32) {
    %c0_i32 = arith.constant 0 : i32
    %c0_i32_0 = arith.constant 0 : i32
    %c0_i32_1 = arith.constant 0 : i32
    return %c0_i32, %c0_i32_0 : i32, i32
  }
  func.func @transform_4(%arg0: i32) -> (i32, i32) {
    %c0_i32 = arith.constant 0 : i32
    %c0_i32_0 = arith.constant 0 : i32
    %c0_i32_1 = arith.constant 0 : i32
    return %c0_i32, %c0_i32_0 : i32, i32
  }
  func.func @transform_5(%arg0: i32) -> (i32, i32) {
    %c0_i32 = arith.constant 0 : i32
    %c0_i32_0 = arith.constant 0 : i32
    %c0_i32_1 = arith.constant 0 : i32
    return %c0_i32, %c0_i32_0 : i32, i32
  }
  func.func @transform_6(%arg0: i32) -> (i32, i32) {
    %c0_i32 = arith.constant 0 : i32
    %c0_i32_0 = arith.constant 0 : i32
    %c0_i32_1 = arith.constant 0 : i32
    return %c0_i32, %c0_i32_0 : i32, i32
  }
  func.func @transform_7(%arg0: i32) -> (i32, i32) {
    %c0_i32 = arith.constant 0 : i32
    %c0_i32_0 = arith.constant 0 : i32
    %c0_i32_1 = arith.constant 0 : i32
    return %c0_i32, %c0_i32_0 : i32, i32
  }
  func.func @transform_8(%arg0: i32) -> (i32, i32) {
    %c0_i32 = arith.constant 0 : i32
    %c0_i32_0 = arith.constant 0 : i32
    %c0_i32_1 = arith.constant 0 : i32
    return %c0_i32, %c0_i32_0 : i32, i32
  }
  func.func @transform_9(%arg0: i32) -> (i32, i32) {
    %c0_i32 = arith.constant 0 : i32
    %c0_i32_0 = arith.constant 0 : i32
    return %arg0, %c0_i32 : i32, i32
  }
}

</mosaic_0001>

<bundles_post_ra>
// kernel: tpu_custom_call.1
= control target key start
LH: loop header
LB: loop body
LE: loop exit
PB: predicated region body
PF: predicated region fallthrough
CT: control target
= control target key end

     0   :  { %14 = vsyncpa [#allocation3], 0  ;;  %s15221_s0 = inlined_call_operand.hbm [shape: f32[8,32], index: 0, kind: input, shape index: {}]   ;;  %s15222_s1 = inlined_call_operand.hbm [shape: bf16[32,1024], index: 1, kind: input, shape index: {}]   ;;  %s15223_s2 = inlined_call_operand.hbm [shape: f32[1,1024], index: 2, kind: input, shape index: {}]   ;;  %s15224_s3 = inlined_call_operand.hbm [shape: bf16[1024,1024], index: 3, kind: input, shape index: {}]   ;;  %s15225_s4 = inlined_call_operand.hbm [shape: f32[1,1024], index: 4, kind: input, shape index: {}]   ;;  %s15226_s5 = inlined_call_operand.hbm [shape: bf16[1024,1024], index: 5, kind: input, shape index: {}]   ;;  %s15227_s6 = inlined_call_operand.hbm [shape: f32[1,1024], index: 6, kind: input, shape index: {}]   ;;  %s15228_s7 = inlined_call_operand.hbm [shape: bf16[1024,128], index: 7, kind: input, shape index: {}]   ;;  %s15229_s8 = inlined_call_operand.hbm [shape: f32[1,128], index: 8, kind: input, shape index: {}]   ;;  %s15230_s9 = inlined_call_operand.hbm [shape: f32[8,128], index: 9, kind: output, shape index: {}]  }
   0x1   :  { %15 = vsyncpa [#allocation6], 0 }
   0x2   :  { %16 = vsyncpa [#allocation9], 0 }
   0x3   :  { %17 = vsyncpa [#allocation12], 0 }
   0x4   :  { %18 = vsyncpa [#allocation15], 0  ;;  %s35_s11 = sshll.u32 %s15222_s1, 4  ;;  %s36_s11 = int_to_ptr.hbm [resolvable:$true] %s35_s11 }
   0x5   :  { %19 = vsyncpa [#allocation4], 0  ;;  %s14735_s12 = smov [#allocation5]   ;;  %s59_s16 = sshll.u32 %s15224_s3, 4  ;;  %s60_s16 = int_to_ptr.hbm [resolvable:$true] %s59_s16 }
   0x6   :  { %s37_s13 = sshll.u32 %s14735_s12, 4  ;;  %s14736_s17 = smov 512   ;;  %s38_s13 = int_to_ptr.vmem [resolvable:$true] %s37_s13 }
   0x7   :  { %s14737_s18 = smov 32   ;;  %s14738_s19 = smov [#allocation8]  }
   0x8   :  { %43 = dma.hbm_to_vmem [thread:$0]  %s36_s11, 2048, %s38_s13, [#allocation6], %s14736_s17, %s14736_s17, %s14737_s18  }
   0x9   :  { %s61_s20 = sshll.u32 %s14738_s19, 4  ;;  %s83_s23 = sshll.u32 %s15226_s5, 4  ;;  %s62_s20 = int_to_ptr.vmem [resolvable:$true] %s61_s20  ;;  %s84_s23 = int_to_ptr.hbm [resolvable:$true] %s83_s23 }
   0xa   :  { %67 = dma.hbm_to_vmem [thread:$0]  %s60_s16, 65536, %s62_s20, [#allocation9], %s14736_s17, %s14736_s17, %s14737_s18  }
   0xb   :  { %s107_s25 = sshll.u32 %s15228_s7, 4  ;;  %s14739_s26 = smov [#allocation11]   ;;  %s108_s25 = int_to_ptr.hbm [resolvable:$true] %s107_s25 }
   0xc   :  { %s85_s27 = sshll.u32 %s14739_s26, 4  ;;  %s14740_s3 = smov [#allocation14]   ;;  %s86_s27 = int_to_ptr.vmem [resolvable:$true] %s85_s27 }
   0xd   :  { %91 = dma.hbm_to_vmem [thread:$0]  %s84_s23, 65536, %s86_s27, [#allocation12], %s14736_s17, %s14736_s17, %s14737_s18  }
   0xe   :  { %s109_s28 = sshll.u32 %s14740_s3, 4  ;;  %s14741_s29 = smov 64   ;;  %s110_s28 = int_to_ptr.vmem [resolvable:$true] %s109_s28 }
   0xf   :  { %s14742_s30 = smov 4   ;;  %s25_s11 = sshll.u32 %s15221_s0, 4  ;;  %s26_s11 = int_to_ptr.hbm [resolvable:$true] %s25_s11 }
  0x10   :  { %115 = dma.hbm_to_vmem [thread:$0]  %s108_s25, 8192, %s110_s28, [#allocation15], %s14741_s29, %s14741_s29, %s14742_s30  }
  0x11   :  { %s14743_s12 = smov [#allocation2]   ;;  %s49_s15 = sshll.u32 %s15223_s2, 4  ;;  %s50_s15 = int_to_ptr.hbm [resolvable:$true] %s49_s15 }
  0x12   :  { %s27_s13 = sshll.u32 %s14743_s12, 4  ;;  %s14744_s16 = smov [#allocation7]   ;;  %s28_s13 = int_to_ptr.vmem [resolvable:$true] %s27_s13 }
  0x13   :  { %30 = dma.hbm_to_vmem [thread:$0]  %s26_s11, 128, %s28_s13, [#allocation3]  }
  0x14   :  { %s51_s17 = sshll.u32 %s14744_s16, 4  ;;  %s73_s20 = sshll.u32 %s15225_s4, 4  ;;  %s52_s17 = int_to_ptr.vmem [resolvable:$true] %s51_s17  ;;  %s74_s20 = int_to_ptr.hbm [resolvable:$true] %s73_s20 }
  0x15   :  { %54 = dma.hbm_to_vmem [thread:$0]  %s50_s15, 128, %s52_s17, [#allocation6]  }
  0x16   :  { %s97_s22 = sshll.u32 %s15227_s6, 4  ;;  %s14745_s23 = smov [#allocation10]   ;;  %s98_s22 = int_to_ptr.hbm [resolvable:$true] %s97_s22 }
  0x17   :  { %s75_s1 = sshll.u32 %s14745_s23, 4  ;;  %s14746_s2 = smov [#allocation13]   ;;  %s76_s1 = int_to_ptr.vmem [resolvable:$true] %s75_s1 }
  0x18   :  { %78 = dma.hbm_to_vmem [thread:$0]  %s74_s20, 128, %s76_s1, [#allocation9]  }
  0x19   :  { %s99_s24 = sshll.u32 %s14746_s2, 4  ;;  %s121_s27 = sshll.u32 %s15229_s8, 4  ;;  %s100_s24 = int_to_ptr.vmem [resolvable:$true] %s99_s24  ;;  %s122_s27 = int_to_ptr.hbm [resolvable:$true] %s121_s27 }
  0x1a   :  { %102 = dma.hbm_to_vmem [thread:$0]  %s98_s22, 128, %s100_s24, [#allocation12]  }
  0x1b   :  { %s14747_s4 = smov [#allocation16]  }
  0x1c   :  { %s123_s3 = sshll.u32 %s14747_s4, 4  ;;  %s124_s3 = int_to_ptr.vmem [resolvable:$true] %s123_s3 }
  0x1d   :  { %126 = dma.hbm_to_vmem [thread:$0]  %s122_s27, 16, %s124_s3, [#allocation15]  }
  0x1e   :  { %14723 = dma.done.wait [#allocation3], 128  }
  0x1f   :  { %14724 = vsyncadd [#allocation3], 4294967168 }
  0x20   :  { %14725 = dma.done.wait [#allocation6], 2176  }
  0x21   :  { %14726 = vsyncadd [#allocation6], 4294965120 }
  0x22   :  { %14727 = dma.done.wait [#allocation9], 65664  }
  0x23   :  { %14728 = vsyncadd [#allocation9], 4294901632 }
  0x24   :  { %14729 = dma.done.wait [#allocation12], 65664  }
  0x25   :  { %14730 = vsyncadd [#allocation12], 4294901632 }
  0x26   :  { %14731 = dma.done.wait [#allocation15], 8208  }
  0x27   :  { %14732 = vsyncadd [#allocation15], 4294959088  ;;  %v8965_v0 = vld [vmem:[#allocation5 + $0x40] sm:$0xf]  ;;  %v13363_v2 = vld [vmem:[#allocation5 + $0x44] sm:$0xf] }
  0x28   :  { %v13367_v1 = vld [vmem:[#allocation5 + $0x5c] sm:$0xf0]  ;;  %v8967_v4 = vld [vmem:[#allocation5 + $0x60] sm:$0xf0]  ;;  %v8973_v5 = vld [vmem:[#allocation5 + $0x48] sm:$0xf] }
  0x29   :  { %v8966_v3 = vor.u32 %v13367_v1, %v8965_v0  ;;  %v13368_v6 = vld [vmem:[#allocation5 + $0x64] sm:$0xf0]  ;;  %v8970_v7 = vor.u32 %v13363_v2, %v8967_v4  ;;  %v13364_v9 = vld [vmem:[#allocation5 + $0x4c] sm:$0xf]  ;;  %v8933_v11 = vld [vmem:[#allocation5] sm:$0xf] }
  0x2a   :  { %v8974_v8 = vor.u32 %v13368_v6, %v8973_v5  ;;  %v8975_v10 = vld [vmem:[#allocation5 + $0x68] sm:$0xf0]  ;;  %v13359_v13 = vld [vmem:[#allocation5 + $0x1c] sm:$0xf0]  ;;  %v13355_v14 = vld [vmem:[#allocation5 + $0x4] sm:$0xf] }
  0x2b   :  { %290 = vmatpush.bf16.msra.mxu0 %v8966_v3  ;;  %v8978_v12 = vor.u32 %v13364_v9, %v8975_v10  ;;  %v8935_v15 = vld [vmem:[#allocation5 + $0x20] sm:$0xf0]  ;;  %303 = vmatpush.bf16.msra.mxu1 %v8970_v7  ;;  %v8934_v16 = vor.u32 %v13359_v13, %v8933_v11  ;;  %v8941_v18 = vld [vmem:[#allocation5 + $0x8] sm:$0xf]  ;;  %v13356_v20 = vld [vmem:[#allocation5 + $0xc] sm:$0xf] }
  0x2c   :  { %316 = vmatpush.bf16.msra.mxu2 %v8974_v8  ;;  %v8938_v17 = vor.u32 %v13355_v14, %v8935_v15  ;;  %v13360_v19 = vld [vmem:[#allocation5 + $0x24] sm:$0xf0]  ;;  %v8943_v22 = vld [vmem:[#allocation5 + $0x28] sm:$0xf0]  ;;  %v164_v23 = vld [vmem:[#allocation2] sm:$0xff]  ;;  %vm280_vm0 = vcmask 261120  }
  0x2d   :  { %329 = vmatpush.bf16.msra.mxu3 %v8978_v12  ;;  %v8942_v21 = vor.u32 %v13360_v19, %v8941_v18  ;;  %v8981_v24 = vld [vmem:[#allocation5 + $0x50] sm:$0xf]  ;;  %v8946_v25 = vor.u32 %v13356_v20, %v8943_v22  ;;  %v14826_v26 = vpack.c.bf16 %v164_v23, %v164_v23  ;;  %v13365_v28 = vld [vmem:[#allocation5 + $0x54] sm:$0xf]  ;;  %v8989_v32 = vld [vmem:[#allocation5 + $0x58] sm:$0xf] }
  0x2e   :  { %v13369_v27 = vld [vmem:[#allocation5 + $0x6c] sm:$0xf0]  ;;  %v8983_v29 = vld [vmem:[#allocation5 + $0x70] sm:$0xf0]  ;;  %v13370_v33 = vld [vmem:[#allocation5 + $0x74] sm:$0xf0] }
  0x2f   :  { %291 = vmatpush.bf16.msra.mxu0 %v8934_v16  ;;  %v8982_v30 = vor.u32 %v13369_v27, %v8981_v24  ;;  %v8986_v31 = vor.u32 %v13365_v28, %v8983_v29  ;;  %v13366_v34 = vld [vmem:[#allocation5 + $0x5c] sm:$0xf]  ;;  %304 = vmatpush.bf16.msra.mxu1 %v8938_v17  ;;  %v8990_v35 = vor.u32 %v13370_v33, %v8989_v32  ;;  %v8949_v37 = vld [vmem:[#allocation5 + $0x10] sm:$0xf]  ;;  %v13357_v41 = vld [vmem:[#allocation5 + $0x14] sm:$0xf] }
  0x30   :  { %317 = vmatpush.bf16.msra.mxu2 %v8942_v21  ;;  %v8991_v36 = vld [vmem:[#allocation5 + $0x78] sm:$0xf0]  ;;  %v13361_v38 = vld [vmem:[#allocation5 + $0x2c] sm:$0xf0]  ;;  %v8951_v42 = vld [vmem:[#allocation5 + $0x30] sm:$0xf0] }
  0x31   :  { %330 = vmatpush.bf16.msra.mxu3 %v8946_v25  ;;  %v8994_v39 = vor.u32 %v13366_v34, %v8991_v36  ;;  %v8950_v40 = vor.u32 %v13361_v38, %v8949_v37  ;;  %v8957_v43 = vld [vmem:[#allocation5 + $0x18] sm:$0xf]  ;;  %v8954_v44 = vor.u32 %v13357_v41, %v8951_v42  ;;  %v13358_v46 = vld [vmem:[#allocation5 + $0x1c] sm:$0xf]  ;;  %v9229_v48 = vld [vmem:[#allocation8 + $0x1c0] sm:$0xf] }
  0x32   :  { %8995 = vmatmul.msk.bf16.vlgmr.msra.gmra.mxu0 %vm280_vm0, %v14826_v26  ;;  %v13362_v45 = vld [vmem:[#allocation5 + $0x34] sm:$0xf0]  ;;  %v8959_v47 = vld [vmem:[#allocation5 + $0x38] sm:$0xf0]  ;;  %8996 = vmatmul.msk.bf16.vlgmr.msra.gmra.mxu1 %vm280_vm0, %v14826_v26  ;;  %v13431_v49 = vld [vmem:[#allocation8 + $0x1dc] sm:$0xf0] }
  0x33   :  { %342 = vmatpush.bf16.msrb.mxu0 %v8982_v30  ;;  %355 = vmatpush.bf16.msrb.mxu1 %v8986_v31  ;;  %v9485_v50 = vld [vmem:[#allocation8 + $0x3c0] sm:$0xf]  ;;  %v8958_v51 = vor.u32 %v13362_v45, %v8957_v43  ;;  %v9230_v52 = vor.u32 %v13431_v49, %v9229_v48  ;;  %v8962_v56 = vor.u32 %v13358_v46, %v8959_v47  ;;  %s14748_s6 = smov [#allocation17]   ;;  %s8917_s30 = sshll.u32 %s15230_s9, 4  ;;  %s8918_s30 = int_to_ptr.hbm [resolvable:$true] %s8917_s30 }
  0x34   :  { %8997 = vmatmul.msk.bf16.vlgmr.msra.gmra.mxu2 %vm280_vm0, %v14826_v26  ;;  %8998 = vmatmul.msk.bf16.vlgmr.msra.gmra.mxu3 %vm280_vm0, %v14826_v26  ;;  %v13495_v53 = vld [vmem:[#allocation8 + $0x3dc] sm:$0xf0]  ;;  %s8915_s8 = sshll.u32 %s14748_s6, 4  ;;  %s8916_s8 = int_to_ptr.vmem [resolvable:$true] %s8915_s8 }
  0x35   :  { %368 = vmatpush.bf16.msrb.mxu2 %v8990_v35  ;;  %v9197_v54 = vld [vmem:[#allocation8 + $0x180] sm:$0xf]  ;;  %381 = vmatpush.bf16.msrb.mxu3 %v8994_v39  ;;  %v9486_v57 = vor.u32 %v13495_v53, %v9485_v50 }
  0x36   :  { %v13423_v55 = vld [vmem:[#allocation8 + $0x19c] sm:$0xf0] }
  0x37   :  { %343 = vmatpush.bf16.msrb.mxu0 %v8950_v40  ;;  %v9453_v58 = vld [vmem:[#allocation8 + $0x380] sm:$0xf]  ;;  %356 = vmatpush.bf16.msrb.mxu1 %v8954_v44  ;;  %v9198_v61 = vor.u32 %v13423_v55, %v9197_v54 }
  0x38   :  { %v13487_v59 = vld [vmem:[#allocation8 + $0x39c] sm:$0xf0] }
  0x39   :  { %v9741_v60 = vld [vmem:[#allocation8 + $0x5c0] sm:$0xf]  ;;  %v9454_v1 = vor.u32 %v13487_v59, %v9453_v58  ;;  %369 = vmatpush.bf16.msrb.mxu2 %v8958_v51  ;;  %382 = vmatpush.bf16.msrb.mxu3 %v8962_v56 }
  0x3a   :  { %v13559_v62 = vld [vmem:[#allocation8 + $0x5dc] sm:$0xf0] }
  0x3b   :  { %3494 = vmatpush.bf16.msra.mxu0 %v9230_v52  ;;  %v9997_v63 = vld [vmem:[#allocation8 + $0x7c0] sm:$0xf]  ;;  %3507 = vmatpush.bf16.msra.mxu1 %v9486_v57  ;;  %v9742_v2 = vor.u32 %v13559_v62, %v9741_v60 }
  0x3c   :  { %v13623_v0 = vld [vmem:[#allocation8 + $0x7dc] sm:$0xf0] }
  0x3d   :  { %v9998_v3 = vor.u32 %v13623_v0, %v9997_v63  ;;  %v9165_v4 = vld [vmem:[#allocation8 + $0x140] sm:$0xf]  ;;  %3520 = vmatpush.bf16.msra.mxu2 %v9742_v2 }
  0x3e   :  { %v13415_v5 = vld [vmem:[#allocation8 + $0x15c] sm:$0xf0] }
  0x3f   :  { %v9421_v6 = vld [vmem:[#allocation8 + $0x340] sm:$0xf]  ;;  %3495 = vmatpush.bf16.msra.mxu0 %v9198_v61  ;;  %3533 = vmatpush.bf16.msra.mxu3 %v9998_v3  ;;  %v9166_v13 = vor.u32 %v13415_v5, %v9165_v4 }
  0x40   :  { %v13479_v7 = vld [vmem:[#allocation8 + $0x35c] sm:$0xf0]  ;;  %3508 = vmatpush.bf16.msra.mxu1 %v9454_v1 }
  0x41   :  { %v9709_v8 = vld [vmem:[#allocation8 + $0x580] sm:$0xf]  ;;  %v9422_v15 = vor.u32 %v13479_v7, %v9421_v6 }
  0x42   :  { %v13551_v9 = vld [vmem:[#allocation8 + $0x59c] sm:$0xf0]  ;;  %8999 = vmatmul.msk.bf16.vlgmr.msrb.gmra.mxu0 %vm280_vm0, %v14826_v26  ;;  %9000 = vmatmul.msk.bf16.vlgmr.msrb.gmra.mxu1 %vm280_vm0, %v14826_v26 }
  0x43   :  { %v9710_v10 = vor.u32 %v13551_v9, %v9709_v8  ;;  %v9965_v11 = vld [vmem:[#allocation8 + $0x780] sm:$0xf]  ;;  %3496 = vmatpush.bf16.msra.mxu0 %v9166_v13 }
  0x44   :  { %v13615_v12 = vld [vmem:[#allocation8 + $0x79c] sm:$0xf0]  ;;  %3509 = vmatpush.bf16.msra.mxu1 %v9422_v15  ;;  %9001 = vmatmul.msk.bf16.vlgmr.msrb.gmra.mxu2 %vm280_vm0, %v14826_v26 }
  0x45   :  { %v9966_v14 = vor.u32 %v13615_v12, %v9965_v11  ;;  %v9677_v16 = vld [vmem:[#allocation8 + $0x540] sm:$0xf]  ;;  %3521 = vmatpush.bf16.msra.mxu2 %v9710_v10  ;;  %9002 = vmatmul.msk.bf16.vlgmr.msrb.gmra.mxu3 %vm280_vm0, %v14826_v26 }
  0x46   :  { %v13543_v17 = vld [vmem:[#allocation8 + $0x55c] sm:$0xf0] }
  0x47   :  { %v9933_v18 = vld [vmem:[#allocation8 + $0x740] sm:$0xf]  ;;  %v9678_v23 = vor.u32 %v13543_v17, %v9677_v16  ;;  %3534 = vmatpush.bf16.msra.mxu3 %v9966_v14 }
  0x48   :  { %v13607_v19 = vld [vmem:[#allocation8 + $0x75c] sm:$0xf0] }
  0x49   :  { %v9133_v20 = vld [vmem:[#allocation8 + $0x100] sm:$0xf]  ;;  %v9934_v25 = vor.u32 %v13607_v19, %v9933_v18  ;;  %3522 = vmatpush.bf16.msra.mxu2 %v9678_v23 }
  0x4a   :  { %v13407_v21 = vld [vmem:[#allocation8 + $0x11c] sm:$0xf0] }
  0x4b   :  { %v9389_v22 = vld [vmem:[#allocation8 + $0x300] sm:$0xf]  ;;  %v9134_v31 = vor.u32 %v13407_v21, %v9133_v20  ;;  %3535 = vmatpush.bf16.msra.mxu3 %v9934_v25 }
  0x4c   :  { %v13471_v24 = vld [vmem:[#allocation8 + $0x31c] sm:$0xf0] }
  0x4d   :  { %v9645_v27 = vld [vmem:[#allocation8 + $0x500] sm:$0xf]  ;;  %v9390_v32 = vor.u32 %v13471_v24, %v9389_v22  ;;  %3497 = vmatpush.bf16.msra.mxu0 %v9134_v31 }
  0x4e   :  { %v13535_v28 = vld [vmem:[#allocation8 + $0x51c] sm:$0xf0] }
  0x4f   :  { %v9901_v29 = vld [vmem:[#allocation8 + $0x700] sm:$0xf]  ;;  %v9646_v36 = vor.u32 %v13535_v28, %v9645_v27  ;;  %3510 = vmatpush.bf16.msra.mxu1 %v9390_v32 }
  0x50   :  { %v13599_v30 = vld [vmem:[#allocation8 + $0x71c] sm:$0xf0] }
  0x51   :  { %v9101_v33 = vld [vmem:[#allocation8 + $0xc0] sm:$0xf]  ;;  %v9902_v38 = vor.u32 %v13599_v30, %v9901_v29  ;;  %3523 = vmatpush.bf16.msra.mxu2 %v9646_v36 }
  0x52   :  { %v13399_v34 = vld [vmem:[#allocation8 + $0xdc] sm:$0xf0] }
  0x53   :  { %v9357_v35 = vld [vmem:[#allocation8 + $0x2c0] sm:$0xf]  ;;  %v9102_v43 = vor.u32 %v13399_v34, %v9101_v33  ;;  %3536 = vmatpush.bf16.msra.mxu3 %v9902_v38 }
  0x54   :  { %v13463_v37 = vld [vmem:[#allocation8 + $0x2dc] sm:$0xf0] }
  0x55   :  { %v9613_v39 = vld [vmem:[#allocation8 + $0x4c0] sm:$0xf]  ;;  %v9358_v44 = vor.u32 %v13463_v37, %v9357_v35  ;;  %3498 = vmatpush.bf16.msra.mxu0 %v9102_v43 }
  0x56   :  { %v13527_v40 = vld [vmem:[#allocation8 + $0x4dc] sm:$0xf0] }
  0x57   :  { %v9869_v41 = vld [vmem:[#allocation8 + $0x6c0] sm:$0xf]  ;;  %v9614_v48 = vor.u32 %v13527_v40, %v9613_v39  ;;  %3511 = vmatpush.bf16.msra.mxu1 %v9358_v44 }
  0x58   :  { %v13591_v42 = vld [vmem:[#allocation8 + $0x6dc] sm:$0xf0] }
  0x59   :  { %v9069_v45 = vld [vmem:[#allocation8 + $0x80] sm:$0xf]  ;;  %v9870_v50 = vor.u32 %v13591_v42, %v9869_v41  ;;  %3524 = vmatpush.bf16.msra.mxu2 %v9614_v48 }
  0x5a   :  { %v13391_v46 = vld [vmem:[#allocation8 + $0x9c] sm:$0xf0] }
  0x5b   :  { %v9325_v47 = vld [vmem:[#allocation8 + $0x280] sm:$0xf]  ;;  %v9070_v55 = vor.u32 %v13391_v46, %v9069_v45  ;;  %3537 = vmatpush.bf16.msra.mxu3 %v9870_v50 }
  0x5c   :  { %v13455_v49 = vld [vmem:[#allocation8 + $0x29c] sm:$0xf0] }
  0x5d   :  { %v9581_v51 = vld [vmem:[#allocation8 + $0x480] sm:$0xf]  ;;  %v9326_v26 = vor.u32 %v13455_v49, %v9325_v47  ;;  %3499 = vmatpush.bf16.msra.mxu0 %v9070_v55 }
  0x5e   :  { %v13519_v52 = vld [vmem:[#allocation8 + $0x49c] sm:$0xf0] }
  0x5f   :  { %v9837_v53 = vld [vmem:[#allocation8 + $0x680] sm:$0xf]  ;;  %v9582_v59 = vor.u32 %v13519_v52, %v9581_v51  ;;  %3512 = vmatpush.bf16.msra.mxu1 %v9326_v26 }
  0x60   :  { %v13583_v54 = vld [vmem:[#allocation8 + $0x69c] sm:$0xf0] }
  0x61   :  { %v9037_v56 = vld [vmem:[#allocation8 + $0x40] sm:$0xf]  ;;  %v9838_v61 = vor.u32 %v13583_v54, %v9837_v53  ;;  %3525 = vmatpush.bf16.msra.mxu2 %v9582_v59 }
  0x62   :  { %v13383_v57 = vld [vmem:[#allocation8 + $0x5c] sm:$0xf0] }
  0x63   :  { %v9293_v58 = vld [vmem:[#allocation8 + $0x240] sm:$0xf]  ;;  %v9038_v2 = vor.u32 %v13383_v57, %v9037_v56  ;;  %3538 = vmatpush.bf16.msra.mxu3 %v9838_v61 }
  0x64   :  { %v13447_v60 = vld [vmem:[#allocation8 + $0x25c] sm:$0xf0] }
  0x65   :  { %v9549_v62 = vld [vmem:[#allocation8 + $0x440] sm:$0xf]  ;;  %v9294_v5 = vor.u32 %v13447_v60, %v9293_v58  ;;  %3500 = vmatpush.bf16.msra.mxu0 %v9038_v2 }
  0x66   :  { %v13511_v63 = vld [vmem:[#allocation8 + $0x45c] sm:$0xf0] }
  0x67   :  { %v9805_v0 = vld [vmem:[#allocation8 + $0x640] sm:$0xf]  ;;  %v9550_v9 = vor.u32 %v13511_v63, %v9549_v62  ;;  %3513 = vmatpush.bf16.msra.mxu1 %v9294_v5 }
  0x68   :  { %v13575_v1 = vld [vmem:[#allocation8 + $0x65c] sm:$0xf0] }
  0x69   :  { %v9005_v3 = vld [vmem:[#allocation8] sm:$0xf]  ;;  %v9806_v13 = vor.u32 %v13575_v1, %v9805_v0  ;;  %3526 = vmatpush.bf16.msra.mxu2 %v9550_v9 }
  0x6a   :  { %v13375_v4 = vld [vmem:[#allocation8 + $0x1c] sm:$0xf0] }
  0x6b   :  { %v9261_v6 = vld [vmem:[#allocation8 + $0x200] sm:$0xf]  ;;  %v9006_v17 = vor.u32 %v13375_v4, %v9005_v3  ;;  %3539 = vmatpush.bf16.msra.mxu3 %v9806_v13 }
  0x6c   :  { %v13439_v7 = vld [vmem:[#allocation8 + $0x21c] sm:$0xf0] }
  0x6d   :  { %v10253_v8 = vld [vmem:[#allocation8 + $0x9c0] sm:$0xf]  ;;  %v9262_v21 = vor.u32 %v13439_v7, %v9261_v6  ;;  %3501 = vmatpush.bf16.msra.mxu0 %v9006_v17 }
  0x6e   :  { %v13687_v10 = vld [vmem:[#allocation8 + $0x9dc] sm:$0xf0] }
  0x6f   :  { %v10509_v11 = vld [vmem:[#allocation8 + $0xbc0] sm:$0xf]  ;;  %v10254_v22 = vor.u32 %v13687_v10, %v10253_v8  ;;  %3514 = vmatpush.bf16.msra.mxu1 %v9262_v21 }
  0x70   :  { %v13751_v12 = vld [vmem:[#allocation8 + $0xbdc] sm:$0xf0] }
  0x71   :  { %v9517_v14 = vld [vmem:[#allocation8 + $0x400] sm:$0xf]  ;;  %v10510_v25 = vor.u32 %v13751_v12, %v10509_v11  ;;  %3546 = vmatpush.bf16.msrb.mxu0 %v10254_v22 }
  0x72   :  { %v13503_v15 = vld [vmem:[#allocation8 + $0x41c] sm:$0xf0] }
  0x73   :  { %v9773_v16 = vld [vmem:[#allocation8 + $0x600] sm:$0xf]  ;;  %v9518_v29 = vor.u32 %v13503_v15, %v9517_v14  ;;  %3559 = vmatpush.bf16.msrb.mxu1 %v10510_v25 }
  0x74   :  { %v13567_v18 = vld [vmem:[#allocation8 + $0x61c] sm:$0xf0] }
  0x75   :  { %v10765_v19 = vld [vmem:[#allocation8 + $0xdc0] sm:$0xf]  ;;  %v9774_v32 = vor.u32 %v13567_v18, %v9773_v16  ;;  %3527 = vmatpush.bf16.msra.mxu2 %v9518_v29 }
  0x76   :  { %v13815_v20 = vld [vmem:[#allocation8 + $0xddc] sm:$0xf0] }
  0x77   :  { %v11021_v23 = vld [vmem:[#allocation8 + $0xfc0] sm:$0xf]  ;;  %v10766_v33 = vor.u32 %v13815_v20, %v10765_v19  ;;  %3540 = vmatpush.bf16.msra.mxu3 %v9774_v32 }
  0x78   :  { %v13879_v24 = vld [vmem:[#allocation8 + $0xfdc] sm:$0xf0] }
  0x79   :  { %v10221_v27 = vld [vmem:[#allocation8 + $0x980] sm:$0xf]  ;;  %v11022_v34 = vor.u32 %v13879_v24, %v11021_v23  ;;  %3572 = vmatpush.bf16.msrb.mxu2 %v10766_v33 }
  0x7a   :  { %v13679_v28 = vld [vmem:[#allocation8 + $0x99c] sm:$0xf0] }
  0x7b   :  { %v10477_v30 = vld [vmem:[#allocation8 + $0xb80] sm:$0xf]  ;;  %v10222_v37 = vor.u32 %v13679_v28, %v10221_v27  ;;  %3585 = vmatpush.bf16.msrb.mxu3 %v11022_v34 }
  0x7c   :  { %v13743_v31 = vld [vmem:[#allocation8 + $0xb9c] sm:$0xf0] }
  0x7d   :  { %v10733_v35 = vld [vmem:[#allocation8 + $0xd80] sm:$0xf]  ;;  %v10478_v40 = vor.u32 %v13743_v31, %v10477_v30  ;;  %3547 = vmatpush.bf16.msrb.mxu0 %v10222_v37 }
  0x7e   :  { %v13807_v36 = vld [vmem:[#allocation8 + $0xd9c] sm:$0xf0] }
  0x7f   :  { %v10989_v38 = vld [vmem:[#allocation8 + $0xf80] sm:$0xf]  ;;  %v10734_v45 = vor.u32 %v13807_v36, %v10733_v35  ;;  %3560 = vmatpush.bf16.msrb.mxu1 %v10478_v40 }
  0x80   :  { %v13871_v39 = vld [vmem:[#allocation8 + $0xf9c] sm:$0xf0] }
  0x81   :  { %v10189_v41 = vld [vmem:[#allocation8 + $0x940] sm:$0xf]  ;;  %v10990_v46 = vor.u32 %v13871_v39, %v10989_v38  ;;  %3573 = vmatpush.bf16.msrb.mxu2 %v10734_v45 }
  0x82   :  { %v13671_v42 = vld [vmem:[#allocation8 + $0x95c] sm:$0xf0] }
  0x83   :  { %v10445_v43 = vld [vmem:[#allocation8 + $0xb40] sm:$0xf]  ;;  %v10190_v49 = vor.u32 %v13671_v42, %v10189_v41  ;;  %3586 = vmatpush.bf16.msrb.mxu3 %v10990_v46 }
  0x84   :  { %v13735_v44 = vld [vmem:[#allocation8 + $0xb5c] sm:$0xf0] }
  0x85   :  { %v10701_v47 = vld [vmem:[#allocation8 + $0xd40] sm:$0xf]  ;;  %v10446_v52 = vor.u32 %v13735_v44, %v10445_v43  ;;  %3548 = vmatpush.bf16.msrb.mxu0 %v10190_v49 }
  0x86   :  { %v13799_v48 = vld [vmem:[#allocation8 + $0xd5c] sm:$0xf0] }
  0x87   :  { %v10957_v50 = vld [vmem:[#allocation8 + $0xf40] sm:$0xf]  ;;  %v10702_v56 = vor.u32 %v13799_v48, %v10701_v47  ;;  %3561 = vmatpush.bf16.msrb.mxu1 %v10446_v52 }
  0x88   :  { %v13863_v51 = vld [vmem:[#allocation8 + $0xf5c] sm:$0xf0] }
  0x89   :  { %v10157_v53 = vld [vmem:[#allocation8 + $0x900] sm:$0xf]  ;;  %v10958_v57 = vor.u32 %v13863_v51, %v10957_v50  ;;  %3574 = vmatpush.bf16.msrb.mxu2 %v10702_v56  ;;  %v14844_v51 = vld [vmem:[#allocation7] sm:$0xff]  ;;  %v13427_v56 = vld [vmem:[#allocation8 + $0x1c4] sm:$0xf] }
  0x8a   :  { %v13663_v54 = vld [vmem:[#allocation8 + $0x91c] sm:$0xf0]  ;;  %v184_v52 = vperm.slane %v14844_v51, 0 }
  0x8b   :  { %v10413_v55 = vld [vmem:[#allocation8 + $0xb00] sm:$0xf]  ;;  %v10158_v60 = vor.u32 %v13663_v54, %v10157_v53  ;;  %3587 = vmatpush.bf16.msrb.mxu3 %v10958_v57  ;;  %v185_v53 = vperm.slane %v14844_v51, 1  ;;  %v9231_v57 = vld [vmem:[#allocation8 + $0x1e0] sm:$0xf0] }
  0x8c   :  { %v13727_v26 = vld [vmem:[#allocation8 + $0xb1c] sm:$0xf0] }
  0x8d   :  { %v10669_v58 = vld [vmem:[#allocation8 + $0xd00] sm:$0xf]  ;;  %v10414_v63 = vor.u32 %v13727_v26, %v10413_v55  ;;  %3549 = vmatpush.bf16.msrb.mxu0 %v10158_v60  ;;  %v9487_v60 = vld [vmem:[#allocation8 + $0x3e0] sm:$0xf0] }
  0x8e   :  { %v13791_v59 = vld [vmem:[#allocation8 + $0xd1c] sm:$0xf0] }
  0x8f   :  { %v10925_v61 = vld [vmem:[#allocation8 + $0xf00] sm:$0xf]  ;;  %v10670_v4 = vor.u32 %v13791_v59, %v10669_v58  ;;  %3562 = vmatpush.bf16.msrb.mxu1 %v10414_v63  ;;  %v13491_v59 = vld [vmem:[#allocation8 + $0x3c4] sm:$0xf]  ;;  %v186_v63 = vperm.slane %v14844_v51, 2 }
  0x90   :  { %v13855_v62 = vld [vmem:[#allocation8 + $0xf1c] sm:$0xf0] }
  0x91   :  { %v10125_v0 = vld [vmem:[#allocation8 + $0x8c0] sm:$0xf]  ;;  %v10926_v5 = vor.u32 %v13855_v62, %v10925_v61  ;;  %3575 = vmatpush.bf16.msrb.mxu2 %v10670_v4  ;;  %v13419_v4 = vld [vmem:[#allocation8 + $0x184] sm:$0xf] }
  0x92   :  { %v13655_v1 = vld [vmem:[#allocation8 + $0x8dc] sm:$0xf0] }
  0x93   :  { %v10381_v2 = vld [vmem:[#allocation8 + $0xac0] sm:$0xf]  ;;  %v10126_v6 = vor.u32 %v13655_v1, %v10125_v0  ;;  %3588 = vmatpush.bf16.msrb.mxu3 %v10926_v5  ;;  %v9234_v0 = vor.u32 %v13427_v56, %v9231_v57  ;;  %v9199_v5 = vld [vmem:[#allocation8 + $0x1a0] sm:$0xf0] }
  0x94   :  { %v13719_v3 = vld [vmem:[#allocation8 + $0xadc] sm:$0xf0]  ;;  %v9935_v56 = vld [vmem:[#allocation8 + $0x760] sm:$0xf0] }
  0x95   :  { %v10382_v7 = vor.u32 %v13719_v3, %v10381_v2  ;;  %v10093_v8 = vld [vmem:[#allocation8 + $0x880] sm:$0xf]  ;;  %3550 = vmatpush.bf16.msrb.mxu0 %v10126_v6  ;;  %v187_v2 = vperm.slane %v14844_v51, 3  ;;  %v9490_v3 = vor.u32 %v13491_v59, %v9487_v60  ;;  %v13395_v57 = vld [vmem:[#allocation8 + $0xc4] sm:$0xf] }
  0x96   :  { %v13647_v9 = vld [vmem:[#allocation8 + $0x89c] sm:$0xf0]  ;;  %v9103_v59 = vld [vmem:[#allocation8 + $0xe0] sm:$0xf0] }
  0x97   :  { %v10349_v10 = vld [vmem:[#allocation8 + $0xa80] sm:$0xf]  ;;  %v10094_v12 = vor.u32 %v13647_v9, %v10093_v8  ;;  %3563 = vmatpush.bf16.msrb.mxu1 %v10382_v7  ;;  %v13483_v7 = vld [vmem:[#allocation8 + $0x384] sm:$0xf] }
  0x98   :  { %v13711_v11 = vld [vmem:[#allocation8 + $0xa9c] sm:$0xf0]  ;;  %v9455_v8 = vld [vmem:[#allocation8 + $0x3a0] sm:$0xf0] }
  0x99   :  { %v10350_v13 = vor.u32 %v13711_v11, %v10349_v10  ;;  %3551 = vmatpush.bf16.msrb.mxu0 %v10094_v12  ;;  %v10637_v14 = vld [vmem:[#allocation8 + $0xcc0] sm:$0xf]  ;;  %v13459_v60 = vld [vmem:[#allocation8 + $0x2c4] sm:$0xf] }
  0x9a   :  { %v13783_v15 = vld [vmem:[#allocation8 + $0xcdc] sm:$0xf0] }
  0x9b   :  { %3564 = vmatpush.bf16.msrb.mxu1 %v10350_v13  ;;  %v10893_v16 = vld [vmem:[#allocation8 + $0xec0] sm:$0xf]  ;;  %v10638_v17 = vor.u32 %v13783_v15, %v10637_v14  ;;  %v9202_v13 = vor.u32 %v13419_v4, %v9199_v5  ;;  %v13555_v14 = vld [vmem:[#allocation8 + $0x5c4] sm:$0xf]  ;;  %v191_v4 = vperm.slane %v14844_v51, 7 }
  0x9c   :  { %v13847_v18 = vld [vmem:[#allocation8 + $0xedc] sm:$0xf0]  ;;  %v9743_v15 = vld [vmem:[#allocation8 + $0x5e0] sm:$0xf0] }
  0x9d   :  { %v10894_v19 = vor.u32 %v13847_v18, %v10893_v16  ;;  %v10061_v20 = vld [vmem:[#allocation8 + $0x840] sm:$0xf]  ;;  %3576 = vmatpush.bf16.msrb.mxu2 %v10638_v17  ;;  %v13619_v16 = vld [vmem:[#allocation8 + $0x7c4] sm:$0xf] }
  0x9e   :  { %v13639_v21 = vld [vmem:[#allocation8 + $0x85c] sm:$0xf0]  ;;  %v13531_v5 = vld [vmem:[#allocation8 + $0x504] sm:$0xf] }
  0x9f   :  { %v10062_v22 = vor.u32 %v13639_v21, %v10061_v20  ;;  %v10317_v23 = vld [vmem:[#allocation8 + $0xa40] sm:$0xf]  ;;  %3589 = vmatpush.bf16.msrb.mxu3 %v10894_v19  ;;  %v9458_v19 = vor.u32 %v13483_v7, %v9455_v8  ;;  %v9999_v20 = vld [vmem:[#allocation8 + $0x7e0] sm:$0xf0] }
  0xa0   :  { %v13703_v24 = vld [vmem:[#allocation8 + $0xa5c] sm:$0xf0]  ;;  %v13411_v21 = vld [vmem:[#allocation8 + $0x144] sm:$0xf] }
  0xa1   :  { %v10318_v25 = vor.u32 %v13703_v24, %v10317_v23  ;;  %v10605_v27 = vld [vmem:[#allocation8 + $0xc80] sm:$0xf]  ;;  %3552 = vmatpush.bf16.msrb.mxu0 %v10062_v22  ;;  %v9167_v22 = vld [vmem:[#allocation8 + $0x160] sm:$0xf0] }
  0xa2   :  { %v13775_v28 = vld [vmem:[#allocation8 + $0xc9c] sm:$0xf0]  ;;  %v13475_v24 = vld [vmem:[#allocation8 + $0x344] sm:$0xf] }
  0xa3   :  { %v10861_v29 = vld [vmem:[#allocation8 + $0xe80] sm:$0xf]  ;;  %v10606_v30 = vor.u32 %v13775_v28, %v10605_v27  ;;  %3565 = vmatpush.bf16.msrb.mxu1 %v10318_v25  ;;  %v9423_v25 = vld [vmem:[#allocation8 + $0x360] sm:$0xf0]  ;;  %v9746_v28 = vor.u32 %v13555_v14, %v9743_v15 }
  0xa4   :  { %v13839_v31 = vld [vmem:[#allocation8 + $0xe9c] sm:$0xf0]  ;;  %v9647_v7 = vld [vmem:[#allocation8 + $0x520] sm:$0xf0] }
  0xa5   :  { %v10862_v32 = vor.u32 %v13839_v31, %v10861_v29  ;;  %v10029_v33 = vld [vmem:[#allocation8 + $0x800] sm:$0xf]  ;;  %3577 = vmatpush.bf16.msrb.mxu2 %v10606_v30  ;;  %v188_v29 = vperm.slane %v14844_v51, 4  ;;  %v10002_v31 = vor.u32 %v13619_v16, %v9999_v20  ;;  %v9071_v15 = vld [vmem:[#allocation8 + $0xa0] sm:$0xf0] }
  0xa6   :  { %v13631_v34 = vld [vmem:[#allocation8 + $0x81c] sm:$0xf0]  ;;  %v13451_v16 = vld [vmem:[#allocation8 + $0x284] sm:$0xf] }
  0xa7   :  { %v10285_v35 = vld [vmem:[#allocation8 + $0xa00] sm:$0xf]  ;;  %v10030_v36 = vor.u32 %v13631_v34, %v10029_v33  ;;  %3590 = vmatpush.bf16.msrb.mxu3 %v10862_v32  ;;  %v9170_v32 = vor.u32 %v13411_v21, %v9167_v22  ;;  %v13547_v33 = vld [vmem:[#allocation8 + $0x584] sm:$0xf] }
  0xa8   :  { %v13695_v37 = vld [vmem:[#allocation8 + $0xa1c] sm:$0xf0]  ;;  %v9711_v34 = vld [vmem:[#allocation8 + $0x5a0] sm:$0xf0] }
  0xa9   :  { %v10286_v38 = vor.u32 %v13695_v37, %v10285_v35  ;;  %3553 = vmatpush.bf16.msrb.mxu0 %v10030_v36  ;;  %v10573_v39 = vld [vmem:[#allocation8 + $0xc40] sm:$0xf]  ;;  %v13611_v35 = vld [vmem:[#allocation8 + $0x784] sm:$0xf]  ;;  %v9426_v37 = vor.u32 %v13475_v24, %v9423_v25 }
  0xaa   :  { %v13767_v40 = vld [vmem:[#allocation8 + $0xc5c] sm:$0xf0]  ;;  %v13523_v22 = vld [vmem:[#allocation8 + $0x4c4] sm:$0xf] }
  0xab   :  { %3566 = vmatpush.bf16.msrb.mxu1 %v10286_v38  ;;  %v10574_v41 = vor.u32 %v13767_v40, %v10573_v39  ;;  %v10829_v42 = vld [vmem:[#allocation8 + $0xe40] sm:$0xf]  ;;  %v9967_v38 = vld [vmem:[#allocation8 + $0x7a0] sm:$0xf0] }
  0xac   :  { %v13831_v43 = vld [vmem:[#allocation8 + $0xe5c] sm:$0xf0]  ;;  %v13403_v39 = vld [vmem:[#allocation8 + $0x104] sm:$0xf] }
  0xad   :  { %v10830_v44 = vor.u32 %v13831_v43, %v10829_v42  ;;  %3578 = vmatpush.bf16.msrb.mxu2 %v10574_v41  ;;  %v10541_v45 = vld [vmem:[#allocation8 + $0xc00] sm:$0xf]  ;;  %v9135_v40 = vld [vmem:[#allocation8 + $0x120] sm:$0xf0]  ;;  %v189_v41 = vperm.slane %v14844_v51, 5 }
  0xae   :  { %v13759_v46 = vld [vmem:[#allocation8 + $0xc1c] sm:$0xf0]  ;;  %v13467_v42 = vld [vmem:[#allocation8 + $0x304] sm:$0xf] }
  0xaf   :  { %3591 = vmatpush.bf16.msrb.mxu3 %v10830_v44  ;;  %v10542_v47 = vor.u32 %v13759_v46, %v10541_v45  ;;  %v10797_v48 = vld [vmem:[#allocation8 + $0xe00] sm:$0xf]  ;;  %v293_v54 = vpop.f32.mrf.mxu0  ;;  %v306_v26 = vpop.f32.mrf.mxu1  ;;  %v9391_v43 = vld [vmem:[#allocation8 + $0x320] sm:$0xf0]  ;;  %v9714_v45 = vor.u32 %v13547_v33, %v9711_v34 }
  0xb0   :  { %v13823_v49 = vld [vmem:[#allocation8 + $0xe1c] sm:$0xf0]  ;;  %v294_v55 = vadd.f32 %v293_v54, %v184_v52  ;;  %v307_v58 = vadd.f32 %v306_v26, %v185_v53  ;;  %v9679_v52 = vld [vmem:[#allocation8 + $0x560] sm:$0xf0] }
  0xb1   :  { %v10798_v50 = vor.u32 %v13823_v49, %v10797_v48  ;;  %3579 = vmatpush.bf16.msrb.mxu2 %v10542_v47  ;;  %v9970_v48 = vor.u32 %v13611_v35, %v9967_v38  ;;  %v9138_v49 = vor.u32 %v13403_v39, %v9135_v40  ;;  %v13603_v26 = vld [vmem:[#allocation8 + $0x744] sm:$0xf] }
  0xb2   :  { %v388_v61 = vmax.f32 %v294_v55, 0.0  ;;  %v389_v62 = vmax.f32 %v307_v58, 0.0  ;;  %v9394_v55 = vor.u32 %v13467_v42, %v9391_v43  ;;  %v13587_v24 = vld [vmem:[#allocation8 + $0x6c4] sm:$0xf] }
  0xb3   :  { %3592 = vmatpush.bf16.msrb.mxu3 %v10798_v50  ;;  %v13539_v50 = vld [vmem:[#allocation8 + $0x544] sm:$0xf] }
  0xb4   :  { %v14849_v1 = vpack.c.bf16 %v388_v61, %v388_v61  ;;  %v14852_v6 = vpack.c.bf16 %v389_v62, %v389_v62  ;;  %v9359_v61 = vld [vmem:[#allocation8 + $0x2e0] sm:$0xf0] }
  0xb5   :  { %v9039_v33 = vld [vmem:[#allocation8 + $0x60] sm:$0xf0] }
  0xb6   :  { %3502 = vmatmul.bf16.vlgmr.msra.gmra.mxu0 %v14849_v1  ;;  %3515 = vmatmul.bf16.vlgmr.msra.gmra.mxu1 %v14852_v6  ;;  %v9295_v38 = vld [vmem:[#allocation8 + $0x260] sm:$0xf0] }
  0xb7   :  { %v319_v9 = vpop.f32.mrf.mxu2  ;;  %v332_v11 = vpop.f32.mrf.mxu3  ;;  %3598 = vmatpush.bf16.msra.mxu0 %v9234_v0  ;;  %3611 = vmatpush.bf16.msra.mxu1 %v9490_v3  ;;  %v190_v0 = vperm.slane %v14844_v51, 6  ;;  %v9938_v3 = vor.u32 %v13603_v26, %v9935_v56  ;;  %v9650_v51 = vor.u32 %v13531_v5, %v9647_v7  ;;  %v13515_v43 = vld [vmem:[#allocation8 + $0x484] sm:$0xf] }
  0xb8   :  { %v320_v10 = vadd.f32 %v319_v9, %v186_v63  ;;  %v295_v12 = vpop.f32.mrf.mxu0  ;;  %v333_v17 = vadd.f32 %v332_v11, %v187_v2  ;;  %v308_v18 = vpop.f32.mrf.mxu1  ;;  %v9682_v63 = vor.u32 %v13539_v50, %v9679_v52  ;;  %v9106_v9 = vor.u32 %v13395_v57, %v9103_v59  ;;  %v13595_v11 = vld [vmem:[#allocation8 + $0x704] sm:$0xf] }
  0xb9   :  { %v9903_v12 = vld [vmem:[#allocation8 + $0x720] sm:$0xf0] }
  0xba   :  { %v390_v23 = vmax.f32 %v320_v10, 0.0  ;;  %v391_v27 = vmax.f32 %v333_v17, 0.0  ;;  %v9362_v10 = vor.u32 %v13459_v60, %v9359_v61  ;;  %v9327_v17 = vld [vmem:[#allocation8 + $0x2a0] sm:$0xf0]  ;;  %v9906_v21 = vor.u32 %v13595_v11, %v9903_v12 }
  0xbb   :  { %3599 = vmatpush.bf16.msra.mxu0 %v9202_v13  ;;  %3612 = vmatpush.bf16.msra.mxu1 %v9458_v19  ;;  %v13387_v13 = vld [vmem:[#allocation8 + $0x84] sm:$0xf] }
  0xbc   :  { %v14857_v30 = vpack.c.bf16 %v390_v23, %v390_v23  ;;  %v14859_v36 = vpack.c.bf16 %v391_v27, %v391_v27  ;;  %v9615_v23 = vld [vmem:[#allocation8 + $0x4e0] sm:$0xf0] }
  0xbd   :  { %v9618_v40 = vor.u32 %v13523_v22, %v9615_v23  ;;  %v13371_v50 = vld [vmem:[#allocation8 + $0x4] sm:$0xf] }
  0xbe   :  { %3528 = vmatmul.bf16.vlgmr.msra.gmra.mxu2 %v14857_v30  ;;  %3541 = vmatmul.bf16.vlgmr.msra.gmra.mxu3 %v14859_v36  ;;  %v9007_v52 = vld [vmem:[#allocation8 + $0x20] sm:$0xf0] }
  0xbf   :  { %3624 = vmatpush.bf16.msra.mxu2 %v9746_v28  ;;  %v321_v44 = vpop.f32.mrf.mxu2  ;;  %3637 = vmatpush.bf16.msra.mxu3 %v10002_v31  ;;  %v334_v46 = vpop.f32.mrf.mxu3  ;;  %v9074_v28 = vor.u32 %v13387_v13, %v9071_v15  ;;  %v9871_v31 = vld [vmem:[#allocation8 + $0x6e0] sm:$0xf0] }
  0xc0   :  { %3600 = vmatpush.bf16.msra.mxu0 %v9170_v32  ;;  %v345_v47 = vpop.f32.mrf.mxu0  ;;  %3613 = vmatpush.bf16.msra.mxu1 %v9426_v37  ;;  %v358_v54 = vpop.f32.mrf.mxu1  ;;  %v13379_v32 = vld [vmem:[#allocation8 + $0x44] sm:$0xf]  ;;  %v9874_v42 = vor.u32 %v13587_v24, %v9871_v31 }
  0xc1   :  { %v346_v53 = vadd.f32 %v345_v47, %v188_v29  ;;  %v359_v58 = vadd.f32 %v358_v54, %v189_v41  ;;  %v9330_v29 = vor.u32 %v13451_v16, %v9327_v17  ;;  %v13443_v37 = vld [vmem:[#allocation8 + $0x244] sm:$0xf]  ;;  %v9042_v47 = vor.u32 %v13379_v32, %v9039_v33 }
  0xc2   :  { %v9583_v44 = vld [vmem:[#allocation8 + $0x4a0] sm:$0xf0] }
  0xc3   :  { %v392_v62 = vmax.f32 %v346_v53, 0.0  ;;  %3625 = vmatpush.bf16.msra.mxu2 %v9714_v45  ;;  %v393_v2 = vmax.f32 %v359_v58, 0.0  ;;  %3638 = vmatpush.bf16.msra.mxu3 %v9970_v48  ;;  %v13579_v45 = vld [vmem:[#allocation8 + $0x684] sm:$0xf]  ;;  %v9298_v48 = vor.u32 %v13443_v37, %v9295_v38  ;;  %v9586_v26 = vor.u32 %v13515_v43, %v9583_v44 }
  0xc4   :  { %3601 = vmatpush.bf16.msra.mxu0 %v9138_v49  ;;  %3614 = vmatpush.bf16.msra.mxu1 %v9394_v55  ;;  %v9839_v49 = vld [vmem:[#allocation8 + $0x6a0] sm:$0xf0] }
  0xc5   :  { %v14866_v8 = vpack.c.bf16 %v392_v62, %v392_v62  ;;  %v14868_v14 = vpack.c.bf16 %v393_v2, %v393_v2  ;;  %v13435_v53 = vld [vmem:[#allocation8 + $0x204] sm:$0xf]  ;;  %v9842_v60 = vor.u32 %v13579_v45, %v9839_v49 }
  0xc6   :  { %v9263_v54 = vld [vmem:[#allocation8 + $0x220] sm:$0xf0] }
  0xc7   :  { %3626 = vmatpush.bf16.msra.mxu2 %v9682_v63  ;;  %v371_v18 = vpop.f32.mrf.mxu2  ;;  %3554 = vmatmul.bf16.vlgmr.msrb.gmra.mxu0 %v14866_v8  ;;  %v13683_v55 = vld [vmem:[#allocation8 + $0x9c4] sm:$0xf]  ;;  %v9266_v2 = vor.u32 %v13435_v53, %v9263_v54 }
  0xc8   :  { %3639 = vmatpush.bf16.msra.mxu3 %v9938_v3  ;;  %v372_v19 = vadd.f32 %v371_v18, %v190_v0  ;;  %v384_v20 = vpop.f32.mrf.mxu3  ;;  %3567 = vmatmul.bf16.vlgmr.msrb.gmra.mxu1 %v14868_v14  ;;  %v347_v25 = vpop.f32.mrf.mxu0  ;;  %v10255_v57 = vld [vmem:[#allocation8 + $0x9e0] sm:$0xf0]  ;;  %v9010_v0 = vor.u32 %v13371_v50, %v9007_v52 }
  0xc9   :  { %v385_v27 = vadd.f32 %v384_v20, %v191_v4  ;;  %3602 = vmatpush.bf16.msra.mxu0 %v9106_v9  ;;  %3615 = vmatpush.bf16.msra.mxu1 %v9362_v10  ;;  %v360_v34 = vpop.f32.mrf.mxu1  ;;  %v13747_v58 = vld [vmem:[#allocation8 + $0xbc4] sm:$0xf]  ;;  %v10258_v5 = vor.u32 %v13683_v55, %v10255_v57 }
  0xca   :  { %v394_v35 = vmax.f32 %v372_v19, 0.0  ;;  %v10511_v59 = vld [vmem:[#allocation8 + $0xbe0] sm:$0xf0] }
  0xcb   :  { %v395_v39 = vmax.f32 %v385_v27, 0.0  ;;  %3627 = vmatpush.bf16.msra.mxu2 %v9650_v51  ;;  %v13507_v62 = vld [vmem:[#allocation8 + $0x444] sm:$0xf]  ;;  %v10514_v7 = vor.u32 %v13747_v58, %v10511_v59 }
  0xcc   :  { %v14872_v41 = vpack.c.bf16 %v394_v35, %v394_v35  ;;  %3640 = vmatpush.bf16.msra.mxu3 %v9906_v21  ;;  %v9551_v63 = vld [vmem:[#allocation8 + $0x460] sm:$0xf0] }
  0xcd   :  { %v14874_v46 = vpack.c.bf16 %v395_v39, %v395_v39  ;;  %3603 = vmatpush.bf16.msra.mxu0 %v9074_v28  ;;  %3616 = vmatpush.bf16.msra.mxu1 %v9330_v29  ;;  %v13571_v3 = vld [vmem:[#allocation8 + $0x644] sm:$0xf]  ;;  %v9554_v10 = vor.u32 %v13507_v62, %v9551_v63 }
  0xce   :  { %3580 = vmatmul.bf16.vlgmr.msrb.gmra.mxu2 %v14872_v41  ;;  %v9807_v4 = vld [vmem:[#allocation8 + $0x660] sm:$0xf0] }
  0xcf   :  { %3593 = vmatmul.bf16.vlgmr.msrb.gmra.mxu3 %v14874_v46  ;;  %3628 = vmatpush.bf16.msra.mxu2 %v9618_v40  ;;  %v373_v56 = vpop.f32.mrf.mxu2  ;;  %v13675_v9 = vld [vmem:[#allocation8 + $0x984] sm:$0xf]  ;;  %v9810_v15 = vor.u32 %v13571_v3, %v9807_v4 }
  0xd0   :  { %3641 = vmatpush.bf16.msra.mxu3 %v9874_v42  ;;  %v386_v61 = vpop.f32.mrf.mxu3  ;;  %v10223_v11 = vld [vmem:[#allocation8 + $0x9a0] sm:$0xf0] }
  0xd1   :  { %3604 = vmatpush.bf16.msra.mxu0 %v9042_v47  ;;  %3617 = vmatpush.bf16.msra.mxu1 %v9298_v48  ;;  %v13739_v12 = vld [vmem:[#allocation8 + $0xb84] sm:$0xf]  ;;  %v10226_v21 = vor.u32 %v13675_v9, %v10223_v11 }
  0xd2   :  { %v10479_v13 = vld [vmem:[#allocation8 + $0xba0] sm:$0xf0] }
  0xd3   :  { %3629 = vmatpush.bf16.msra.mxu2 %v9586_v26  ;;  %v13499_v16 = vld [vmem:[#allocation8 + $0x404] sm:$0xf]  ;;  %v10482_v22 = vor.u32 %v13739_v12, %v10479_v13 }
  0xd4   :  { %3642 = vmatpush.bf16.msra.mxu3 %v9842_v60  ;;  %v9519_v17 = vld [vmem:[#allocation8 + $0x420] sm:$0xf0] }
  0xd5   :  { %v13563_v18 = vld [vmem:[#allocation8 + $0x604] sm:$0xf]  ;;  %3605 = vmatpush.bf16.msra.mxu0 %v9010_v0  ;;  %3618 = vmatpush.bf16.msra.mxu1 %v9266_v2  ;;  %v9522_v27 = vor.u32 %v13499_v16, %v9519_v17 }
  0xd6   :  { %v9775_v51 = vld [vmem:[#allocation8 + $0x620] sm:$0xf0] }
  0xd7   :  { %v13811_v19 = vld [vmem:[#allocation8 + $0xdc4] sm:$0xf]  ;;  %3630 = vmatpush.bf16.msra.mxu2 %v9554_v10  ;;  %v9778_v32 = vor.u32 %v13563_v18, %v9775_v51 }
  0xd8   :  { %v10767_v20 = vld [vmem:[#allocation8 + $0xde0] sm:$0xf0]  ;;  %3643 = vmatpush.bf16.msra.mxu3 %v9810_v15  ;;  %3606 = vmatmul.bf16.vlgmr.msra.gmra.mxu0 %v14849_v1 }
  0xd9   :  { %3650 = vmatpush.bf16.msrb.mxu0 %v10258_v5  ;;  %3663 = vmatpush.bf16.msrb.mxu1 %v10514_v7  ;;  %v13875_v23 = vld [vmem:[#allocation8 + $0xfc4] sm:$0xf]  ;;  %v10770_v33 = vor.u32 %v13811_v19, %v10767_v20 }
  0xda   :  { %v11023_v24 = vld [vmem:[#allocation8 + $0xfe0] sm:$0xf0]  ;;  %3619 = vmatmul.bf16.vlgmr.msra.gmra.mxu1 %v14852_v6 }
  0xdb   :  { %v13667_v25 = vld [vmem:[#allocation8 + $0x944] sm:$0xf]  ;;  %v11026_v34 = vor.u32 %v13875_v23, %v11023_v24  ;;  %3631 = vmatpush.bf16.msra.mxu2 %v9522_v27 }
  0xdc   :  { %v10191_v28 = vld [vmem:[#allocation8 + $0x960] sm:$0xf0]  ;;  %3644 = vmatpush.bf16.msra.mxu3 %v9778_v32 }
  0xdd   :  { %v13731_v29 = vld [vmem:[#allocation8 + $0xb44] sm:$0xf]  ;;  %3651 = vmatpush.bf16.msrb.mxu0 %v10226_v21  ;;  %3664 = vmatpush.bf16.msrb.mxu1 %v10482_v22  ;;  %v10194_v38 = vor.u32 %v13667_v25, %v10191_v28 }
  0xde   :  { %v10447_v31 = vld [vmem:[#allocation8 + $0xb60] sm:$0xf0]  ;;  %3632 = vmatmul.bf16.vlgmr.msra.gmra.mxu2 %v14857_v30 }
  0xdf   :  { %v13803_v35 = vld [vmem:[#allocation8 + $0xd84] sm:$0xf]  ;;  %v10450_v39 = vor.u32 %v13731_v29, %v10447_v31  ;;  %3676 = vmatpush.bf16.msrb.mxu2 %v10770_v33  ;;  %3645 = vmatmul.bf16.vlgmr.msra.gmra.mxu3 %v14859_v36 }
  0xe0   :  { %v10735_v37 = vld [vmem:[#allocation8 + $0xda0] sm:$0xf0]  ;;  %3689 = vmatpush.bf16.msrb.mxu3 %v11026_v34 }
  0xe1   :  { %v13867_v40 = vld [vmem:[#allocation8 + $0xf84] sm:$0xf]  ;;  %v10738_v48 = vor.u32 %v13803_v35, %v10735_v37  ;;  %3652 = vmatpush.bf16.msrb.mxu0 %v10194_v38  ;;  %3665 = vmatpush.bf16.msrb.mxu1 %v10450_v39  ;;  %v9237_v38 = vld [vmem:[#allocation8 + $0x1c8] sm:$0xf] }
  0xe2   :  { %v10991_v42 = vld [vmem:[#allocation8 + $0xfa0] sm:$0xf0] }
  0xe3   :  { %v13659_v43 = vld [vmem:[#allocation8 + $0x904] sm:$0xf]  ;;  %v10994_v49 = vor.u32 %v13867_v40, %v10991_v42  ;;  %3677 = vmatpush.bf16.msrb.mxu2 %v10738_v48  ;;  %v13432_v40 = vld [vmem:[#allocation8 + $0x1e4] sm:$0xf0] }
  0xe4   :  { %v10159_v44 = vld [vmem:[#allocation8 + $0x920] sm:$0xf0]  ;;  %v9493_v42 = vld [vmem:[#allocation8 + $0x3c8] sm:$0xf] }
  0xe5   :  { %v13723_v45 = vld [vmem:[#allocation8 + $0xb04] sm:$0xf]  ;;  %v10162_v53 = vor.u32 %v13659_v43, %v10159_v44  ;;  %3690 = vmatpush.bf16.msrb.mxu3 %v10994_v49  ;;  %v13496_v43 = vld [vmem:[#allocation8 + $0x3e4] sm:$0xf0] }
  0xe6   :  { %v10415_v47 = vld [vmem:[#allocation8 + $0xb20] sm:$0xf0] }
  0xe7   :  { %v13795_v50 = vld [vmem:[#allocation8 + $0xd44] sm:$0xf]  ;;  %v10418_v54 = vor.u32 %v13723_v45, %v10415_v47  ;;  %3653 = vmatpush.bf16.msrb.mxu0 %v10162_v53  ;;  %v9238_v53 = vor.u32 %v13432_v40, %v9237_v38  ;;  %v9109_v38 = vld [vmem:[#allocation8 + $0xc8] sm:$0xf] }
  0xe8   :  { %v10703_v52 = vld [vmem:[#allocation8 + $0xd60] sm:$0xf0] }
  0xe9   :  { %v13859_v55 = vld [vmem:[#allocation8 + $0xf44] sm:$0xf]  ;;  %v10706_v60 = vor.u32 %v13795_v50, %v10703_v52  ;;  %3666 = vmatpush.bf16.msrb.mxu1 %v10418_v54  ;;  %v9494_v54 = vor.u32 %v13496_v43, %v9493_v42  ;;  %v9365_v42 = vld [vmem:[#allocation8 + $0x2c8] sm:$0xf] }
  0xea   :  { %v10959_v26 = vld [vmem:[#allocation8 + $0xf60] sm:$0xf0]  ;;  %v13464_v43 = vld [vmem:[#allocation8 + $0x2e4] sm:$0xf0] }
  0xeb   :  { %v13651_v56 = vld [vmem:[#allocation8 + $0x8c4] sm:$0xf]  ;;  %v10962_v61 = vor.u32 %v13859_v55, %v10959_v26  ;;  %3678 = vmatpush.bf16.msrb.mxu2 %v10706_v60  ;;  %v9205_v55 = vld [vmem:[#allocation8 + $0x188] sm:$0xf] }
  0xec   :  { %v10127_v57 = vld [vmem:[#allocation8 + $0x8e0] sm:$0xf0] }
  0xed   :  { %v13715_v58 = vld [vmem:[#allocation8 + $0xac4] sm:$0xf]  ;;  %v10130_v0 = vor.u32 %v13651_v56, %v10127_v57  ;;  %3691 = vmatpush.bf16.msrb.mxu3 %v10962_v61  ;;  %v13424_v56 = vld [vmem:[#allocation8 + $0x1a4] sm:$0xf0] }
  0xee   :  { %v10383_v59 = vld [vmem:[#allocation8 + $0xae0] sm:$0xf0]  ;;  %v9461_v57 = vld [vmem:[#allocation8 + $0x388] sm:$0xf] }
  0xef   :  { %v13787_v62 = vld [vmem:[#allocation8 + $0xd04] sm:$0xf]  ;;  %v10386_v2 = vor.u32 %v13715_v58, %v10383_v59  ;;  %3654 = vmatpush.bf16.msrb.mxu0 %v10130_v0  ;;  %v13488_v58 = vld [vmem:[#allocation8 + $0x3a4] sm:$0xf0] }
  0xf0   :  { %v10671_v63 = vld [vmem:[#allocation8 + $0xd20] sm:$0xf0]  ;;  %v9749_v0 = vld [vmem:[#allocation8 + $0x5c8] sm:$0xf] }
  0xf1   :  { %v13851_v3 = vld [vmem:[#allocation8 + $0xf04] sm:$0xf]  ;;  %v10674_v11 = vor.u32 %v13787_v62, %v10671_v63  ;;  %3667 = vmatpush.bf16.msrb.mxu1 %v10386_v2  ;;  %v13560_v2 = vld [vmem:[#allocation8 + $0x5e4] sm:$0xf0] }
  0xf2   :  { %v10927_v4 = vld [vmem:[#allocation8 + $0xf20] sm:$0xf0] }
  0xf3   :  { %v13643_v5 = vld [vmem:[#allocation8 + $0x884] sm:$0xf]  ;;  %v10930_v12 = vor.u32 %v13851_v3, %v10927_v4  ;;  %3679 = vmatpush.bf16.msrb.mxu2 %v10674_v11  ;;  %v9206_v3 = vor.u32 %v13424_v56, %v9205_v55  ;;  %v9462_v4 = vor.u32 %v13488_v58, %v9461_v57  ;;  %v13416_v11 = vld [vmem:[#allocation8 + $0x164] sm:$0xf0] }
  0xf4   :  { %v10095_v7 = vld [vmem:[#allocation8 + $0x8a0] sm:$0xf0]  ;;  %v13456_v56 = vld [vmem:[#allocation8 + $0x2a4] sm:$0xf0] }
  0xf5   :  { %v13707_v9 = vld [vmem:[#allocation8 + $0xa84] sm:$0xf]  ;;  %v10098_v16 = vor.u32 %v13643_v5, %v10095_v7  ;;  %3692 = vmatpush.bf16.msrb.mxu3 %v10930_v12  ;;  %v10005_v5 = vld [vmem:[#allocation8 + $0x7c8] sm:$0xf] }
  0xf6   :  { %v10351_v10 = vld [vmem:[#allocation8 + $0xaa0] sm:$0xf0]  ;;  %v13624_v7 = vld [vmem:[#allocation8 + $0x7e4] sm:$0xf0] }
  0xf7   :  { %v13779_v13 = vld [vmem:[#allocation8 + $0xcc4] sm:$0xf]  ;;  %v10354_v17 = vor.u32 %v13707_v9, %v10351_v10  ;;  %3655 = vmatpush.bf16.msrb.mxu0 %v10098_v16  ;;  %v9173_v10 = vld [vmem:[#allocation8 + $0x148] sm:$0xf] }
  0xf8   :  { %v10639_v15 = vld [vmem:[#allocation8 + $0xce0] sm:$0xf0]  ;;  %v13480_v16 = vld [vmem:[#allocation8 + $0x364] sm:$0xf0] }
  0xf9   :  { %v13843_v18 = vld [vmem:[#allocation8 + $0xec4] sm:$0xf]  ;;  %v10642_v23 = vor.u32 %v13779_v13, %v10639_v15  ;;  %3668 = vmatpush.bf16.msrb.mxu1 %v10354_v17  ;;  %v9750_v13 = vor.u32 %v13560_v2, %v9749_v0  ;;  %v9429_v15 = vld [vmem:[#allocation8 + $0x348] sm:$0xf]  ;;  %v10006_v17 = vor.u32 %v13624_v7, %v10005_v5 }
  0xfa   :  { %v10895_v51 = vld [vmem:[#allocation8 + $0xee0] sm:$0xf0]  ;;  %v9621_v58 = vld [vmem:[#allocation8 + $0x4c8] sm:$0xf] }
  0xfb   :  { %v13635_v19 = vld [vmem:[#allocation8 + $0x844] sm:$0xf]  ;;  %v10898_v24 = vor.u32 %v13843_v18, %v10895_v51  ;;  %3680 = vmatpush.bf16.msrb.mxu2 %v10642_v23  ;;  %v9717_v18 = vld [vmem:[#allocation8 + $0x588] sm:$0xf] }
  0xfc   :  { %v10063_v20 = vld [vmem:[#allocation8 + $0x860] sm:$0xf0]  ;;  %v13552_v51 = vld [vmem:[#allocation8 + $0x5a4] sm:$0xf0] }
  0xfd   :  { %v13699_v21 = vld [vmem:[#allocation8 + $0xa44] sm:$0xf]  ;;  %v10066_v29 = vor.u32 %v13635_v19, %v10063_v20  ;;  %3693 = vmatpush.bf16.msrb.mxu3 %v10898_v24  ;;  %v9174_v19 = vor.u32 %v13416_v11, %v9173_v10  ;;  %v9973_v20 = vld [vmem:[#allocation8 + $0x788] sm:$0xf] }
  0xfe   :  { %v10319_v22 = vld [vmem:[#allocation8 + $0xa60] sm:$0xf0]  ;;  %v9141_v23 = vld [vmem:[#allocation8 + $0x108] sm:$0xf] }
  0xff   :  { %v13771_v25 = vld [vmem:[#allocation8 + $0xc84] sm:$0xf]  ;;  %v10322_v31 = vor.u32 %v13699_v21, %v10319_v22  ;;  %3656 = vmatpush.bf16.msrb.mxu0 %v10066_v29  ;;  %v13616_v21 = vld [vmem:[#allocation8 + $0x7a4] sm:$0xf0]  ;;  %v9430_v22 = vor.u32 %v13480_v16, %v9429_v15 }
 0x100   :  { %v10607_v27 = vld [vmem:[#allocation8 + $0xca0] sm:$0xf0]  ;;  %v13408_v24 = vld [vmem:[#allocation8 + $0x124] sm:$0xf0]  ;;  %v9974_v29 = vor.u32 %v13616_v21, %v9973_v20 }
 0x101   :  { %v13835_v28 = vld [vmem:[#allocation8 + $0xe84] sm:$0xf]  ;;  %v10610_v39 = vor.u32 %v13771_v25, %v10607_v27  ;;  %3669 = vmatpush.bf16.msrb.mxu1 %v10322_v31  ;;  %v9718_v25 = vor.u32 %v13552_v51, %v9717_v18  ;;  %v9397_v27 = vld [vmem:[#allocation8 + $0x308] sm:$0xf] }
 0x102   :  { %v10863_v32 = vld [vmem:[#allocation8 + $0xea0] sm:$0xf0]  ;;  %v9685_v31 = vld [vmem:[#allocation8 + $0x548] sm:$0xf] }
 0x103   :  { %v13627_v33 = vld [vmem:[#allocation8 + $0x804] sm:$0xf]  ;;  %v10866_v44 = vor.u32 %v13835_v28, %v10863_v32  ;;  %3681 = vmatpush.bf16.msrb.mxu2 %v10610_v39  ;;  %v13472_v28 = vld [vmem:[#allocation8 + $0x324] sm:$0xf0] }
 0x104   :  { %v10031_v34 = vld [vmem:[#allocation8 + $0x820] sm:$0xf0]  ;;  %v13544_v32 = vld [vmem:[#allocation8 + $0x564] sm:$0xf0] }
 0x105   :  { %v13691_v35 = vld [vmem:[#allocation8 + $0xa04] sm:$0xf]  ;;  %v10034_v48 = vor.u32 %v13627_v33, %v10031_v34  ;;  %3694 = vmatpush.bf16.msrb.mxu3 %v10866_v44  ;;  %v9142_v33 = vor.u32 %v13408_v24, %v9141_v23  ;;  %v9941_v34 = vld [vmem:[#allocation8 + $0x748] sm:$0xf]  ;;  %v9686_v40 = vor.u32 %v13544_v32, %v9685_v31 }
 0x106   :  { %v10287_v37 = vld [vmem:[#allocation8 + $0xa20] sm:$0xf0]  ;;  %v13400_v39 = vld [vmem:[#allocation8 + $0xe4] sm:$0xf0] }
 0x107   :  { %v13763_v45 = vld [vmem:[#allocation8 + $0xc44] sm:$0xf]  ;;  %v10290_v49 = vor.u32 %v13691_v35, %v10287_v37  ;;  %3657 = vmatpush.bf16.msrb.mxu0 %v10034_v48  ;;  %v13608_v35 = vld [vmem:[#allocation8 + $0x764] sm:$0xf0]  ;;  %v9398_v37 = vor.u32 %v13472_v28, %v9397_v27  ;;  %v9110_v48 = vor.u32 %v13400_v39, %v9109_v38 }
 0x108   :  { %v10575_v47 = vld [vmem:[#allocation8 + $0xc60] sm:$0xf0]  ;;  %v9942_v44 = vor.u32 %v13608_v35, %v9941_v34  ;;  %v9045_v0 = vld [vmem:[#allocation8 + $0x48] sm:$0xf] }
 0x109   :  { %v13827_v50 = vld [vmem:[#allocation8 + $0xe44] sm:$0xf]  ;;  %v10578_v26 = vor.u32 %v13763_v45, %v10575_v47  ;;  %3670 = vmatpush.bf16.msrb.mxu1 %v10290_v49  ;;  %v9653_v45 = vld [vmem:[#allocation8 + $0x508] sm:$0xf] }
 0x10a   :  { %v10831_v52 = vld [vmem:[#allocation8 + $0xe60] sm:$0xf0]  ;;  %3658 = vmatmul.bf16.vlgmr.msrb.gmra.mxu0 %v14866_v8  ;;  %v13536_v47 = vld [vmem:[#allocation8 + $0x524] sm:$0xf0] }
 0x10b   :  { %v10834_v59 = vor.u32 %v13827_v50, %v10831_v52  ;;  %v13755_v60 = vld [vmem:[#allocation8 + $0xc04] sm:$0xf]  ;;  %3702 = vmatpush.bf16.msra.mxu0 %v9238_v53  ;;  %3682 = vmatpush.bf16.msrb.mxu2 %v10578_v26  ;;  %v9909_v49 = vld [vmem:[#allocation8 + $0x708] sm:$0xf]  ;;  %v9366_v52 = vor.u32 %v13464_v43, %v9365_v42  ;;  %v9654_v55 = vor.u32 %v13536_v47, %v9653_v45 }
 0x10c   :  { %v10543_v61 = vld [vmem:[#allocation8 + $0xc20] sm:$0xf0]  ;;  %3671 = vmatmul.bf16.vlgmr.msrb.gmra.mxu1 %v14868_v14  ;;  %v13600_v50 = vld [vmem:[#allocation8 + $0x724] sm:$0xf0] }
 0x10d   :  { %v13819_v62 = vld [vmem:[#allocation8 + $0xe04] sm:$0xf]  ;;  %3715 = vmatpush.bf16.msra.mxu1 %v9494_v54  ;;  %v10546_v9 = vor.u32 %v13755_v60, %v10543_v61  ;;  %3695 = vmatpush.bf16.msrb.mxu3 %v10834_v59  ;;  %v9077_v53 = vld [vmem:[#allocation8 + $0x88] sm:$0xf]  ;;  %v9910_v57 = vor.u32 %v13600_v50, %v9909_v49 }
 0x10e   :  { %v10799_v63 = vld [vmem:[#allocation8 + $0xe20] sm:$0xf0]  ;;  %v13392_v54 = vld [vmem:[#allocation8 + $0xa4] sm:$0xf0] }
 0x10f   :  { %v10802_v12 = vor.u32 %v13819_v62, %v10799_v63  ;;  %3703 = vmatpush.bf16.msra.mxu0 %v9206_v3  ;;  %3683 = vmatpush.bf16.msrb.mxu2 %v10546_v9  ;;  %v9333_v26 = vld [vmem:[#allocation8 + $0x288] sm:$0xf]  ;;  %v9078_v60 = vor.u32 %v13392_v54, %v9077_v53 }
 0x110   :  { %v13528_v59 = vld [vmem:[#allocation8 + $0x4e4] sm:$0xf0]  ;;  %v9334_v63 = vor.u32 %v13456_v56, %v9333_v26 }
 0x111   :  { %3716 = vmatpush.bf16.msra.mxu1 %v9462_v4  ;;  %3696 = vmatpush.bf16.msrb.mxu3 %v10802_v12  ;;  %v9877_v61 = vld [vmem:[#allocation8 + $0x6c8] sm:$0xf]  ;;  %v9622_v3 = vor.u32 %v13528_v59, %v9621_v58 }
 0x112   :  { %3684 = vmatmul.bf16.vlgmr.msrb.gmra.mxu2 %v14872_v41  ;;  %v13592_v62 = vld [vmem:[#allocation8 + $0x6e4] sm:$0xf0] }
 0x113   :  { %3728 = vmatpush.bf16.msra.mxu2 %v9750_v13  ;;  %3704 = vmatpush.bf16.msra.mxu0 %v9174_v19  ;;  %v13384_v2 = vld [vmem:[#allocation8 + $0x64] sm:$0xf0]  ;;  %v9878_v7 = vor.u32 %v13592_v62, %v9877_v61 }
 0x114   :  { %3697 = vmatmul.bf16.vlgmr.msrb.gmra.mxu3 %v14874_v46  ;;  %v9301_v4 = vld [vmem:[#allocation8 + $0x248] sm:$0xf]  ;;  %v9046_v11 = vor.u32 %v13384_v2, %v9045_v0 }
 0x115   :  { %3741 = vmatpush.bf16.msra.mxu3 %v10006_v17  ;;  %3717 = vmatpush.bf16.msra.mxu1 %v9430_v22  ;;  %v13448_v5 = vld [vmem:[#allocation8 + $0x264] sm:$0xf0] }
 0x116   :  { %v9589_v9 = vld [vmem:[#allocation8 + $0x488] sm:$0xf]  ;;  %v9302_v16 = vor.u32 %v13448_v5, %v9301_v4 }
 0x117   :  { %3729 = vmatpush.bf16.msra.mxu2 %v9718_v25  ;;  %3705 = vmatpush.bf16.msra.mxu0 %v9142_v33  ;;  %v13520_v10 = vld [vmem:[#allocation8 + $0x4a4] sm:$0xf0] }
 0x118   :  { %v9845_v12 = vld [vmem:[#allocation8 + $0x688] sm:$0xf]  ;;  %v9590_v19 = vor.u32 %v13520_v10, %v9589_v9 }
 0x119   :  { %3742 = vmatpush.bf16.msra.mxu3 %v9974_v29  ;;  %3718 = vmatpush.bf16.msra.mxu1 %v9398_v37  ;;  %v13584_v13 = vld [vmem:[#allocation8 + $0x6a4] sm:$0xf0] }
 0x11a   :  { %v9013_v15 = vld [vmem:[#allocation8 + $0x8] sm:$0xf]  ;;  %v9846_v23 = vor.u32 %v13584_v13, %v9845_v12 }
 0x11b   :  { %3730 = vmatpush.bf16.msra.mxu2 %v9686_v40  ;;  %3706 = vmatpush.bf16.msra.mxu0 %v9110_v48  ;;  %v13376_v17 = vld [vmem:[#allocation8 + $0x24] sm:$0xf0] }
 0x11c   :  { %v9269_v18 = vld [vmem:[#allocation8 + $0x208] sm:$0xf]  ;;  %v9014_v28 = vor.u32 %v13376_v17, %v9013_v15 }
 0x11d   :  { %3743 = vmatpush.bf16.msra.mxu3 %v9942_v44  ;;  %3719 = vmatpush.bf16.msra.mxu1 %v9366_v52  ;;  %v13440_v51 = vld [vmem:[#allocation8 + $0x224] sm:$0xf0] }
 0x11e   :  { %v10261_v20 = vld [vmem:[#allocation8 + $0x9c8] sm:$0xf]  ;;  %v9270_v32 = vor.u32 %v13440_v51, %v9269_v18 }
 0x11f   :  { %3731 = vmatpush.bf16.msra.mxu2 %v9654_v55  ;;  %3707 = vmatpush.bf16.msra.mxu0 %v9078_v60  ;;  %v13688_v21 = vld [vmem:[#allocation8 + $0x9e4] sm:$0xf0] }
 0x120   :  { %v10517_v22 = vld [vmem:[#allocation8 + $0xbc8] sm:$0xf]  ;;  %v10262_v33 = vor.u32 %v13688_v21, %v10261_v20 }
 0x121   :  { %3744 = vmatpush.bf16.msra.mxu3 %v9910_v57  ;;  %3720 = vmatpush.bf16.msra.mxu1 %v9334_v63  ;;  %v13752_v24 = vld [vmem:[#allocation8 + $0xbe4] sm:$0xf0] }
 0x122   :  { %v9557_v25 = vld [vmem:[#allocation8 + $0x448] sm:$0xf]  ;;  %v10518_v35 = vor.u32 %v13752_v24, %v10517_v22 }
 0x123   :  { %3732 = vmatpush.bf16.msra.mxu2 %v9622_v3  ;;  %v13512_v27 = vld [vmem:[#allocation8 + $0x464] sm:$0xf0]  ;;  %3708 = vmatpush.bf16.msra.mxu0 %v9046_v11 }
 0x124   :  { %v9813_v29 = vld [vmem:[#allocation8 + $0x648] sm:$0xf]  ;;  %v9558_v37 = vor.u32 %v13512_v27, %v9557_v25 }
 0x125   :  { %3745 = vmatpush.bf16.msra.mxu3 %v9878_v7  ;;  %v13576_v31 = vld [vmem:[#allocation8 + $0x664] sm:$0xf0]  ;;  %3721 = vmatpush.bf16.msra.mxu1 %v9302_v16 }
 0x126   :  { %v10229_v34 = vld [vmem:[#allocation8 + $0x988] sm:$0xf]  ;;  %v9814_v42 = vor.u32 %v13576_v31, %v9813_v29 }
 0x127   :  { %3733 = vmatpush.bf16.msra.mxu2 %v9590_v19  ;;  %v13680_v38 = vld [vmem:[#allocation8 + $0x9a4] sm:$0xf0]  ;;  %3709 = vmatpush.bf16.msra.mxu0 %v9014_v28 }
 0x128   :  { %v10485_v39 = vld [vmem:[#allocation8 + $0xb88] sm:$0xf]  ;;  %v10230_v50 = vor.u32 %v13680_v38, %v10229_v34 }
 0x129   :  { %v13744_v40 = vld [vmem:[#allocation8 + $0xba4] sm:$0xf0]  ;;  %3746 = vmatpush.bf16.msra.mxu3 %v9846_v23  ;;  %3722 = vmatpush.bf16.msra.mxu1 %v9270_v32 }
 0x12a   :  { %v9525_v43 = vld [vmem:[#allocation8 + $0x408] sm:$0xf]  ;;  %v10486_v54 = vor.u32 %v13744_v40, %v10485_v39  ;;  %3710 = vmatmul.bf16.vlgmr.msra.gmra.mxu0 %v14849_v1 }
 0x12b   :  { %v13504_v44 = vld [vmem:[#allocation8 + $0x424] sm:$0xf0]  ;;  %3754 = vmatpush.bf16.msrb.mxu0 %v10262_v33  ;;  %3734 = vmatpush.bf16.msra.mxu2 %v9558_v37 }
 0x12c   :  { %v9781_v45 = vld [vmem:[#allocation8 + $0x608] sm:$0xf]  ;;  %v9526_v55 = vor.u32 %v13504_v44, %v9525_v43  ;;  %3723 = vmatmul.bf16.vlgmr.msra.gmra.mxu1 %v14852_v6 }
 0x12d   :  { %v13568_v47 = vld [vmem:[#allocation8 + $0x624] sm:$0xf0]  ;;  %3767 = vmatpush.bf16.msrb.mxu1 %v10518_v35  ;;  %3747 = vmatpush.bf16.msra.mxu3 %v9814_v42 }
 0x12e   :  { %v10773_v48 = vld [vmem:[#allocation8 + $0xdc8] sm:$0xf]  ;;  %v9782_v57 = vor.u32 %v13568_v47, %v9781_v45 }
 0x12f   :  { %v13816_v49 = vld [vmem:[#allocation8 + $0xde4] sm:$0xf0]  ;;  %3755 = vmatpush.bf16.msrb.mxu0 %v10230_v50  ;;  %3735 = vmatpush.bf16.msra.mxu2 %v9526_v55 }
 0x130   :  { %v11029_v52 = vld [vmem:[#allocation8 + $0xfc8] sm:$0xf]  ;;  %v10774_v58 = vor.u32 %v13816_v49, %v10773_v48 }
 0x131   :  { %v13880_v53 = vld [vmem:[#allocation8 + $0xfe4] sm:$0xf0]  ;;  %3768 = vmatpush.bf16.msrb.mxu1 %v10486_v54  ;;  %3748 = vmatpush.bf16.msra.mxu3 %v9782_v57 }
 0x132   :  { %v10197_v26 = vld [vmem:[#allocation8 + $0x948] sm:$0xf]  ;;  %v11030_v61 = vor.u32 %v13880_v53, %v11029_v52  ;;  %3736 = vmatmul.bf16.vlgmr.msra.gmra.mxu2 %v14857_v30 }
 0x133   :  { %v13672_v56 = vld [vmem:[#allocation8 + $0x964] sm:$0xf0]  ;;  %3780 = vmatpush.bf16.msrb.mxu2 %v10774_v58 }
 0x134   :  { %v10453_v59 = vld [vmem:[#allocation8 + $0xb48] sm:$0xf]  ;;  %v10198_v0 = vor.u32 %v13672_v56, %v10197_v26  ;;  %3749 = vmatmul.bf16.vlgmr.msra.gmra.mxu3 %v14859_v36 }
 0x135   :  { %v13736_v60 = vld [vmem:[#allocation8 + $0xb64] sm:$0xf0]  ;;  %3793 = vmatpush.bf16.msrb.mxu3 %v11030_v61 }
 0x136   :  { %v10741_v62 = vld [vmem:[#allocation8 + $0xd88] sm:$0xf]  ;;  %v10454_v4 = vor.u32 %v13736_v60, %v10453_v59  ;;  %3756 = vmatpush.bf16.msrb.mxu0 %v10198_v0 }
 0x137   :  { %v13808_v63 = vld [vmem:[#allocation8 + $0xda4] sm:$0xf0] }
 0x138   :  { %v10997_v2 = vld [vmem:[#allocation8 + $0xf88] sm:$0xf]  ;;  %v10742_v9 = vor.u32 %v13808_v63, %v10741_v62  ;;  %3769 = vmatpush.bf16.msrb.mxu1 %v10454_v4  ;;  %v13492_v4 = vld [vmem:[#allocation8 + $0x3cc] sm:$0xf] }
 0x139   :  { %v13872_v3 = vld [vmem:[#allocation8 + $0xfa4] sm:$0xf0] }
 0x13a   :  { %v10165_v5 = vld [vmem:[#allocation8 + $0x908] sm:$0xf]  ;;  %v10998_v12 = vor.u32 %v13872_v3, %v10997_v2  ;;  %3781 = vmatpush.bf16.msrb.mxu2 %v10742_v9  ;;  %v13428_v2 = vld [vmem:[#allocation8 + $0x1cc] sm:$0xf] }
 0x13b   :  { %v13664_v7 = vld [vmem:[#allocation8 + $0x924] sm:$0xf0]  ;;  %v9239_v3 = vld [vmem:[#allocation8 + $0x1e8] sm:$0xf0] }
 0x13c   :  { %v10421_v10 = vld [vmem:[#allocation8 + $0xb08] sm:$0xf]  ;;  %v10166_v16 = vor.u32 %v13664_v7, %v10165_v5  ;;  %3794 = vmatpush.bf16.msrb.mxu3 %v10998_v12  ;;  %v9495_v7 = vld [vmem:[#allocation8 + $0x3e8] sm:$0xf0] }
 0x13d   :  { %v13728_v11 = vld [vmem:[#allocation8 + $0xb24] sm:$0xf0] }
 0x13e   :  { %v10709_v13 = vld [vmem:[#allocation8 + $0xd48] sm:$0xf]  ;;  %v10422_v51 = vor.u32 %v13728_v11, %v10421_v10  ;;  %3757 = vmatpush.bf16.msrb.mxu0 %v10166_v16  ;;  %v9242_v16 = vor.u32 %v13428_v2, %v9239_v3  ;;  %v13604_v3 = vld [vmem:[#allocation8 + $0x74c] sm:$0xf] }
 0x13f   :  { %v13800_v15 = vld [vmem:[#allocation8 + $0xd64] sm:$0xf0] }
 0x140   :  { %v10965_v17 = vld [vmem:[#allocation8 + $0xf48] sm:$0xf]  ;;  %v10710_v21 = vor.u32 %v13800_v15, %v10709_v13  ;;  %3770 = vmatpush.bf16.msrb.mxu1 %v10422_v51 }
 0x141   :  { %v13864_v18 = vld [vmem:[#allocation8 + $0xf64] sm:$0xf0] }
 0x142   :  { %v10133_v19 = vld [vmem:[#allocation8 + $0x8c8] sm:$0xf]  ;;  %v10966_v24 = vor.u32 %v13864_v18, %v10965_v17  ;;  %3782 = vmatpush.bf16.msrb.mxu2 %v10710_v21  ;;  %v13420_v17 = vld [vmem:[#allocation8 + $0x18c] sm:$0xf]  ;;  %v9498_v18 = vor.u32 %v13492_v4, %v9495_v7 }
 0x143   :  { %v13656_v20 = vld [vmem:[#allocation8 + $0x8e4] sm:$0xf0]  ;;  %v9463_v21 = vld [vmem:[#allocation8 + $0x3a8] sm:$0xf0] }
 0x144   :  { %v10389_v22 = vld [vmem:[#allocation8 + $0xac8] sm:$0xf]  ;;  %v10134_v28 = vor.u32 %v13656_v20, %v10133_v19  ;;  %3795 = vmatpush.bf16.msrb.mxu3 %v10966_v24  ;;  %v9207_v19 = vld [vmem:[#allocation8 + $0x1a8] sm:$0xf0] }
 0x145   :  { %v13720_v23 = vld [vmem:[#allocation8 + $0xae4] sm:$0xf0]  ;;  %v13484_v20 = vld [vmem:[#allocation8 + $0x38c] sm:$0xf] }
 0x146   :  { %v10677_v25 = vld [vmem:[#allocation8 + $0xd08] sm:$0xf]  ;;  %v10390_v32 = vor.u32 %v13720_v23, %v10389_v22  ;;  %3758 = vmatpush.bf16.msrb.mxu0 %v10134_v28  ;;  %v13556_v28 = vld [vmem:[#allocation8 + $0x5cc] sm:$0xf] }
 0x147   :  { %v13792_v27 = vld [vmem:[#allocation8 + $0xd24] sm:$0xf0]  ;;  %v9943_v4 = vld [vmem:[#allocation8 + $0x768] sm:$0xf0] }
 0x148   :  { %v10933_v29 = vld [vmem:[#allocation8 + $0xf08] sm:$0xf]  ;;  %v10678_v35 = vor.u32 %v13792_v27, %v10677_v25  ;;  %3771 = vmatpush.bf16.msrb.mxu1 %v10390_v32  ;;  %v13620_v32 = vld [vmem:[#allocation8 + $0x7cc] sm:$0xf] }
 0x149   :  { %v13856_v31 = vld [vmem:[#allocation8 + $0xf24] sm:$0xf0]  ;;  %v13396_v7 = vld [vmem:[#allocation8 + $0xcc] sm:$0xf] }
 0x14a   :  { %v10101_v33 = vld [vmem:[#allocation8 + $0x888] sm:$0xf]  ;;  %v10934_v39 = vor.u32 %v13856_v31, %v10933_v29  ;;  %3783 = vmatpush.bf16.msrb.mxu2 %v10678_v35  ;;  %v9751_v29 = vld [vmem:[#allocation8 + $0x5e8] sm:$0xf0]  ;;  %v9210_v31 = vor.u32 %v13420_v17, %v9207_v19 }
 0x14b   :  { %v13648_v34 = vld [vmem:[#allocation8 + $0x8a4] sm:$0xf0]  ;;  %v9655_v17 = vld [vmem:[#allocation8 + $0x528] sm:$0xf0] }
 0x14c   :  { %v10357_v37 = vld [vmem:[#allocation8 + $0xa88] sm:$0xf]  ;;  %v10102_v43 = vor.u32 %v13648_v34, %v10101_v33  ;;  %3796 = vmatpush.bf16.msrb.mxu3 %v10934_v39  ;;  %v10007_v33 = vld [vmem:[#allocation8 + $0x7e8] sm:$0xf0]  ;;  %v9466_v34 = vor.u32 %v13484_v20, %v9463_v21  ;;  %v14890_v39 = vld [vmem:[#allocation10] sm:$0xff] }
 0x14d   :  { %v13712_v38 = vld [vmem:[#allocation8 + $0xaa4] sm:$0xf0]  ;;  %v9911_v19 = vld [vmem:[#allocation8 + $0x728] sm:$0xf0] }
 0x14e   :  { %v10645_v40 = vld [vmem:[#allocation8 + $0xcc8] sm:$0xf]  ;;  %v10358_v47 = vor.u32 %v13712_v38, %v10357_v37  ;;  %3759 = vmatpush.bf16.msrb.mxu0 %v10102_v43  ;;  %v13412_v37 = vld [vmem:[#allocation8 + $0x14c] sm:$0xf] }
 0x14f   :  { %v13784_v42 = vld [vmem:[#allocation8 + $0xce4] sm:$0xf0]  ;;  %v9175_v38 = vld [vmem:[#allocation8 + $0x168] sm:$0xf0] }
 0x150   :  { %v10901_v44 = vld [vmem:[#allocation8 + $0xec8] sm:$0xf]  ;;  %v10646_v50 = vor.u32 %v13784_v42, %v10645_v40  ;;  %3772 = vmatpush.bf16.msrb.mxu1 %v10358_v47  ;;  %v9754_v42 = vor.u32 %v13556_v28, %v9751_v29  ;;  %v13476_v43 = vld [vmem:[#allocation8 + $0x34c] sm:$0xf] }
 0x151   :  { %v13848_v45 = vld [vmem:[#allocation8 + $0xee4] sm:$0xf0]  ;;  %v13548_v47 = vld [vmem:[#allocation8 + $0x58c] sm:$0xf] }
 0x152   :  { %v10069_v48 = vld [vmem:[#allocation8 + $0x848] sm:$0xf]  ;;  %v10902_v54 = vor.u32 %v13848_v45, %v10901_v44  ;;  %3784 = vmatpush.bf16.msrb.mxu2 %v10646_v50  ;;  %v9431_v44 = vld [vmem:[#allocation8 + $0x368] sm:$0xf0]  ;;  %v10010_v45 = vor.u32 %v13620_v32, %v10007_v33  ;;  %v918_v50 = vperm.slane %v14890_v39, 0 }
 0x153   :  { %v13640_v49 = vld [vmem:[#allocation8 + $0x864] sm:$0xf0]  ;;  %v13388_v21 = vld [vmem:[#allocation8 + $0x8c] sm:$0xf] }
 0x154   :  { %v10325_v52 = vld [vmem:[#allocation8 + $0xa48] sm:$0xf]  ;;  %v10070_v56 = vor.u32 %v13640_v49, %v10069_v48  ;;  %3797 = vmatpush.bf16.msrb.mxu3 %v10902_v54  ;;  %v9719_v48 = vld [vmem:[#allocation8 + $0x5a8] sm:$0xf0]  ;;  %v9178_v49 = vor.u32 %v13412_v37, %v9175_v38  ;;  %v9434_v54 = vor.u32 %v13476_v43, %v9431_v44 }
 0x155   :  { %v13704_v53 = vld [vmem:[#allocation8 + $0xa64] sm:$0xf0]  ;;  %v13524_v29 = vld [vmem:[#allocation8 + $0x4cc] sm:$0xf] }
 0x156   :  { %v10613_v55 = vld [vmem:[#allocation8 + $0xc88] sm:$0xf]  ;;  %v10326_v60 = vor.u32 %v13704_v53, %v10325_v52  ;;  %3760 = vmatpush.bf16.msrb.mxu0 %v10070_v56  ;;  %v13612_v52 = vld [vmem:[#allocation8 + $0x78c] sm:$0xf]  ;;  %v9722_v56 = vor.u32 %v13548_v47, %v9719_v48 }
 0x157   :  { %v13776_v26 = vld [vmem:[#allocation8 + $0xca4] sm:$0xf0]  ;;  %v9975_v53 = vld [vmem:[#allocation8 + $0x7a8] sm:$0xf0] }
 0x158   :  { %v10869_v57 = vld [vmem:[#allocation8 + $0xe88] sm:$0xf]  ;;  %v10614_v0 = vor.u32 %v13776_v26, %v10613_v55  ;;  %3773 = vmatpush.bf16.msrb.mxu1 %v10326_v60  ;;  %v13404_v55 = vld [vmem:[#allocation8 + $0x10c] sm:$0xf]  ;;  %v9978_v60 = vor.u32 %v13612_v52, %v9975_v53 }
 0x159   :  { %v13840_v58 = vld [vmem:[#allocation8 + $0xea4] sm:$0xf0]  ;;  %v9143_v26 = vld [vmem:[#allocation8 + $0x128] sm:$0xf0] }
 0x15a   :  { %v10037_v59 = vld [vmem:[#allocation8 + $0x808] sm:$0xf]  ;;  %v10870_v5 = vor.u32 %v13840_v58, %v10869_v57  ;;  %3785 = vmatpush.bf16.msrb.mxu2 %v10614_v0  ;;  %v13468_v57 = vld [vmem:[#allocation8 + $0x30c] sm:$0xf]  ;;  %v3516_v0 = vpop.f32.mrf.mxu1  ;;  %v9146_v2 = vor.u32 %v13404_v55, %v9143_v26  ;;  %v3542_v26 = vpop.f32.mrf.mxu3 }
 0x15b   :  { %v13632_v61 = vld [vmem:[#allocation8 + $0x824] sm:$0xf0]  ;;  %v9399_v58 = vld [vmem:[#allocation8 + $0x328] sm:$0xf0] }
 0x15c   :  { %v10293_v62 = vld [vmem:[#allocation8 + $0xa08] sm:$0xf]  ;;  %v10038_v11 = vor.u32 %v13632_v61, %v10037_v59  ;;  %3798 = vmatpush.bf16.msrb.mxu3 %v10870_v5  ;;  %v3503_v59 = vpop.f32.mrf.mxu0  ;;  %v13540_v61 = vld [vmem:[#allocation8 + $0x54c] sm:$0xf]  ;;  %v9402_v5 = vor.u32 %v13468_v57, %v9399_v58 }
 0x15d   :  { %v13696_v63 = vld [vmem:[#allocation8 + $0xa24] sm:$0xf0]  ;;  %v13380_v38 = vld [vmem:[#allocation8 + $0x4c] sm:$0xf] }
 0x15e   :  { %v10581_v9 = vld [vmem:[#allocation8 + $0xc48] sm:$0xf]  ;;  %v10294_v15 = vor.u32 %v13696_v63, %v10293_v62  ;;  %3761 = vmatpush.bf16.msrb.mxu0 %v10038_v11  ;;  %v9687_v62 = vld [vmem:[#allocation8 + $0x568] sm:$0xf0]  ;;  %v3504_v63 = vadd.f32 %v3503_v59, %v918_v50 }
 0x15f   :  { %v13768_v10 = vld [vmem:[#allocation8 + $0xc64] sm:$0xf0]  ;;  %v9690_v11 = vor.u32 %v13540_v61, %v9687_v62  ;;  %v13444_v43 = vld [vmem:[#allocation8 + $0x24c] sm:$0xf] }
 0x160   :  { %v10837_v12 = vld [vmem:[#allocation8 + $0xe48] sm:$0xf]  ;;  %v10582_v51 = vor.u32 %v13768_v10, %v10581_v9  ;;  %3774 = vmatpush.bf16.msrb.mxu1 %v10294_v15  ;;  %v9111_v9 = vld [vmem:[#allocation8 + $0xe8] sm:$0xf0]  ;;  %v3517_v10 = vadd.f32 %v3516_v0, %v3504_v63  ;;  %v9946_v15 = vor.u32 %v13604_v3, %v9943_v4 }
 0x161   :  { %v13832_v13 = vld [vmem:[#allocation8 + $0xe64] sm:$0xf0]  ;;  %3762 = vmatmul.bf16.vlgmr.msrb.gmra.mxu0 %v14866_v8  ;;  %v9303_v44 = vld [vmem:[#allocation8 + $0x268] sm:$0xf0] }
 0x162   :  { %v10838_v22 = vor.u32 %v13832_v13, %v10837_v12  ;;  %v10549_v23 = vld [vmem:[#allocation8 + $0xc08] sm:$0xf]  ;;  %3806 = vmatpush.bf16.msra.mxu0 %v9242_v16  ;;  %3786 = vmatpush.bf16.msrb.mxu2 %v10582_v51  ;;  %v13460_v12 = vld [vmem:[#allocation8 + $0x2cc] sm:$0xf]  ;;  %v3518_v32 = vpop.f32.mrf.mxu1 }
 0x163   :  { %v13760_v24 = vld [vmem:[#allocation8 + $0xc24] sm:$0xf0]  ;;  %3775 = vmatmul.bf16.vlgmr.msrb.gmra.mxu1 %v14868_v14  ;;  %v9367_v13 = vld [vmem:[#allocation8 + $0x2e8] sm:$0xf0] }
 0x164   :  { %v10805_v25 = vld [vmem:[#allocation8 + $0xe08] sm:$0xf]  ;;  %3819 = vmatpush.bf16.msra.mxu1 %v9498_v18  ;;  %v10550_v35 = vor.u32 %v13760_v24, %v10549_v23  ;;  %3799 = vmatpush.bf16.msrb.mxu3 %v10838_v22  ;;  %v13532_v16 = vld [vmem:[#allocation8 + $0x50c] sm:$0xf]  ;;  %v9114_v18 = vor.u32 %v13396_v7, %v9111_v9  ;;  %v9370_v20 = vor.u32 %v13460_v12, %v9367_v13 }
 0x165   :  { %v13824_v27 = vld [vmem:[#allocation8 + $0xe24] sm:$0xf0]  ;;  %v13596_v51 = vld [vmem:[#allocation8 + $0x70c] sm:$0xf]  ;;  %v9658_v23 = vor.u32 %v13532_v16, %v9655_v17 }
 0x166   :  { %v10806_v40 = vor.u32 %v13824_v27, %v10805_v25  ;;  %3807 = vmatpush.bf16.msra.mxu0 %v9210_v31  ;;  %3787 = vmatpush.bf16.msrb.mxu2 %v10550_v35  ;;  %v9079_v22 = vld [vmem:[#allocation8 + $0xa8] sm:$0xf0]  ;;  %v3505_v27 = vpop.f32.mrf.mxu0  ;;  %v9914_v28 = vor.u32 %v13596_v51, %v9911_v19 }
 0x167   :  { %v13452_v24 = vld [vmem:[#allocation8 + $0x28c] sm:$0xf]  ;;  %v9082_v33 = vor.u32 %v13388_v21, %v9079_v22 }
 0x168   :  { %3820 = vmatpush.bf16.msra.mxu1 %v9466_v34  ;;  %3800 = vmatpush.bf16.msrb.mxu3 %v10806_v40  ;;  %v9335_v25 = vld [vmem:[#allocation8 + $0x2a8] sm:$0xf0] }
 0x169   :  { %3788 = vmatmul.bf16.vlgmr.msrb.gmra.mxu2 %v14872_v41  ;;  %v9623_v31 = vld [vmem:[#allocation8 + $0x4e8] sm:$0xf0]  ;;  %v9338_v37 = vor.u32 %v13452_v24, %v9335_v25 }
 0x16a   :  { %3832 = vmatpush.bf16.msra.mxu2 %v9754_v42  ;;  %3808 = vmatpush.bf16.msra.mxu0 %v9178_v49  ;;  %v13588_v34 = vld [vmem:[#allocation8 + $0x6cc] sm:$0xf]  ;;  %v9626_v42 = vor.u32 %v13524_v29, %v9623_v31  ;;  %v3529_v49 = vpop.f32.mrf.mxu2  ;;  %v3568_v9 = vpop.f32.mrf.mxu1 }
 0x16b   :  { %3801 = vmatmul.bf16.vlgmr.msrb.gmra.mxu3 %v14874_v46  ;;  %v9879_v35 = vld [vmem:[#allocation8 + $0x6e8] sm:$0xf0]  ;;  %v3530_v55 = vadd.f32 %v3529_v49, %v3517_v10 }
 0x16c   :  { %3845 = vmatpush.bf16.msra.mxu3 %v10010_v45  ;;  %3821 = vmatpush.bf16.msra.mxu1 %v9434_v54  ;;  %v9047_v40 = vld [vmem:[#allocation8 + $0x68] sm:$0xf0]  ;;  %v9882_v45 = vor.u32 %v13588_v34, %v9879_v35 }
 0x16d   :  { %v13516_v47 = vld [vmem:[#allocation8 + $0x48c] sm:$0xf]  ;;  %v9050_v50 = vor.u32 %v13380_v38, %v9047_v40  ;;  %v3543_v0 = vadd.f32 %v3542_v26, %v3530_v55 }
 0x16e   :  { %3833 = vmatpush.bf16.msra.mxu2 %v9722_v56  ;;  %3809 = vmatpush.bf16.msra.mxu0 %v9146_v2  ;;  %v9591_v48 = vld [vmem:[#allocation8 + $0x4a8] sm:$0xf0]  ;;  %v9306_v56 = vor.u32 %v13444_v43, %v9303_v44  ;;  %v3555_v2 = vpop.f32.mrf.mxu0 }
 0x16f   :  { %v13580_v52 = vld [vmem:[#allocation8 + $0x68c] sm:$0xf]  ;;  %v3556_v13 = vadd.f32 %v3555_v2, %v3543_v0 }
 0x170   :  { %3846 = vmatpush.bf16.msra.mxu3 %v9978_v60  ;;  %3822 = vmatpush.bf16.msra.mxu1 %v9402_v5  ;;  %v9847_v53 = vld [vmem:[#allocation8 + $0x6a8] sm:$0xf0]  ;;  %v9594_v60 = vor.u32 %v13516_v47, %v9591_v48 }
 0x171   :  { %v13372_v54 = vld [vmem:[#allocation8 + $0xc] sm:$0xf]  ;;  %v9850_v3 = vor.u32 %v13580_v52, %v9847_v53  ;;  %v3569_v22 = vadd.f32 %v3568_v9, %v3556_v13 }
 0x172   :  { %3834 = vmatpush.bf16.msra.mxu2 %v9690_v11  ;;  %3810 = vmatpush.bf16.msra.mxu0 %v9114_v18  ;;  %v9015_v57 = vld [vmem:[#allocation8 + $0x28] sm:$0xf0] }
 0x173   :  { %v13436_v58 = vld [vmem:[#allocation8 + $0x20c] sm:$0xf]  ;;  %v9018_v10 = vor.u32 %v13372_v54, %v9015_v57 }
 0x174   :  { %3847 = vmatpush.bf16.msra.mxu3 %v9946_v15  ;;  %3823 = vmatpush.bf16.msra.mxu1 %v9370_v20  ;;  %v9271_v59 = vld [vmem:[#allocation8 + $0x228] sm:$0xf0] }
 0x175   :  { %v13684_v61 = vld [vmem:[#allocation8 + $0x9cc] sm:$0xf]  ;;  %v9274_v15 = vor.u32 %v13436_v58, %v9271_v59 }
 0x176   :  { %3835 = vmatpush.bf16.msra.mxu2 %v9658_v23  ;;  %3811 = vmatpush.bf16.msra.mxu0 %v9082_v33  ;;  %v10263_v62 = vld [vmem:[#allocation8 + $0x9e8] sm:$0xf0]  ;;  %v3544_v33 = vpop.f32.mrf.mxu3  ;;  %v3557_v44 = vpop.f32.mrf.mxu0 }
 0x177   :  { %v13748_v63 = vld [vmem:[#allocation8 + $0xbcc] sm:$0xf]  ;;  %v10266_v16 = vor.u32 %v13684_v61, %v10263_v62 }
 0x178   :  { %3848 = vmatpush.bf16.msra.mxu3 %v9914_v28  ;;  %3824 = vmatpush.bf16.msra.mxu1 %v9338_v37  ;;  %v10519_v4 = vld [vmem:[#allocation8 + $0xbe8] sm:$0xf0]  ;;  %v3531_v28 = vpop.f32.mrf.mxu2 }
 0x179   :  { %v13508_v5 = vld [vmem:[#allocation8 + $0x44c] sm:$0xf]  ;;  %v10522_v18 = vor.u32 %v13748_v63, %v10519_v4 }
 0x17a   :  { %3836 = vmatpush.bf16.msra.mxu2 %v9626_v42  ;;  %v9559_v7 = vld [vmem:[#allocation8 + $0x468] sm:$0xf0]  ;;  %3812 = vmatpush.bf16.msra.mxu0 %v9050_v50  ;;  %v3570_v50 = vpop.f32.mrf.mxu1 }
 0x17b   :  { %v13572_v11 = vld [vmem:[#allocation8 + $0x64c] sm:$0xf]  ;;  %v9562_v51 = vor.u32 %v13508_v5, %v9559_v7  ;;  %v919_v7 = vperm.slane %v14890_v39, 1 }
 0x17c   :  { %3849 = vmatpush.bf16.msra.mxu3 %v9882_v45  ;;  %v9815_v12 = vld [vmem:[#allocation8 + $0x668] sm:$0xf0]  ;;  %3825 = vmatpush.bf16.msra.mxu1 %v9306_v56 }
 0x17d   :  { %v13676_v17 = vld [vmem:[#allocation8 + $0x98c] sm:$0xf]  ;;  %v9818_v23 = vor.u32 %v13572_v11, %v9815_v12 }
 0x17e   :  { %3837 = vmatpush.bf16.msra.mxu2 %v9594_v60  ;;  %v10231_v19 = vld [vmem:[#allocation8 + $0x9a8] sm:$0xf0]  ;;  %3813 = vmatpush.bf16.msra.mxu0 %v9018_v10  ;;  %v3594_v5 = vpop.f32.mrf.mxu3 }
 0x17f   :  { %v13740_v20 = vld [vmem:[#allocation8 + $0xb8c] sm:$0xf]  ;;  %v10234_v34 = vor.u32 %v13676_v17, %v10231_v19  ;;  %v3607_v19 = vpop.f32.mrf.mxu0 }
 0x180   :  { %v10487_v21 = vld [vmem:[#allocation8 + $0xba8] sm:$0xf0]  ;;  %3850 = vmatpush.bf16.msra.mxu3 %v9850_v3  ;;  %3826 = vmatpush.bf16.msra.mxu1 %v9274_v15  ;;  %v3581_v63 = vpop.f32.mrf.mxu2 }
 0x181   :  { %v13500_v24 = vld [vmem:[#allocation8 + $0x40c] sm:$0xf]  ;;  %v10490_v38 = vor.u32 %v13740_v20, %v10487_v21  ;;  %3814 = vmatmul.bf16.vlgmr.msra.gmra.mxu0 %v14849_v1  ;;  %v3582_v4 = vadd.f32 %v3581_v63, %v3569_v22 }
 0x182   :  { %v9527_v25 = vld [vmem:[#allocation8 + $0x428] sm:$0xf0]  ;;  %3858 = vmatpush.bf16.msrb.mxu0 %v10266_v16  ;;  %3838 = vmatpush.bf16.msra.mxu2 %v9562_v51 }
 0x183   :  { %v13564_v27 = vld [vmem:[#allocation8 + $0x60c] sm:$0xf]  ;;  %v9530_v40 = vor.u32 %v13500_v24, %v9527_v25  ;;  %3827 = vmatmul.bf16.vlgmr.msra.gmra.mxu1 %v14852_v6  ;;  %v14902_v16 = vadd.f32 %v3594_v5, %v3582_v4  ;;  %v3620_v24 = vpop.f32.mrf.mxu1 }
 0x184   :  { %v9783_v29 = vld [vmem:[#allocation8 + $0x628] sm:$0xf0]  ;;  %3871 = vmatpush.bf16.msrb.mxu1 %v10522_v18  ;;  %3851 = vmatpush.bf16.msra.mxu3 %v9818_v23  ;;  %v3608_v23 = vadd.f32 %v3607_v19, %v919_v7  ;;  %v9245_v7 = vld [vmem:[#allocation8 + $0x1d0] sm:$0xf] }
 0x185   :  { %v13812_v31 = vld [vmem:[#allocation8 + $0xdcc] sm:$0xf]  ;;  %v9786_v45 = vor.u32 %v13564_v27, %v9783_v29 }
 0x186   :  { %v10775_v32 = vld [vmem:[#allocation8 + $0xde8] sm:$0xf0]  ;;  %3859 = vmatpush.bf16.msrb.mxu0 %v10234_v34  ;;  %3839 = vmatpush.bf16.msra.mxu2 %v9530_v40  ;;  %v3621_v33 = vadd.f32 %v3620_v24, %v3608_v23  ;;  %v3596_v44 = vpop.f32.mrf.mxu3  ;;  %v9213_v24 = vld [vmem:[#allocation8 + $0x190] sm:$0xf] }
 0x187   :  { %v13876_v35 = vld [vmem:[#allocation8 + $0xfcc] sm:$0xf]  ;;  %v10778_v47 = vor.u32 %v13812_v31, %v10775_v32  ;;  %v10013_v44 = vld [vmem:[#allocation8 + $0x7d0] sm:$0xf] }
 0x188   :  { %v11031_v37 = vld [vmem:[#allocation8 + $0xfe8] sm:$0xf0]  ;;  %3872 = vmatpush.bf16.msrb.mxu1 %v10490_v38  ;;  %3852 = vmatpush.bf16.msra.mxu3 %v9786_v45  ;;  %v3583_v38 = vpop.f32.mrf.mxu2 }
 0x189   :  { %v13668_v42 = vld [vmem:[#allocation8 + $0x94c] sm:$0xf]  ;;  %v11034_v52 = vor.u32 %v13876_v35, %v11031_v37  ;;  %3840 = vmatmul.bf16.vlgmr.msra.gmra.mxu2 %v14857_v30 }
 0x18a   :  { %v10199_v43 = vld [vmem:[#allocation8 + $0x968] sm:$0xf0]  ;;  %3884 = vmatpush.bf16.msrb.mxu2 %v10778_v47 }
 0x18b   :  { %v13732_v48 = vld [vmem:[#allocation8 + $0xb4c] sm:$0xf]  ;;  %v10202_v55 = vor.u32 %v13668_v42, %v10199_v43  ;;  %3853 = vmatmul.bf16.vlgmr.msra.gmra.mxu3 %v14859_v36 }
 0x18c   :  { %v10455_v49 = vld [vmem:[#allocation8 + $0xb68] sm:$0xf0]  ;;  %3897 = vmatpush.bf16.msrb.mxu3 %v11034_v52 }
 0x18d   :  { %v13804_v53 = vld [vmem:[#allocation8 + $0xd8c] sm:$0xf]  ;;  %v10458_v57 = vor.u32 %v13732_v48, %v10455_v49  ;;  %3860 = vmatpush.bf16.msrb.mxu0 %v10202_v55 }
 0x18e   :  { %v10743_v54 = vld [vmem:[#allocation8 + $0xda8] sm:$0xf0] }
 0x18f   :  { %v13868_v26 = vld [vmem:[#allocation8 + $0xf8c] sm:$0xf]  ;;  %v10746_v60 = vor.u32 %v13804_v53, %v10743_v54  ;;  %3873 = vmatpush.bf16.msrb.mxu1 %v10458_v57 }
 0x190   :  { %v10999_v56 = vld [vmem:[#allocation8 + $0xfa8] sm:$0xf0] }
 0x191   :  { %v13660_v58 = vld [vmem:[#allocation8 + $0x90c] sm:$0xf]  ;;  %v11002_v0 = vor.u32 %v13868_v26, %v10999_v56  ;;  %3885 = vmatpush.bf16.msrb.mxu2 %v10746_v60  ;;  %v3609_v26 = vpop.f32.mrf.mxu0 }
 0x192   :  { %v10167_v59 = vld [vmem:[#allocation8 + $0x928] sm:$0xf0] }
 0x193   :  { %v13724_v61 = vld [vmem:[#allocation8 + $0xb0c] sm:$0xf]  ;;  %v10170_v9 = vor.u32 %v13660_v58, %v10167_v59  ;;  %3898 = vmatpush.bf16.msrb.mxu3 %v11002_v0  ;;  %v3622_v59 = vpop.f32.mrf.mxu1 }
 0x194   :  { %v10423_v62 = vld [vmem:[#allocation8 + $0xb28] sm:$0xf0]  ;;  %v13553_v59 = vld [vmem:[#allocation8 + $0x5ac] sm:$0xf0] }
 0x195   :  { %v13796_v2 = vld [vmem:[#allocation8 + $0xd4c] sm:$0xf]  ;;  %v10426_v12 = vor.u32 %v13724_v61, %v10423_v62  ;;  %3861 = vmatpush.bf16.msrb.mxu0 %v10170_v9  ;;  %v13433_v9 = vld [vmem:[#allocation8 + $0x1ec] sm:$0xf0] }
 0x196   :  { %v10711_v3 = vld [vmem:[#allocation8 + $0xd68] sm:$0xf0]  ;;  %v9246_v23 = vor.u32 %v13433_v9, %v9245_v7  ;;  %v9693_v9 = vld [vmem:[#allocation8 + $0x550] sm:$0xf] }
 0x197   :  { %v13860_v10 = vld [vmem:[#allocation8 + $0xf4c] sm:$0xf]  ;;  %v10714_v17 = vor.u32 %v13796_v2, %v10711_v3  ;;  %3874 = vmatpush.bf16.msrb.mxu1 %v10426_v12  ;;  %v13497_v12 = vld [vmem:[#allocation8 + $0x3ec] sm:$0xf0] }
 0x198   :  { %v10967_v11 = vld [vmem:[#allocation8 + $0xf68] sm:$0xf0] }
 0x199   :  { %v13652_v13 = vld [vmem:[#allocation8 + $0x8cc] sm:$0xf]  ;;  %v10970_v20 = vor.u32 %v13860_v10, %v10967_v11  ;;  %3886 = vmatpush.bf16.msrb.mxu2 %v10714_v17  ;;  %v9501_v10 = vld [vmem:[#allocation8 + $0x3d0] sm:$0xf]  ;;  %v3633_v17 = vpop.f32.mrf.mxu2 }
 0x19a   :  { %v10135_v15 = vld [vmem:[#allocation8 + $0x8e8] sm:$0xf0] }
 0x19b   :  { %v13716_v18 = vld [vmem:[#allocation8 + $0xacc] sm:$0xf]  ;;  %v10138_v25 = vor.u32 %v13652_v13, %v10135_v15  ;;  %3899 = vmatpush.bf16.msrb.mxu3 %v10970_v20 }
 0x19c   :  { %v10391_v51 = vld [vmem:[#allocation8 + $0xae8] sm:$0xf0] }
 0x19d   :  { %v13788_v21 = vld [vmem:[#allocation8 + $0xd0c] sm:$0xf]  ;;  %v10394_v29 = vor.u32 %v13716_v18, %v10391_v51  ;;  %3862 = vmatpush.bf16.msrb.mxu0 %v10138_v25  ;;  %v3646_v18 = vpop.f32.mrf.mxu3  ;;  %v9502_v25 = vor.u32 %v13497_v12, %v9501_v10  ;;  %v13545_v10 = vld [vmem:[#allocation8 + $0x56c] sm:$0xf0] }
 0x19e   :  { %v10679_v22 = vld [vmem:[#allocation8 + $0xd28] sm:$0xf0]  ;;  %v9949_v12 = vld [vmem:[#allocation8 + $0x750] sm:$0xf] }
 0x19f   :  { %v13852_v27 = vld [vmem:[#allocation8 + $0xf0c] sm:$0xf]  ;;  %v10682_v34 = vor.u32 %v13788_v21, %v10679_v22  ;;  %3875 = vmatpush.bf16.msrb.mxu1 %v10394_v29  ;;  %v3634_v21 = vadd.f32 %v3633_v17, %v3621_v33  ;;  %v9469_v29 = vld [vmem:[#allocation8 + $0x390] sm:$0xf] }
 0x1a0   :  { %v10935_v28 = vld [vmem:[#allocation8 + $0xf28] sm:$0xf0]  ;;  %v9757_v33 = vld [vmem:[#allocation8 + $0x5d0] sm:$0xf] }
 0x1a1   :  { %v13644_v31 = vld [vmem:[#allocation8 + $0x88c] sm:$0xf]  ;;  %v10938_v40 = vor.u32 %v13852_v27, %v10935_v28  ;;  %3887 = vmatpush.bf16.msrb.mxu2 %v10682_v34  ;;  %v13425_v28 = vld [vmem:[#allocation8 + $0x1ac] sm:$0xf0]  ;;  %v3635_v26 = vpop.f32.mrf.mxu2 }
 0x1a2   :  { %v10103_v32 = vld [vmem:[#allocation8 + $0x8a8] sm:$0xf0]  ;;  %v9117_v17 = vld [vmem:[#allocation8 + $0xd0] sm:$0xf] }
 0x1a3   :  { %v13708_v35 = vld [vmem:[#allocation8 + $0xa8c] sm:$0xf]  ;;  %v10106_v45 = vor.u32 %v13644_v31, %v10103_v32  ;;  %3900 = vmatpush.bf16.msrb.mxu3 %v10938_v40  ;;  %v13489_v31 = vld [vmem:[#allocation8 + $0x3ac] sm:$0xf0]  ;;  %v14904_v32 = vadd.f32 %v3646_v18, %v3634_v21  ;;  %v3659_v21 = vpop.f32.mrf.mxu0 }
 0x1a4   :  { %v10359_v37 = vld [vmem:[#allocation8 + $0xaa8] sm:$0xf0]  ;;  %v13401_v18 = vld [vmem:[#allocation8 + $0xec] sm:$0xf0] }
 0x1a5   :  { %v13780_v42 = vld [vmem:[#allocation8 + $0xccc] sm:$0xf]  ;;  %v10362_v49 = vor.u32 %v13708_v35, %v10359_v37  ;;  %3863 = vmatpush.bf16.msrb.mxu0 %v10106_v45  ;;  %v13625_v45 = vld [vmem:[#allocation8 + $0x7ec] sm:$0xf0] }
 0x1a6   :  { %v10647_v43 = vld [vmem:[#allocation8 + $0xce8] sm:$0xf0] }
 0x1a7   :  { %v13844_v47 = vld [vmem:[#allocation8 + $0xecc] sm:$0xf]  ;;  %v10650_v53 = vor.u32 %v13780_v42, %v10647_v43  ;;  %3876 = vmatpush.bf16.msrb.mxu1 %v10362_v49  ;;  %v13561_v42 = vld [vmem:[#allocation8 + $0x5ec] sm:$0xf0]  ;;  %v9214_v43 = vor.u32 %v13425_v28, %v9213_v24  ;;  %v9118_v28 = vor.u32 %v13401_v18, %v9117_v17 }
 0x1a8   :  { %v10903_v48 = vld [vmem:[#allocation8 + $0xee8] sm:$0xf0]  ;;  %v9181_v49 = vld [vmem:[#allocation8 + $0x150] sm:$0xf] }
 0x1a9   :  { %v13636_v50 = vld [vmem:[#allocation8 + $0x84c] sm:$0xf]  ;;  %v10906_v56 = vor.u32 %v13844_v47, %v10903_v48  ;;  %3888 = vmatpush.bf16.msrb.mxu2 %v10650_v53  ;;  %v9470_v47 = vor.u32 %v13489_v31, %v9469_v29  ;;  %v9758_v53 = vor.u32 %v13561_v42, %v9757_v33  ;;  %v13537_v24 = vld [vmem:[#allocation8 + $0x52c] sm:$0xf0] }
 0x1aa   :  { %v10071_v52 = vld [vmem:[#allocation8 + $0x868] sm:$0xf0]  ;;  %v9917_v29 = vld [vmem:[#allocation8 + $0x710] sm:$0xf] }
 0x1ab   :  { %v13700_v54 = vld [vmem:[#allocation8 + $0xa4c] sm:$0xf]  ;;  %v10074_v60 = vor.u32 %v13636_v50, %v10071_v52  ;;  %3901 = vmatpush.bf16.msrb.mxu3 %v10906_v56  ;;  %v13417_v50 = vld [vmem:[#allocation8 + $0x16c] sm:$0xf0]  ;;  %v3648_v56 = vpop.f32.mrf.mxu3  ;;  %v3661_v26 = vpop.f32.mrf.mxu0 }
 0x1ac   :  { %v10327_v55 = vld [vmem:[#allocation8 + $0xa68] sm:$0xf0]  ;;  %v13601_v31 = vld [vmem:[#allocation8 + $0x72c] sm:$0xf0] }
 0x1ad   :  { %v13772_v57 = vld [vmem:[#allocation8 + $0xc8c] sm:$0xf]  ;;  %v10330_v0 = vor.u32 %v13700_v54, %v10327_v55  ;;  %3864 = vmatpush.bf16.msrb.mxu0 %v10074_v60  ;;  %v9437_v54 = vld [vmem:[#allocation8 + $0x350] sm:$0xf]  ;;  %v9182_v60 = vor.u32 %v13417_v50, %v9181_v49 }
 0x1ae   :  { %v10615_v58 = vld [vmem:[#allocation8 + $0xca8] sm:$0xf0]  ;;  %v13481_v55 = vld [vmem:[#allocation8 + $0x36c] sm:$0xf0] }
 0x1af   :  { %v13836_v61 = vld [vmem:[#allocation8 + $0xe8c] sm:$0xf]  ;;  %v10618_v5 = vor.u32 %v13772_v57, %v10615_v58  ;;  %3877 = vmatpush.bf16.msrb.mxu1 %v10330_v0  ;;  %v10014_v57 = vor.u32 %v13625_v45, %v10013_v44  ;;  %v9725_v58 = vld [vmem:[#allocation8 + $0x590] sm:$0xf] }
 0x1b0   :  { %v10871_v62 = vld [vmem:[#allocation8 + $0xea8] sm:$0xf0]  ;;  %v9149_v0 = vld [vmem:[#allocation8 + $0x110] sm:$0xf] }
 0x1b1   :  { %v13628_v63 = vld [vmem:[#allocation8 + $0x80c] sm:$0xf]  ;;  %v10874_v11 = vor.u32 %v13836_v61, %v10871_v62  ;;  %3889 = vmatpush.bf16.msrb.mxu2 %v10618_v5  ;;  %v9981_v61 = vld [vmem:[#allocation8 + $0x790] sm:$0xf] }
 0x1b2   :  { %v10039_v2 = vld [vmem:[#allocation8 + $0x828] sm:$0xf0]  ;;  %v13617_v62 = vld [vmem:[#allocation8 + $0x7ac] sm:$0xf0] }
 0x1b3   :  { %v13692_v3 = vld [vmem:[#allocation8 + $0xa0c] sm:$0xf]  ;;  %v10042_v51 = vor.u32 %v13628_v63, %v10039_v2  ;;  %3902 = vmatpush.bf16.msrb.mxu3 %v10874_v11  ;;  %v9438_v63 = vor.u32 %v13481_v55, %v9437_v54  ;;  %v13409_v2 = vld [vmem:[#allocation8 + $0x12c] sm:$0xf0]  ;;  %v9982_v7 = vor.u32 %v13617_v62, %v9981_v61 }
 0x1b4   :  { %v10295_v4 = vld [vmem:[#allocation8 + $0xa28] sm:$0xf0]  ;;  %v13473_v5 = vld [vmem:[#allocation8 + $0x32c] sm:$0xf0]  ;;  %v9150_v11 = vor.u32 %v13409_v2, %v9149_v0 }
 0x1b5   :  { %v13764_v13 = vld [vmem:[#allocation8 + $0xc4c] sm:$0xf]  ;;  %v10298_v22 = vor.u32 %v13692_v3, %v10295_v4  ;;  %3865 = vmatpush.bf16.msrb.mxu0 %v10042_v51  ;;  %v9726_v3 = vor.u32 %v13553_v59, %v9725_v58  ;;  %v9405_v4 = vld [vmem:[#allocation8 + $0x310] sm:$0xf]  ;;  %v9694_v51 = vor.u32 %v13545_v10, %v9693_v9 }
 0x1b6   :  { %v10583_v15 = vld [vmem:[#allocation8 + $0xc68] sm:$0xf0]  ;;  %v9341_v33 = vld [vmem:[#allocation8 + $0x290] sm:$0xf] }
 0x1b7   :  { %v13828_v19 = vld [vmem:[#allocation8 + $0xe4c] sm:$0xf]  ;;  %v10586_v27 = vor.u32 %v13764_v13, %v10583_v15  ;;  %3878 = vmatpush.bf16.msrb.mxu1 %v10298_v22  ;;  %v13609_v13 = vld [vmem:[#allocation8 + $0x76c] sm:$0xf0]  ;;  %v9406_v15 = vor.u32 %v13473_v5, %v9405_v4 }
 0x1b8   :  { %v10839_v20 = vld [vmem:[#allocation8 + $0xe68] sm:$0xf0]  ;;  %3866 = vmatmul.bf16.vlgmr.msrb.gmra.mxu0 %v14866_v8  ;;  %v9950_v22 = vor.u32 %v13609_v13, %v9949_v12  ;;  %v13457_v42 = vld [vmem:[#allocation8 + $0x2ac] sm:$0xf0] }
 0x1b9   :  { %v10842_v34 = vor.u32 %v13828_v19, %v10839_v20  ;;  %v13756_v35 = vld [vmem:[#allocation8 + $0xc0c] sm:$0xf]  ;;  %3910 = vmatpush.bf16.msra.mxu0 %v9246_v23  ;;  %3890 = vmatpush.bf16.msrb.mxu2 %v10586_v27  ;;  %v9373_v19 = vld [vmem:[#allocation8 + $0x2d0] sm:$0xf]  ;;  %v3672_v27 = vpop.f32.mrf.mxu1  ;;  %v9342_v49 = vor.u32 %v13457_v42, %v9341_v33 }
 0x1ba   :  { %v10551_v37 = vld [vmem:[#allocation8 + $0xc28] sm:$0xf0]  ;;  %3879 = vmatmul.bf16.vlgmr.msrb.gmra.mxu1 %v14868_v14  ;;  %v13465_v20 = vld [vmem:[#allocation8 + $0x2ec] sm:$0xf0] }
 0x1bb   :  { %v13820_v38 = vld [vmem:[#allocation8 + $0xe0c] sm:$0xf]  ;;  %3923 = vmatpush.bf16.msra.mxu1 %v9502_v25  ;;  %v10554_v48 = vor.u32 %v13756_v35, %v10551_v37  ;;  %3903 = vmatpush.bf16.msrb.mxu3 %v10842_v34  ;;  %v9661_v23 = vld [vmem:[#allocation8 + $0x510] sm:$0xf]  ;;  %v3660_v25 = vadd.f32 %v3659_v21, %v14904_v32  ;;  %v9374_v34 = vor.u32 %v13465_v20, %v9373_v19 }
 0x1bc   :  { %v10807_v40 = vld [vmem:[#allocation8 + $0xe28] sm:$0xf0]  ;;  %v9085_v35 = vld [vmem:[#allocation8 + $0x90] sm:$0xf] }
 0x1bd   :  { %v10810_v52 = vor.u32 %v13820_v38, %v10807_v40  ;;  %3911 = vmatpush.bf16.msra.mxu0 %v9214_v43  ;;  %3891 = vmatpush.bf16.msrb.mxu2 %v10554_v48  ;;  %v13393_v37 = vld [vmem:[#allocation8 + $0xac] sm:$0xf0]  ;;  %v3673_v38 = vadd.f32 %v3672_v27, %v3660_v25  ;;  %v9662_v40 = vor.u32 %v13537_v24, %v9661_v23 }
 0x1be   :  { %v9918_v43 = vor.u32 %v13601_v31, %v9917_v29  ;;  %v9629_v44 = vld [vmem:[#allocation8 + $0x4d0] sm:$0xf]  ;;  %v9086_v32 = vor.u32 %v13393_v37, %v9085_v35 }
 0x1bf   :  { %3924 = vmatpush.bf16.msra.mxu1 %v9470_v47  ;;  %3904 = vmatpush.bf16.msrb.mxu3 %v10810_v52  ;;  %v13529_v45 = vld [vmem:[#allocation8 + $0x4ec] sm:$0xf0] }
 0x1c0   :  { %3892 = vmatmul.bf16.vlgmr.msrb.gmra.mxu2 %v14872_v41  ;;  %v9885_v47 = vld [vmem:[#allocation8 + $0x6d0] sm:$0xf] }
 0x1c1   :  { %3936 = vmatpush.bf16.msra.mxu2 %v9758_v53  ;;  %3912 = vmatpush.bf16.msra.mxu0 %v9182_v60  ;;  %v13593_v48 = vld [vmem:[#allocation8 + $0x6ec] sm:$0xf0]  ;;  %v9630_v53 = vor.u32 %v13529_v45, %v9629_v44  ;;  %v3674_v59 = vpop.f32.mrf.mxu1 }
 0x1c2   :  { %3905 = vmatmul.bf16.vlgmr.msrb.gmra.mxu3 %v14874_v46  ;;  %v9053_v50 = vld [vmem:[#allocation8 + $0x50] sm:$0xf]  ;;  %v9886_v56 = vor.u32 %v13593_v48, %v9885_v47 }
 0x1c3   :  { %3949 = vmatpush.bf16.msra.mxu3 %v10014_v57  ;;  %3925 = vmatpush.bf16.msra.mxu1 %v9438_v63  ;;  %v13385_v52 = vld [vmem:[#allocation8 + $0x6c] sm:$0xf0] }
 0x1c4   :  { %v9309_v54 = vld [vmem:[#allocation8 + $0x250] sm:$0xf]  ;;  %v9054_v60 = vor.u32 %v13385_v52, %v9053_v50 }
 0x1c5   :  { %3937 = vmatpush.bf16.msra.mxu2 %v9726_v3  ;;  %3913 = vmatpush.bf16.msra.mxu0 %v9150_v11  ;;  %v13449_v55 = vld [vmem:[#allocation8 + $0x26c] sm:$0xf0]  ;;  %v3685_v11 = vpop.f32.mrf.mxu2 }
 0x1c6   :  { %v9597_v57 = vld [vmem:[#allocation8 + $0x490] sm:$0xf]  ;;  %v9310_v0 = vor.u32 %v13449_v55, %v9309_v54  ;;  %v3686_v18 = vadd.f32 %v3685_v11, %v3673_v38  ;;  %v920_v11 = vperm.slane %v14890_v39, 2 }
 0x1c7   :  { %3950 = vmatpush.bf16.msra.mxu3 %v9982_v7  ;;  %3926 = vmatpush.bf16.msra.mxu1 %v9406_v15  ;;  %v13521_v58 = vld [vmem:[#allocation8 + $0x4ac] sm:$0xf0] }
 0x1c8   :  { %v9853_v61 = vld [vmem:[#allocation8 + $0x690] sm:$0xf]  ;;  %v9598_v5 = vor.u32 %v13521_v58, %v9597_v57 }
 0x1c9   :  { %3938 = vmatpush.bf16.msra.mxu2 %v9694_v51  ;;  %3914 = vmatpush.bf16.msra.mxu0 %v9118_v28  ;;  %v13585_v62 = vld [vmem:[#allocation8 + $0x6ac] sm:$0xf0]  ;;  %v3698_v51 = vpop.f32.mrf.mxu3  ;;  %v3724_v39 = vpop.f32.mrf.mxu1 }
 0x1ca   :  { %v9021_v63 = vld [vmem:[#allocation8 + $0x10] sm:$0xf]  ;;  %v9854_v12 = vor.u32 %v13585_v62, %v9853_v61  ;;  %v14911_v25 = vadd.f32 %v3698_v51, %v3686_v18 }
 0x1cb   :  { %3951 = vmatpush.bf16.msra.mxu3 %v9950_v22  ;;  %3927 = vmatpush.bf16.msra.mxu1 %v9374_v34  ;;  %v13377_v2 = vld [vmem:[#allocation8 + $0x2c] sm:$0xf0] }
 0x1cc   :  { %v9277_v3 = vld [vmem:[#allocation8 + $0x210] sm:$0xf]  ;;  %v9022_v19 = vor.u32 %v13377_v2, %v9021_v63 }
 0x1cd   :  { %3939 = vmatpush.bf16.msra.mxu2 %v9662_v40  ;;  %3915 = vmatpush.bf16.msra.mxu0 %v9086_v32  ;;  %v13441_v4 = vld [vmem:[#allocation8 + $0x22c] sm:$0xf0]  ;;  %v3687_v52 = vpop.f32.mrf.mxu2 }
 0x1ce   :  { %v10269_v7 = vld [vmem:[#allocation8 + $0x9d0] sm:$0xf]  ;;  %v9278_v22 = vor.u32 %v13441_v4, %v9277_v3 }
 0x1cf   :  { %3952 = vmatpush.bf16.msra.mxu3 %v9918_v43  ;;  %3928 = vmatpush.bf16.msra.mxu1 %v9342_v49  ;;  %v13689_v9 = vld [vmem:[#allocation8 + $0x9ec] sm:$0xf0] }
 0x1d0   :  { %v10525_v10 = vld [vmem:[#allocation8 + $0xbd0] sm:$0xf]  ;;  %v10270_v23 = vor.u32 %v13689_v9, %v10269_v7 }
 0x1d1   :  { %3940 = vmatpush.bf16.msra.mxu2 %v9630_v53  ;;  %v13753_v13 = vld [vmem:[#allocation8 + $0xbec] sm:$0xf0]  ;;  %3916 = vmatpush.bf16.msra.mxu0 %v9054_v60 }
 0x1d2   :  { %v9565_v15 = vld [vmem:[#allocation8 + $0x450] sm:$0xf]  ;;  %v10526_v27 = vor.u32 %v13753_v13, %v10525_v10 }
 0x1d3   :  { %3953 = vmatpush.bf16.msra.mxu3 %v9886_v56  ;;  %v13513_v17 = vld [vmem:[#allocation8 + $0x46c] sm:$0xf0]  ;;  %3929 = vmatpush.bf16.msra.mxu1 %v9310_v0  ;;  %v3700_v56 = vpop.f32.mrf.mxu3 }
 0x1d4   :  { %v9821_v20 = vld [vmem:[#allocation8 + $0x650] sm:$0xf]  ;;  %v9566_v28 = vor.u32 %v13513_v17, %v9565_v15 }
 0x1d5   :  { %v13577_v21 = vld [vmem:[#allocation8 + $0x66c] sm:$0xf0]  ;;  %3941 = vmatpush.bf16.msra.mxu2 %v9598_v5  ;;  %3917 = vmatpush.bf16.msra.mxu0 %v9022_v19 }
 0x1d6   :  { %v10237_v24 = vld [vmem:[#allocation8 + $0x990] sm:$0xf]  ;;  %v9822_v35 = vor.u32 %v13577_v21, %v9821_v20 }
 0x1d7   :  { %v13681_v29 = vld [vmem:[#allocation8 + $0x9ac] sm:$0xf0]  ;;  %3954 = vmatpush.bf16.msra.mxu3 %v9854_v12  ;;  %3930 = vmatpush.bf16.msra.mxu1 %v9278_v22  ;;  %v3711_v22 = vpop.f32.mrf.mxu0 }
 0x1d8   :  { %v10493_v31 = vld [vmem:[#allocation8 + $0xb90] sm:$0xf]  ;;  %v10238_v44 = vor.u32 %v13681_v29, %v10237_v24  ;;  %3918 = vmatmul.bf16.vlgmr.msra.gmra.mxu0 %v14849_v1 }
 0x1d9   :  { %v13745_v34 = vld [vmem:[#allocation8 + $0xbac] sm:$0xf0]  ;;  %3962 = vmatpush.bf16.msrb.mxu0 %v10270_v23  ;;  %3942 = vmatpush.bf16.msra.mxu2 %v9566_v28  ;;  %v3712_v28 = vadd.f32 %v3711_v22, %v920_v11  ;;  %v13493_v11 = vld [vmem:[#allocation8 + $0x3d4] sm:$0xf] }
 0x1da   :  { %v9533_v37 = vld [vmem:[#allocation8 + $0x410] sm:$0xf]  ;;  %v10494_v47 = vor.u32 %v13745_v34, %v10493_v31  ;;  %3931 = vmatmul.bf16.vlgmr.msra.gmra.mxu1 %v14852_v6 }
 0x1db   :  { %v13505_v38 = vld [vmem:[#allocation8 + $0x42c] sm:$0xf0]  ;;  %3975 = vmatpush.bf16.msrb.mxu1 %v10526_v27  ;;  %3955 = vmatpush.bf16.msra.mxu3 %v9822_v35 }
 0x1dc   :  { %v9789_v40 = vld [vmem:[#allocation8 + $0x610] sm:$0xf]  ;;  %v9534_v48 = vor.u32 %v13505_v38, %v9533_v37 }
 0x1dd   :  { %v13569_v33 = vld [vmem:[#allocation8 + $0x62c] sm:$0xf0]  ;;  %3963 = vmatpush.bf16.msrb.mxu0 %v10238_v44 }
 0x1de   :  { %v10781_v42 = vld [vmem:[#allocation8 + $0xdd0] sm:$0xf]  ;;  %v9790_v53 = vor.u32 %v13569_v33, %v9789_v40  ;;  %3943 = vmatpush.bf16.msra.mxu2 %v9534_v48  ;;  %v3725_v40 = vadd.f32 %v3724_v39, %v3712_v28 }
 0x1df   :  { %v13817_v43 = vld [vmem:[#allocation8 + $0xdec] sm:$0xf0]  ;;  %3976 = vmatpush.bf16.msrb.mxu1 %v10494_v47  ;;  %v3713_v56 = vpop.f32.mrf.mxu0 }
 0x1e0   :  { %v11037_v45 = vld [vmem:[#allocation8 + $0xfd0] sm:$0xf]  ;;  %v10782_v54 = vor.u32 %v13817_v43, %v10781_v42  ;;  %3956 = vmatpush.bf16.msra.mxu3 %v9790_v53  ;;  %v9439_v56 = vld [vmem:[#allocation8 + $0x370] sm:$0xf0] }
 0x1e1   :  { %v13881_v32 = vld [vmem:[#allocation8 + $0xfec] sm:$0xf0]  ;;  %3944 = vmatmul.bf16.vlgmr.msra.gmra.mxu2 %v14857_v30 }
 0x1e2   :  { %v10205_v49 = vld [vmem:[#allocation8 + $0x950] sm:$0xf]  ;;  %v11038_v57 = vor.u32 %v13881_v32, %v11037_v45  ;;  %3988 = vmatpush.bf16.msrb.mxu2 %v10782_v54 }
 0x1e3   :  { %v13673_v50 = vld [vmem:[#allocation8 + $0x96c] sm:$0xf0]  ;;  %3957 = vmatmul.bf16.vlgmr.msra.gmra.mxu3 %v14859_v36 }
 0x1e4   :  { %v10461_v55 = vld [vmem:[#allocation8 + $0xb50] sm:$0xf]  ;;  %v10206_v60 = vor.u32 %v13673_v50, %v10205_v49  ;;  %4001 = vmatpush.bf16.msrb.mxu3 %v11038_v57 }
 0x1e5   :  { %v13737_v26 = vld [vmem:[#allocation8 + $0xb6c] sm:$0xf0] }
 0x1e6   :  { %v10749_v58 = vld [vmem:[#allocation8 + $0xd90] sm:$0xf]  ;;  %v10462_v63 = vor.u32 %v13737_v26, %v10461_v55  ;;  %3964 = vmatpush.bf16.msrb.mxu0 %v10206_v60  ;;  %v3726_v60 = vpop.f32.mrf.mxu1 }
 0x1e7   :  { %v13809_v59 = vld [vmem:[#allocation8 + $0xdac] sm:$0xf0]  ;;  %v9727_v60 = vld [vmem:[#allocation8 + $0x5b0] sm:$0xf0] }
 0x1e8   :  { %v11005_v61 = vld [vmem:[#allocation8 + $0xf90] sm:$0xf]  ;;  %v10750_v3 = vor.u32 %v13809_v59, %v10749_v58  ;;  %3977 = vmatpush.bf16.msrb.mxu1 %v10462_v63 }
 0x1e9   :  { %v13873_v62 = vld [vmem:[#allocation8 + $0xfac] sm:$0xf0] }
 0x1ea   :  { %v10173_v0 = vld [vmem:[#allocation8 + $0x910] sm:$0xf]  ;;  %v11006_v7 = vor.u32 %v13873_v62, %v11005_v61  ;;  %3989 = vmatpush.bf16.msrb.mxu2 %v10750_v3 }
 0x1eb   :  { %v13665_v2 = vld [vmem:[#allocation8 + $0x92c] sm:$0xf0] }
 0x1ec   :  { %v10429_v4 = vld [vmem:[#allocation8 + $0xb10] sm:$0xf]  ;;  %v10174_v12 = vor.u32 %v13665_v2, %v10173_v0  ;;  %4002 = vmatpush.bf16.msrb.mxu3 %v11006_v7 }
 0x1ed   :  { %v13729_v5 = vld [vmem:[#allocation8 + $0xb2c] sm:$0xf0] }
 0x1ee   :  { %v10717_v9 = vld [vmem:[#allocation8 + $0xd50] sm:$0xf]  ;;  %v10430_v17 = vor.u32 %v13729_v5, %v10429_v4  ;;  %3965 = vmatpush.bf16.msrb.mxu0 %v10174_v12  ;;  %v3737_v12 = vpop.f32.mrf.mxu2 }
 0x1ef   :  { %v13801_v10 = vld [vmem:[#allocation8 + $0xd6c] sm:$0xf0] }
 0x1f0   :  { %v10973_v13 = vld [vmem:[#allocation8 + $0xf50] sm:$0xf]  ;;  %v10718_v19 = vor.u32 %v13801_v10, %v10717_v9  ;;  %3978 = vmatpush.bf16.msrb.mxu1 %v10430_v17  ;;  %v13429_v9 = vld [vmem:[#allocation8 + $0x1d4] sm:$0xf] }
 0x1f1   :  { %v13865_v15 = vld [vmem:[#allocation8 + $0xf6c] sm:$0xf0]  ;;  %v9247_v10 = vld [vmem:[#allocation8 + $0x1f0] sm:$0xf0] }
 0x1f2   :  { %v10141_v18 = vld [vmem:[#allocation8 + $0x8d0] sm:$0xf]  ;;  %v10974_v23 = vor.u32 %v13865_v15, %v10973_v13  ;;  %3990 = vmatpush.bf16.msrb.mxu2 %v10718_v19  ;;  %v9503_v15 = vld [vmem:[#allocation8 + $0x3f0] sm:$0xf0]  ;;  %v3750_v19 = vpop.f32.mrf.mxu3 }
 0x1f3   :  { %v13657_v51 = vld [vmem:[#allocation8 + $0x8ec] sm:$0xf0]  ;;  %v9506_v39 = vor.u32 %v13493_v11, %v9503_v15  ;;  %v9695_v11 = vld [vmem:[#allocation8 + $0x570] sm:$0xf0] }
 0x1f4   :  { %v10397_v20 = vld [vmem:[#allocation8 + $0xad0] sm:$0xf]  ;;  %v10142_v29 = vor.u32 %v13657_v51, %v10141_v18  ;;  %4003 = vmatpush.bf16.msrb.mxu3 %v10974_v23  ;;  %v3738_v51 = vadd.f32 %v3737_v12, %v3725_v40  ;;  %v9951_v15 = vld [vmem:[#allocation8 + $0x770] sm:$0xf0] }
 0x1f5   :  { %v13721_v21 = vld [vmem:[#allocation8 + $0xaec] sm:$0xf0] }
 0x1f6   :  { %v10685_v24 = vld [vmem:[#allocation8 + $0xd10] sm:$0xf]  ;;  %v10398_v35 = vor.u32 %v13721_v21, %v10397_v20  ;;  %3966 = vmatpush.bf16.msrb.mxu0 %v10142_v29  ;;  %v14918_v28 = vadd.f32 %v3750_v19, %v3738_v51  ;;  %v9119_v51 = vld [vmem:[#allocation8 + $0xf0] sm:$0xf0] }
 0x1f7   :  { %v13793_v27 = vld [vmem:[#allocation8 + $0xd2c] sm:$0xf0] }
 0x1f8   :  { %v10941_v31 = vld [vmem:[#allocation8 + $0xf10] sm:$0xf]  ;;  %v10686_v33 = vor.u32 %v13793_v27, %v10685_v24  ;;  %3979 = vmatpush.bf16.msrb.mxu1 %v10398_v35  ;;  %v9250_v24 = vor.u32 %v13429_v9, %v9247_v10  ;;  %v13421_v27 = vld [vmem:[#allocation8 + $0x194] sm:$0xf] }
 0x1f9   :  { %v13857_v34 = vld [vmem:[#allocation8 + $0xf2c] sm:$0xf0]  ;;  %v9471_v35 = vld [vmem:[#allocation8 + $0x3b0] sm:$0xf0] }
 0x1fa   :  { %v10109_v37 = vld [vmem:[#allocation8 + $0x890] sm:$0xf]  ;;  %v10942_v44 = vor.u32 %v13857_v34, %v10941_v31  ;;  %3991 = vmatpush.bf16.msrb.mxu2 %v10686_v33  ;;  %v9215_v31 = vld [vmem:[#allocation8 + $0x1b0] sm:$0xf0] }
 0x1fb   :  { %v13649_v38 = vld [vmem:[#allocation8 + $0x8ac] sm:$0xf0]  ;;  %v13485_v34 = vld [vmem:[#allocation8 + $0x394] sm:$0xf] }
 0x1fc   :  { %v10365_v42 = vld [vmem:[#allocation8 + $0xa90] sm:$0xf]  ;;  %v10110_v47 = vor.u32 %v13649_v38, %v10109_v37  ;;  %4004 = vmatpush.bf16.msrb.mxu3 %v10942_v44  ;;  %v9759_v44 = vld [vmem:[#allocation8 + $0x5f0] sm:$0xf0] }
 0x1fd   :  { %v13713_v43 = vld [vmem:[#allocation8 + $0xaac] sm:$0xf0]  ;;  %v13541_v10 = vld [vmem:[#allocation8 + $0x554] sm:$0xf] }
 0x1fe   :  { %v10653_v45 = vld [vmem:[#allocation8 + $0xcd0] sm:$0xf]  ;;  %v10366_v50 = vor.u32 %v13713_v43, %v10365_v42  ;;  %3967 = vmatpush.bf16.msrb.mxu0 %v10110_v47  ;;  %v13557_v43 = vld [vmem:[#allocation8 + $0x5d4] sm:$0xf]  ;;  %v9698_v19 = vor.u32 %v13541_v10, %v9695_v11 }
 0x1ff   :  { %v13785_v32 = vld [vmem:[#allocation8 + $0xcec] sm:$0xf0]  ;;  %v10015_v47 = vld [vmem:[#allocation8 + $0x7f0] sm:$0xf0] }
 0x200   :  { %v10909_v48 = vld [vmem:[#allocation8 + $0xed0] sm:$0xf]  ;;  %v10654_v54 = vor.u32 %v13785_v32, %v10653_v45  ;;  %3980 = vmatpush.bf16.msrb.mxu1 %v10366_v50  ;;  %v9218_v45 = vor.u32 %v13421_v27, %v9215_v31  ;;  %v13621_v32 = vld [vmem:[#allocation8 + $0x7d4] sm:$0xf] }
 0x201   :  { %v13849_v49 = vld [vmem:[#allocation8 + $0xeec] sm:$0xf0]  ;;  %v13413_v50 = vld [vmem:[#allocation8 + $0x154] sm:$0xf] }
 0x202   :  { %v10077_v52 = vld [vmem:[#allocation8 + $0x850] sm:$0xf]  ;;  %v10910_v57 = vor.u32 %v13849_v49, %v10909_v48  ;;  %3992 = vmatpush.bf16.msrb.mxu2 %v10654_v54  ;;  %v9474_v48 = vor.u32 %v13485_v34, %v9471_v35  ;;  %v9663_v27 = vld [vmem:[#allocation8 + $0x530] sm:$0xf0] }
 0x203   :  { %v13641_v53 = vld [vmem:[#allocation8 + $0x86c] sm:$0xf0]  ;;  %v13597_v34 = vld [vmem:[#allocation8 + $0x714] sm:$0xf] }
 0x204   :  { %v10333_v55 = vld [vmem:[#allocation8 + $0xa50] sm:$0xf]  ;;  %v10078_v61 = vor.u32 %v13641_v53, %v10077_v52  ;;  %4005 = vmatpush.bf16.msrb.mxu3 %v10910_v57  ;;  %v9183_v52 = vld [vmem:[#allocation8 + $0x170] sm:$0xf0]  ;;  %v3739_v53 = vpop.f32.mrf.mxu2  ;;  %v3752_v57 = vpop.f32.mrf.mxu3 }
 0x205   :  { %v13705_v26 = vld [vmem:[#allocation8 + $0xa6c] sm:$0xf0]  ;;  %v9919_v35 = vld [vmem:[#allocation8 + $0x730] sm:$0xf0] }
 0x206   :  { %v10621_v58 = vld [vmem:[#allocation8 + $0xc90] sm:$0xf]  ;;  %v10334_v2 = vor.u32 %v13705_v26, %v10333_v55  ;;  %3968 = vmatpush.bf16.msrb.mxu0 %v10078_v61  ;;  %v9762_v55 = vor.u32 %v13557_v43, %v9759_v44  ;;  %v13477_v26 = vld [vmem:[#allocation8 + $0x354] sm:$0xf]  ;;  %v9186_v61 = vor.u32 %v13413_v50, %v9183_v52 }
 0x207   :  { %v13777_v59 = vld [vmem:[#allocation8 + $0xcac] sm:$0xf0]  ;;  %v13453_v43 = vld [vmem:[#allocation8 + $0x294] sm:$0xf] }
 0x208   :  { %v10877_v62 = vld [vmem:[#allocation8 + $0xe90] sm:$0xf]  ;;  %v10622_v7 = vor.u32 %v13777_v59, %v10621_v58  ;;  %3981 = vmatpush.bf16.msrb.mxu1 %v10334_v2  ;;  %v10018_v58 = vor.u32 %v13621_v32, %v10015_v47  ;;  %v13549_v59 = vld [vmem:[#allocation8 + $0x594] sm:$0xf] }
 0x209   :  { %v13841_v63 = vld [vmem:[#allocation8 + $0xeac] sm:$0xf0]  ;;  %v13405_v2 = vld [vmem:[#allocation8 + $0x114] sm:$0xf] }
 0x20a   :  { %v10045_v0 = vld [vmem:[#allocation8 + $0x810] sm:$0xf]  ;;  %v10878_v13 = vor.u32 %v13841_v63, %v10877_v62  ;;  %3993 = vmatpush.bf16.msrb.mxu2 %v10622_v7  ;;  %v13613_v62 = vld [vmem:[#allocation8 + $0x794] sm:$0xf] }
 0x20b   :  { %v13633_v3 = vld [vmem:[#allocation8 + $0x82c] sm:$0xf0]  ;;  %v9983_v63 = vld [vmem:[#allocation8 + $0x7b0] sm:$0xf0] }
 0x20c   :  { %v10301_v4 = vld [vmem:[#allocation8 + $0xa10] sm:$0xf]  ;;  %v10046_v20 = vor.u32 %v13633_v3, %v10045_v0  ;;  %4006 = vmatpush.bf16.msrb.mxu3 %v10878_v13  ;;  %v9442_v0 = vor.u32 %v13477_v26, %v9439_v56  ;;  %v9151_v3 = vld [vmem:[#allocation8 + $0x130] sm:$0xf0]  ;;  %v9986_v9 = vor.u32 %v13613_v62, %v9983_v63 }
 0x20d   :  { %v13697_v5 = vld [vmem:[#allocation8 + $0xa2c] sm:$0xf0]  ;;  %v9407_v7 = vld [vmem:[#allocation8 + $0x330] sm:$0xf0]  ;;  %v9154_v12 = vor.u32 %v13405_v2, %v9151_v3 }
 0x20e   :  { %v10589_v17 = vld [vmem:[#allocation8 + $0xc50] sm:$0xf]  ;;  %v10302_v23 = vor.u32 %v13697_v5, %v10301_v4  ;;  %3969 = vmatpush.bf16.msrb.mxu0 %v10046_v20  ;;  %v9730_v4 = vor.u32 %v13549_v59, %v9727_v60  ;;  %v13469_v5 = vld [vmem:[#allocation8 + $0x314] sm:$0xf] }
 0x20f   :  { %v13769_v18 = vld [vmem:[#allocation8 + $0xc6c] sm:$0xf0]  ;;  %v13605_v13 = vld [vmem:[#allocation8 + $0x754] sm:$0xf] }
 0x210   :  { %v10845_v21 = vld [vmem:[#allocation8 + $0xe50] sm:$0xf]  ;;  %v10590_v29 = vor.u32 %v13769_v18, %v10589_v17  ;;  %3982 = vmatpush.bf16.msrb.mxu1 %v10302_v23  ;;  %v9410_v17 = vor.u32 %v13469_v5, %v9407_v7  ;;  %v13397_v18 = vld [vmem:[#allocation8 + $0xd4] sm:$0xf]  ;;  %v9954_v23 = vor.u32 %v13605_v13, %v9951_v15 }
 0x211   :  { %v13833_v22 = vld [vmem:[#allocation8 + $0xe6c] sm:$0xf0]  ;;  %3970 = vmatmul.bf16.vlgmr.msrb.gmra.mxu0 %v14866_v8  ;;  %v13461_v20 = vld [vmem:[#allocation8 + $0x2d4] sm:$0xf]  ;;  %v9122_v31 = vor.u32 %v13397_v18, %v9119_v51 }
 0x212   :  { %v10846_v37 = vor.u32 %v13833_v22, %v10845_v21  ;;  %v10557_v38 = vld [vmem:[#allocation8 + $0xc10] sm:$0xf]  ;;  %4014 = vmatpush.bf16.msra.mxu0 %v9250_v24  ;;  %3994 = vmatpush.bf16.msrb.mxu2 %v10590_v29  ;;  %v9375_v21 = vld [vmem:[#allocation8 + $0x2f0] sm:$0xf0]  ;;  %v3763_v22 = vpop.f32.mrf.mxu0  ;;  %v3776_v29 = vpop.f32.mrf.mxu1 }
 0x213   :  { %v13761_v40 = vld [vmem:[#allocation8 + $0xc2c] sm:$0xf0]  ;;  %3983 = vmatmul.bf16.vlgmr.msrb.gmra.mxu1 %v14868_v14  ;;  %v13533_v24 = vld [vmem:[#allocation8 + $0x514] sm:$0xf] }
 0x214   :  { %v10813_v33 = vld [vmem:[#allocation8 + $0xe10] sm:$0xf]  ;;  %4027 = vmatpush.bf16.msra.mxu1 %v9506_v39  ;;  %v10558_v49 = vor.u32 %v13761_v40, %v10557_v38  ;;  %4007 = vmatpush.bf16.msrb.mxu3 %v10846_v37  ;;  %v3764_v39 = vadd.f32 %v3763_v22, %v14918_v28  ;;  %v9378_v37 = vor.u32 %v13461_v20, %v9375_v21  ;;  %v13389_v38 = vld [vmem:[#allocation8 + $0x94] sm:$0xf] }
 0x215   :  { %v13825_v42 = vld [vmem:[#allocation8 + $0xe2c] sm:$0xf0]  ;;  %v9087_v40 = vld [vmem:[#allocation8 + $0xb0] sm:$0xf0] }
 0x216   :  { %v10814_v54 = vor.u32 %v13825_v42, %v10813_v33  ;;  %4015 = vmatpush.bf16.msra.mxu0 %v9218_v45  ;;  %3995 = vmatpush.bf16.msrb.mxu2 %v10558_v49  ;;  %v3777_v33 = vadd.f32 %v3776_v29, %v3764_v39  ;;  %v9666_v42 = vor.u32 %v13533_v24, %v9663_v27  ;;  %v9343_v44 = vld [vmem:[#allocation8 + $0x2b0] sm:$0xf0] }
 0x217   :  { %v9922_v45 = vor.u32 %v13597_v34, %v9919_v35  ;;  %v13525_v32 = vld [vmem:[#allocation8 + $0x4d4] sm:$0xf]  ;;  %v9090_v28 = vor.u32 %v13389_v38, %v9087_v40  ;;  %v9346_v50 = vor.u32 %v13453_v43, %v9343_v44 }
 0x218   :  { %4028 = vmatpush.bf16.msra.mxu1 %v9474_v48  ;;  %4008 = vmatpush.bf16.msrb.mxu3 %v10814_v54  ;;  %v9631_v47 = vld [vmem:[#allocation8 + $0x4f0] sm:$0xf0] }
 0x219   :  { %3996 = vmatmul.bf16.vlgmr.msrb.gmra.mxu2 %v14872_v41  ;;  %v13589_v48 = vld [vmem:[#allocation8 + $0x6d4] sm:$0xf]  ;;  %v9634_v54 = vor.u32 %v13525_v32, %v9631_v47 }
 0x21a   :  { %4040 = vmatpush.bf16.msra.mxu2 %v9762_v55  ;;  %4016 = vmatpush.bf16.msra.mxu0 %v9186_v61  ;;  %v9887_v49 = vld [vmem:[#allocation8 + $0x6f0] sm:$0xf0]  ;;  %v3765_v56 = vpop.f32.mrf.mxu0  ;;  %v3778_v60 = vpop.f32.mrf.mxu1 }
 0x21b   :  { %4009 = vmatmul.bf16.vlgmr.msrb.gmra.mxu3 %v14874_v46  ;;  %v13381_v52 = vld [vmem:[#allocation8 + $0x54] sm:$0xf]  ;;  %v9890_v57 = vor.u32 %v13589_v48, %v9887_v49 }
 0x21c   :  { %4053 = vmatpush.bf16.msra.mxu3 %v10018_v58  ;;  %4029 = vmatpush.bf16.msra.mxu1 %v9442_v0  ;;  %v9055_v53 = vld [vmem:[#allocation8 + $0x70] sm:$0xf0] }
 0x21d   :  { %v13445_v55 = vld [vmem:[#allocation8 + $0x254] sm:$0xf]  ;;  %v9058_v61 = vor.u32 %v13381_v52, %v9055_v53 }
 0x21e   :  { %4041 = vmatpush.bf16.msra.mxu2 %v9730_v4  ;;  %4017 = vmatpush.bf16.msra.mxu0 %v9154_v12  ;;  %v9311_v26 = vld [vmem:[#allocation8 + $0x270] sm:$0xf0]  ;;  %v3789_v12 = vpop.f32.mrf.mxu2 }
 0x21f   :  { %v13517_v58 = vld [vmem:[#allocation8 + $0x494] sm:$0xf]  ;;  %v9314_v2 = vor.u32 %v13445_v55, %v9311_v26  ;;  %v3790_v51 = vadd.f32 %v3789_v12, %v3777_v33  ;;  %v14930_v12 = vld [vmem:[#allocation10] sm:$0xff] }
 0x220   :  { %4054 = vmatpush.bf16.msra.mxu3 %v9986_v9  ;;  %4030 = vmatpush.bf16.msra.mxu1 %v9410_v17  ;;  %v9599_v59 = vld [vmem:[#allocation8 + $0x4b0] sm:$0xf0] }
 0x221   :  { %v13581_v62 = vld [vmem:[#allocation8 + $0x694] sm:$0xf]  ;;  %v9602_v7 = vor.u32 %v13517_v58, %v9599_v59 }
 0x222   :  { %4042 = vmatpush.bf16.msra.mxu2 %v9698_v19  ;;  %4018 = vmatpush.bf16.msra.mxu0 %v9122_v31  ;;  %v9855_v63 = vld [vmem:[#allocation8 + $0x6b0] sm:$0xf0]  ;;  %v3802_v19 = vpop.f32.mrf.mxu3 }
 0x223   :  { %v13373_v0 = vld [vmem:[#allocation8 + $0x14] sm:$0xf]  ;;  %v9858_v13 = vor.u32 %v13581_v62, %v9855_v63  ;;  %v14925_v39 = vadd.f32 %v3802_v19, %v3790_v51 }
 0x224   :  { %4055 = vmatpush.bf16.msra.mxu3 %v9954_v23  ;;  %4031 = vmatpush.bf16.msra.mxu1 %v9378_v37  ;;  %v9023_v3 = vld [vmem:[#allocation8 + $0x30] sm:$0xf0] }
 0x225   :  { %v13437_v4 = vld [vmem:[#allocation8 + $0x214] sm:$0xf]  ;;  %v9026_v20 = vor.u32 %v13373_v0, %v9023_v3 }
 0x226   :  { %4043 = vmatpush.bf16.msra.mxu2 %v9666_v42  ;;  %4019 = vmatpush.bf16.msra.mxu0 %v9090_v28  ;;  %v9279_v5 = vld [vmem:[#allocation8 + $0x230] sm:$0xf0]  ;;  %v3791_v53 = vpop.f32.mrf.mxu2 }
 0x227   :  { %v13685_v9 = vld [vmem:[#allocation8 + $0x9d4] sm:$0xf]  ;;  %v9282_v23 = vor.u32 %v13437_v4, %v9279_v5 }
 0x228   :  { %4056 = vmatpush.bf16.msra.mxu3 %v9922_v45  ;;  %4032 = vmatpush.bf16.msra.mxu1 %v9346_v50  ;;  %v10271_v10 = vld [vmem:[#allocation8 + $0x9f0] sm:$0xf0] }
 0x229   :  { %v13749_v11 = vld [vmem:[#allocation8 + $0xbd4] sm:$0xf]  ;;  %v10274_v24 = vor.u32 %v13685_v9, %v10271_v10 }
 0x22a   :  { %4044 = vmatpush.bf16.msra.mxu2 %v9634_v54  ;;  %v10527_v15 = vld [vmem:[#allocation8 + $0xbf0] sm:$0xf0]  ;;  %4020 = vmatpush.bf16.msra.mxu0 %v9058_v61 }
 0x22b   :  { %v13509_v17 = vld [vmem:[#allocation8 + $0x454] sm:$0xf]  ;;  %v10530_v29 = vor.u32 %v13749_v11, %v10527_v15 }
 0x22c   :  { %4057 = vmatpush.bf16.msra.mxu3 %v9890_v57  ;;  %v9567_v18 = vld [vmem:[#allocation8 + $0x470] sm:$0xf0]  ;;  %4033 = vmatpush.bf16.msra.mxu1 %v9314_v2  ;;  %v3804_v57 = vpop.f32.mrf.mxu3 }
 0x22d   :  { %v13573_v21 = vld [vmem:[#allocation8 + $0x654] sm:$0xf]  ;;  %v9570_v31 = vor.u32 %v13509_v17, %v9567_v18 }
 0x22e   :  { %v9823_v22 = vld [vmem:[#allocation8 + $0x670] sm:$0xf0]  ;;  %4045 = vmatpush.bf16.msra.mxu2 %v9602_v7  ;;  %4021 = vmatpush.bf16.msra.mxu0 %v9026_v20 }
 0x22f   :  { %v13677_v27 = vld [vmem:[#allocation8 + $0x994] sm:$0xf]  ;;  %v9826_v38 = vor.u32 %v13573_v21, %v9823_v22 }
 0x230   :  { %v10239_v34 = vld [vmem:[#allocation8 + $0x9b0] sm:$0xf0]  ;;  %4058 = vmatpush.bf16.msra.mxu3 %v9858_v13  ;;  %4034 = vmatpush.bf16.msra.mxu1 %v9282_v23  ;;  %v921_v13 = vperm.slane %v14930_v12, 3 }
 0x231   :  { %v13741_v35 = vld [vmem:[#allocation8 + $0xb94] sm:$0xf]  ;;  %v10242_v32 = vor.u32 %v13677_v27, %v10239_v34  ;;  %4022 = vmatmul.bf16.vlgmr.msra.gmra.mxu0 %v14849_v1 }
 0x232   :  { %v10495_v37 = vld [vmem:[#allocation8 + $0xbb0] sm:$0xf0]  ;;  %4066 = vmatpush.bf16.msrb.mxu0 %v10274_v24  ;;  %4046 = vmatpush.bf16.msra.mxu2 %v9570_v31  ;;  %v3815_v24 = vpop.f32.mrf.mxu0 }
 0x233   :  { %v13501_v40 = vld [vmem:[#allocation8 + $0x414] sm:$0xf]  ;;  %v10498_v48 = vor.u32 %v13741_v35, %v10495_v37  ;;  %4035 = vmatmul.bf16.vlgmr.msra.gmra.mxu1 %v14852_v6  ;;  %v3816_v34 = vadd.f32 %v3815_v24, %v921_v13  ;;  %v3828_v35 = vpop.f32.mrf.mxu1  ;;  %v9253_v13 = vld [vmem:[#allocation8 + $0x1d8] sm:$0xf] }
 0x234   :  { %v9535_v33 = vld [vmem:[#allocation8 + $0x430] sm:$0xf0]  ;;  %4079 = vmatpush.bf16.msrb.mxu1 %v10530_v29  ;;  %4059 = vmatpush.bf16.msra.mxu3 %v9826_v38 }
 0x235   :  { %v13565_v42 = vld [vmem:[#allocation8 + $0x614] sm:$0xf]  ;;  %v9538_v49 = vor.u32 %v13501_v40, %v9535_v33 }
 0x236   :  { %v9791_v43 = vld [vmem:[#allocation8 + $0x630] sm:$0xf0]  ;;  %4067 = vmatpush.bf16.msrb.mxu0 %v10242_v32 }
 0x237   :  { %v13813_v44 = vld [vmem:[#allocation8 + $0xdd4] sm:$0xf]  ;;  %v9794_v54 = vor.u32 %v13565_v42, %v9791_v43  ;;  %4047 = vmatpush.bf16.msra.mxu2 %v9538_v49 }
 0x238   :  { %v10783_v45 = vld [vmem:[#allocation8 + $0xdf0] sm:$0xf0]  ;;  %4080 = vmatpush.bf16.msrb.mxu1 %v10498_v48 }
 0x239   :  { %v13877_v47 = vld [vmem:[#allocation8 + $0xfd4] sm:$0xf]  ;;  %v10786_v55 = vor.u32 %v13813_v44, %v10783_v45  ;;  %4060 = vmatpush.bf16.msra.mxu3 %v9794_v54  ;;  %v3829_v44 = vadd.f32 %v3828_v35, %v3816_v34  ;;  %v9221_v35 = vld [vmem:[#allocation8 + $0x198] sm:$0xf] }
 0x23a   :  { %v11039_v28 = vld [vmem:[#allocation8 + $0xff0] sm:$0xf0]  ;;  %4048 = vmatmul.bf16.vlgmr.msra.gmra.mxu2 %v14857_v30 }
 0x23b   :  { %v13669_v50 = vld [vmem:[#allocation8 + $0x954] sm:$0xf]  ;;  %v11042_v58 = vor.u32 %v13877_v47, %v11039_v28  ;;  %4092 = vmatpush.bf16.msrb.mxu2 %v10786_v55 }
 0x23c   :  { %v10207_v52 = vld [vmem:[#allocation8 + $0x970] sm:$0xf0]  ;;  %4061 = vmatmul.bf16.vlgmr.msra.gmra.mxu3 %v14859_v36 }
 0x23d   :  { %v13733_v26 = vld [vmem:[#allocation8 + $0xb54] sm:$0xf]  ;;  %v10210_v61 = vor.u32 %v13669_v50, %v10207_v52  ;;  %4105 = vmatpush.bf16.msrb.mxu3 %v11042_v58 }
 0x23e   :  { %v10463_v56 = vld [vmem:[#allocation8 + $0xb70] sm:$0xf0] }
 0x23f   :  { %v13805_v59 = vld [vmem:[#allocation8 + $0xd94] sm:$0xf]  ;;  %v10466_v0 = vor.u32 %v13733_v26, %v10463_v56  ;;  %4068 = vmatpush.bf16.msrb.mxu0 %v10210_v61 }
 0x240   :  { %v10751_v60 = vld [vmem:[#allocation8 + $0xdb0] sm:$0xf0] }
 0x241   :  { %v13869_v62 = vld [vmem:[#allocation8 + $0xf94] sm:$0xf]  ;;  %v10754_v4 = vor.u32 %v13805_v59, %v10751_v60  ;;  %4081 = vmatpush.bf16.msrb.mxu1 %v10466_v0  ;;  %v3817_v59 = vpop.f32.mrf.mxu0 }
 0x242   :  { %v11007_v63 = vld [vmem:[#allocation8 + $0xfb0] sm:$0xf0] }
 0x243   :  { %v13661_v2 = vld [vmem:[#allocation8 + $0x914] sm:$0xf]  ;;  %v11010_v9 = vor.u32 %v13869_v62, %v11007_v63  ;;  %4093 = vmatpush.bf16.msrb.mxu2 %v10754_v4  ;;  %v3830_v63 = vpop.f32.mrf.mxu1 }
 0x244   :  { %v10175_v3 = vld [vmem:[#allocation8 + $0x930] sm:$0xf0] }
 0x245   :  { %v13725_v5 = vld [vmem:[#allocation8 + $0xb14] sm:$0xf]  ;;  %v10178_v15 = vor.u32 %v13661_v2, %v10175_v3  ;;  %4106 = vmatpush.bf16.msrb.mxu3 %v11010_v9 }
 0x246   :  { %v10431_v7 = vld [vmem:[#allocation8 + $0xb30] sm:$0xf0] }
 0x247   :  { %v13797_v10 = vld [vmem:[#allocation8 + $0xd54] sm:$0xf]  ;;  %v10434_v51 = vor.u32 %v13725_v5, %v10431_v7  ;;  %4069 = vmatpush.bf16.msrb.mxu0 %v10178_v15  ;;  %v13434_v15 = vld [vmem:[#allocation8 + $0x1f4] sm:$0xf0] }
 0x248   :  { %v10719_v11 = vld [vmem:[#allocation8 + $0xd70] sm:$0xf0]  ;;  %v9254_v34 = vor.u32 %v13434_v15, %v9253_v13  ;;  %v9413_v13 = vld [vmem:[#allocation8 + $0x318] sm:$0xf] }
 0x249   :  { %v13861_v17 = vld [vmem:[#allocation8 + $0xf54] sm:$0xf]  ;;  %v10722_v21 = vor.u32 %v13797_v10, %v10719_v11  ;;  %4082 = vmatpush.bf16.msrb.mxu1 %v10434_v51  ;;  %v13474_v15 = vld [vmem:[#allocation8 + $0x334] sm:$0xf0] }
 0x24a   :  { %v10975_v18 = vld [vmem:[#allocation8 + $0xf70] sm:$0xf0] }
 0x24b   :  { %v13653_v19 = vld [vmem:[#allocation8 + $0x8d4] sm:$0xf]  ;;  %v10978_v27 = vor.u32 %v13861_v17, %v10975_v18  ;;  %4094 = vmatpush.bf16.msrb.mxu2 %v10722_v21  ;;  %v9509_v17 = vld [vmem:[#allocation8 + $0x3d8] sm:$0xf]  ;;  %v3841_v18 = vpop.f32.mrf.mxu2 }
 0x24c   :  { %v10143_v20 = vld [vmem:[#allocation8 + $0x8f0] sm:$0xf0] }
 0x24d   :  { %v13717_v22 = vld [vmem:[#allocation8 + $0xad4] sm:$0xf]  ;;  %v10146_v37 = vor.u32 %v13653_v19, %v10143_v20  ;;  %4107 = vmatpush.bf16.msrb.mxu3 %v10978_v27  ;;  %v13498_v19 = vld [vmem:[#allocation8 + $0x3f4] sm:$0xf0] }
 0x24e   :  { %v10399_v23 = vld [vmem:[#allocation8 + $0xaf0] sm:$0xf0] }
 0x24f   :  { %v13789_v29 = vld [vmem:[#allocation8 + $0xd14] sm:$0xf]  ;;  %v10402_v33 = vor.u32 %v13717_v22, %v10399_v23  ;;  %4070 = vmatpush.bf16.msrb.mxu0 %v10146_v37  ;;  %v3842_v22 = vadd.f32 %v3841_v18, %v3829_v44  ;;  %v3854_v23 = vpop.f32.mrf.mxu3  ;;  %v9701_v18 = vld [vmem:[#allocation8 + $0x558] sm:$0xf] }
 0x250   :  { %v10687_v31 = vld [vmem:[#allocation8 + $0xd30] sm:$0xf0] }
 0x251   :  { %v13853_v38 = vld [vmem:[#allocation8 + $0xf14] sm:$0xf]  ;;  %v10690_v45 = vor.u32 %v13789_v29, %v10687_v31  ;;  %4083 = vmatpush.bf16.msrb.mxu1 %v10402_v33  ;;  %v14934_v37 = vadd.f32 %v3854_v23, %v3842_v22  ;;  %v13426_v33 = vld [vmem:[#allocation8 + $0x1b4] sm:$0xf0]  ;;  %v9414_v22 = vor.u32 %v13474_v15, %v9413_v13 }
 0x252   :  { %v10943_v40 = vld [vmem:[#allocation8 + $0xf30] sm:$0xf0]  ;;  %v9125_v23 = vld [vmem:[#allocation8 + $0xd8] sm:$0xf] }
 0x253   :  { %v13645_v42 = vld [vmem:[#allocation8 + $0x894] sm:$0xf]  ;;  %v10946_v28 = vor.u32 %v13853_v38, %v10943_v40  ;;  %4095 = vmatpush.bf16.msrb.mxu2 %v10690_v45  ;;  %v9510_v38 = vor.u32 %v13498_v19, %v9509_v17  ;;  %v13378_v13 = vld [vmem:[#allocation8 + $0x34] sm:$0xf0] }
 0x254   :  { %v10111_v43 = vld [vmem:[#allocation8 + $0x8b0] sm:$0xf0]  ;;  %v9285_v15 = vld [vmem:[#allocation8 + $0x218] sm:$0xf] }
 0x255   :  { %v13709_v32 = vld [vmem:[#allocation8 + $0xa94] sm:$0xf]  ;;  %v10114_v50 = vor.u32 %v13645_v42, %v10111_v43  ;;  %4108 = vmatpush.bf16.msrb.mxu3 %v10946_v28  ;;  %v9477_v42 = vld [vmem:[#allocation8 + $0x398] sm:$0xf] }
 0x256   :  { %v10367_v47 = vld [vmem:[#allocation8 + $0xab0] sm:$0xf0]  ;;  %v13490_v43 = vld [vmem:[#allocation8 + $0x3b4] sm:$0xf0] }
 0x257   :  { %v13781_v48 = vld [vmem:[#allocation8 + $0xcd4] sm:$0xf]  ;;  %v10370_v54 = vor.u32 %v13709_v32, %v10367_v47  ;;  %4071 = vmatpush.bf16.msrb.mxu0 %v10114_v50  ;;  %v9222_v50 = vor.u32 %v13426_v33, %v9221_v35 }
 0x258   :  { %v10655_v49 = vld [vmem:[#allocation8 + $0xcf0] sm:$0xf0] }
 0x259   :  { %v13845_v52 = vld [vmem:[#allocation8 + $0xed4] sm:$0xf]  ;;  %v10658_v56 = vor.u32 %v13781_v48, %v10655_v49  ;;  %4084 = vmatpush.bf16.msrb.mxu1 %v10370_v54  ;;  %v9765_v48 = vld [vmem:[#allocation8 + $0x5d8] sm:$0xf]  ;;  %v9478_v54 = vor.u32 %v13490_v43, %v9477_v42  ;;  %v3880_v42 = vpop.f32.mrf.mxu1 }
 0x25a   :  { %v10911_v53 = vld [vmem:[#allocation8 + $0xef0] sm:$0xf0]  ;;  %v13562_v49 = vld [vmem:[#allocation8 + $0x5f4] sm:$0xf0] }
 0x25b   :  { %v13637_v55 = vld [vmem:[#allocation8 + $0x854] sm:$0xf]  ;;  %v10914_v60 = vor.u32 %v13845_v52, %v10911_v53  ;;  %4096 = vmatpush.bf16.msrb.mxu2 %v10658_v56  ;;  %v10021_v52 = vld [vmem:[#allocation8 + $0x7d8] sm:$0xf]  ;;  %v9766_v59 = vor.u32 %v13562_v49, %v9765_v48 }
 0x25c   :  { %v10079_v26 = vld [vmem:[#allocation8 + $0x870] sm:$0xf0]  ;;  %v13626_v53 = vld [vmem:[#allocation8 + $0x7f4] sm:$0xf0] }
 0x25d   :  { %v13701_v57 = vld [vmem:[#allocation8 + $0xa54] sm:$0xf]  ;;  %v10082_v0 = vor.u32 %v13637_v55, %v10079_v26  ;;  %4109 = vmatpush.bf16.msrb.mxu3 %v10914_v60  ;;  %v9189_v26 = vld [vmem:[#allocation8 + $0x158] sm:$0xf]  ;;  %v10022_v63 = vor.u32 %v13626_v53, %v10021_v52 }
 0x25e   :  { %v10335_v58 = vld [vmem:[#allocation8 + $0xa70] sm:$0xf0]  ;;  %v13418_v56 = vld [vmem:[#allocation8 + $0x174] sm:$0xf0] }
 0x25f   :  { %v13773_v61 = vld [vmem:[#allocation8 + $0xc94] sm:$0xf]  ;;  %v10338_v5 = vor.u32 %v13701_v57, %v10335_v58  ;;  %4072 = vmatpush.bf16.msrb.mxu0 %v10082_v0  ;;  %v3843_v57 = vpop.f32.mrf.mxu2  ;;  %v9445_v60 = vld [vmem:[#allocation8 + $0x358] sm:$0xf] }
 0x260   :  { %v10623_v62 = vld [vmem:[#allocation8 + $0xcb0] sm:$0xf0]  ;;  %v9733_v0 = vld [vmem:[#allocation8 + $0x598] sm:$0xf] }
 0x261   :  { %v13837_v2 = vld [vmem:[#allocation8 + $0xe94] sm:$0xf]  ;;  %v10626_v11 = vor.u32 %v13773_v61, %v10623_v62  ;;  %4085 = vmatpush.bf16.msrb.mxu1 %v10338_v5  ;;  %v13482_v61 = vld [vmem:[#allocation8 + $0x374] sm:$0xf0]  ;;  %v3856_v62 = vpop.f32.mrf.mxu3 }
 0x262   :  { %v10879_v3 = vld [vmem:[#allocation8 + $0xeb0] sm:$0xf0]  ;;  %v13618_v5 = vld [vmem:[#allocation8 + $0x7b4] sm:$0xf0] }
 0x263   :  { %v13629_v4 = vld [vmem:[#allocation8 + $0x814] sm:$0xf]  ;;  %v10882_v51 = vor.u32 %v13837_v2, %v10879_v3  ;;  %4097 = vmatpush.bf16.msrb.mxu2 %v10626_v11  ;;  %v13554_v2 = vld [vmem:[#allocation8 + $0x5b4] sm:$0xf0]  ;;  %v9190_v3 = vor.u32 %v13418_v56, %v9189_v26 }
 0x264   :  { %v10047_v7 = vld [vmem:[#allocation8 + $0x830] sm:$0xf0]  ;;  %v9734_v11 = vor.u32 %v13554_v2, %v9733_v0  ;;  %v13458_v52 = vld [vmem:[#allocation8 + $0x2b4] sm:$0xf0] }
 0x265   :  { %v13693_v9 = vld [vmem:[#allocation8 + $0xa14] sm:$0xf]  ;;  %v10050_v24 = vor.u32 %v13629_v4, %v10047_v7  ;;  %4110 = vmatpush.bf16.msrb.mxu3 %v10882_v51  ;;  %v9989_v4 = vld [vmem:[#allocation8 + $0x798] sm:$0xf]  ;;  %v9446_v7 = vor.u32 %v13482_v61, %v9445_v60 }
 0x266   :  { %v10303_v10 = vld [vmem:[#allocation8 + $0xa30] sm:$0xf0]  ;;  %v9990_v17 = vor.u32 %v13618_v5, %v9989_v4  ;;  %v13546_v51 = vld [vmem:[#allocation8 + $0x574] sm:$0xf0]  ;;  %v3882_v4 = vpop.f32.mrf.mxu1 }
 0x267   :  { %v13765_v20 = vld [vmem:[#allocation8 + $0xc54] sm:$0xf]  ;;  %v10306_v31 = vor.u32 %v13693_v9, %v10303_v10  ;;  %4073 = vmatpush.bf16.msrb.mxu0 %v10050_v24  ;;  %v9157_v9 = vld [vmem:[#allocation8 + $0x118] sm:$0xf] }
 0x268   :  { %v10591_v21 = vld [vmem:[#allocation8 + $0xc70] sm:$0xf0]  ;;  %v13410_v10 = vld [vmem:[#allocation8 + $0x134] sm:$0xf0] }
 0x269   :  { %v13829_v27 = vld [vmem:[#allocation8 + $0xe54] sm:$0xf]  ;;  %v10594_v40 = vor.u32 %v13765_v20, %v10591_v21  ;;  %4086 = vmatpush.bf16.msrb.mxu1 %v10306_v31  ;;  %v9158_v19 = vor.u32 %v13410_v10, %v9157_v9  ;;  %v9957_v20 = vld [vmem:[#allocation8 + $0x758] sm:$0xf] }
 0x26a   :  { %v10847_v29 = vld [vmem:[#allocation8 + $0xe70] sm:$0xf0]  ;;  %4074 = vmatmul.bf16.vlgmr.msrb.gmra.mxu0 %v14866_v8  ;;  %v13610_v21 = vld [vmem:[#allocation8 + $0x774] sm:$0xf0] }
 0x26b   :  { %v10850_v45 = vor.u32 %v13829_v27, %v10847_v29  ;;  %v13757_v44 = vld [vmem:[#allocation8 + $0xc14] sm:$0xf]  ;;  %4118 = vmatpush.bf16.msra.mxu0 %v9254_v34  ;;  %4098 = vmatpush.bf16.msrb.mxu2 %v10594_v40  ;;  %v13402_v24 = vld [vmem:[#allocation8 + $0xf4] sm:$0xf0]  ;;  %v9702_v27 = vor.u32 %v13546_v51, %v9701_v18  ;;  %v3867_v34 = vpop.f32.mrf.mxu0  ;;  %v9958_v35 = vor.u32 %v13610_v21, %v9957_v20  ;;  %v3893_v21 = vpop.f32.mrf.mxu2 }
 0x26c   :  { %v10559_v32 = vld [vmem:[#allocation8 + $0xc30] sm:$0xf0]  ;;  %4087 = vmatmul.bf16.vlgmr.msrb.gmra.mxu1 %v14868_v14  ;;  %v9381_v29 = vld [vmem:[#allocation8 + $0x2d8] sm:$0xf]  ;;  %v3868_v33 = vadd.f32 %v3867_v34, %v14934_v37  ;;  %v9126_v43 = vor.u32 %v13402_v24, %v9125_v23 }
 0x26d   :  { %v13821_v47 = vld [vmem:[#allocation8 + $0xe14] sm:$0xf]  ;;  %4131 = vmatpush.bf16.msra.mxu1 %v9510_v38  ;;  %v10562_v55 = vor.u32 %v13757_v44, %v10559_v32  ;;  %4111 = vmatpush.bf16.msrb.mxu3 %v10850_v45  ;;  %v13466_v31 = vld [vmem:[#allocation8 + $0x2f4] sm:$0xf0] }
 0x26e   :  { %v10815_v28 = vld [vmem:[#allocation8 + $0xe30] sm:$0xf0]  ;;  %v9669_v38 = vld [vmem:[#allocation8 + $0x518] sm:$0xf]  ;;  %v9382_v32 = vor.u32 %v13466_v31, %v9381_v29  ;;  %v3881_v48 = vadd.f32 %v3880_v42, %v3868_v33  ;;  %v3906_v31 = vpop.f32.mrf.mxu3 }
 0x26f   :  { %v10818_v58 = vor.u32 %v13821_v47, %v10815_v28  ;;  %4119 = vmatpush.bf16.msra.mxu0 %v9222_v50  ;;  %4099 = vmatpush.bf16.msrb.mxu2 %v10562_v55  ;;  %v13538_v40 = vld [vmem:[#allocation8 + $0x534] sm:$0xf0] }
 0x270   :  { %v9925_v45 = vld [vmem:[#allocation8 + $0x718] sm:$0xf]  ;;  %v9670_v49 = vor.u32 %v13538_v40, %v9669_v38  ;;  %v3894_v29 = vadd.f32 %v3893_v21, %v3881_v48 }
 0x271   :  { %4132 = vmatpush.bf16.msra.mxu1 %v9478_v54  ;;  %4112 = vmatpush.bf16.msrb.mxu3 %v10818_v58  ;;  %v13602_v44 = vld [vmem:[#allocation8 + $0x734] sm:$0xf0] }
 0x272   :  { %4100 = vmatmul.bf16.vlgmr.msrb.gmra.mxu2 %v14872_v41  ;;  %v9093_v47 = vld [vmem:[#allocation8 + $0x98] sm:$0xf]  ;;  %v9926_v53 = vor.u32 %v13602_v44, %v9925_v45 }
 0x273   :  { %4144 = vmatpush.bf16.msra.mxu2 %v9766_v59  ;;  %4120 = vmatpush.bf16.msra.mxu0 %v9190_v3  ;;  %v13394_v28 = vld [vmem:[#allocation8 + $0xb4] sm:$0xf0] }
 0x274   :  { %4113 = vmatmul.bf16.vlgmr.msrb.gmra.mxu3 %v14874_v46  ;;  %v9349_v50 = vld [vmem:[#allocation8 + $0x298] sm:$0xf]  ;;  %v9094_v37 = vor.u32 %v13394_v28, %v9093_v47 }
 0x275   :  { %4157 = vmatpush.bf16.msra.mxu3 %v10022_v63  ;;  %4133 = vmatpush.bf16.msra.mxu1 %v9446_v7  ;;  %v9637_v54 = vld [vmem:[#allocation8 + $0x4d8] sm:$0xf]  ;;  %v9350_v57 = vor.u32 %v13458_v52, %v9349_v50  ;;  %v3869_v63 = vpop.f32.mrf.mxu0 }
 0x276   :  { %v13530_v55 = vld [vmem:[#allocation8 + $0x4f4] sm:$0xf0] }
 0x277   :  { %4145 = vmatpush.bf16.msra.mxu2 %v9734_v11  ;;  %4121 = vmatpush.bf16.msra.mxu0 %v9158_v19  ;;  %v9893_v26 = vld [vmem:[#allocation8 + $0x6d8] sm:$0xf]  ;;  %v9638_v60 = vor.u32 %v13530_v55, %v9637_v54 }
 0x278   :  { %v13594_v56 = vld [vmem:[#allocation8 + $0x6f4] sm:$0xf0] }
 0x279   :  { %4158 = vmatpush.bf16.msra.mxu3 %v9990_v17  ;;  %4134 = vmatpush.bf16.msra.mxu1 %v9414_v22  ;;  %v9061_v58 = vld [vmem:[#allocation8 + $0x58] sm:$0xf]  ;;  %v9894_v0 = vor.u32 %v13594_v56, %v9893_v26 }
 0x27a   :  { %v13386_v59 = vld [vmem:[#allocation8 + $0x74] sm:$0xf0] }
 0x27b   :  { %4146 = vmatpush.bf16.msra.mxu2 %v9702_v27  ;;  %4122 = vmatpush.bf16.msra.mxu0 %v9126_v43  ;;  %v9317_v61 = vld [vmem:[#allocation8 + $0x258] sm:$0xf]  ;;  %v9062_v5 = vor.u32 %v13386_v59, %v9061_v58  ;;  %v14941_v43 = vadd.f32 %v3906_v31, %v3894_v29 }
 0x27c   :  { %v13450_v62 = vld [vmem:[#allocation8 + $0x274] sm:$0xf0] }
 0x27d   :  { %4159 = vmatpush.bf16.msra.mxu3 %v9958_v35  ;;  %4135 = vmatpush.bf16.msra.mxu1 %v9382_v32  ;;  %v9605_v2 = vld [vmem:[#allocation8 + $0x498] sm:$0xf]  ;;  %v9318_v11 = vor.u32 %v13450_v62, %v9317_v61  ;;  %v3895_v61 = vpop.f32.mrf.mxu2 }
 0x27e   :  { %v13522_v3 = vld [vmem:[#allocation8 + $0x4b4] sm:$0xf0] }
 0x27f   :  { %4147 = vmatpush.bf16.msra.mxu2 %v9670_v49  ;;  %4123 = vmatpush.bf16.msra.mxu0 %v9094_v37  ;;  %v9861_v7 = vld [vmem:[#allocation8 + $0x698] sm:$0xf]  ;;  %v9606_v18 = vor.u32 %v13522_v3, %v9605_v2  ;;  %v3908_v3 = vpop.f32.mrf.mxu3 }
 0x280   :  { %v13586_v9 = vld [vmem:[#allocation8 + $0x6b4] sm:$0xf0] }
 0x281   :  { %4160 = vmatpush.bf16.msra.mxu3 %v9926_v53  ;;  %v9029_v10 = vld [vmem:[#allocation8 + $0x18] sm:$0xf]  ;;  %4136 = vmatpush.bf16.msra.mxu1 %v9350_v57  ;;  %v9862_v22 = vor.u32 %v13586_v9, %v9861_v7 }
 0x282   :  { %v13442_v17 = vld [vmem:[#allocation8 + $0x234] sm:$0xf0]  ;;  %v9030_v34 = vor.u32 %v13378_v13, %v9029_v10 }
 0x283   :  { %4148 = vmatpush.bf16.msra.mxu2 %v9638_v60  ;;  %v10277_v51 = vld [vmem:[#allocation8 + $0x9d8] sm:$0xf]  ;;  %4124 = vmatpush.bf16.msra.mxu0 %v9062_v5  ;;  %v9286_v40 = vor.u32 %v13442_v17, %v9285_v15 }
 0x284   :  { %v13690_v19 = vld [vmem:[#allocation8 + $0x9f4] sm:$0xf0] }
 0x285   :  { %v10533_v20 = vld [vmem:[#allocation8 + $0xbd8] sm:$0xf]  ;;  %4161 = vmatpush.bf16.msra.mxu3 %v9894_v0  ;;  %4137 = vmatpush.bf16.msra.mxu1 %v9318_v11  ;;  %v10278_v33 = vor.u32 %v13690_v19, %v10277_v51 }
 0x286   :  { %v13754_v23 = vld [vmem:[#allocation8 + $0xbf4] sm:$0xf0] }
 0x287   :  { %v9573_v24 = vld [vmem:[#allocation8 + $0x458] sm:$0xf]  ;;  %4149 = vmatpush.bf16.msra.mxu2 %v9606_v18  ;;  %v10534_v45 = vor.u32 %v13754_v23, %v10533_v20  ;;  %4125 = vmatpush.bf16.msra.mxu0 %v9030_v34  ;;  %v922_v23 = vperm.slane %v14930_v12, 4  ;;  %v3932_v12 = vpop.f32.mrf.mxu1 }
 0x288   :  { %v13514_v27 = vld [vmem:[#allocation8 + $0x474] sm:$0xf0] }
 0x289   :  { %v9829_v35 = vld [vmem:[#allocation8 + $0x658] sm:$0xf]  ;;  %v9574_v44 = vor.u32 %v13514_v27, %v9573_v24  ;;  %4162 = vmatpush.bf16.msra.mxu3 %v9862_v22  ;;  %4138 = vmatpush.bf16.msra.mxu1 %v9286_v40 }
 0x28a   :  { %v13578_v38 = vld [vmem:[#allocation8 + $0x674] sm:$0xf0]  ;;  %4126 = vmatmul.bf16.vlgmr.msra.gmra.mxu0 %v14849_v1 }
 0x28b   :  { %v10245_v42 = vld [vmem:[#allocation8 + $0x998] sm:$0xf]  ;;  %v9830_v49 = vor.u32 %v13578_v38, %v9829_v35  ;;  %4170 = vmatpush.bf16.msrb.mxu0 %v10278_v33  ;;  %4150 = vmatpush.bf16.msra.mxu2 %v9574_v44 }
 0x28c   :  { %v13682_v32 = vld [vmem:[#allocation8 + $0x9b4] sm:$0xf0]  ;;  %4139 = vmatmul.bf16.vlgmr.msra.gmra.mxu1 %v14852_v6 }
 0x28d   :  { %v10501_v47 = vld [vmem:[#allocation8 + $0xb98] sm:$0xf]  ;;  %v10246_v37 = vor.u32 %v13682_v32, %v10245_v42  ;;  %4183 = vmatpush.bf16.msrb.mxu1 %v10534_v45  ;;  %4163 = vmatpush.bf16.msra.mxu3 %v9830_v49  ;;  %v3919_v42 = vpop.f32.mrf.mxu0 }
 0x28e   :  { %v13746_v28 = vld [vmem:[#allocation8 + $0xbb4] sm:$0xf0] }
 0x28f   :  { %v9541_v48 = vld [vmem:[#allocation8 + $0x418] sm:$0xf]  ;;  %v10502_v57 = vor.u32 %v13746_v28, %v10501_v47  ;;  %4171 = vmatpush.bf16.msrb.mxu0 %v10246_v37  ;;  %v3920_v47 = vadd.f32 %v3919_v42, %v922_v23  ;;  %v13430_v23 = vld [vmem:[#allocation8 + $0x1dc] sm:$0xf] }
 0x290   :  { %v13506_v50 = vld [vmem:[#allocation8 + $0x434] sm:$0xf0] }
 0x291   :  { %v9797_v52 = vld [vmem:[#allocation8 + $0x618] sm:$0xf]  ;;  %v9542_v58 = vor.u32 %v13506_v50, %v9541_v48  ;;  %4184 = vmatpush.bf16.msrb.mxu1 %v10502_v57 }
 0x292   :  { %v13570_v53 = vld [vmem:[#allocation8 + $0x634] sm:$0xf0] }
 0x293   :  { %v10789_v54 = vld [vmem:[#allocation8 + $0xdd8] sm:$0xf]  ;;  %v9798_v62 = vor.u32 %v13570_v53, %v9797_v52  ;;  %4151 = vmatpush.bf16.msra.mxu2 %v9542_v58 }
 0x294   :  { %v13818_v55 = vld [vmem:[#allocation8 + $0xdf4] sm:$0xf0] }
 0x295   :  { %v11045_v26 = vld [vmem:[#allocation8 + $0xfd8] sm:$0xf]  ;;  %v10790_v63 = vor.u32 %v13818_v55, %v10789_v54  ;;  %4164 = vmatpush.bf16.msra.mxu3 %v9798_v62  ;;  %v3933_v54 = vadd.f32 %v3932_v12, %v3920_v47  ;;  %v13422_v12 = vld [vmem:[#allocation8 + $0x19c] sm:$0xf] }
 0x296   :  { %v13882_v56 = vld [vmem:[#allocation8 + $0xff4] sm:$0xf0]  ;;  %4152 = vmatmul.bf16.vlgmr.msra.gmra.mxu2 %v14857_v30 }
 0x297   :  { %v10213_v59 = vld [vmem:[#allocation8 + $0x958] sm:$0xf]  ;;  %v11046_v4 = vor.u32 %v13882_v56, %v11045_v26  ;;  %4196 = vmatpush.bf16.msrb.mxu2 %v10790_v63 }
 0x298   :  { %v13674_v60 = vld [vmem:[#allocation8 + $0x974] sm:$0xf0]  ;;  %4165 = vmatmul.bf16.vlgmr.msra.gmra.mxu3 %v14859_v36 }
 0x299   :  { %v10469_v0 = vld [vmem:[#allocation8 + $0xb58] sm:$0xf]  ;;  %v10214_v9 = vor.u32 %v13674_v60, %v10213_v59  ;;  %4209 = vmatpush.bf16.msrb.mxu3 %v11046_v4 }
 0x29a   :  { %v13738_v2 = vld [vmem:[#allocation8 + $0xb74] sm:$0xf0] }
 0x29b   :  { %v10757_v5 = vld [vmem:[#allocation8 + $0xd98] sm:$0xf]  ;;  %v10470_v13 = vor.u32 %v13738_v2, %v10469_v0  ;;  %4172 = vmatpush.bf16.msrb.mxu0 %v10214_v9 }
 0x29c   :  { %v13810_v7 = vld [vmem:[#allocation8 + $0xdb4] sm:$0xf0] }
 0x29d   :  { %v11013_v10 = vld [vmem:[#allocation8 + $0xf98] sm:$0xf]  ;;  %v10758_v18 = vor.u32 %v13810_v7, %v10757_v5  ;;  %4185 = vmatpush.bf16.msrb.mxu1 %v10470_v13  ;;  %v3921_v5 = vpop.f32.mrf.mxu0 }
 0x29e   :  { %v13874_v11 = vld [vmem:[#allocation8 + $0xfb4] sm:$0xf0] }
 0x29f   :  { %v10181_v15 = vld [vmem:[#allocation8 + $0x918] sm:$0xf]  ;;  %v11014_v20 = vor.u32 %v13874_v11, %v11013_v10  ;;  %4197 = vmatpush.bf16.msrb.mxu2 %v10758_v18  ;;  %v3934_v11 = vpop.f32.mrf.mxu1 }
 0x2a0   :  { %v13666_v17 = vld [vmem:[#allocation8 + $0x934] sm:$0xf0] }
 0x2a1   :  { %v10437_v51 = vld [vmem:[#allocation8 + $0xb18] sm:$0xf]  ;;  %v10182_v24 = vor.u32 %v13666_v17, %v10181_v15  ;;  %4210 = vmatpush.bf16.msrb.mxu3 %v11014_v20 }
 0x2a2   :  { %v13730_v19 = vld [vmem:[#allocation8 + $0xb34] sm:$0xf0] }
 0x2a3   :  { %v10725_v21 = vld [vmem:[#allocation8 + $0xd58] sm:$0xf]  ;;  %v10438_v31 = vor.u32 %v13730_v19, %v10437_v51  ;;  %4173 = vmatpush.bf16.msrb.mxu0 %v10182_v24  ;;  %v9255_v24 = vld [vmem:[#allocation8 + $0x1f8] sm:$0xf0] }
 0x2a4   :  { %v13802_v22 = vld [vmem:[#allocation8 + $0xd74] sm:$0xf0]  ;;  %v9258_v47 = vor.u32 %v13430_v23, %v9255_v24  ;;  %v13470_v23 = vld [vmem:[#allocation8 + $0x31c] sm:$0xf] }
 0x2a5   :  { %v10981_v27 = vld [vmem:[#allocation8 + $0xf58] sm:$0xf]  ;;  %v10726_v38 = vor.u32 %v13802_v22, %v10725_v21  ;;  %4186 = vmatpush.bf16.msrb.mxu1 %v10438_v31  ;;  %v9415_v24 = vld [vmem:[#allocation8 + $0x338] sm:$0xf0] }
 0x2a6   :  { %v13866_v29 = vld [vmem:[#allocation8 + $0xf74] sm:$0xf0] }
 0x2a7   :  { %v10149_v34 = vld [vmem:[#allocation8 + $0x8d8] sm:$0xf]  ;;  %v10982_v45 = vor.u32 %v13866_v29, %v10981_v27  ;;  %4198 = vmatpush.bf16.msrb.mxu2 %v10726_v38  ;;  %v13494_v27 = vld [vmem:[#allocation8 + $0x3dc] sm:$0xf]  ;;  %v3945_v29 = vpop.f32.mrf.mxu2 }
 0x2a8   :  { %v13658_v35 = vld [vmem:[#allocation8 + $0x8f4] sm:$0xf0] }
 0x2a9   :  { %v10405_v40 = vld [vmem:[#allocation8 + $0xad8] sm:$0xf]  ;;  %v10150_v28 = vor.u32 %v13658_v35, %v10149_v34  ;;  %4211 = vmatpush.bf16.msrb.mxu3 %v10982_v45  ;;  %v9511_v34 = vld [vmem:[#allocation8 + $0x3f8] sm:$0xf0] }
 0x2aa   :  { %v13722_v33 = vld [vmem:[#allocation8 + $0xaf4] sm:$0xf0] }
 0x2ab   :  { %v10693_v44 = vld [vmem:[#allocation8 + $0xd18] sm:$0xf]  ;;  %v10406_v50 = vor.u32 %v13722_v33, %v10405_v40  ;;  %4174 = vmatpush.bf16.msrb.mxu0 %v10150_v28  ;;  %v3946_v40 = vadd.f32 %v3945_v29, %v3933_v54  ;;  %v3958_v33 = vpop.f32.mrf.mxu3  ;;  %v13542_v29 = vld [vmem:[#allocation8 + $0x55c] sm:$0xf] }
 0x2ac   :  { %v13794_v32 = vld [vmem:[#allocation8 + $0xd34] sm:$0xf0] }
 0x2ad   :  { %v10949_v49 = vld [vmem:[#allocation8 + $0xf18] sm:$0xf]  ;;  %v10694_v55 = vor.u32 %v13794_v32, %v10693_v44  ;;  %4187 = vmatpush.bf16.msrb.mxu1 %v10406_v50  ;;  %v14948_v28 = vadd.f32 %v3958_v33, %v3946_v40  ;;  %v9223_v50 = vld [vmem:[#allocation8 + $0x1b8] sm:$0xf0]  ;;  %v9418_v40 = vor.u32 %v13470_v23, %v9415_v24 }
 0x2ae   :  { %v13858_v48 = vld [vmem:[#allocation8 + $0xf34] sm:$0xf0]  ;;  %v13398_v33 = vld [vmem:[#allocation8 + $0xdc] sm:$0xf] }
 0x2af   :  { %v10117_v52 = vld [vmem:[#allocation8 + $0x898] sm:$0xf]  ;;  %v10950_v56 = vor.u32 %v13858_v48, %v10949_v49  ;;  %4199 = vmatpush.bf16.msrb.mxu2 %v10694_v55  ;;  %v9514_v49 = vor.u32 %v13494_v27, %v9511_v34  ;;  %v9031_v23 = vld [vmem:[#allocation8 + $0x38] sm:$0xf0] }
 0x2b0   :  { %v13650_v53 = vld [vmem:[#allocation8 + $0x8b4] sm:$0xf0]  ;;  %v13438_v24 = vld [vmem:[#allocation8 + $0x21c] sm:$0xf] }
 0x2b1   :  { %v10373_v37 = vld [vmem:[#allocation8 + $0xa98] sm:$0xf]  ;;  %v10118_v59 = vor.u32 %v13650_v53, %v10117_v52  ;;  %4212 = vmatpush.bf16.msrb.mxu3 %v10950_v56  ;;  %v13486_v52 = vld [vmem:[#allocation8 + $0x39c] sm:$0xf] }
 0x2b2   :  { %v13714_v26 = vld [vmem:[#allocation8 + $0xab4] sm:$0xf0]  ;;  %v9479_v53 = vld [vmem:[#allocation8 + $0x3b8] sm:$0xf0] }
 0x2b3   :  { %v10661_v57 = vld [vmem:[#allocation8 + $0xcd8] sm:$0xf]  ;;  %v10374_v62 = vor.u32 %v13714_v26, %v10373_v37  ;;  %4175 = vmatpush.bf16.msrb.mxu0 %v10118_v59  ;;  %v9226_v59 = vor.u32 %v13422_v12, %v9223_v50 }
 0x2b4   :  { %v13786_v58 = vld [vmem:[#allocation8 + $0xcf4] sm:$0xf0] }
 0x2b5   :  { %v10917_v60 = vld [vmem:[#allocation8 + $0xed8] sm:$0xf]  ;;  %v10662_v2 = vor.u32 %v13786_v58, %v10661_v57  ;;  %4188 = vmatpush.bf16.msrb.mxu1 %v10374_v62  ;;  %v13558_v57 = vld [vmem:[#allocation8 + $0x5dc] sm:$0xf]  ;;  %v9482_v62 = vor.u32 %v13486_v52, %v9479_v53  ;;  %v3984_v52 = vpop.f32.mrf.mxu1 }
 0x2b6   :  { %v13850_v61 = vld [vmem:[#allocation8 + $0xef4] sm:$0xf0]  ;;  %v9767_v58 = vld [vmem:[#allocation8 + $0x5f8] sm:$0xf0] }
 0x2b7   :  { %v10085_v63 = vld [vmem:[#allocation8 + $0x858] sm:$0xf]  ;;  %v10918_v7 = vor.u32 %v13850_v61, %v10917_v60  ;;  %4200 = vmatpush.bf16.msrb.mxu2 %v10662_v2  ;;  %v13622_v60 = vld [vmem:[#allocation8 + $0x7dc] sm:$0xf]  ;;  %v9770_v5 = vor.u32 %v13558_v57, %v9767_v58 }
 0x2b8   :  { %v13642_v0 = vld [vmem:[#allocation8 + $0x874] sm:$0xf0]  ;;  %v10023_v61 = vld [vmem:[#allocation8 + $0x7f8] sm:$0xf0] }
 0x2b9   :  { %v10341_v3 = vld [vmem:[#allocation8 + $0xa58] sm:$0xf]  ;;  %v10086_v13 = vor.u32 %v13642_v0, %v10085_v63  ;;  %4213 = vmatpush.bf16.msrb.mxu3 %v10918_v7  ;;  %v13414_v0 = vld [vmem:[#allocation8 + $0x15c] sm:$0xf]  ;;  %v10026_v11 = vor.u32 %v13622_v60, %v10023_v61 }
 0x2ba   :  { %v13706_v4 = vld [vmem:[#allocation8 + $0xa74] sm:$0xf0]  ;;  %v9191_v2 = vld [vmem:[#allocation8 + $0x178] sm:$0xf0] }
 0x2bb   :  { %v10629_v9 = vld [vmem:[#allocation8 + $0xc98] sm:$0xf]  ;;  %v10342_v51 = vor.u32 %v13706_v4, %v10341_v3  ;;  %4176 = vmatpush.bf16.msrb.mxu0 %v10086_v13  ;;  %v3947_v3 = vpop.f32.mrf.mxu2  ;;  %v13478_v7 = vld [vmem:[#allocation8 + $0x35c] sm:$0xf] }
 0x2bc   :  { %v13778_v10 = vld [vmem:[#allocation8 + $0xcb4] sm:$0xf0]  ;;  %v13550_v13 = vld [vmem:[#allocation8 + $0x59c] sm:$0xf] }
 0x2bd   :  { %v10885_v15 = vld [vmem:[#allocation8 + $0xe98] sm:$0xf]  ;;  %v10630_v22 = vor.u32 %v13778_v10, %v10629_v9  ;;  %4189 = vmatpush.bf16.msrb.mxu1 %v10342_v51  ;;  %v9447_v9 = vld [vmem:[#allocation8 + $0x378] sm:$0xf0]  ;;  %v3960_v10 = vpop.f32.mrf.mxu3 }
 0x2be   :  { %v13842_v17 = vld [vmem:[#allocation8 + $0xeb4] sm:$0xf0]  ;;  %v9991_v51 = vld [vmem:[#allocation8 + $0x7b8] sm:$0xf0] }
 0x2bf   :  { %v10053_v18 = vld [vmem:[#allocation8 + $0x818] sm:$0xf]  ;;  %v10886_v31 = vor.u32 %v13842_v17, %v10885_v15  ;;  %4201 = vmatpush.bf16.msrb.mxu2 %v10630_v22  ;;  %v9735_v15 = vld [vmem:[#allocation8 + $0x5b8] sm:$0xf0]  ;;  %v9194_v17 = vor.u32 %v13414_v0, %v9191_v2 }
 0x2c0   :  { %v13634_v19 = vld [vmem:[#allocation8 + $0x834] sm:$0xf0]  ;;  %v9738_v22 = vor.u32 %v13550_v13, %v9735_v15  ;;  %v9351_v60 = vld [vmem:[#allocation8 + $0x2b8] sm:$0xf0] }
 0x2c1   :  { %v10309_v20 = vld [vmem:[#allocation8 + $0xa18] sm:$0xf]  ;;  %v10054_v42 = vor.u32 %v13634_v19, %v10053_v18  ;;  %4214 = vmatpush.bf16.msrb.mxu3 %v10886_v31  ;;  %v13614_v18 = vld [vmem:[#allocation8 + $0x79c] sm:$0xf]  ;;  %v9450_v19 = vor.u32 %v13478_v7, %v9447_v9 }
 0x2c2   :  { %v13698_v21 = vld [vmem:[#allocation8 + $0xa34] sm:$0xf0]  ;;  %v9994_v27 = vor.u32 %v13614_v18, %v9991_v51  ;;  %v9703_v31 = vld [vmem:[#allocation8 + $0x578] sm:$0xf0]  ;;  %v3986_v18 = vpop.f32.mrf.mxu1 }
 0x2c3   :  { %v10597_v35 = vld [vmem:[#allocation8 + $0xc58] sm:$0xf]  ;;  %v10310_v32 = vor.u32 %v13698_v21, %v10309_v20  ;;  %4177 = vmatpush.bf16.msrb.mxu0 %v10054_v42  ;;  %v13406_v20 = vld [vmem:[#allocation8 + $0x11c] sm:$0xf] }
 0x2c4   :  { %v13770_v38 = vld [vmem:[#allocation8 + $0xc74] sm:$0xf0]  ;;  %v9159_v21 = vld [vmem:[#allocation8 + $0x138] sm:$0xf0] }
 0x2c5   :  { %v10853_v45 = vld [vmem:[#allocation8 + $0xe58] sm:$0xf]  ;;  %v10598_v48 = vor.u32 %v13770_v38, %v10597_v35  ;;  %4190 = vmatpush.bf16.msrb.mxu1 %v10310_v32  ;;  %v9162_v34 = vor.u32 %v13406_v20, %v9159_v21  ;;  %v13606_v35 = vld [vmem:[#allocation8 + $0x75c] sm:$0xf] }
 0x2c6   :  { %v13834_v44 = vld [vmem:[#allocation8 + $0xe74] sm:$0xf0]  ;;  %4178 = vmatmul.bf16.vlgmr.msrb.gmra.mxu0 %v14866_v8  ;;  %v9959_v38 = vld [vmem:[#allocation8 + $0x778] sm:$0xf0] }
 0x2c7   :  { %v10854_v55 = vor.u32 %v13834_v44, %v10853_v45  ;;  %v10565_v54 = vld [vmem:[#allocation8 + $0xc18] sm:$0xf]  ;;  %4222 = vmatpush.bf16.msra.mxu0 %v9258_v47  ;;  %4202 = vmatpush.bf16.msrb.mxu2 %v10598_v48  ;;  %v9127_v42 = vld [vmem:[#allocation8 + $0xf8] sm:$0xf0]  ;;  %v9706_v45 = vor.u32 %v13542_v29, %v9703_v31  ;;  %v3971_v47 = vpop.f32.mrf.mxu0  ;;  %v9962_v12 = vor.u32 %v13606_v35, %v9959_v38  ;;  %v3997_v38 = vpop.f32.mrf.mxu2 }
 0x2c8   :  { %v13762_v37 = vld [vmem:[#allocation8 + $0xc34] sm:$0xf0]  ;;  %4191 = vmatmul.bf16.vlgmr.msrb.gmra.mxu1 %v14868_v14  ;;  %v13462_v44 = vld [vmem:[#allocation8 + $0x2dc] sm:$0xf]  ;;  %v3972_v50 = vadd.f32 %v3971_v47, %v14948_v28  ;;  %v9130_v53 = vor.u32 %v13398_v33, %v9127_v42 }
 0x2c9   :  { %v10821_v26 = vld [vmem:[#allocation8 + $0xe18] sm:$0xf]  ;;  %4235 = vmatpush.bf16.msra.mxu1 %v9514_v49  ;;  %v10566_v63 = vor.u32 %v13762_v37, %v10565_v54  ;;  %4215 = vmatpush.bf16.msrb.mxu3 %v10854_v55  ;;  %v9383_v32 = vld [vmem:[#allocation8 + $0x2f8] sm:$0xf0] }
 0x2ca   :  { %v13826_v56 = vld [vmem:[#allocation8 + $0xe34] sm:$0xf0]  ;;  %v13534_v49 = vld [vmem:[#allocation8 + $0x51c] sm:$0xf]  ;;  %v9386_v37 = vor.u32 %v13462_v44, %v9383_v32  ;;  %v3985_v57 = vadd.f32 %v3984_v52, %v3972_v50  ;;  %v4010_v32 = vpop.f32.mrf.mxu3 }
 0x2cb   :  { %v10822_v4 = vor.u32 %v13826_v56, %v10821_v26  ;;  %4223 = vmatpush.bf16.msra.mxu0 %v9226_v59  ;;  %4203 = vmatpush.bf16.msrb.mxu2 %v10566_v63  ;;  %v9671_v48 = vld [vmem:[#allocation8 + $0x538] sm:$0xf0] }
 0x2cc   :  { %v13598_v55 = vld [vmem:[#allocation8 + $0x71c] sm:$0xf]  ;;  %v9674_v58 = vor.u32 %v13534_v49, %v9671_v48  ;;  %v3998_v44 = vadd.f32 %v3997_v38, %v3985_v57 }
 0x2cd   :  { %4236 = vmatpush.bf16.msra.mxu1 %v9482_v62  ;;  %4216 = vmatpush.bf16.msrb.mxu3 %v10822_v4  ;;  %v9927_v54 = vld [vmem:[#allocation8 + $0x738] sm:$0xf0] }
 0x2ce   :  { %4204 = vmatmul.bf16.vlgmr.msrb.gmra.mxu2 %v14872_v41  ;;  %v13390_v26 = vld [vmem:[#allocation8 + $0x9c] sm:$0xf]  ;;  %v9930_v61 = vor.u32 %v13598_v55, %v9927_v54 }
 0x2cf   :  { %4248 = vmatpush.bf16.msra.mxu2 %v9770_v5  ;;  %4224 = vmatpush.bf16.msra.mxu0 %v9194_v17  ;;  %v9095_v56 = vld [vmem:[#allocation8 + $0xb8] sm:$0xf0] }
 0x2d0   :  { %4217 = vmatmul.bf16.vlgmr.msrb.gmra.mxu3 %v14874_v46  ;;  %v13454_v59 = vld [vmem:[#allocation8 + $0x29c] sm:$0xf]  ;;  %v9098_v28 = vor.u32 %v13390_v26, %v9095_v56 }
 0x2d1   :  { %4261 = vmatpush.bf16.msra.mxu3 %v10026_v11  ;;  %4237 = vmatpush.bf16.msra.mxu1 %v9450_v19  ;;  %v13526_v62 = vld [vmem:[#allocation8 + $0x4dc] sm:$0xf]  ;;  %v9354_v3 = vor.u32 %v13454_v59, %v9351_v60  ;;  %v3973_v11 = vpop.f32.mrf.mxu0 }
 0x2d2   :  { %v9639_v63 = vld [vmem:[#allocation8 + $0x4f8] sm:$0xf0] }
 0x2d3   :  { %4249 = vmatpush.bf16.msra.mxu2 %v9738_v22  ;;  %4225 = vmatpush.bf16.msra.mxu0 %v9162_v34  ;;  %v13590_v0 = vld [vmem:[#allocation8 + $0x6dc] sm:$0xf]  ;;  %v9642_v7 = vor.u32 %v13526_v62, %v9639_v63 }
 0x2d4   :  { %v9895_v2 = vld [vmem:[#allocation8 + $0x6f8] sm:$0xf0] }
 0x2d5   :  { %4262 = vmatpush.bf16.msra.mxu3 %v9994_v27  ;;  %4238 = vmatpush.bf16.msra.mxu1 %v9418_v40  ;;  %v13382_v4 = vld [vmem:[#allocation8 + $0x5c] sm:$0xf]  ;;  %v9898_v13 = vor.u32 %v13590_v0, %v9895_v2 }
 0x2d6   :  { %v9063_v5 = vld [vmem:[#allocation8 + $0x78] sm:$0xf0] }
 0x2d7   :  { %4250 = vmatpush.bf16.msra.mxu2 %v9706_v45  ;;  %4226 = vmatpush.bf16.msra.mxu0 %v9130_v53  ;;  %v13446_v9 = vld [vmem:[#allocation8 + $0x25c] sm:$0xf]  ;;  %v9066_v51 = vor.u32 %v13382_v4, %v9063_v5  ;;  %v14955_v53 = vadd.f32 %v4010_v32, %v3998_v44 }
 0x2d8   :  { %v9319_v10 = vld [vmem:[#allocation8 + $0x278] sm:$0xf0] }
 0x2d9   :  { %4263 = vmatpush.bf16.msra.mxu3 %v9962_v12  ;;  %4239 = vmatpush.bf16.msra.mxu1 %v9386_v37  ;;  %v13518_v15 = vld [vmem:[#allocation8 + $0x49c] sm:$0xf]  ;;  %v9322_v22 = vor.u32 %v13446_v9, %v9319_v10  ;;  %v3999_v9 = vpop.f32.mrf.mxu2 }
 0x2da   :  { %v9607_v17 = vld [vmem:[#allocation8 + $0x4b8] sm:$0xf0] }
 0x2db   :  { %4251 = vmatpush.bf16.msra.mxu2 %v9674_v58  ;;  %4227 = vmatpush.bf16.msra.mxu0 %v9098_v28  ;;  %v13582_v19 = vld [vmem:[#allocation8 + $0x69c] sm:$0xf]  ;;  %v9610_v29 = vor.u32 %v13518_v15, %v9607_v17  ;;  %v4012_v17 = vpop.f32.mrf.mxu3 }
 0x2dc   :  { %v9863_v20 = vld [vmem:[#allocation8 + $0x6b8] sm:$0xf0] }
 0x2dd   :  { %4264 = vmatpush.bf16.msra.mxu3 %v9930_v61  ;;  %v13374_v21 = vld [vmem:[#allocation8 + $0x1c] sm:$0xf]  ;;  %4240 = vmatpush.bf16.msra.mxu1 %v9354_v3  ;;  %v9866_v40 = vor.u32 %v13582_v19, %v9863_v20 }
 0x2de   :  { %v9287_v27 = vld [vmem:[#allocation8 + $0x238] sm:$0xf0]  ;;  %v9034_v47 = vor.u32 %v13374_v21, %v9031_v23 }
 0x2df   :  { %4252 = vmatpush.bf16.msra.mxu2 %v9642_v7  ;;  %v13686_v31 = vld [vmem:[#allocation8 + $0x9dc] sm:$0xf]  ;;  %4228 = vmatpush.bf16.msra.mxu0 %v9066_v51  ;;  %v9290_v48 = vor.u32 %v13438_v24, %v9287_v27 }
 0x2e0   :  { %v10279_v34 = vld [vmem:[#allocation8 + $0x9f8] sm:$0xf0] }
 0x2e1   :  { %v13750_v35 = vld [vmem:[#allocation8 + $0xbdc] sm:$0xf]  ;;  %4265 = vmatpush.bf16.msra.mxu3 %v9898_v13  ;;  %4241 = vmatpush.bf16.msra.mxu1 %v9322_v22  ;;  %v10282_v50 = vor.u32 %v13686_v31, %v10279_v34 }
 0x2e2   :  { %v10535_v33 = vld [vmem:[#allocation8 + $0xbf8] sm:$0xf0] }
 0x2e3   :  { %v13510_v42 = vld [vmem:[#allocation8 + $0x45c] sm:$0xf]  ;;  %4253 = vmatpush.bf16.msra.mxu2 %v9610_v29  ;;  %v10538_v55 = vor.u32 %v13750_v35, %v10535_v33  ;;  %4229 = vmatpush.bf16.msra.mxu0 %v9034_v47 }
 0x2e4   :  { %v9575_v45 = vld [vmem:[#allocation8 + $0x478] sm:$0xf0] }
 0x2e5   :  { %v13574_v12 = vld [vmem:[#allocation8 + $0x65c] sm:$0xf]  ;;  %v9578_v54 = vor.u32 %v13510_v42, %v9575_v45  ;;  %4266 = vmatpush.bf16.msra.mxu3 %v9866_v40  ;;  %4242 = vmatpush.bf16.msra.mxu1 %v9290_v48 }
 0x2e6   :  { %v9831_v49 = vld [vmem:[#allocation8 + $0x678] sm:$0xf0]  ;;  %4230 = vmatmul.bf16.vlgmr.msra.gmra.mxu0 %v14849_v1 }
 0x2e7   :  { %v13678_v52 = vld [vmem:[#allocation8 + $0x99c] sm:$0xf]  ;;  %v9834_v58 = vor.u32 %v13574_v12, %v9831_v49  ;;  %4274 = vmatpush.bf16.msrb.mxu0 %v10282_v50  ;;  %4254 = vmatpush.bf16.msra.mxu2 %v9578_v54  ;;  %v14961_v49 = vpop.f32.mrf.mxu0 }
 0x2e8   :  { %v10247_v37 = vld [vmem:[#allocation8 + $0x9b8] sm:$0xf0]  ;;  %4243 = vmatmul.bf16.vlgmr.msra.gmra.mxu1 %v14852_v6 }
 0x2e9   :  { %v13742_v26 = vld [vmem:[#allocation8 + $0xb9c] sm:$0xf]  ;;  %v10250_v28 = vor.u32 %v13678_v52, %v10247_v37  ;;  %4287 = vmatpush.bf16.msrb.mxu1 %v10538_v55  ;;  %4267 = vmatpush.bf16.msra.mxu3 %v9834_v58  ;;  %v14963_v52 = vpop.f32.mrf.mxu1 }
 0x2ea   :  { %v10503_v56 = vld [vmem:[#allocation8 + $0xbb8] sm:$0xf0] }
 0x2eb   :  { %v13502_v57 = vld [vmem:[#allocation8 + $0x41c] sm:$0xf]  ;;  %v10506_v3 = vor.u32 %v13742_v26, %v10503_v56  ;;  %4275 = vmatpush.bf16.msrb.mxu0 %v10250_v28 }
 0x2ec   :  { %v9543_v59 = vld [vmem:[#allocation8 + $0x438] sm:$0xf0] }
 0x2ed   :  { %v13566_v60 = vld [vmem:[#allocation8 + $0x61c] sm:$0xf]  ;;  %v9546_v4 = vor.u32 %v13502_v57, %v9543_v59  ;;  %4288 = vmatpush.bf16.msrb.mxu1 %v10506_v3 }
 0x2ee   :  { %v9799_v61 = vld [vmem:[#allocation8 + $0x638] sm:$0xf0] }
 0x2ef   :  { %v13814_v62 = vld [vmem:[#allocation8 + $0xddc] sm:$0xf]  ;;  %v9802_v10 = vor.u32 %v13566_v60, %v9799_v61  ;;  %4255 = vmatpush.bf16.msra.mxu2 %v9546_v4 }
 0x2f0   :  { %v10791_v63 = vld [vmem:[#allocation8 + $0xdf8] sm:$0xf0] }
 0x2f1   :  { %v13878_v0 = vld [vmem:[#allocation8 + $0xfdc] sm:$0xf]  ;;  %v10794_v11 = vor.u32 %v13814_v62, %v10791_v63  ;;  %4268 = vmatpush.bf16.msra.mxu3 %v9802_v10  ;;  %v4025_v10 = vpop.f32.mrf.mxu0  ;;  %v4038_v17 = vpop.f32.mrf.mxu1 }
 0x2f2   :  { %v11047_v2 = vld [vmem:[#allocation8 + $0xff8] sm:$0xf0]  ;;  %4256 = vmatmul.bf16.vlgmr.msra.gmra.mxu2 %v14857_v30 }
 0x2f3   :  { %v13670_v5 = vld [vmem:[#allocation8 + $0x95c] sm:$0xf]  ;;  %v11050_v18 = vor.u32 %v13878_v0, %v11047_v2  ;;  %4300 = vmatpush.bf16.msrb.mxu2 %v10794_v11 }
 0x2f4   :  { %v10215_v7 = vld [vmem:[#allocation8 + $0x978] sm:$0xf0]  ;;  %4269 = vmatmul.bf16.vlgmr.msra.gmra.mxu3 %v14859_v36 }
 0x2f5   :  { %v13734_v13 = vld [vmem:[#allocation8 + $0xb5c] sm:$0xf]  ;;  %v10218_v20 = vor.u32 %v13670_v5, %v10215_v7  ;;  %4313 = vmatpush.bf16.msrb.mxu3 %v11050_v18 }
 0x2f6   :  { %v10471_v15 = vld [vmem:[#allocation8 + $0xb78] sm:$0xf0] }
 0x2f7   :  { %v13806_v51 = vld [vmem:[#allocation8 + $0xd9c] sm:$0xf]  ;;  %v10474_v23 = vor.u32 %v13734_v13, %v10471_v15  ;;  %4276 = vmatpush.bf16.msrb.mxu0 %v10218_v20 }
 0x2f8   :  { %v10759_v19 = vld [vmem:[#allocation8 + $0xdb8] sm:$0xf0] }
 0x2f9   :  { %v13870_v21 = vld [vmem:[#allocation8 + $0xf9c] sm:$0xf]  ;;  %v10762_v1 = vor.u32 %v13806_v51, %v10759_v19  ;;  %4289 = vmatpush.bf16.msrb.mxu1 %v10474_v23 }
 0x2fa   :  { %v11015_v22 = vld [vmem:[#allocation8 + $0xfb8] sm:$0xf0] }
 0x2fb   :  { %v13662_v24 = vld [vmem:[#allocation8 + $0x91c] sm:$0xf]  ;;  %v11018_v34 = vor.u32 %v13870_v21, %v11015_v22  ;;  %4301 = vmatpush.bf16.msrb.mxu2 %v10762_v1  ;;  %v11277_v1 = vld [vmem:[#allocation11 + $0x1c0] sm:$0xf] }
 0x2fc   :  { %v10183_v27 = vld [vmem:[#allocation8 + $0x938] sm:$0xf0] }
 0x2fd   :  { %v13726_v29 = vld [vmem:[#allocation8 + $0xb1c] sm:$0xf]  ;;  %v10186_v38 = vor.u32 %v13662_v24, %v10183_v27  ;;  %4314 = vmatpush.bf16.msrb.mxu3 %v11018_v34  ;;  %v14965_v34 = vpop.f32.mrf.mxu2 }
 0x2fe   :  { %v10439_v31 = vld [vmem:[#allocation8 + $0xb38] sm:$0xf0] }
 0x2ff   :  { %v13798_v6 = vld [vmem:[#allocation8 + $0xd5c] sm:$0xf]  ;;  %v10442_v42 = vor.u32 %v13726_v29, %v10439_v31  ;;  %4277 = vmatpush.bf16.msrb.mxu0 %v10186_v38  ;;  %v13943_v29 = vld [vmem:[#allocation11 + $0x1dc] sm:$0xf0] }
 0x300   :  { %v10727_v35 = vld [vmem:[#allocation8 + $0xd78] sm:$0xf0]  ;;  %v11533_v31 = vld [vmem:[#allocation11 + $0x3c0] sm:$0xf] }
 0x301   :  { %v13862_v40 = vld [vmem:[#allocation8 + $0xf5c] sm:$0xf]  ;;  %v10730_v32 = vor.u32 %v13798_v6, %v10727_v35  ;;  %4290 = vmatpush.bf16.msrb.mxu1 %v10442_v42  ;;  %v14007_v35 = vld [vmem:[#allocation11 + $0x3dc] sm:$0xf0] }
 0x302   :  { %v10983_v33 = vld [vmem:[#allocation8 + $0xf78] sm:$0xf0] }
 0x303   :  { %v13654_v45 = vld [vmem:[#allocation8 + $0x8dc] sm:$0xf]  ;;  %v10986_v48 = vor.u32 %v13862_v40, %v10983_v33  ;;  %4302 = vmatpush.bf16.msrb.mxu2 %v10730_v32  ;;  %v14967_v33 = vpop.f32.mrf.mxu3 }
 0x304   :  { %v10151_v44 = vld [vmem:[#allocation8 + $0x8f8] sm:$0xf0] }
 0x305   :  { %v13718_v47 = vld [vmem:[#allocation8 + $0xadc] sm:$0xf]  ;;  %v10154_v55 = vor.u32 %v13654_v45, %v10151_v44  ;;  %4315 = vmatpush.bf16.msrb.mxu3 %v10986_v48  ;;  %v11534_v48 = vor.u32 %v14007_v35, %v11533_v31  ;;  %v14119_v31 = vld [vmem:[#allocation11 + $0x75c] sm:$0xf0] }
 0x306   :  { %v10407_v12 = vld [vmem:[#allocation8 + $0xaf8] sm:$0xf0]  ;;  %v11149_v35 = vld [vmem:[#allocation11 + $0xc0] sm:$0xf] }
 0x307   :  { %v13790_v50 = vld [vmem:[#allocation8 + $0xd1c] sm:$0xf]  ;;  %v10410_v37 = vor.u32 %v13718_v47, %v10407_v12  ;;  %4278 = vmatpush.bf16.msrb.mxu0 %v10154_v55  ;;  %v11278_v47 = vor.u32 %v13943_v29, %v11277_v1  ;;  %v11245_v12 = vld [vmem:[#allocation11 + $0x180] sm:$0xf] }
 0x308   :  { %v10695_v30 = vld [vmem:[#allocation8 + $0xd38] sm:$0xf0]  ;;  %v11501_v55 = vld [vmem:[#allocation11 + $0x380] sm:$0xf] }
 0x309   :  { %v13854_v54 = vld [vmem:[#allocation8 + $0xf1c] sm:$0xf]  ;;  %v10698_v58 = vor.u32 %v13790_v50, %v10695_v30  ;;  %4291 = vmatpush.bf16.msrb.mxu1 %v10410_v37  ;;  %v13935_v30 = vld [vmem:[#allocation11 + $0x19c] sm:$0xf0] }
 0x30a   :  { %v10951_v36 = vld [vmem:[#allocation8 + $0xf38] sm:$0xf0]  ;;  %v11981_v29 = vld [vmem:[#allocation11 + $0x740] sm:$0xf] }
 0x30b   :  { %v13646_v26 = vld [vmem:[#allocation8 + $0x89c] sm:$0xf]  ;;  %v10954_v60 = vor.u32 %v13854_v54, %v10951_v36  ;;  %4303 = vmatpush.bf16.msrb.mxu2 %v10698_v58  ;;  %v13999_v54 = vld [vmem:[#allocation11 + $0x39c] sm:$0xf0]  ;;  %v4064_v10 = vpop.f32.mrf.mxu3 }
 0x30c   :  { %v10119_v56 = vld [vmem:[#allocation8 + $0x8b8] sm:$0xf0] }
 0x30d   :  { %v13710_v57 = vld [vmem:[#allocation8 + $0xa9c] sm:$0xf]  ;;  %v10122_v63 = vor.u32 %v13646_v26, %v10119_v56  ;;  %4316 = vmatpush.bf16.msrb.mxu3 %v10954_v60  ;;  %v11246_v60 = vor.u32 %v13935_v30, %v11245_v12  ;;  %v14975_v12 = vpop.f32.mrf.mxu1 }
 0x30e   :  { %v10375_v59 = vld [vmem:[#allocation8 + $0xab8] sm:$0xf0] }
 0x30f   :  { %v13782_v61 = vld [vmem:[#allocation8 + $0xcdc] sm:$0xf]  ;;  %v10378_v2 = vor.u32 %v13710_v57, %v10375_v59  ;;  %4279 = vmatpush.bf16.msrb.mxu0 %v10122_v63  ;;  %v11789_v57 = vld [vmem:[#allocation11 + $0x5c0] sm:$0xf]  ;;  %v11502_v63 = vor.u32 %v13999_v54, %v11501_v55 }
 0x310   :  { %v10663_v62 = vld [vmem:[#allocation8 + $0xcf8] sm:$0xf0]  ;;  %v14071_v59 = vld [vmem:[#allocation11 + $0x5dc] sm:$0xf0] }
 0x311   :  { %v13846_v28 = vld [vmem:[#allocation8 + $0xedc] sm:$0xf]  ;;  %v10666_v5 = vor.u32 %v13782_v61, %v10663_v62  ;;  %4292 = vmatpush.bf16.msrb.mxu1 %v10378_v2  ;;  %v12045_v61 = vld [vmem:[#allocation11 + $0x7c0] sm:$0xf] }
 0x312   :  { %v10919_v0 = vld [vmem:[#allocation8 + $0xef8] sm:$0xf0]  ;;  %v14135_v62 = vld [vmem:[#allocation11 + $0x7dc] sm:$0xf0] }
 0x313   :  { %v13638_v3 = vld [vmem:[#allocation8 + $0x85c] sm:$0xf]  ;;  %v10922_v11 = vor.u32 %v13846_v28, %v10919_v0  ;;  %4304 = vmatpush.bf16.msrb.mxu2 %v10666_v5  ;;  %v11213_v0 = vld [vmem:[#allocation11 + $0x140] sm:$0xf]  ;;  %v11790_v5 = vor.u32 %v14071_v59, %v11789_v57 }
 0x314   :  { %v10087_v4 = vld [vmem:[#allocation8 + $0x878] sm:$0xf0]  ;;  %v13927_v2 = vld [vmem:[#allocation11 + $0x15c] sm:$0xf0] }
 0x315   :  { %v13702_v7 = vld [vmem:[#allocation8 + $0xa5c] sm:$0xf]  ;;  %v10090_v18 = vor.u32 %v13638_v3, %v10087_v4  ;;  %4317 = vmatpush.bf16.msrb.mxu3 %v10922_v11  ;;  %v4051_v3 = vpop.f32.mrf.mxu2  ;;  %v12046_v11 = vor.u32 %v14135_v62, %v12045_v61  ;;  %v11214_v17 = vor.u32 %v13927_v2, %v11213_v0  ;;  %v11117_v55 = vld [vmem:[#allocation11 + $0x80] sm:$0xf]  ;;  %v4090_v10 = vpop.f32.mrf.mxu1 }
 0x316   :  { %v10343_v9 = vld [vmem:[#allocation8 + $0xa78] sm:$0xf0]  ;;  %v13903_v54 = vld [vmem:[#allocation11 + $0x9c] sm:$0xf0] }
 0x317   :  { %v13774_v13 = vld [vmem:[#allocation8 + $0xc9c] sm:$0xf]  ;;  %v10346_v21 = vor.u32 %v13702_v7, %v10343_v9  ;;  %4280 = vmatpush.bf16.msrb.mxu0 %v10090_v18  ;;  %v11469_v7 = vld [vmem:[#allocation11 + $0x340] sm:$0xf]  ;;  %v11118_v59 = vor.u32 %v13903_v54, %v11117_v55 }
 0x318   :  { %v10631_v15 = vld [vmem:[#allocation8 + $0xcb8] sm:$0xf0]  ;;  %v13991_v9 = vld [vmem:[#allocation11 + $0x35c] sm:$0xf0] }
 0x319   :  { %v13838_v51 = vld [vmem:[#allocation8 + $0xe9c] sm:$0xf]  ;;  %v10634_v27 = vor.u32 %v13774_v13, %v10631_v15  ;;  %4293 = vmatpush.bf16.msrb.mxu1 %v10346_v21  ;;  %v11757_v13 = vld [vmem:[#allocation11 + $0x580] sm:$0xf] }
 0x31a   :  { %v10887_v19 = vld [vmem:[#allocation8 + $0xeb8] sm:$0xf0]  ;;  %v14063_v15 = vld [vmem:[#allocation11 + $0x59c] sm:$0xf0] }
 0x31b   :  { %v13630_v20 = vld [vmem:[#allocation8 + $0x81c] sm:$0xf]  ;;  %v10890_v6 = vor.u32 %v13838_v51, %v10887_v19  ;;  %4305 = vmatpush.bf16.msrb.mxu2 %v10634_v27  ;;  %v12013_v18 = vld [vmem:[#allocation11 + $0x780] sm:$0xf]  ;;  %v11470_v19 = vor.u32 %v13991_v9, %v11469_v7 }
 0x31c   :  { %v10055_v22 = vld [vmem:[#allocation8 + $0x838] sm:$0xf0]  ;;  %v14127_v51 = vld [vmem:[#allocation11 + $0x79c] sm:$0xf0] }
 0x31d   :  { %v13694_v23 = vld [vmem:[#allocation8 + $0xa1c] sm:$0xf]  ;;  %v10058_v42 = vor.u32 %v13630_v20, %v10055_v22  ;;  %4318 = vmatpush.bf16.msrb.mxu3 %v10890_v6  ;;  %v11181_v20 = vld [vmem:[#allocation11 + $0x100] sm:$0xf] }
 0x31e   :  { %v10311_v24 = vld [vmem:[#allocation8 + $0xa38] sm:$0xf0]  ;;  %v13919_v21 = vld [vmem:[#allocation11 + $0x11c] sm:$0xf0] }
 0x31f   :  { %v13766_v38 = vld [vmem:[#allocation8 + $0xc5c] sm:$0xf]  ;;  %v10314_v32 = vor.u32 %v13694_v23, %v10311_v24  ;;  %4281 = vmatpush.bf16.msrb.mxu0 %v10058_v42  ;;  %v11437_v22 = vld [vmem:[#allocation11 + $0x300] sm:$0xf]  ;;  %v12014_v24 = vor.u32 %v14127_v51, %v12013_v18  ;;  %v11182_v1 = vor.u32 %v13919_v21, %v11181_v20 }
 0x320   :  { %v10599_v40 = vld [vmem:[#allocation8 + $0xc78] sm:$0xf0]  ;;  %v13983_v23 = vld [vmem:[#allocation11 + $0x31c] sm:$0xf0] }
 0x321   :  { %v13830_v45 = vld [vmem:[#allocation8 + $0xe5c] sm:$0xf]  ;;  %v10602_v50 = vor.u32 %v13766_v38, %v10599_v40  ;;  %4294 = vmatpush.bf16.msrb.mxu1 %v10314_v32  ;;  %v14055_v27 = vld [vmem:[#allocation11 + $0x55c] sm:$0xf0]  ;;  %v11438_v6 = vor.u32 %v13983_v23, %v11437_v22  ;;  %v11982_v32 = vor.u32 %v14119_v31, %v11981_v29  ;;  %v14979_v31 = vld [vmem:[#allocation10] sm:$0xff] }
 0x322   :  { %v10855_v44 = vld [vmem:[#allocation8 + $0xe78] sm:$0xf0]  ;;  %4282 = vmatmul.bf16.vlgmr.msrb.gmra.mxu0 %v14866_v8  ;;  %v11758_v8 = vor.u32 %v14063_v15, %v11757_v13  ;;  %v13911_v38 = vld [vmem:[#allocation11 + $0xdc] sm:$0xf0] }
 0x323   :  { %v10858_v36 = vor.u32 %v13830_v45, %v10855_v44  ;;  %v13758_v37 = vld [vmem:[#allocation8 + $0xc1c] sm:$0xf]  ;;  %7432 = vmatpush.bf16.msra.mxu0 %v11278_v47  ;;  %4306 = vmatpush.bf16.msrb.mxu2 %v10602_v50  ;;  %v11405_v42 = vld [vmem:[#allocation11 + $0x2c0] sm:$0xf]  ;;  %v14973_v44 = vpop.f32.mrf.mxu0 }
 0x324   :  { %v10567_v26 = vld [vmem:[#allocation8 + $0xc38] sm:$0xf0]  ;;  %4295 = vmatmul.bf16.vlgmr.msrb.gmra.mxu1 %v14868_v14  ;;  %v11725_v14 = vld [vmem:[#allocation11 + $0x540] sm:$0xf] }
 0x325   :  { %v13822_v56 = vld [vmem:[#allocation8 + $0xe1c] sm:$0xf]  ;;  %7445 = vmatpush.bf16.msra.mxu1 %v11534_v48  ;;  %v10570_v28 = vor.u32 %v13758_v37, %v10567_v26  ;;  %4319 = vmatpush.bf16.msrb.mxu3 %v10858_v36  ;;  %v11726_v40 = vor.u32 %v14055_v27, %v11725_v14  ;;  %v13975_v45 = vld [vmem:[#allocation11 + $0x2dc] sm:$0xf0]  ;;  %v11150_v48 = vor.u32 %v13911_v38, %v11149_v35  ;;  %v14982_v35 = vpop.f32.mrf.mxu3 }
 0x326   :  { %v10823_v58 = vld [vmem:[#allocation8 + $0xe38] sm:$0xf0]  ;;  %v11693_v47 = vld [vmem:[#allocation11 + $0x500] sm:$0xf]  ;;  %v11406_v30 = vor.u32 %v13975_v45, %v11405_v42  ;;  %v4326_v45 = vmax.f32 %v14902_v16, 0.0 }
 0x327   :  { %v10826_v4 = vor.u32 %v13822_v56, %v10823_v58  ;;  %7433 = vmatpush.bf16.msra.mxu0 %v11246_v60  ;;  %4307 = vmatpush.bf16.msrb.mxu2 %v10570_v28  ;;  %v11949_v50 = vld [vmem:[#allocation11 + $0x700] sm:$0xf] }
 0x328   :  { %v11373_v37 = vld [vmem:[#allocation11 + $0x280] sm:$0xf] }
 0x329   :  { %7446 = vmatpush.bf16.msra.mxu1 %v11502_v63  ;;  %4320 = vmatpush.bf16.msrb.mxu3 %v10826_v4  ;;  %v13967_v26 = vld [vmem:[#allocation11 + $0x29c] sm:$0xf0] }
 0x32a   :  { %4308 = vmatmul.bf16.vlgmr.msrb.gmra.mxu2 %v14872_v41  ;;  %v14047_v41 = vld [vmem:[#allocation11 + $0x51c] sm:$0xf0]  ;;  %v11374_v62 = vor.u32 %v13967_v26, %v11373_v37 }
 0x32b   :  { %7458 = vmatpush.bf16.msra.mxu2 %v11790_v5  ;;  %7434 = vmatpush.bf16.msra.mxu0 %v11214_v17  ;;  %v11694_v36 = vor.u32 %v14047_v41, %v11693_v47  ;;  %v11661_v58 = vld [vmem:[#allocation11 + $0x4c0] sm:$0xf]  ;;  %v4077_v4 = vpop.f32.mrf.mxu0 }
 0x32c   :  { %4321 = vmatmul.bf16.vlgmr.msrb.gmra.mxu3 %v14874_v46  ;;  %v14111_v46 = vld [vmem:[#allocation11 + $0x71c] sm:$0xf0] }
 0x32d   :  { %7471 = vmatpush.bf16.msra.mxu3 %v12046_v11  ;;  %7447 = vmatpush.bf16.msra.mxu1 %v11470_v19  ;;  %v11950_v56 = vor.u32 %v14111_v46, %v11949_v50  ;;  %v14039_v57 = vld [vmem:[#allocation11 + $0x4dc] sm:$0xf0] }
 0x32e   :  { %v11917_v60 = vld [vmem:[#allocation11 + $0x6c0] sm:$0xf]  ;;  %v11662_v0 = vor.u32 %v14039_v57, %v11661_v58 }
 0x32f   :  { %7459 = vmatpush.bf16.msra.mxu2 %v11758_v8  ;;  %7435 = vmatpush.bf16.msra.mxu0 %v11182_v1  ;;  %v14103_v61 = vld [vmem:[#allocation11 + $0x6dc] sm:$0xf0] }
 0x330   :  { %v11085_v63 = vld [vmem:[#allocation11 + $0x40] sm:$0xf]  ;;  %v11918_v5 = vor.u32 %v14103_v61, %v11917_v60 }
 0x331   :  { %7472 = vmatpush.bf16.msra.mxu3 %v12014_v24  ;;  %7448 = vmatpush.bf16.msra.mxu1 %v11438_v6  ;;  %v13895_v28 = vld [vmem:[#allocation11 + $0x5c] sm:$0xf0]  ;;  %v14977_v24 = vpop.f32.mrf.mxu2  ;;  %v923_v6 = vperm.slane %v14979_v31, 5 }
 0x332   :  { %v11341_v2 = vld [vmem:[#allocation11 + $0x240] sm:$0xf]  ;;  %v11086_v11 = vor.u32 %v13895_v28, %v11085_v63 }
 0x333   :  { %7460 = vmatpush.bf16.msra.mxu2 %v11726_v40  ;;  %7436 = vmatpush.bf16.msra.mxu0 %v11150_v48  ;;  %v13959_v3 = vld [vmem:[#allocation11 + $0x25c] sm:$0xf0]  ;;  %v4024_v58 = vadd.f32 %v14961_v49, %v923_v6 }
 0x334   :  { %v11629_v7 = vld [vmem:[#allocation11 + $0x480] sm:$0xf]  ;;  %v11342_v18 = vor.u32 %v13959_v3, %v11341_v2  ;;  %v4328_v2 = vmax.f32 %v14925_v39, 0.0 }
 0x335   :  { %7473 = vmatpush.bf16.msra.mxu3 %v11982_v32  ;;  %7449 = vmatpush.bf16.msra.mxu1 %v11406_v30  ;;  %v14031_v9 = vld [vmem:[#allocation11 + $0x49c] sm:$0xf0]  ;;  %v4327_v32 = vmax.f32 %v14911_v25, 0.0  ;;  %v4037_v10 = vadd.f32 %v14963_v52, %v4024_v58 }
 0x336   :  { %v11885_v13 = vld [vmem:[#allocation11 + $0x680] sm:$0xf]  ;;  %v11630_v21 = vor.u32 %v14031_v9, %v11629_v7  ;;  %v4329_v9 = vmax.f32 %v14941_v43, 0.0 }
 0x337   :  { %7461 = vmatpush.bf16.msra.mxu2 %v11694_v36  ;;  %7437 = vmatpush.bf16.msra.mxu0 %v11118_v59  ;;  %v14095_v15 = vld [vmem:[#allocation11 + $0x69c] sm:$0xf0]  ;;  %v14987_v59 = vpack.c.bf16 %v4326_v45, %v4326_v45  ;;  %v14989_v61 = vpack.c.bf16 %v4327_v32, %v4327_v32  ;;  %v4050_v39 = vadd.f32 %v14965_v34, %v4037_v10  ;;  %v15005_v45 = vpop.f32.mrf.mxu0  ;;  %v13939_v10 = vld [vmem:[#allocation11 + $0x1c4] sm:$0xf] }
 0x338   :  { %v11053_v17 = vld [vmem:[#allocation11] sm:$0xf]  ;;  %v11886_v14 = vor.u32 %v14095_v15, %v11885_v13 }
 0x339   :  { %7474 = vmatpush.bf16.msra.mxu3 %v11950_v56  ;;  %7450 = vmatpush.bf16.msra.mxu1 %v11374_v62  ;;  %v13887_v51 = vld [vmem:[#allocation11 + $0x1c] sm:$0xf0]  ;;  %v4103_v49 = vpop.f32.mrf.mxu2 }
 0x33a   :  { %v11309_v19 = vld [vmem:[#allocation11 + $0x200] sm:$0xf]  ;;  %v11054_v38 = vor.u32 %v13887_v51, %v11053_v17 }
 0x33b   :  { %v13951_v20 = vld [vmem:[#allocation11 + $0x21c] sm:$0xf0]  ;;  %7462 = vmatpush.bf16.msra.mxu2 %v11662_v0  ;;  %7438 = vmatpush.bf16.msra.mxu0 %v11086_v11  ;;  %v4116_v11 = vpop.f32.mrf.mxu3 }
 0x33c   :  { %v12301_v8 = vld [vmem:[#allocation11 + $0x9c0] sm:$0xf]  ;;  %v11310_v47 = vor.u32 %v13951_v20, %v11309_v19  ;;  %v14997_v20 = vpack.c.bf16 %v4328_v2, %v4328_v2  ;;  %v11279_v11 = vld [vmem:[#allocation11 + $0x1e0] sm:$0xf0] }
 0x33d   :  { %v14199_v22 = vld [vmem:[#allocation11 + $0x9dc] sm:$0xf0]  ;;  %7475 = vmatpush.bf16.msra.mxu3 %v11918_v5  ;;  %7451 = vmatpush.bf16.msra.mxu1 %v11342_v18 }
 0x33e   :  { %v12557_v23 = vld [vmem:[#allocation11 + $0xbc0] sm:$0xf]  ;;  %v12302_v41 = vor.u32 %v14199_v22, %v12301_v8  ;;  %v14999_v8 = vpack.c.bf16 %v4329_v9, %v4329_v9 }
 0x33f   :  { %v14263_v27 = vld [vmem:[#allocation11 + $0xbdc] sm:$0xf0]  ;;  %7463 = vmatpush.bf16.msra.mxu2 %v11630_v21  ;;  %7439 = vmatpush.bf16.msra.mxu0 %v11054_v38 }
 0x340   :  { %v11597_v1 = vld [vmem:[#allocation11 + $0x440] sm:$0xf]  ;;  %v12558_v50 = vor.u32 %v14263_v27, %v12557_v23 }
 0x341   :  { %v14023_v29 = vld [vmem:[#allocation11 + $0x45c] sm:$0xf0]  ;;  %7476 = vmatpush.bf16.msra.mxu3 %v11886_v14  ;;  %7452 = vmatpush.bf16.msra.mxu1 %v11310_v47  ;;  %v4063_v14 = vadd.f32 %v14967_v33, %v4050_v39 }
 0x342   :  { %v11853_v40 = vld [vmem:[#allocation11 + $0x640] sm:$0xf]  ;;  %v11598_v46 = vor.u32 %v14023_v29, %v11597_v1  ;;  %7440 = vmatmul.bf16.vlgmr.msra.gmra.mxu0 %v14987_v59 }
 0x343   :  { %v14087_v42 = vld [vmem:[#allocation11 + $0x65c] sm:$0xf0]  ;;  %7484 = vmatpush.bf16.msrb.mxu0 %v12302_v41  ;;  %v15007_v41 = vpop.f32.mrf.mxu1 }
 0x344   :  { %v12269_v48 = vld [vmem:[#allocation11 + $0x980] sm:$0xf]  ;;  %v11854_v36 = vor.u32 %v14087_v42, %v11853_v40  ;;  %7464 = vmatpush.bf16.msra.mxu2 %v11598_v46  ;;  %7453 = vmatmul.bf16.vlgmr.msra.gmra.mxu1 %v14989_v61  ;;  %v4076_v42 = vadd.f32 %v14973_v44, %v4063_v14 }
 0x345   :  { %v14191_v30 = vld [vmem:[#allocation11 + $0x99c] sm:$0xf0]  ;;  %7497 = vmatpush.bf16.msrb.mxu1 %v12558_v50 }
 0x346   :  { %v12525_v55 = vld [vmem:[#allocation11 + $0xb80] sm:$0xf]  ;;  %v12270_v60 = vor.u32 %v14191_v30, %v12269_v48  ;;  %7477 = vmatpush.bf16.msra.mxu3 %v11854_v36  ;;  %v4089_v36 = vadd.f32 %v14975_v12, %v4076_v42  ;;  %v14067_v42 = vld [vmem:[#allocation11 + $0x5c4] sm:$0xf] }
 0x347   :  { %v14255_v54 = vld [vmem:[#allocation11 + $0xb9c] sm:$0xf0] }
 0x348   :  { %v11565_v37 = vld [vmem:[#allocation11 + $0x400] sm:$0xf]  ;;  %v12526_v62 = vor.u32 %v14255_v54, %v12525_v55  ;;  %7485 = vmatpush.bf16.msrb.mxu0 %v12270_v60 }
 0x349   :  { %v14015_v26 = vld [vmem:[#allocation11 + $0x41c] sm:$0xf0] }
 0x34a   :  { %v11821_v56 = vld [vmem:[#allocation11 + $0x600] sm:$0xf]  ;;  %v11566_v63 = vor.u32 %v14015_v26, %v11565_v37  ;;  %7498 = vmatpush.bf16.msrb.mxu1 %v12526_v62 }
 0x34b   :  { %v14079_v16 = vld [vmem:[#allocation11 + $0x61c] sm:$0xf0]  ;;  %v4142_v2 = vpop.f32.mrf.mxu1 }
 0x34c   :  { %v12813_v25 = vld [vmem:[#allocation11 + $0xdc0] sm:$0xf]  ;;  %v11822_v3 = vor.u32 %v14079_v16, %v11821_v56  ;;  %7465 = vmatpush.bf16.msra.mxu2 %v11566_v63  ;;  %v4102_v56 = vadd.f32 %v14977_v24, %v4089_v36  ;;  %v4129_v63 = vpop.f32.mrf.mxu0  ;;  %v13987_v36 = vld [vmem:[#allocation11 + $0x344] sm:$0xf] }
 0x34d   :  { %v14327_v57 = vld [vmem:[#allocation11 + $0xddc] sm:$0xf0]  ;;  %v13979_v2 = vld [vmem:[#allocation11 + $0x304] sm:$0xf] }
 0x34e   :  { %v12237_v28 = vld [vmem:[#allocation11 + $0x940] sm:$0xf]  ;;  %v12814_v4 = vor.u32 %v14327_v57, %v12813_v25  ;;  %7478 = vmatpush.bf16.msra.mxu3 %v11822_v3  ;;  %v4115_v3 = vadd.f32 %v14982_v35, %v4102_v56  ;;  %v4330_v35 = vmax.f32 %v14955_v53, 0.0 }
 0x34f   :  { %v14183_v0 = vld [vmem:[#allocation11 + $0x95c] sm:$0xf0]  ;;  %7466 = vmatmul.bf16.vlgmr.msra.gmra.mxu2 %v14997_v20 }
 0x350   :  { %v12493_v5 = vld [vmem:[#allocation11 + $0xb40] sm:$0xf]  ;;  %v12238_v17 = vor.u32 %v14183_v0, %v12237_v28  ;;  %7510 = vmatpush.bf16.msrb.mxu2 %v12814_v4  ;;  %v15017_v53 = vpack.c.bf16 %v4330_v35, %v4330_v35 }
 0x351   :  { %v14247_v7 = vld [vmem:[#allocation11 + $0xb5c] sm:$0xf0]  ;;  %7479 = vmatmul.bf16.vlgmr.msra.gmra.mxu3 %v14999_v8 }
 0x352   :  { %v12781_v13 = vld [vmem:[#allocation11 + $0xd80] sm:$0xf]  ;;  %v12494_v18 = vor.u32 %v14247_v7, %v12493_v5  ;;  %7486 = vmatpush.bf16.msrb.mxu0 %v12238_v17  ;;  %v11535_v17 = vld [vmem:[#allocation11 + $0x3e0] sm:$0xf0] }
 0x353   :  { %v14319_v15 = vld [vmem:[#allocation11 + $0xd9c] sm:$0xf0] }
 0x354   :  { %v12205_v51 = vld [vmem:[#allocation11 + $0x900] sm:$0xf]  ;;  %v12782_v43 = vor.u32 %v14319_v15, %v12781_v13  ;;  %7499 = vmatpush.bf16.msrb.mxu1 %v12494_v18  ;;  %v14003_v13 = vld [vmem:[#allocation11 + $0x3c4] sm:$0xf]  ;;  %v15012_v15 = vpop.f32.mrf.mxu2 }
 0x355   :  { %v14175_v19 = vld [vmem:[#allocation11 + $0x91c] sm:$0xf0] }
 0x356   :  { %v12461_v52 = vld [vmem:[#allocation11 + $0xb00] sm:$0xf]  ;;  %v12206_v34 = vor.u32 %v14175_v19, %v12205_v51  ;;  %7511 = vmatpush.bf16.msrb.mxu2 %v12782_v43  ;;  %v15014_v51 = vpop.f32.mrf.mxu3  ;;  %v4331_v43 = vmax.f32 %v4115_v3, 0.0  ;;  %v11439_v3 = vld [vmem:[#allocation11 + $0x320] sm:$0xf0] }
 0x357   :  { %v14239_v21 = vld [vmem:[#allocation11 + $0xb1c] sm:$0xf0] }
 0x358   :  { %v12749_v22 = vld [vmem:[#allocation11 + $0xd40] sm:$0xf]  ;;  %v12462_v27 = vor.u32 %v14239_v21, %v12461_v52  ;;  %7487 = vmatpush.bf16.msrb.mxu0 %v12206_v34  ;;  %v11282_v21 = vor.u32 %v13939_v10, %v11279_v11  ;;  %v11538_v34 = vor.u32 %v14003_v13, %v11535_v17  ;;  %v11442_v11 = vor.u32 %v13979_v2, %v11439_v3  ;;  %v13907_v13 = vld [vmem:[#allocation11 + $0xc4] sm:$0xf] }
 0x359   :  { %v14311_v23 = vld [vmem:[#allocation11 + $0xd5c] sm:$0xf0]  ;;  %v11151_v17 = vld [vmem:[#allocation11 + $0xe0] sm:$0xf0] }
 0x35a   :  { %v12173_v1 = vld [vmem:[#allocation11 + $0x8c0] sm:$0xf]  ;;  %v12750_v6 = vor.u32 %v14311_v23, %v12749_v22  ;;  %7500 = vmatpush.bf16.msrb.mxu1 %v12462_v27  ;;  %v13931_v22 = vld [vmem:[#allocation11 + $0x184] sm:$0xf] }
 0x35b   :  { %v14167_v29 = vld [vmem:[#allocation11 + $0x8dc] sm:$0xf0]  ;;  %v11247_v23 = vld [vmem:[#allocation11 + $0x1a0] sm:$0xf0] }
 0x35c   :  { %v12429_v38 = vld [vmem:[#allocation11 + $0xac0] sm:$0xf]  ;;  %v12174_v33 = vor.u32 %v14167_v29, %v12173_v1  ;;  %7512 = vmatpush.bf16.msrb.mxu2 %v12750_v6  ;;  %v13995_v27 = vld [vmem:[#allocation11 + $0x384] sm:$0xf] }
 0x35d   :  { %v14231_v40 = vld [vmem:[#allocation11 + $0xadc] sm:$0xf0]  ;;  %v11503_v1 = vld [vmem:[#allocation11 + $0x3a0] sm:$0xf0] }
 0x35e   :  { %v12717_v32 = vld [vmem:[#allocation11 + $0xd00] sm:$0xf]  ;;  %v12430_v48 = vor.u32 %v14231_v40, %v12429_v38  ;;  %7488 = vmatpush.bf16.msrb.mxu0 %v12174_v33  ;;  %v924_v33 = vperm.slane %v14979_v31, 6  ;;  %v12303_v3 = vld [vmem:[#allocation11 + $0x9e0] sm:$0xf0] }
 0x35f   :  { %v14303_v47 = vld [vmem:[#allocation11 + $0xd1c] sm:$0xf0] }
 0x360   :  { %v12141_v50 = vld [vmem:[#allocation11 + $0x880] sm:$0xf]  ;;  %v12718_v30 = vor.u32 %v14303_v47, %v12717_v32  ;;  %7501 = vmatpush.bf16.msrb.mxu1 %v12430_v48  ;;  %v11791_v32 = vld [vmem:[#allocation11 + $0x5e0] sm:$0xf0]  ;;  %v11250_v48 = vor.u32 %v13931_v22, %v11247_v23 }
 0x361   :  { %v14159_v46 = vld [vmem:[#allocation11 + $0x89c] sm:$0xf0]  ;;  %v11695_v22 = vld [vmem:[#allocation11 + $0x520] sm:$0xf0] }
 0x362   :  { %v12397_v55 = vld [vmem:[#allocation11 + $0xa80] sm:$0xf]  ;;  %v12142_v26 = vor.u32 %v14159_v46, %v12141_v50  ;;  %7513 = vmatpush.bf16.msrb.mxu2 %v12718_v30  ;;  %v15020_v50 = vpack.c.bf16 %v4331_v43, %v4331_v43  ;;  %v11506_v46 = vor.u32 %v13995_v27, %v11503_v1  ;;  %v11154_v27 = vor.u32 %v13907_v13, %v11151_v17  ;;  %v14019_v13 = vld [vmem:[#allocation11 + $0x444] sm:$0xf] }
 0x363   :  { %v14223_v54 = vld [vmem:[#allocation11 + $0xa9c] sm:$0xf0]  ;;  %v11599_v17 = vld [vmem:[#allocation11 + $0x460] sm:$0xf0] }
 0x364   :  { %v12685_v37 = vld [vmem:[#allocation11 + $0xcc0] sm:$0xf]  ;;  %v12398_v58 = vor.u32 %v14223_v54, %v12397_v55  ;;  %7489 = vmatpush.bf16.msrb.mxu0 %v12142_v26  ;;  %v13923_v55 = vld [vmem:[#allocation11 + $0x144] sm:$0xf] }
 0x365   :  { %v14295_v44 = vld [vmem:[#allocation11 + $0xcdc] sm:$0xf0]  ;;  %v11215_v54 = vld [vmem:[#allocation11 + $0x160] sm:$0xf0] }
 0x366   :  { %v12109_v16 = vld [vmem:[#allocation11 + $0x840] sm:$0xf]  ;;  %v12686_v57 = vor.u32 %v14295_v44, %v12685_v37  ;;  %7502 = vmatpush.bf16.msrb.mxu1 %v12398_v58  ;;  %v4155_v37 = vpop.f32.mrf.mxu2  ;;  %v11794_v44 = vor.u32 %v14067_v42, %v11791_v32  ;;  %v11471_v26 = vld [vmem:[#allocation11 + $0x360] sm:$0xf0] }
 0x367   :  { %v14151_v25 = vld [vmem:[#allocation11 + $0x85c] sm:$0xf0]  ;;  %v11474_v63 = vor.u32 %v13987_v36, %v11471_v26  ;;  %v13955_v36 = vld [vmem:[#allocation11 + $0x244] sm:$0xf] }
 0x368   :  { %v12365_v60 = vld [vmem:[#allocation11 + $0xa40] sm:$0xf]  ;;  %v12110_v12 = vor.u32 %v14151_v25, %v12109_v16  ;;  %7514 = vmatpush.bf16.msrb.mxu2 %v12686_v57  ;;  %v4168_v16 = vpop.f32.mrf.mxu3  ;;  %v14059_v25 = vld [vmem:[#allocation11 + $0x584] sm:$0xf] }
 0x369   :  { %v14215_v62 = vld [vmem:[#allocation11 + $0xa5c] sm:$0xf0]  ;;  %v11759_v57 = vld [vmem:[#allocation11 + $0x5a0] sm:$0xf0] }
 0x36a   :  { %v12653_v28 = vld [vmem:[#allocation11 + $0xc80] sm:$0xf]  ;;  %v12366_v4 = vor.u32 %v14215_v62, %v12365_v60  ;;  %7490 = vmatpush.bf16.msrb.mxu0 %v12110_v12  ;;  %v11218_v62 = vor.u32 %v13923_v55, %v11215_v54  ;;  %v4128_v12 = vadd.f32 %v15005_v45, %v924_v33  ;;  %v11663_v33 = vld [vmem:[#allocation11 + $0x4e0] sm:$0xf0] }
 0x36b   :  { %v14287_v0 = vld [vmem:[#allocation11 + $0xc9c] sm:$0xf0]  ;;  %v13891_v55 = vld [vmem:[#allocation11 + $0x44] sm:$0xf] }
 0x36c   :  { %v12077_v49 = vld [vmem:[#allocation11 + $0x800] sm:$0xf]  ;;  %v12654_v9 = vor.u32 %v14287_v0, %v12653_v28  ;;  %7503 = vmatpush.bf16.msrb.mxu1 %v12366_v4  ;;  %v13915_v28 = vld [vmem:[#allocation11 + $0x104] sm:$0xf] }
 0x36d   :  { %v14143_v24 = vld [vmem:[#allocation11 + $0x81c] sm:$0xf0]  ;;  %v11183_v0 = vld [vmem:[#allocation11 + $0x120] sm:$0xf0] }
 0x36e   :  { %v12333_v5 = vld [vmem:[#allocation11 + $0xa00] sm:$0xf]  ;;  %v12078_v19 = vor.u32 %v14143_v24, %v12077_v49  ;;  %7515 = vmatpush.bf16.msrb.mxu2 %v12654_v9  ;;  %v11762_v49 = vor.u32 %v14059_v25, %v11759_v57  ;;  %v11186_v10 = vor.u32 %v13915_v28, %v11183_v0  ;;  %v11087_v54 = vld [vmem:[#allocation11 + $0x60] sm:$0xf0] }
 0x36f   :  { %v14207_v7 = vld [vmem:[#allocation11 + $0xa1c] sm:$0xf0]  ;;  %v11343_v26 = vld [vmem:[#allocation11 + $0x260] sm:$0xf0] }
 0x370   :  { %v12621_v39 = vld [vmem:[#allocation11 + $0xc40] sm:$0xf]  ;;  %v12334_v52 = vor.u32 %v14207_v7, %v12333_v5  ;;  %7491 = vmatpush.bf16.msrb.mxu0 %v12078_v19  ;;  %v14051_v5 = vld [vmem:[#allocation11 + $0x544] sm:$0xf]  ;;  %v11346_v2 = vor.u32 %v13955_v36, %v11343_v26 }
 0x371   :  { %v14279_v18 = vld [vmem:[#allocation11 + $0xc5c] sm:$0xf0]  ;;  %v11727_v7 = vld [vmem:[#allocation11 + $0x560] sm:$0xf0] }
 0x372   :  { %v12622_v14 = vor.u32 %v14279_v18, %v12621_v39  ;;  %v12589_v29 = vld [vmem:[#allocation11 + $0xc00] sm:$0xf]  ;;  %7504 = vmatpush.bf16.msrb.mxu1 %v12334_v52  ;;  %v13971_v39 = vld [vmem:[#allocation11 + $0x2c4] sm:$0xf]  ;;  %v4141_v18 = vadd.f32 %v15007_v41, %v4128_v12  ;;  %v11730_v45 = vor.u32 %v14051_v5, %v11727_v7  ;;  %v4179_v52 = vpop.f32.mrf.mxu0 }
 0x373   :  { %v14271_v6 = vld [vmem:[#allocation11 + $0xc1c] sm:$0xf0]  ;;  %7492 = vmatmul.bf16.vlgmr.msrb.gmra.mxu0 %v15017_v53  ;;  %v11407_v19 = vld [vmem:[#allocation11 + $0x2e0] sm:$0xf0] }
 0x374   :  { %v13069_v38 = vld [vmem:[#allocation11 + $0xfc0] sm:$0xf]  ;;  %7536 = vmatpush.bf16.msra.mxu0 %v11282_v21  ;;  %7516 = vmatpush.bf16.msrb.mxu2 %v12622_v14  ;;  %v12590_v30 = vor.u32 %v14271_v6, %v12589_v29  ;;  %v14043_v21 = vld [vmem:[#allocation11 + $0x504] sm:$0xf]  ;;  %v4192_v14 = vpop.f32.mrf.mxu1  ;;  %v11410_v1 = vor.u32 %v13971_v39, %v11407_v19 }
 0x375   :  { %v14391_v40 = vld [vmem:[#allocation11 + $0xfdc] sm:$0xf0]  ;;  %7505 = vmatmul.bf16.vlgmr.msrb.gmra.mxu1 %v15020_v50  ;;  %v13899_v29 = vld [vmem:[#allocation11 + $0x84] sm:$0xf] }
 0x376   :  { %v13070_v47 = vor.u32 %v14391_v40, %v13069_v38  ;;  %7549 = vmatpush.bf16.msra.mxu1 %v11538_v34  ;;  %v13037_v56 = vld [vmem:[#allocation11 + $0xf80] sm:$0xf]  ;;  %v4154_v34 = vadd.f32 %v15012_v15, %v4141_v18  ;;  %v11119_v6 = vld [vmem:[#allocation11 + $0xa0] sm:$0xf0]  ;;  %v11698_v38 = vor.u32 %v14043_v21, %v11695_v22 }
 0x377   :  { %v14383_v58 = vld [vmem:[#allocation11 + $0xf9c] sm:$0xf0]  ;;  %v13963_v41 = vld [vmem:[#allocation11 + $0x284] sm:$0xf]  ;;  %v11122_v15 = vor.u32 %v13899_v29, %v11119_v6 }
 0x378   :  { %7523 = vmatpush.bf16.msrb.mxu3 %v13070_v47  ;;  %v13038_v60 = vor.u32 %v14383_v58, %v13037_v56  ;;  %7537 = vmatpush.bf16.msra.mxu0 %v11250_v48  ;;  %v13005_v4 = vld [vmem:[#allocation11 + $0xf40] sm:$0xf]  ;;  %v11375_v40 = vld [vmem:[#allocation11 + $0x2a0] sm:$0xf0] }
 0x379   :  { %7517 = vmatpush.bf16.msrb.mxu2 %v12590_v30  ;;  %v14375_v24 = vld [vmem:[#allocation11 + $0xf5c] sm:$0xf0]  ;;  %v14035_v47 = vld [vmem:[#allocation11 + $0x4c4] sm:$0xf]  ;;  %v11378_v30 = vor.u32 %v13963_v41, %v11375_v40 }
 0x37a   :  { %7550 = vmatpush.bf16.msra.mxu1 %v11506_v46  ;;  %v13006_v9 = vor.u32 %v14375_v24, %v13005_v4  ;;  %v12973_v35 = vld [vmem:[#allocation11 + $0xf00] sm:$0xf]  ;;  %v4167_v46 = vadd.f32 %v15014_v51, %v4154_v34  ;;  %v4181_v16 = vpop.f32.mrf.mxu0  ;;  %v14027_v25 = vld [vmem:[#allocation11 + $0x484] sm:$0xf]  ;;  %v11090_v51 = vor.u32 %v13891_v55, %v11087_v54 }
 0x37b   :  { %v14367_v43 = vld [vmem:[#allocation11 + $0xf1c] sm:$0xf0]  ;;  %v11631_v57 = vld [vmem:[#allocation11 + $0x4a0] sm:$0xf0] }
 0x37c   :  { %7524 = vmatpush.bf16.msrb.mxu3 %v13038_v60  ;;  %7538 = vmatpush.bf16.msra.mxu0 %v11218_v62  ;;  %v12974_v23 = vor.u32 %v14367_v43, %v12973_v35  ;;  %v12941_v42 = vld [vmem:[#allocation11 + $0xec0] sm:$0xf]  ;;  %v4180_v37 = vadd.f32 %v4179_v52, %v4167_v46  ;;  %v4194_v62 = vpop.f32.mrf.mxu1  ;;  %v11055_v28 = vld [vmem:[#allocation11 + $0x20] sm:$0xf0]  ;;  %v11634_v24 = vor.u32 %v14027_v25, %v11631_v57 }
 0x37d   :  { %7562 = vmatpush.bf16.msra.mxu2 %v11794_v44  ;;  %v14359_v32 = vld [vmem:[#allocation11 + $0xedc] sm:$0xf0]  ;;  %v11666_v44 = vor.u32 %v14035_v47, %v11663_v33  ;;  %v13947_v0 = vld [vmem:[#allocation11 + $0x204] sm:$0xf] }
 0x37e   :  { %7551 = vmatpush.bf16.msra.mxu1 %v11474_v63  ;;  %v12942_v48 = vor.u32 %v14359_v32, %v12941_v42  ;;  %v12909_v56 = vld [vmem:[#allocation11 + $0xe80] sm:$0xf]  ;;  %v13883_v63 = vld [vmem:[#allocation11 + $0x4] sm:$0xf]  ;;  %v4193_v4 = vadd.f32 %v4192_v14, %v4180_v37 }
 0x37f   :  { %v14351_v58 = vld [vmem:[#allocation11 + $0xe9c] sm:$0xf0]  ;;  %v11311_v12 = vld [vmem:[#allocation11 + $0x220] sm:$0xf0]  ;;  %v11058_v19 = vor.u32 %v13883_v63, %v11055_v28 }
 0x380   :  { %7525 = vmatpush.bf16.msrb.mxu3 %v13006_v9  ;;  %7539 = vmatpush.bf16.msra.mxu0 %v11186_v10  ;;  %v12910_v60 = vor.u32 %v14351_v58, %v12909_v56  ;;  %v14259_v5 = vld [vmem:[#allocation11 + $0xbc4] sm:$0xf]  ;;  %v12877_v7 = vld [vmem:[#allocation11 + $0xe40] sm:$0xf]  ;;  %v4205_v10 = vpop.f32.mrf.mxu2  ;;  %v11314_v43 = vor.u32 %v13947_v0, %v11311_v12 }
 0x381   :  { %7563 = vmatpush.bf16.msra.mxu2 %v11762_v49  ;;  %v14195_v49 = vld [vmem:[#allocation11 + $0x9c4] sm:$0xf]  ;;  %v14343_v9 = vld [vmem:[#allocation11 + $0xe5c] sm:$0xf0]  ;;  %v4206_v18 = vadd.f32 %v4205_v10, %v4193_v4 }
 0x382   :  { %7552 = vmatpush.bf16.msra.mxu1 %v11442_v11  ;;  %v12559_v11 = vld [vmem:[#allocation11 + $0xbe0] sm:$0xf0]  ;;  %v12878_v39 = vor.u32 %v14343_v9, %v12877_v7  ;;  %v12306_v52 = vor.u32 %v14195_v49, %v12303_v3  ;;  %v12845_v29 = vld [vmem:[#allocation11 + $0xe00] sm:$0xf] }
 0x383   :  { %v14187_v35 = vld [vmem:[#allocation11 + $0x984] sm:$0xf]  ;;  %v12562_v14 = vor.u32 %v14259_v5, %v12559_v11  ;;  %v14335_v6 = vld [vmem:[#allocation11 + $0xe1c] sm:$0xf0] }
 0x384   :  { %7526 = vmatpush.bf16.msrb.mxu3 %v12974_v23  ;;  %7540 = vmatpush.bf16.msra.mxu0 %v11154_v27  ;;  %v12271_v21 = vld [vmem:[#allocation11 + $0x9a0] sm:$0xf0]  ;;  %v11602_v27 = vor.u32 %v14019_v13, %v11599_v17 }
 0x385   :  { %7564 = vmatpush.bf16.msra.mxu2 %v11730_v45  ;;  %v4218_v45 = vpop.f32.mrf.mxu3  ;;  %v14251_v22 = vld [vmem:[#allocation11 + $0xb84] sm:$0xf] }
 0x386   :  { %7553 = vmatpush.bf16.msra.mxu1 %v11410_v1  ;;  %v12527_v23 = vld [vmem:[#allocation11 + $0xba0] sm:$0xf0]  ;;  %v4219_v34 = vadd.f32 %v4218_v45, %v4206_v18 }
 0x387   :  { %v14011_v1 = vld [vmem:[#allocation11 + $0x404] sm:$0xf] }
 0x388   :  { %7527 = vmatpush.bf16.msrb.mxu3 %v12942_v48  ;;  %7541 = vmatpush.bf16.msra.mxu0 %v11122_v15  ;;  %v11567_v41 = vld [vmem:[#allocation11 + $0x420] sm:$0xf0]  ;;  %v4332_v32 = vmax.f32 %v4219_v34, 0.0  ;;  %v12274_v48 = vor.u32 %v14187_v35, %v12271_v21  ;;  %v15033_v35 = vpop.f32.mrf.mxu0  ;;  %v15035_v21 = vpop.f32.mrf.mxu1 }
 0x389   :  { %7565 = vmatpush.bf16.msra.mxu2 %v11698_v38  ;;  %v12846_v38 = vor.u32 %v14335_v6, %v12845_v29  ;;  %v14131_v40 = vld [vmem:[#allocation11 + $0x7c4] sm:$0xf]  ;;  %v11570_v55 = vor.u32 %v14011_v1, %v11567_v41 }
 0x38a   :  { %7554 = vmatpush.bf16.msra.mxu1 %v11378_v30  ;;  %v12047_v42 = vld [vmem:[#allocation11 + $0x7e0] sm:$0xf0]  ;;  %v15028_v15 = vpack.c.bf16 %v4332_v32, %v4332_v32  ;;  %v12530_v30 = vor.u32 %v14251_v22, %v12527_v23 }
 0x38b   :  { %v14323_v47 = vld [vmem:[#allocation11 + $0xdc4] sm:$0xf]  ;;  %v12050_v46 = vor.u32 %v14131_v40, %v12047_v42 }
 0x38c   :  { %7528 = vmatpush.bf16.msrb.mxu3 %v12910_v60  ;;  %7542 = vmatpush.bf16.msra.mxu0 %v11090_v51  ;;  %v12815_v33 = vld [vmem:[#allocation11 + $0xde0] sm:$0xf0] }
 0x38d   :  { %7566 = vmatpush.bf16.msra.mxu2 %v11666_v44  ;;  %v14179_v54 = vld [vmem:[#allocation11 + $0x944] sm:$0xf]  ;;  %v4207_v44 = vpop.f32.mrf.mxu2  ;;  %v12818_v26 = vor.u32 %v14323_v47, %v12815_v33  ;;  %v4220_v25 = vpop.f32.mrf.mxu3 }
 0x38e   :  { %7555 = vmatpush.bf16.msra.mxu1 %v11346_v2  ;;  %v12239_v36 = vld [vmem:[#allocation11 + $0x960] sm:$0xf0]  ;;  %7518 = vmatmul.bf16.vlgmr.msrb.gmra.mxu2 %v15028_v15 }
 0x38f   :  { %v14243_v37 = vld [vmem:[#allocation11 + $0xb44] sm:$0xf]  ;;  %v12242_v62 = vor.u32 %v14179_v54, %v12239_v36 }
 0x390   :  { %7529 = vmatpush.bf16.msrb.mxu3 %v12878_v39  ;;  %7543 = vmatpush.bf16.msra.mxu0 %v11058_v19  ;;  %v12495_v56 = vld [vmem:[#allocation11 + $0xb60] sm:$0xf0]  ;;  %v4233_v44 = vpop.f32.mrf.mxu0 }
 0x391   :  { %7567 = vmatpush.bf16.msra.mxu2 %v11634_v24  ;;  %v14123_v58 = vld [vmem:[#allocation11 + $0x784] sm:$0xf]  ;;  %v12498_v63 = vor.u32 %v14243_v37, %v12495_v56  ;;  %v11189_v44 = vld [vmem:[#allocation11 + $0x108] sm:$0xf] }
 0x392   :  { %7556 = vmatpush.bf16.msra.mxu1 %v11314_v43  ;;  %v12015_v16 = vld [vmem:[#allocation11 + $0x7a0] sm:$0xf0] }
 0x393   :  { %7544 = vmatmul.bf16.vlgmr.msra.gmra.mxu0 %v14987_v59  ;;  %v14315_v57 = vld [vmem:[#allocation11 + $0xd84] sm:$0xf]  ;;  %v12018_v51 = vor.u32 %v14123_v58, %v12015_v16  ;;  %v4246_v58 = vpop.f32.mrf.mxu1 }
 0x394   :  { %7588 = vmatpush.bf16.msrb.mxu0 %v12306_v52  ;;  %7530 = vmatpush.bf16.msrb.mxu3 %v12846_v38  ;;  %v12783_v60 = vld [vmem:[#allocation11 + $0xda0] sm:$0xf0]  ;;  %v11445_v58 = vld [vmem:[#allocation11 + $0x308] sm:$0xf] }
 0x395   :  { %7568 = vmatpush.bf16.msra.mxu2 %v11602_v27  ;;  %7557 = vmatmul.bf16.vlgmr.msra.gmra.mxu1 %v14989_v61  ;;  %v14171_v28 = vld [vmem:[#allocation11 + $0x904] sm:$0xf]  ;;  %v12786_v12 = vor.u32 %v14315_v57, %v12783_v60 }
 0x396   :  { %7601 = vmatpush.bf16.msrb.mxu1 %v12562_v14  ;;  %v12207_v0 = vld [vmem:[#allocation11 + $0x920] sm:$0xf0] }
 0x397   :  { %v14235_v2 = vld [vmem:[#allocation11 + $0xb04] sm:$0xf]  ;;  %v12210_v7 = vor.u32 %v14171_v28, %v12207_v0  ;;  %v11285_v28 = vld [vmem:[#allocation11 + $0x1c8] sm:$0xf] }
 0x398   :  { %7589 = vmatpush.bf16.msrb.mxu0 %v12274_v48  ;;  %7575 = vmatpush.bf16.msra.mxu3 %v12050_v46  ;;  %v12463_v49 = vld [vmem:[#allocation11 + $0xb20] sm:$0xf0]  ;;  %v13944_v0 = vld [vmem:[#allocation11 + $0x1e4] sm:$0xf0] }
 0x399   :  { %7569 = vmatpush.bf16.msra.mxu2 %v11570_v55  ;;  %v14115_v3 = vld [vmem:[#allocation11 + $0x744] sm:$0xf]  ;;  %v12466_v10 = vor.u32 %v14235_v2, %v12463_v49 }
 0x39a   :  { %7602 = vmatpush.bf16.msrb.mxu1 %v12530_v30  ;;  %v11983_v4 = vld [vmem:[#allocation11 + $0x760] sm:$0xf0] }
 0x39b   :  { %v14307_v24 = vld [vmem:[#allocation11 + $0xd44] sm:$0xf]  ;;  %v11986_v9 = vor.u32 %v14115_v3, %v11983_v4  ;;  %v15038_v4 = vpop.f32.mrf.mxu2 }
 0x39c   :  { %v12751_v5 = vld [vmem:[#allocation11 + $0xd60] sm:$0xf0]  ;;  %7590 = vmatpush.bf16.msrb.mxu0 %v12242_v62  ;;  %7576 = vmatpush.bf16.msra.mxu3 %v12018_v51 }
 0x39d   :  { %7614 = vmatpush.bf16.msrb.mxu2 %v12818_v26  ;;  %v14163_v11 = vld [vmem:[#allocation11 + $0x8c4] sm:$0xf]  ;;  %v12754_v39 = vor.u32 %v14307_v24, %v12751_v5  ;;  %v14008_v24 = vld [vmem:[#allocation11 + $0x3e4] sm:$0xf0] }
 0x39e   :  { %7603 = vmatpush.bf16.msrb.mxu1 %v12498_v63  ;;  %v12175_v13 = vld [vmem:[#allocation11 + $0x8e0] sm:$0xf0]  ;;  %7570 = vmatmul.bf16.vlgmr.msra.gmra.mxu2 %v14997_v20 }
 0x39f   :  { %v14227_v17 = vld [vmem:[#allocation11 + $0xac4] sm:$0xf]  ;;  %v12178_v22 = vor.u32 %v14163_v11, %v12175_v13 }
 0x3a0   :  { %v12431_v18 = vld [vmem:[#allocation11 + $0xae0] sm:$0xf0]  ;;  %7591 = vmatpush.bf16.msrb.mxu0 %v12210_v7  ;;  %7577 = vmatpush.bf16.msra.mxu3 %v11986_v9  ;;  %v15040_v9 = vpop.f32.mrf.mxu3 }
 0x3a1   :  { %7615 = vmatpush.bf16.msrb.mxu2 %v12786_v12  ;;  %v14107_v45 = vld [vmem:[#allocation11 + $0x704] sm:$0xf]  ;;  %v12434_v34 = vor.u32 %v14227_v17, %v12431_v18  ;;  %v11541_v12 = vld [vmem:[#allocation11 + $0x3c8] sm:$0xf]  ;;  %v11286_v17 = vor.u32 %v13944_v0, %v11285_v28 }
 0x3a2   :  { %v11951_v19 = vld [vmem:[#allocation11 + $0x720] sm:$0xf0]  ;;  %7604 = vmatpush.bf16.msrb.mxu1 %v12466_v10  ;;  %v13936_v18 = vld [vmem:[#allocation11 + $0x1a4] sm:$0xf0] }
 0x3a3   :  { %v14299_v43 = vld [vmem:[#allocation11 + $0xd04] sm:$0xf]  ;;  %v11954_v23 = vor.u32 %v14107_v45, %v11951_v19  ;;  %v11542_v45 = vor.u32 %v14008_v24, %v11541_v12  ;;  %v4283_v12 = vpop.f32.mrf.mxu0 }
 0x3a4   :  { %v12719_v52 = vld [vmem:[#allocation11 + $0xd20] sm:$0xf0]  ;;  %7592 = vmatpush.bf16.msrb.mxu0 %v12178_v22 }
 0x3a5   :  { %v14155_v14 = vld [vmem:[#allocation11 + $0x884] sm:$0xf]  ;;  %7616 = vmatpush.bf16.msrb.mxu2 %v12754_v39  ;;  %v12722_v29 = vor.u32 %v14299_v43, %v12719_v52  ;;  %7578 = vmatpush.bf16.msra.mxu3 %v11954_v23  ;;  %v11253_v39 = vld [vmem:[#allocation11 + $0x188] sm:$0xf] }
 0x3a6   :  { %v12143_v27 = vld [vmem:[#allocation11 + $0x8a0] sm:$0xf0]  ;;  %7605 = vmatpush.bf16.msrb.mxu1 %v12434_v34  ;;  %v11509_v43 = vld [vmem:[#allocation11 + $0x388] sm:$0xf] }
 0x3a7   :  { %v14219_v1 = vld [vmem:[#allocation11 + $0xa84] sm:$0xf]  ;;  %v12146_v32 = vor.u32 %v14155_v14, %v12143_v27  ;;  %v14000_v23 = vld [vmem:[#allocation11 + $0x3a4] sm:$0xf0] }
 0x3a8   :  { %v12399_v6 = vld [vmem:[#allocation11 + $0xaa0] sm:$0xf0]  ;;  %v11797_v27 = vld [vmem:[#allocation11 + $0x5c8] sm:$0xf] }
 0x3a9   :  { %v14099_v41 = vld [vmem:[#allocation11 + $0x6c4] sm:$0xf]  ;;  %v12402_v33 = vor.u32 %v14219_v1, %v12399_v6  ;;  %7617 = vmatpush.bf16.msrb.mxu2 %v12722_v29  ;;  %7593 = vmatpush.bf16.msrb.mxu0 %v12146_v32  ;;  %v14072_v1 = vld [vmem:[#allocation11 + $0x5e4] sm:$0xf0]  ;;  %v11254_v6 = vor.u32 %v13936_v18, %v11253_v39  ;;  %v925_v32 = vperm.slane %v14979_v31, 7 }
 0x3aa   :  { %v11919_v38 = vld [vmem:[#allocation11 + $0x6e0] sm:$0xf0]  ;;  %v11381_v39 = vld [vmem:[#allocation11 + $0x288] sm:$0xf] }
 0x3ab   :  { %v14291_v40 = vld [vmem:[#allocation11 + $0xcc4] sm:$0xf]  ;;  %v11922_v47 = vor.u32 %v14099_v41, %v11919_v38  ;;  %7606 = vmatpush.bf16.msrb.mxu1 %v12402_v33  ;;  %v11510_v41 = vor.u32 %v14000_v23, %v11509_v43  ;;  %v11798_v33 = vor.u32 %v14072_v1, %v11797_v27  ;;  %v4232_v31 = vadd.f32 %v15033_v35, %v925_v32  ;;  %v13976_v35 = vld [vmem:[#allocation11 + $0x2e4] sm:$0xf0]  ;;  %v4285_v1 = vpop.f32.mrf.mxu0 }
 0x3ac   :  { %v12687_v42 = vld [vmem:[#allocation11 + $0xce0] sm:$0xf0]  ;;  %v11669_v18 = vld [vmem:[#allocation11 + $0x4c8] sm:$0xf] }
 0x3ad   :  { %v14147_v48 = vld [vmem:[#allocation11 + $0x844] sm:$0xf]  ;;  %v12690_v55 = vor.u32 %v14291_v40, %v12687_v42  ;;  %7579 = vmatpush.bf16.msra.mxu3 %v11922_v47  ;;  %v11221_v40 = vld [vmem:[#allocation11 + $0x148] sm:$0xf]  ;;  %v4259_v47 = vpop.f32.mrf.mxu2  ;;  %v4245_v28 = vadd.f32 %v15035_v21, %v4232_v31 }
 0x3ae   :  { %v12111_v46 = vld [vmem:[#allocation11 + $0x860] sm:$0xf0]  ;;  %v13928_v42 = vld [vmem:[#allocation11 + $0x164] sm:$0xf0] }
 0x3af   :  { %v14211_v30 = vld [vmem:[#allocation11 + $0xa44] sm:$0xf]  ;;  %v12114_v16 = vor.u32 %v14147_v48, %v12111_v46  ;;  %7618 = vmatpush.bf16.msrb.mxu2 %v12690_v55  ;;  %v11477_v48 = vld [vmem:[#allocation11 + $0x348] sm:$0xf]  ;;  %v4258_v24 = vadd.f32 %v15038_v4, %v4245_v28 }
 0x3b0   :  { %v12367_v54 = vld [vmem:[#allocation11 + $0xa60] sm:$0xf0]  ;;  %v13992_v46 = vld [vmem:[#allocation11 + $0x364] sm:$0xf0] }
 0x3b1   :  { %v14091_v36 = vld [vmem:[#allocation11 + $0x684] sm:$0xf]  ;;  %v12370_v51 = vor.u32 %v14211_v30, %v12367_v54  ;;  %7594 = vmatpush.bf16.msrb.mxu0 %v12114_v16  ;;  %v4272_v30 = vpop.f32.mrf.mxu3  ;;  %v11765_v55 = vld [vmem:[#allocation11 + $0x588] sm:$0xf] }
 0x3b2   :  { %v11887_v37 = vld [vmem:[#allocation11 + $0x6a0] sm:$0xf0]  ;;  %v14064_v54 = vld [vmem:[#allocation11 + $0x5a4] sm:$0xf0] }
 0x3b3   :  { %v14283_v26 = vld [vmem:[#allocation11 + $0xc84] sm:$0xf]  ;;  %v11890_v62 = vor.u32 %v14091_v36, %v11887_v37  ;;  %7607 = vmatpush.bf16.msrb.mxu1 %v12370_v51  ;;  %v11222_v36 = vor.u32 %v13928_v42, %v11221_v40  ;;  %v11478_v37 = vor.u32 %v13992_v46, %v11477_v48  ;;  %v13984_v16 = vld [vmem:[#allocation11 + $0x324] sm:$0xf0] }
 0x3b4   :  { %v12655_v56 = vld [vmem:[#allocation11 + $0xca0] sm:$0xf0]  ;;  %v11157_v51 = vld [vmem:[#allocation11 + $0xc8] sm:$0xf] }
 0x3b5   :  { %v14139_v25 = vld [vmem:[#allocation11 + $0x804] sm:$0xf]  ;;  %v12658_v2 = vor.u32 %v14283_v26, %v12655_v56  ;;  %7580 = vmatpush.bf16.msra.mxu3 %v11890_v62  ;;  %v13920_v26 = vld [vmem:[#allocation11 + $0x124] sm:$0xf0]  ;;  %v11766_v56 = vor.u32 %v14064_v54, %v11765_v55  ;;  %v11446_v62 = vor.u32 %v13984_v16, %v11445_v58  ;;  %v4309_v54 = vpop.f32.mrf.mxu2 }
 0x3b6   :  { %v12079_v57 = vld [vmem:[#allocation11 + $0x820] sm:$0xf0]  ;;  %v13968_v21 = vld [vmem:[#allocation11 + $0x2a4] sm:$0xf0] }
 0x3b7   :  { %v14203_v60 = vld [vmem:[#allocation11 + $0xa04] sm:$0xf]  ;;  %v12082_v10 = vor.u32 %v14139_v25, %v12079_v57  ;;  %7619 = vmatpush.bf16.msrb.mxu2 %v12658_v2  ;;  %v11733_v25 = vld [vmem:[#allocation11 + $0x548] sm:$0xf] }
 0x3b8   :  { %v12335_v63 = vld [vmem:[#allocation11 + $0xa20] sm:$0xf0]  ;;  %v14056_v57 = vld [vmem:[#allocation11 + $0x564] sm:$0xf0] }
 0x3b9   :  { %v14083_v49 = vld [vmem:[#allocation11 + $0x644] sm:$0xf]  ;;  %v12338_v13 = vor.u32 %v14203_v60, %v12335_v63  ;;  %7595 = vmatpush.bf16.msrb.mxu0 %v12082_v10  ;;  %v11190_v60 = vor.u32 %v13920_v26, %v11189_v44  ;;  %v13912_v63 = vld [vmem:[#allocation11 + $0xe4] sm:$0xf0]  ;;  %v11734_v0 = vor.u32 %v14056_v57, %v11733_v25  ;;  %v4322_v31 = vpop.f32.mrf.mxu3 }
 0x3ba   :  { %v11855_v3 = vld [vmem:[#allocation11 + $0x660] sm:$0xf0]  ;;  %v11413_v2 = vld [vmem:[#allocation11 + $0x2c8] sm:$0xf] }
 0x3bb   :  { %v14275_v5 = vld [vmem:[#allocation11 + $0xc44] sm:$0xf]  ;;  %v11858_v11 = vor.u32 %v14083_v49, %v11855_v3  ;;  %7608 = vmatpush.bf16.msrb.mxu1 %v12338_v13  ;;  %v11701_v49 = vld [vmem:[#allocation11 + $0x508] sm:$0xf]  ;;  %v11414_v10 = vor.u32 %v13976_v35, %v11413_v2 }
 0x3bc   :  { %v12623_v7 = vld [vmem:[#allocation11 + $0xc60] sm:$0xf0]  ;;  %7596 = vmatmul.bf16.vlgmr.msrb.gmra.mxu0 %v15017_v53  ;;  %v14048_v3 = vld [vmem:[#allocation11 + $0x524] sm:$0xf0] }
 0x3bd   :  { %v12626_v19 = vor.u32 %v14275_v5, %v12623_v7  ;;  %v14075_v52 = vld [vmem:[#allocation11 + $0x604] sm:$0xf]  ;;  %7581 = vmatpush.bf16.msra.mxu3 %v11858_v11  ;;  %7640 = vmatpush.bf16.msra.mxu0 %v11286_v17  ;;  %v4296_v5 = vpop.f32.mrf.mxu1  ;;  %v11158_v7 = vor.u32 %v13912_v63, %v11157_v51  ;;  %v11125_v11 = vld [vmem:[#allocation11 + $0x88] sm:$0xf]  ;;  %v11702_v17 = vor.u32 %v14048_v3, %v11701_v49 }
 0x3be   :  { %v11823_v22 = vld [vmem:[#allocation11 + $0x620] sm:$0xf0]  ;;  %7609 = vmatmul.bf16.vlgmr.msrb.gmra.mxu1 %v15020_v50  ;;  %v13904_v13 = vld [vmem:[#allocation11 + $0xa4] sm:$0xf0] }
 0x3bf   :  { %v14267_v34 = vld [vmem:[#allocation11 + $0xc04] sm:$0xf]  ;;  %v11826_v29 = vor.u32 %v14075_v52, %v11823_v22  ;;  %7653 = vmatpush.bf16.msra.mxu1 %v11542_v45  ;;  %7620 = vmatpush.bf16.msrb.mxu2 %v12626_v19  ;;  %v14040_v45 = vld [vmem:[#allocation11 + $0x4e4] sm:$0xf0]  ;;  %v4271_v19 = vadd.f32 %v15040_v9, %v4258_v24  ;;  %v11126_v43 = vor.u32 %v13904_v13, %v11125_v11 }
 0x3c0   :  { %v12591_v14 = vld [vmem:[#allocation11 + $0xc20] sm:$0xf0]  ;;  %v11382_v52 = vor.u32 %v13968_v21, %v11381_v39  ;;  %v11093_v4 = vld [vmem:[#allocation11 + $0x48] sm:$0xf] }
 0x3c1   :  { %v12594_v38 = vor.u32 %v14267_v34, %v12591_v14  ;;  %7582 = vmatpush.bf16.msra.mxu3 %v11826_v29  ;;  %7641 = vmatpush.bf16.msra.mxu0 %v11254_v6  ;;  %v13896_v22 = vld [vmem:[#allocation11 + $0x64] sm:$0xf0]  ;;  %v4284_v23 = vadd.f32 %v4283_v12, %v4271_v19  ;;  %v11670_v34 = vor.u32 %v14040_v45, %v11669_v18  ;;  %v14387_v25 = vld [vmem:[#allocation11 + $0xfc4] sm:$0xf]  ;;  %v4311_v18 = vpop.f32.mrf.mxu2 }
 0x3c2   :  { %v11349_v14 = vld [vmem:[#allocation11 + $0x248] sm:$0xf]  ;;  %v13071_v57 = vld [vmem:[#allocation11 + $0xfe0] sm:$0xf0] }
 0x3c3   :  { %7654 = vmatpush.bf16.msra.mxu1 %v11510_v41  ;;  %7621 = vmatpush.bf16.msrb.mxu2 %v12594_v38  ;;  %v13960_v27 = vld [vmem:[#allocation11 + $0x264] sm:$0xf0]  ;;  %v11094_v38 = vor.u32 %v13896_v22, %v11093_v4  ;;  %v13039_v39 = vld [vmem:[#allocation11 + $0xfa0] sm:$0xf0]  ;;  %v4324_v4 = vpop.f32.mrf.mxu3 }
 0x3c4   :  { %v11637_v29 = vld [vmem:[#allocation11 + $0x488] sm:$0xf]  ;;  %v11350_v9 = vor.u32 %v13960_v27, %v11349_v14  ;;  %v14371_v14 = vld [vmem:[#allocation11 + $0xf44] sm:$0xf] }
 0x3c5   :  { %7642 = vmatpush.bf16.msra.mxu0 %v11222_v36  ;;  %v14032_v6 = vld [vmem:[#allocation11 + $0x4a4] sm:$0xf0]  ;;  %v4298_v41 = vpop.f32.mrf.mxu1 }
 0x3c6   :  { %7622 = vmatmul.bf16.vlgmr.msrb.gmra.mxu2 %v15028_v15  ;;  %v11061_v40 = vld [vmem:[#allocation11 + $0x8] sm:$0xf]  ;;  %v11638_v48 = vor.u32 %v14032_v6, %v11637_v29  ;;  %v15055_v29 = vld [vmem:[#allocation13] sm:$0xff] }
 0x3c7   :  { %7666 = vmatpush.bf16.msra.mxu2 %v11798_v33  ;;  %7655 = vmatpush.bf16.msra.mxu1 %v11478_v37  ;;  %v13888_v42 = vld [vmem:[#allocation11 + $0x24] sm:$0xf0]  ;;  %v4297_v33 = vadd.f32 %v4296_v5, %v4284_v23  ;;  %v13074_v5 = vor.u32 %v14387_v25, %v13071_v57  ;;  %v13007_v6 = vld [vmem:[#allocation11 + $0xf60] sm:$0xf0] }
 0x3c8   :  { %v11317_v32 = vld [vmem:[#allocation11 + $0x208] sm:$0xf] }
 0x3c9   :  { %7643 = vmatpush.bf16.msra.mxu0 %v11190_v60  ;;  %v13952_v47 = vld [vmem:[#allocation11 + $0x224] sm:$0xf0]  ;;  %v4310_v26 = vadd.f32 %v4309_v54, %v4297_v33  ;;  %v4856_v33 = vperm.slane %v15055_v29, 0  ;;  %v12975_v54 = vld [vmem:[#allocation11 + $0xf20] sm:$0xf0] }
 0x3ca   :  { %v12309_v46 = vld [vmem:[#allocation11 + $0x9c8] sm:$0xf]  ;;  %v11318_v58 = vor.u32 %v13952_v47, %v11317_v32 }
 0x3cb   :  { %7667 = vmatpush.bf16.msra.mxu2 %v11766_v56  ;;  %7656 = vmatpush.bf16.msra.mxu1 %v11446_v62  ;;  %v14200_v30 = vld [vmem:[#allocation11 + $0x9e4] sm:$0xf0]  ;;  %v11062_v56 = vor.u32 %v13888_v42, %v11061_v40  ;;  %v4323_v60 = vadd.f32 %v4322_v31, %v4310_v26 }
 0x3cc   :  { %v12565_v55 = vld [vmem:[#allocation11 + $0xbc8] sm:$0xf]  ;;  %v12310_v16 = vor.u32 %v14200_v30, %v12309_v46 }
 0x3cd   :  { %7644 = vmatpush.bf16.msra.mxu0 %v11158_v7  ;;  %v14264_v36 = vld [vmem:[#allocation11 + $0xbe4] sm:$0xf0]  ;;  %v4333_v49 = vmax.f32 %v4323_v60, 0.0  ;;  %v7454_v57 = vpop.f32.mrf.mxu1 }
 0x3ce   :  { %v11605_v37 = vld [vmem:[#allocation11 + $0x448] sm:$0xf]  ;;  %v12566_v62 = vor.u32 %v14264_v36, %v12565_v55  ;;  %v14363_v55 = vld [vmem:[#allocation11 + $0xf04] sm:$0xf] }
 0x3cf   :  { %7668 = vmatpush.bf16.msra.mxu2 %v11734_v0  ;;  %7657 = vmatpush.bf16.msra.mxu1 %v11414_v10  ;;  %v14024_v44 = vld [vmem:[#allocation11 + $0x464] sm:$0xf0]  ;;  %v15050_v10 = vpack.c.bf16 %v4333_v49, %v4333_v49  ;;  %v12978_v60 = vor.u32 %v14363_v55, %v12975_v54 }
 0x3d0   :  { %v11606_v51 = vor.u32 %v14024_v44, %v11605_v37  ;;  %v12277_v63 = vld [vmem:[#allocation11 + $0x988] sm:$0xf] }
 0x3d1   :  { %7645 = vmatpush.bf16.msra.mxu0 %v11126_v43  ;;  %v14192_v28 = vld [vmem:[#allocation11 + $0x9a4] sm:$0xf0]  ;;  %7531 = vmatmul.bf16.vlgmr.msrb.gmra.mxu3 %v15050_v10 }
 0x3d2   :  { %v12533_v0 = vld [vmem:[#allocation11 + $0xb88] sm:$0xf]  ;;  %v12278_v7 = vor.u32 %v14192_v28, %v12277_v63  ;;  %7627 = vmatpush.bf16.msrb.mxu3 %v13074_v5  ;;  %v14355_v63 = vld [vmem:[#allocation11 + $0xec4] sm:$0xf] }
 0x3d3   :  { %7669 = vmatpush.bf16.msra.mxu2 %v11702_v17  ;;  %7658 = vmatpush.bf16.msra.mxu1 %v11382_v52  ;;  %v14256_v2 = vld [vmem:[#allocation11 + $0xba4] sm:$0xf0]  ;;  %v14379_v17 = vld [vmem:[#allocation11 + $0xf84] sm:$0xf] }
 0x3d4   :  { %v11573_v35 = vld [vmem:[#allocation11 + $0x408] sm:$0xf]  ;;  %v12534_v11 = vor.u32 %v14256_v2, %v12533_v0  ;;  %v12943_v28 = vld [vmem:[#allocation11 + $0xee0] sm:$0xf0]  ;;  %v7480_v55 = vpop.f32.mrf.mxu3 }
 0x3d5   :  { %7646 = vmatpush.bf16.msra.mxu0 %v11094_v38  ;;  %v14016_v12 = vld [vmem:[#allocation11 + $0x424] sm:$0xf0] }
 0x3d6   :  { %v12821_v3 = vld [vmem:[#allocation11 + $0xdc8] sm:$0xf]  ;;  %v11574_v13 = vor.u32 %v14016_v12, %v11573_v35 }
 0x3d7   :  { %7670 = vmatpush.bf16.msra.mxu2 %v11670_v34  ;;  %7659 = vmatpush.bf16.msra.mxu1 %v11350_v9  ;;  %v14328_v24 = vld [vmem:[#allocation11 + $0xde4] sm:$0xf0]  ;;  %v13042_v34 = vor.u32 %v14379_v17, %v13039_v39  ;;  %v14347_v17 = vld [vmem:[#allocation11 + $0xe84] sm:$0xf] }
 0x3d8   :  { %v12245_v21 = vld [vmem:[#allocation11 + $0x948] sm:$0xf]  ;;  %v12822_v45 = vor.u32 %v14328_v24, %v12821_v3  ;;  %v12911_v39 = vld [vmem:[#allocation11 + $0xea0] sm:$0xf0] }
 0x3d9   :  { %7647 = vmatpush.bf16.msra.mxu0 %v11062_v56  ;;  %v14184_v19 = vld [vmem:[#allocation11 + $0x964] sm:$0xf0]  ;;  %7628 = vmatpush.bf16.msrb.mxu3 %v13042_v34  ;;  %v7441_v56 = vpop.f32.mrf.mxu0  ;;  %v12914_v34 = vor.u32 %v14347_v17, %v12911_v39 }
 0x3da   :  { %v12501_v43 = vld [vmem:[#allocation11 + $0xb48] sm:$0xf]  ;;  %v12246_v27 = vor.u32 %v14184_v19, %v12245_v21  ;;  %v7442_v25 = vadd.f32 %v7441_v56, %v4856_v33  ;;  %v11287_v33 = vld [vmem:[#allocation11 + $0x1e8] sm:$0xf0]  ;;  %v12847_v56 = vld [vmem:[#allocation11 + $0xe20] sm:$0xf0] }
 0x3db   :  { %7671 = vmatpush.bf16.msra.mxu2 %v11638_v48  ;;  %7660 = vmatpush.bf16.msra.mxu1 %v11318_v58  ;;  %v14248_v52 = vld [vmem:[#allocation11 + $0xb64] sm:$0xf0]  ;;  %v13010_v48 = vor.u32 %v14371_v14, %v13007_v6  ;;  %v14339_v14 = vld [vmem:[#allocation11 + $0xe44] sm:$0xf] }
 0x3dc   :  { %7648 = vmatmul.bf16.vlgmr.msra.gmra.mxu0 %v14987_v59  ;;  %v12789_v22 = vld [vmem:[#allocation11 + $0xd88] sm:$0xf]  ;;  %v12502_v1 = vor.u32 %v14248_v52, %v12501_v43  ;;  %v7455_v2 = vadd.f32 %v7454_v57, %v7442_v25  ;;  %v12879_v6 = vld [vmem:[#allocation11 + $0xe60] sm:$0xf0] }
 0x3dd   :  { %7692 = vmatpush.bf16.msrb.mxu0 %v12310_v16  ;;  %v14320_v23 = vld [vmem:[#allocation11 + $0xda4] sm:$0xf0]  ;;  %7629 = vmatpush.bf16.msrb.mxu3 %v13010_v48  ;;  %v14004_v48 = vld [vmem:[#allocation11 + $0x3cc] sm:$0xf]  ;;  %v12882_v54 = vor.u32 %v14339_v14, %v12879_v6 }
 0x3de   :  { %7661 = vmatmul.bf16.vlgmr.msra.gmra.mxu1 %v14989_v61  ;;  %v12213_v41 = vld [vmem:[#allocation11 + $0x908] sm:$0xf]  ;;  %v12790_v38 = vor.u32 %v14320_v23, %v12789_v22  ;;  %v7456_v23 = vpop.f32.mrf.mxu1  ;;  %v13916_v6 = vld [vmem:[#allocation11 + $0x10c] sm:$0xf] }
 0x3df   :  { %7705 = vmatpush.bf16.msrb.mxu1 %v12566_v62  ;;  %7672 = vmatpush.bf16.msra.mxu2 %v11606_v51  ;;  %v14176_v40 = vld [vmem:[#allocation11 + $0x924] sm:$0xf0]  ;;  %v11767_v23 = vld [vmem:[#allocation11 + $0x5a8] sm:$0xf0] }
 0x3e0   :  { %v12469_v9 = vld [vmem:[#allocation11 + $0xb08] sm:$0xf]  ;;  %v12214_v46 = vor.u32 %v14176_v40, %v12213_v41 }
 0x3e1   :  { %7693 = vmatpush.bf16.msrb.mxu0 %v12278_v7  ;;  %v14240_v42 = vld [vmem:[#allocation11 + $0xb24] sm:$0xf0]  ;;  %7630 = vmatpush.bf16.msrb.mxu3 %v12978_v60  ;;  %v12946_v7 = vor.u32 %v14355_v63, %v12943_v28  ;;  %v7443_v52 = vpop.f32.mrf.mxu0  ;;  %v11255_v63 = vld [vmem:[#allocation11 + $0x1a8] sm:$0xf0] }
 0x3e2   :  { %v12757_v32 = vld [vmem:[#allocation11 + $0xd48] sm:$0xf]  ;;  %v12470_v30 = vor.u32 %v14240_v42, %v12469_v9  ;;  %7583 = vmatmul.bf16.vlgmr.msra.gmra.mxu3 %v14999_v8  ;;  %v13996_v28 = vld [vmem:[#allocation11 + $0x38c] sm:$0xf] }
 0x3e3   :  { %7706 = vmatpush.bf16.msrb.mxu1 %v12534_v11  ;;  %7673 = vmatpush.bf16.msra.mxu2 %v11574_v13  ;;  %v14312_v47 = vld [vmem:[#allocation11 + $0xd64] sm:$0xf0]  ;;  %v11479_v52 = vld [vmem:[#allocation11 + $0x368] sm:$0xf0] }
 0x3e4   :  { %v12181_v36 = vld [vmem:[#allocation11 + $0x8c8] sm:$0xf]  ;;  %v12758_v37 = vor.u32 %v14312_v47, %v12757_v32  ;;  %v13940_v32 = vld [vmem:[#allocation11 + $0x1cc] sm:$0xf]  ;;  %v7467_v47 = vpop.f32.mrf.mxu2 }
 0x3e5   :  { %7694 = vmatpush.bf16.msrb.mxu0 %v12246_v27  ;;  %v14168_v44 = vld [vmem:[#allocation11 + $0x8e4] sm:$0xf0]  ;;  %7631 = vmatpush.bf16.msrb.mxu3 %v12946_v7 }
 0x3e6   :  { %7674 = vmatmul.bf16.vlgmr.msra.gmra.mxu2 %v14997_v20  ;;  %v12437_v26 = vld [vmem:[#allocation11 + $0xac8] sm:$0xf]  ;;  %v12182_v62 = vor.u32 %v14168_v44, %v12181_v36 }
 0x3e7   :  { %7718 = vmatpush.bf16.msrb.mxu2 %v12822_v45  ;;  %7707 = vmatpush.bf16.msrb.mxu1 %v12502_v1  ;;  %v14232_v31 = vld [vmem:[#allocation11 + $0xae4] sm:$0xf0] }
 0x3e8   :  { %v12725_v58 = vld [vmem:[#allocation11 + $0xd08] sm:$0xf]  ;;  %v12438_v51 = vor.u32 %v14232_v31, %v12437_v26  ;;  %v14331_v31 = vld [vmem:[#allocation11 + $0xe04] sm:$0xf] }
 0x3e9   :  { %v14304_v16 = vld [vmem:[#allocation11 + $0xd24] sm:$0xf0]  ;;  %7695 = vmatpush.bf16.msrb.mxu0 %v12214_v46  ;;  %v11543_v46 = vld [vmem:[#allocation11 + $0x3e8] sm:$0xf0]  ;;  %7632 = vmatpush.bf16.msrb.mxu3 %v12914_v34 }
 0x3ea   :  { %v12149_v0 = vld [vmem:[#allocation11 + $0x888] sm:$0xf]  ;;  %v12726_v35 = vor.u32 %v14304_v16, %v12725_v58  ;;  %v11290_v16 = vor.u32 %v13940_v32, %v11287_v33  ;;  %v11546_v25 = vor.u32 %v14004_v48, %v11543_v46  ;;  %v14052_v32 = vld [vmem:[#allocation11 + $0x54c] sm:$0xf] }
 0x3eb   :  { %7719 = vmatpush.bf16.msrb.mxu2 %v12790_v38  ;;  %7708 = vmatpush.bf16.msrb.mxu1 %v12470_v30  ;;  %v14160_v12 = vld [vmem:[#allocation11 + $0x8a4] sm:$0xf0]  ;;  %v7468_v30 = vadd.f32 %v7467_v47, %v7455_v2  ;;  %v12850_v2 = vor.u32 %v14331_v31, %v12847_v56  ;;  %v11735_v47 = vld [vmem:[#allocation11 + $0x568] sm:$0xf0] }
 0x3ec   :  { %v12405_v49 = vld [vmem:[#allocation11 + $0xa88] sm:$0xf]  ;;  %v12150_v11 = vor.u32 %v14160_v12, %v12149_v0  ;;  %v11511_v0 = vld [vmem:[#allocation11 + $0x3a8] sm:$0xf0]  ;;  %v7469_v17 = vpop.f32.mrf.mxu2 }
 0x3ed   :  { %v14224_v3 = vld [vmem:[#allocation11 + $0xaa4] sm:$0xf0]  ;;  %7696 = vmatpush.bf16.msrb.mxu0 %v12182_v62  ;;  %v15060_v58 = vadd.f32 %v7480_v55, %v7468_v30  ;;  %v13932_v62 = vld [vmem:[#allocation11 + $0x18c] sm:$0xf]  ;;  %7633 = vmatpush.bf16.msrb.mxu3 %v12882_v54  ;;  %v11514_v7 = vor.u32 %v13996_v28, %v11511_v0 }
 0x3ee   :  { %v12693_v24 = vld [vmem:[#allocation11 + $0xcc8] sm:$0xf]  ;;  %v12406_v13 = vor.u32 %v14224_v3, %v12405_v49  ;;  %v14068_v3 = vld [vmem:[#allocation11 + $0x5cc] sm:$0xf] }
 0x3ef   :  { %7720 = vmatpush.bf16.msrb.mxu2 %v12758_v37  ;;  %v14296_v5 = vld [vmem:[#allocation11 + $0xce4] sm:$0xf0]  ;;  %7709 = vmatpush.bf16.msrb.mxu1 %v12438_v51  ;;  %v13908_v55 = vld [vmem:[#allocation11 + $0xcc] sm:$0xf] }
 0x3f0   :  { %v12117_v21 = vld [vmem:[#allocation11 + $0x848] sm:$0xf]  ;;  %v12694_v18 = vor.u32 %v14296_v5, %v12693_v24  ;;  %v11799_v24 = vld [vmem:[#allocation11 + $0x5e8] sm:$0xf0]  ;;  %v11258_v5 = vor.u32 %v13932_v62, %v11255_v63 }
 0x3f1   :  { %v14152_v45 = vld [vmem:[#allocation11 + $0x864] sm:$0xf0]  ;;  %7697 = vmatpush.bf16.msrb.mxu0 %v12150_v11  ;;  %7634 = vmatpush.bf16.msrb.mxu3 %v12850_v2  ;;  %v11159_v54 = vld [vmem:[#allocation11 + $0xe8] sm:$0xf0] }
 0x3f2   :  { %v12373_v19 = vld [vmem:[#allocation11 + $0xa48] sm:$0xf]  ;;  %v12118_v27 = vor.u32 %v14152_v45, %v12117_v21  ;;  %v13924_v21 = vld [vmem:[#allocation11 + $0x14c] sm:$0xf]  ;;  %v7482_v45 = vpop.f32.mrf.mxu3  ;;  %v7506_v56 = vpop.f32.mrf.mxu1 }
 0x3f3   :  { %7721 = vmatpush.bf16.msrb.mxu2 %v12726_v35  ;;  %v14216_v43 = vld [vmem:[#allocation11 + $0xa64] sm:$0xf0]  ;;  %7710 = vmatpush.bf16.msrb.mxu1 %v12406_v13  ;;  %v13900_v0 = vld [vmem:[#allocation11 + $0x8c] sm:$0xf] }
 0x3f4   :  { %v12661_v4 = vld [vmem:[#allocation11 + $0xc88] sm:$0xf]  ;;  %v12374_v1 = vor.u32 %v14216_v43, %v12373_v19  ;;  %v11802_v19 = vor.u32 %v14068_v3, %v11799_v24  ;;  %v13988_v43 = vld [vmem:[#allocation11 + $0x34c] sm:$0xf]  ;;  %7635 = vmatmul.bf16.vlgmr.msrb.gmra.mxu3 %v15050_v10 }
 0x3f5   :  { %v14288_v22 = vld [vmem:[#allocation11 + $0xca4] sm:$0xf0]  ;;  %7698 = vmatpush.bf16.msrb.mxu0 %v12118_v27  ;;  %v11127_v2 = vld [vmem:[#allocation11 + $0xa8] sm:$0xf0] }
 0x3f6   :  { %v12085_v41 = vld [vmem:[#allocation11 + $0x808] sm:$0xf]  ;;  %v12662_v40 = vor.u32 %v14288_v22, %v12661_v4  ;;  %v14060_v22 = vld [vmem:[#allocation11 + $0x58c] sm:$0xf] }
 0x3f7   :  { %v14144_v38 = vld [vmem:[#allocation11 + $0x824] sm:$0xf0]  ;;  %7722 = vmatpush.bf16.msrb.mxu2 %v12694_v18  ;;  %7711 = vmatpush.bf16.msrb.mxu1 %v12374_v1  ;;  %v11223_v18 = vld [vmem:[#allocation11 + $0x168] sm:$0xf0]  ;;  %v11482_v1 = vor.u32 %v13988_v43, %v11479_v52 }
 0x3f8   :  { %v12341_v9 = vld [vmem:[#allocation11 + $0xa08] sm:$0xf]  ;;  %v12086_v44 = vor.u32 %v14144_v38, %v12085_v41  ;;  %v11226_v34 = vor.u32 %v13924_v21, %v11223_v18  ;;  %v11191_v41 = vld [vmem:[#allocation11 + $0x128] sm:$0xf0]  ;;  %v11770_v38 = vor.u32 %v14060_v22, %v11767_v23 }
 0x3f9   :  { %v14208_v42 = vld [vmem:[#allocation11 + $0xa24] sm:$0xf0]  ;;  %v11194_v33 = vor.u32 %v13916_v6, %v11191_v41  ;;  %v14036_v3 = vld [vmem:[#allocation11 + $0x4cc] sm:$0xf] }
 0x3fa   :  { %v12629_v36 = vld [vmem:[#allocation11 + $0xc48] sm:$0xf]  ;;  %v12342_v26 = vor.u32 %v14208_v42, %v12341_v9  ;;  %7699 = vmatpush.bf16.msrb.mxu0 %v12086_v44  ;;  %v11447_v9 = vld [vmem:[#allocation11 + $0x328] sm:$0xf0]  ;;  %v7508_v43 = vpop.f32.mrf.mxu1 }
 0x3fb   :  { %v14280_v37 = vld [vmem:[#allocation11 + $0xc64] sm:$0xf0]  ;;  %7723 = vmatpush.bf16.msrb.mxu2 %v12662_v40  ;;  %v13980_v40 = vld [vmem:[#allocation11 + $0x30c] sm:$0xf] }
 0x3fc   :  { %v12053_v57 = vld [vmem:[#allocation11 + $0x7c8] sm:$0xf]  ;;  %v12630_v51 = vor.u32 %v14280_v37, %v12629_v36  ;;  %7712 = vmatpush.bf16.msrb.mxu1 %v12342_v26  ;;  %v11450_v30 = vor.u32 %v13980_v40, %v11447_v9  ;;  %v7493_v36 = vpop.f32.mrf.mxu0  ;;  %v11738_v37 = vor.u32 %v14052_v32, %v11735_v47  ;;  %v13972_v44 = vld [vmem:[#allocation11 + $0x2cc] sm:$0xf] }
 0x3fd   :  { %v14136_v60 = vld [vmem:[#allocation11 + $0x7e4] sm:$0xf0]  ;;  %7700 = vmatmul.bf16.vlgmr.msrb.gmra.mxu0 %v15017_v53  ;;  %v11415_v26 = vld [vmem:[#allocation11 + $0x2e8] sm:$0xf0]  ;;  %v7494_v31 = vadd.f32 %v7493_v36, %v15060_v58 }
 0x3fe   :  { %v12597_v35 = vld [vmem:[#allocation11 + $0xc08] sm:$0xf]  ;;  %v12054_v49 = vor.u32 %v14136_v60, %v12053_v57  ;;  %7744 = vmatpush.bf16.msra.mxu0 %v11290_v16  ;;  %v11703_v57 = vld [vmem:[#allocation11 + $0x528] sm:$0xf0]  ;;  %v11162_v60 = vor.u32 %v13908_v55, %v11159_v54  ;;  %v11418_v28 = vor.u32 %v13972_v44, %v11415_v26 }
 0x3ff   :  { %v14272_v12 = vld [vmem:[#allocation11 + $0xc24] sm:$0xf0]  ;;  %7724 = vmatpush.bf16.msrb.mxu2 %v12630_v51  ;;  %7713 = vmatmul.bf16.vlgmr.msrb.gmra.mxu1 %v15020_v50  ;;  %v15067_v63 = vadd.f32 %v7506_v56, %v7494_v31  ;;  %v11671_v24 = vld [vmem:[#allocation11 + $0x4e8] sm:$0xf0] }
 0x400   :  { %7757 = vmatpush.bf16.msra.mxu1 %v11546_v25  ;;  %v12021_v11 = vld [vmem:[#allocation11 + $0x788] sm:$0xf]  ;;  %v12598_v39 = vor.u32 %v14272_v12, %v12597_v35  ;;  %7679 = vmatpush.bf16.msra.mxu3 %v12054_v49  ;;  %v14044_v25 = vld [vmem:[#allocation11 + $0x50c] sm:$0xf]  ;;  %v11674_v18 = vor.u32 %v14036_v3, %v11671_v24 }
 0x401   :  { %v14128_v13 = vld [vmem:[#allocation11 + $0x7a4] sm:$0xf0]  ;;  %v11706_v35 = vor.u32 %v14044_v25, %v11703_v57  ;;  %v13964_v12 = vld [vmem:[#allocation11 + $0x28c] sm:$0xf] }
 0x402   :  { %v12022_v4 = vor.u32 %v14128_v13, %v12021_v11  ;;  %7745 = vmatpush.bf16.msra.mxu0 %v11258_v5  ;;  %v11989_v14 = vld [vmem:[#allocation11 + $0x748] sm:$0xf]  ;;  %v11383_v49 = vld [vmem:[#allocation11 + $0x2a8] sm:$0xf0]  ;;  %v11130_v5 = vor.u32 %v13900_v0, %v11127_v2 }
 0x403   :  { %v14120_v27 = vld [vmem:[#allocation11 + $0x764] sm:$0xf0]  ;;  %7725 = vmatpush.bf16.msrb.mxu2 %v12598_v39  ;;  %v11386_v13 = vor.u32 %v13964_v12, %v11383_v49  ;;  %v13892_v17 = vld [vmem:[#allocation11 + $0x4c] sm:$0xf] }
 0x404   :  { %7758 = vmatpush.bf16.msra.mxu1 %v11514_v7  ;;  %7680 = vmatpush.bf16.msra.mxu3 %v12022_v4  ;;  %v11990_v42 = vor.u32 %v14120_v27, %v11989_v14  ;;  %v11957_v48 = vld [vmem:[#allocation11 + $0x708] sm:$0xf]  ;;  %v11095_v39 = vld [vmem:[#allocation11 + $0x68] sm:$0xf0]  ;;  %v7495_v21 = vpop.f32.mrf.mxu0 }
 0x405   :  { %v14112_v46 = vld [vmem:[#allocation11 + $0x724] sm:$0xf0]  ;;  %v13956_v45 = vld [vmem:[#allocation11 + $0x24c] sm:$0xf]  ;;  %v11098_v23 = vor.u32 %v13892_v17, %v11095_v39 }
 0x406   :  { %7726 = vmatmul.bf16.vlgmr.msrb.gmra.mxu2 %v15028_v15  ;;  %7746 = vmatpush.bf16.msra.mxu0 %v11226_v34  ;;  %v11958_v16 = vor.u32 %v14112_v46, %v11957_v48  ;;  %v11925_v62 = vld [vmem:[#allocation11 + $0x6c8] sm:$0xf]  ;;  %v14028_v4 = vld [vmem:[#allocation11 + $0x48c] sm:$0xf] }
 0x407   :  { %7770 = vmatpush.bf16.msra.mxu2 %v11802_v19  ;;  %v14104_v51 = vld [vmem:[#allocation11 + $0x6e4] sm:$0xf0]  ;;  %v11351_v19 = vld [vmem:[#allocation11 + $0x268] sm:$0xf0] }
 0x408   :  { %7759 = vmatpush.bf16.msra.mxu1 %v11482_v1  ;;  %7681 = vmatpush.bf16.msra.mxu3 %v11990_v42  ;;  %v11926_v58 = vor.u32 %v14104_v51, %v11925_v62  ;;  %v11893_v7 = vld [vmem:[#allocation11 + $0x688] sm:$0xf]  ;;  %v11639_v22 = vld [vmem:[#allocation11 + $0x4a8] sm:$0xf0]  ;;  %v11354_v1 = vor.u32 %v13956_v45, %v11351_v19 }
 0x409   :  { %v14096_v11 = vld [vmem:[#allocation11 + $0x6a4] sm:$0xf0]  ;;  %v13884_v27 = vld [vmem:[#allocation11 + $0xc] sm:$0xf]  ;;  %v11642_v40 = vor.u32 %v14028_v4, %v11639_v22 }
 0x40a   :  { %7747 = vmatpush.bf16.msra.mxu0 %v11194_v33  ;;  %v11894_v52 = vor.u32 %v14096_v11, %v11893_v7  ;;  %v11861_v34 = vld [vmem:[#allocation11 + $0x648] sm:$0xf]  ;;  %v11063_v6 = vld [vmem:[#allocation11 + $0x28] sm:$0xf0] }
 0x40b   :  { %7771 = vmatpush.bf16.msra.mxu2 %v11770_v38  ;;  %v14088_v14 = vld [vmem:[#allocation11 + $0x664] sm:$0xf0]  ;;  %v13948_v41 = vld [vmem:[#allocation11 + $0x20c] sm:$0xf] }
 0x40c   :  { %7760 = vmatpush.bf16.msra.mxu1 %v11450_v30  ;;  %7682 = vmatpush.bf16.msra.mxu3 %v11958_v16  ;;  %v11319_v38 = vld [vmem:[#allocation11 + $0x228] sm:$0xf0]  ;;  %v11862_v47 = vor.u32 %v14088_v14, %v11861_v34  ;;  %v11066_v30 = vor.u32 %v13884_v27, %v11063_v6  ;;  %v11829_v55 = vld [vmem:[#allocation11 + $0x608] sm:$0xf]  ;;  %v4857_v27 = vperm.slane %v15055_v29, 1 }
 0x40d   :  { %v14196_v9 = vld [vmem:[#allocation11 + $0x9cc] sm:$0xf]  ;;  %v14080_v54 = vld [vmem:[#allocation11 + $0x624] sm:$0xf0]  ;;  %v11322_v36 = vor.u32 %v13948_v41, %v11319_v38 }
 0x40e   :  { %7748 = vmatpush.bf16.msra.mxu0 %v11162_v60  ;;  %v12311_v42 = vld [vmem:[#allocation11 + $0x9e8] sm:$0xf0]  ;;  %v13077_v44 = vld [vmem:[#allocation11 + $0xfc8] sm:$0xf]  ;;  %v11830_v57 = vor.u32 %v14080_v54, %v11829_v55 }
 0x40f   :  { %7772 = vmatpush.bf16.msra.mxu2 %v11738_v37  ;;  %v14260_v32 = vld [vmem:[#allocation11 + $0xbcc] sm:$0xf]  ;;  %v12314_v37 = vor.u32 %v14196_v9, %v12311_v42  ;;  %v14392_v26 = vld [vmem:[#allocation11 + $0xfe4] sm:$0xf0] }
 0x410   :  { %7761 = vmatpush.bf16.msra.mxu1 %v11418_v28  ;;  %7683 = vmatpush.bf16.msra.mxu3 %v11926_v58  ;;  %v12567_v33 = vld [vmem:[#allocation11 + $0xbe8] sm:$0xf0]  ;;  %v13078_v51 = vor.u32 %v14392_v26, %v13077_v44  ;;  %v13045_v49 = vld [vmem:[#allocation11 + $0xf88] sm:$0xf] }
 0x411   :  { %v14020_v48 = vld [vmem:[#allocation11 + $0x44c] sm:$0xf]  ;;  %v12570_v31 = vor.u32 %v14260_v32, %v12567_v33  ;;  %v14384_v58 = vld [vmem:[#allocation11 + $0xfa4] sm:$0xf0]  ;;  %v7545_v33 = vpop.f32.mrf.mxu0 }
 0x412   :  { %7749 = vmatpush.bf16.msra.mxu0 %v11130_v5  ;;  %v11607_v46 = vld [vmem:[#allocation11 + $0x468] sm:$0xf0]  ;;  %v13046_v39 = vor.u32 %v14384_v58, %v13045_v49  ;;  %v13013_v19 = vld [vmem:[#allocation11 + $0xf48] sm:$0xf]  ;;  %v7558_v55 = vpop.f32.mrf.mxu1  ;;  %v7519_v58 = vpop.f32.mrf.mxu2 }
 0x413   :  { %7773 = vmatpush.bf16.msra.mxu2 %v11706_v35  ;;  %v11610_v56 = vor.u32 %v14020_v48, %v11607_v46  ;;  %v14188_v16 = vld [vmem:[#allocation11 + $0x98c] sm:$0xf]  ;;  %v14376_v43 = vld [vmem:[#allocation11 + $0xf64] sm:$0xf0] }
 0x414   :  { %7762 = vmatpush.bf16.msra.mxu1 %v11386_v13  ;;  %7684 = vmatpush.bf16.msra.mxu3 %v11894_v52  ;;  %v12279_v25 = vld [vmem:[#allocation11 + $0x9a8] sm:$0xf0]  ;;  %v14368_v9 = vld [vmem:[#allocation11 + $0xf24] sm:$0xf0] }
 0x415   :  { %v14252_v60 = vld [vmem:[#allocation11 + $0xb8c] sm:$0xf]  ;;  %v12282_v35 = vor.u32 %v14188_v16, %v12279_v25  ;;  %v12949_v26 = vld [vmem:[#allocation11 + $0xec8] sm:$0xf] }
 0x416   :  { %7750 = vmatpush.bf16.msra.mxu0 %v11098_v23  ;;  %v12535_v62 = vld [vmem:[#allocation11 + $0xba8] sm:$0xf0]  ;;  %v14352_v49 = vld [vmem:[#allocation11 + $0xea4] sm:$0xf0] }
 0x417   :  { %7774 = vmatpush.bf16.msra.mxu2 %v11674_v18  ;;  %v14012_v28 = vld [vmem:[#allocation11 + $0x40c] sm:$0xf]  ;;  %v12538_v3 = vor.u32 %v14252_v60, %v12535_v62 }
 0x418   :  { %7763 = vmatpush.bf16.msra.mxu1 %v11354_v1  ;;  %7685 = vmatpush.bf16.msra.mxu3 %v11862_v47  ;;  %v11575_v0 = vld [vmem:[#allocation11 + $0x428] sm:$0xf0]  ;;  %v13014_v1 = vor.u32 %v14376_v43, %v13013_v19 }
 0x419   :  { %v14324_v2 = vld [vmem:[#allocation11 + $0xdcc] sm:$0xf]  ;;  %v11578_v7 = vor.u32 %v14012_v28, %v11575_v0 }
 0x41a   :  { %7751 = vmatpush.bf16.msra.mxu0 %v11066_v30  ;;  %v12823_v12 = vld [vmem:[#allocation11 + $0xde8] sm:$0xf0]  ;;  %v7546_v30 = vadd.f32 %v7545_v33, %v4857_v27  ;;  %v11293_v27 = vld [vmem:[#allocation11 + $0x1d0] sm:$0xf]  ;;  %v14336_v33 = vld [vmem:[#allocation11 + $0xe24] sm:$0xf0] }
 0x41b   :  { %7775 = vmatpush.bf16.msra.mxu2 %v11642_v40  ;;  %v14180_v24 = vld [vmem:[#allocation11 + $0x94c] sm:$0xf]  ;;  %v12826_v17 = vor.u32 %v14324_v2, %v12823_v12  ;;  %v12981_v40 = vld [vmem:[#allocation11 + $0xf08] sm:$0xf] }
 0x41c   :  { %7764 = vmatpush.bf16.msra.mxu1 %v11322_v36  ;;  %v12247_v5 = vld [vmem:[#allocation11 + $0x968] sm:$0xf0]  ;;  %7686 = vmatpush.bf16.msra.mxu3 %v11830_v57  ;;  %v12982_v54 = vor.u32 %v14368_v9, %v12981_v40  ;;  %v12917_v12 = vld [vmem:[#allocation11 + $0xe88] sm:$0xf]  ;;  %v14009_v40 = vld [vmem:[#allocation11 + $0x3ec] sm:$0xf0] }
 0x41d   :  { %7752 = vmatmul.bf16.vlgmr.msra.gmra.mxu0 %v14987_v59  ;;  %v14244_v11 = vld [vmem:[#allocation11 + $0xb4c] sm:$0xf]  ;;  %v12250_v18 = vor.u32 %v14180_v24, %v12247_v5 }
 0x41e   :  { %7796 = vmatpush.bf16.msrb.mxu0 %v12314_v37  ;;  %v12503_v13 = vld [vmem:[#allocation11 + $0xb68] sm:$0xf0] }
 0x41f   :  { %7776 = vmatpush.bf16.msra.mxu2 %v11610_v56  ;;  %7765 = vmatmul.bf16.vlgmr.msra.gmra.mxu1 %v14989_v61  ;;  %v14316_v21 = vld [vmem:[#allocation11 + $0xd8c] sm:$0xf]  ;;  %v12506_v52 = vor.u32 %v14244_v11, %v12503_v13  ;;  %v15074_v56 = vadd.f32 %v7558_v55, %v7546_v30  ;;  %v7547_v11 = vpop.f32.mrf.mxu0 }
 0x420   :  { %7809 = vmatpush.bf16.msrb.mxu1 %v12570_v31  ;;  %7731 = vmatpush.bf16.msrb.mxu3 %v13078_v51  ;;  %v12791_v45 = vld [vmem:[#allocation11 + $0xda8] sm:$0xf0]  ;;  %v14360_v31 = vld [vmem:[#allocation11 + $0xee4] sm:$0xf0] }
 0x421   :  { %7687 = vmatmul.bf16.vlgmr.msra.gmra.mxu3 %v14999_v8  ;;  %v14172_v4 = vld [vmem:[#allocation11 + $0x90c] sm:$0xf]  ;;  %v12794_v14 = vor.u32 %v14316_v21, %v12791_v45  ;;  %v12950_v28 = vor.u32 %v14360_v31, %v12949_v26  ;;  %v11517_v31 = vld [vmem:[#allocation11 + $0x390] sm:$0xf] }
 0x422   :  { %7797 = vmatpush.bf16.msrb.mxu0 %v12282_v35  ;;  %v12215_v22 = vld [vmem:[#allocation11 + $0x928] sm:$0xf0] }
 0x423   :  { %7777 = vmatpush.bf16.msra.mxu2 %v11578_v7  ;;  %v14236_v23 = vld [vmem:[#allocation11 + $0xb0c] sm:$0xf]  ;;  %v12218_v41 = vor.u32 %v14172_v4, %v12215_v22  ;;  %v15077_v7 = vadd.f32 %v7519_v58, %v15067_v63  ;;  %v14344_v4 = vld [vmem:[#allocation11 + $0xe64] sm:$0xf0] }
 0x424   :  { %7810 = vmatpush.bf16.msrb.mxu1 %v12538_v3  ;;  %v12471_v34 = vld [vmem:[#allocation11 + $0xb28] sm:$0xf0]  ;;  %7732 = vmatpush.bf16.msrb.mxu3 %v13046_v39  ;;  %v7560_v39 = vpop.f32.mrf.mxu1 }
 0x425   :  { %v14308_v6 = vld [vmem:[#allocation11 + $0xd4c] sm:$0xf]  ;;  %v12474_v42 = vor.u32 %v14236_v23, %v12471_v34  ;;  %v11773_v39 = vld [vmem:[#allocation11 + $0x590] sm:$0xf] }
 0x426   :  { %7798 = vmatpush.bf16.msrb.mxu0 %v12250_v18  ;;  %v12759_v38 = vld [vmem:[#allocation11 + $0xd68] sm:$0xf0]  ;;  %7778 = vmatmul.bf16.vlgmr.msra.gmra.mxu2 %v14997_v20  ;;  %v12918_v18 = vor.u32 %v14352_v49, %v12917_v12  ;;  %v11229_v12 = vld [vmem:[#allocation11 + $0x150] sm:$0xf] }
 0x427   :  { %7822 = vmatpush.bf16.msrb.mxu2 %v12826_v17  ;;  %v14164_v32 = vld [vmem:[#allocation11 + $0x8cc] sm:$0xf]  ;;  %v12762_v29 = vor.u32 %v14308_v6, %v12759_v38  ;;  %v11549_v38 = vld [vmem:[#allocation11 + $0x3d0] sm:$0xf] }
 0x428   :  { %7811 = vmatpush.bf16.msrb.mxu1 %v12506_v52  ;;  %v12183_v47 = vld [vmem:[#allocation11 + $0x8e8] sm:$0xf0]  ;;  %7733 = vmatpush.bf16.msrb.mxu3 %v13014_v1  ;;  %v12885_v52 = vld [vmem:[#allocation11 + $0xe48] sm:$0xf]  ;;  %v13945_v1 = vld [vmem:[#allocation11 + $0x1ec] sm:$0xf0] }
 0x429   :  { %v14228_v48 = vld [vmem:[#allocation11 + $0xacc] sm:$0xf]  ;;  %v12186_v37 = vor.u32 %v14164_v32, %v12183_v47  ;;  %v12853_v47 = vld [vmem:[#allocation11 + $0xe08] sm:$0xf]  ;;  %v11294_v30 = vor.u32 %v13945_v1, %v11293_v27  ;;  %v13929_v49 = vld [vmem:[#allocation11 + $0x16c] sm:$0xf0] }
 0x42a   :  { %v12439_v46 = vld [vmem:[#allocation11 + $0xae8] sm:$0xf0]  ;;  %7799 = vmatpush.bf16.msrb.mxu0 %v12218_v41  ;;  %v12886_v41 = vor.u32 %v14344_v4, %v12885_v52  ;;  %v12854_v26 = vor.u32 %v14336_v33, %v12853_v47  ;;  %v11197_v52 = vld [vmem:[#allocation11 + $0x110] sm:$0xf] }
 0x42b   :  { %7823 = vmatpush.bf16.msrb.mxu2 %v12794_v14  ;;  %v14300_v36 = vld [vmem:[#allocation11 + $0xd0c] sm:$0xf]  ;;  %v12442_v16 = vor.u32 %v14228_v48, %v12439_v46  ;;  %v7521_v48 = vpop.f32.mrf.mxu2  ;;  %v13921_v4 = vld [vmem:[#allocation11 + $0x12c] sm:$0xf0] }
 0x42c   :  { %v12727_v44 = vld [vmem:[#allocation11 + $0xd28] sm:$0xf0]  ;;  %7812 = vmatpush.bf16.msrb.mxu1 %v12474_v42  ;;  %7734 = vmatpush.bf16.msrb.mxu3 %v12982_v54  ;;  %v11741_v27 = vld [vmem:[#allocation11 + $0x550] sm:$0xf] }
 0x42d   :  { %v14156_v25 = vld [vmem:[#allocation11 + $0x88c] sm:$0xf]  ;;  %v12730_v51 = vor.u32 %v14300_v36, %v12727_v44  ;;  %v11261_v36 = vld [vmem:[#allocation11 + $0x190] sm:$0xf] }
 0x42e   :  { %v12151_v57 = vld [vmem:[#allocation11 + $0x8a8] sm:$0xf0]  ;;  %7800 = vmatpush.bf16.msrb.mxu0 %v12186_v37  ;;  %v13937_v37 = vld [vmem:[#allocation11 + $0x1ac] sm:$0xf0] }
 0x42f   :  { %v14220_v60 = vld [vmem:[#allocation11 + $0xa8c] sm:$0xf]  ;;  %7824 = vmatpush.bf16.msrb.mxu2 %v12762_v29  ;;  %v12154_v2 = vor.u32 %v14156_v25, %v12151_v57  ;;  %v11550_v29 = vor.u32 %v14009_v40, %v11549_v38  ;;  %v14057_v1 = vld [vmem:[#allocation11 + $0x56c] sm:$0xf0] }
 0x430   :  { %v12407_v62 = vld [vmem:[#allocation11 + $0xaa8] sm:$0xf0]  ;;  %7813 = vmatpush.bf16.msrb.mxu1 %v12442_v16  ;;  %7735 = vmatpush.bf16.msrb.mxu3 %v12950_v28  ;;  %v14001_v16 = vld [vmem:[#allocation11 + $0x3ac] sm:$0xf0]  ;;  %v11742_v33 = vor.u32 %v14057_v1, %v11741_v27 }
 0x431   :  { %v14292_v0 = vld [vmem:[#allocation11 + $0xccc] sm:$0xf]  ;;  %v12410_v3 = vor.u32 %v14220_v60, %v12407_v62  ;;  %v11262_v62 = vor.u32 %v13937_v37, %v11261_v36  ;;  %v14073_v28 = vld [vmem:[#allocation11 + $0x5ec] sm:$0xf0] }
 0x432   :  { %v12695_v35 = vld [vmem:[#allocation11 + $0xce8] sm:$0xf0]  ;;  %7801 = vmatpush.bf16.msrb.mxu0 %v12154_v2  ;;  %v11518_v2 = vor.u32 %v14001_v16, %v11517_v31  ;;  %v11165_v38 = vld [vmem:[#allocation11 + $0xd0] sm:$0xf] }
 0x433   :  { %v14148_v24 = vld [vmem:[#allocation11 + $0x84c] sm:$0xf]  ;;  %7825 = vmatpush.bf16.msrb.mxu2 %v12730_v51  ;;  %v12698_v21 = vor.u32 %v14292_v0, %v12695_v35  ;;  %v11805_v51 = vld [vmem:[#allocation11 + $0x5d0] sm:$0xf]  ;;  %v7571_v11 = vpop.f32.mrf.mxu2 }
 0x434   :  { %v12119_v5 = vld [vmem:[#allocation11 + $0x868] sm:$0xf0]  ;;  %7814 = vmatpush.bf16.msrb.mxu1 %v12410_v3  ;;  %7736 = vmatpush.bf16.msrb.mxu3 %v12918_v18  ;;  %v11485_v3 = vld [vmem:[#allocation11 + $0x350] sm:$0xf] }
 0x435   :  { %v14212_v13 = vld [vmem:[#allocation11 + $0xa4c] sm:$0xf]  ;;  %v12122_v19 = vor.u32 %v14148_v24, %v12119_v5  ;;  %v13993_v24 = vld [vmem:[#allocation11 + $0x36c] sm:$0xf0]  ;;  %v11806_v5 = vor.u32 %v14073_v28, %v11805_v51 }
 0x436   :  { %v12375_v17 = vld [vmem:[#allocation11 + $0xa68] sm:$0xf0]  ;;  %v13913_v40 = vld [vmem:[#allocation11 + $0xec] sm:$0xf0] }
 0x437   :  { %v14284_v45 = vld [vmem:[#allocation11 + $0xc8c] sm:$0xf]  ;;  %v12378_v22 = vor.u32 %v14212_v13, %v12375_v17  ;;  %7826 = vmatpush.bf16.msrb.mxu2 %v12698_v21  ;;  %7802 = vmatpush.bf16.msrb.mxu0 %v12122_v19  ;;  %v11230_v17 = vor.u32 %v13929_v49, %v11229_v12  ;;  %v14065_v21 = vld [vmem:[#allocation11 + $0x5ac] sm:$0xf0]  ;;  %v11486_v19 = vor.u32 %v13993_v24, %v11485_v3 }
 0x438   :  { %v12663_v43 = vld [vmem:[#allocation11 + $0xca8] sm:$0xf0]  ;;  %7737 = vmatpush.bf16.msrb.mxu3 %v12886_v41  ;;  %v11389_v31 = vld [vmem:[#allocation11 + $0x290] sm:$0xf] }
 0x439   :  { %v14140_v23 = vld [vmem:[#allocation11 + $0x80c] sm:$0xf]  ;;  %v12666_v6 = vor.u32 %v14284_v45, %v12663_v43  ;;  %7815 = vmatpush.bf16.msrb.mxu1 %v12378_v22  ;;  %v15082_v45 = vadd.f32 %v7571_v11, %v15074_v56  ;;  %v11453_v22 = vld [vmem:[#allocation11 + $0x310] sm:$0xf] }
 0x43a   :  { %v12087_v34 = vld [vmem:[#allocation11 + $0x828] sm:$0xf0]  ;;  %v13969_v16 = vld [vmem:[#allocation11 + $0x2ac] sm:$0xf0] }
 0x43b   :  { %v14204_v63 = vld [vmem:[#allocation11 + $0xa0c] sm:$0xf]  ;;  %v12090_v42 = vor.u32 %v14140_v23, %v12087_v34  ;;  %7827 = vmatpush.bf16.msrb.mxu2 %v12666_v6  ;;  %v13985_v23 = vld [vmem:[#allocation11 + $0x32c] sm:$0xf0]  ;;  %v11774_v34 = vor.u32 %v14065_v21, %v11773_v39  ;;  %v15088_v47 = vpop.f32.mrf.mxu1  ;;  %v7573_v48 = vpop.f32.mrf.mxu2 }
 0x43c   :  { %v12343_v14 = vld [vmem:[#allocation11 + $0xa28] sm:$0xf0]  ;;  %7738 = vmatpush.bf16.msrb.mxu3 %v12854_v26  ;;  %v11454_v56 = vor.u32 %v13985_v23, %v11453_v22  ;;  %v13905_v26 = vld [vmem:[#allocation11 + $0xac] sm:$0xf0] }
 0x43d   :  { %v14276_v9 = vld [vmem:[#allocation11 + $0xc4c] sm:$0xf]  ;;  %v12346_v46 = vor.u32 %v14204_v63, %v12343_v14  ;;  %7803 = vmatpush.bf16.msrb.mxu0 %v12090_v42  ;;  %v11198_v14 = vor.u32 %v13921_v4, %v11197_v52  ;;  %v11421_v42 = vld [vmem:[#allocation11 + $0x2d0] sm:$0xf] }
 0x43e   :  { %v12631_v32 = vld [vmem:[#allocation11 + $0xc68] sm:$0xf0]  ;;  %v14041_v51 = vld [vmem:[#allocation11 + $0x4ec] sm:$0xf0] }
 0x43f   :  { %v14132_v55 = vld [vmem:[#allocation11 + $0x7cc] sm:$0xf]  ;;  %v12634_v44 = vor.u32 %v14276_v9, %v12631_v32  ;;  %7816 = vmatpush.bf16.msrb.mxu1 %v12346_v46  ;;  %7739 = vmatmul.bf16.vlgmr.msrb.gmra.mxu3 %v15050_v10  ;;  %v15086_v9 = vpop.f32.mrf.mxu0  ;;  %v13977_v32 = vld [vmem:[#allocation11 + $0x2ec] sm:$0xf0] }
 0x440   :  { %v12055_v54 = vld [vmem:[#allocation11 + $0x7e8] sm:$0xf0]  ;;  %7804 = vmatmul.bf16.vlgmr.msrb.gmra.mxu0 %v15017_v53  ;;  %v11422_v36 = vor.u32 %v13977_v32, %v11421_v42  ;;  %v13897_v12 = vld [vmem:[#allocation11 + $0x6c] sm:$0xf0] }
 0x441   :  { %v14268_v25 = vld [vmem:[#allocation11 + $0xc0c] sm:$0xf]  ;;  %7848 = vmatpush.bf16.msra.mxu0 %v11294_v30  ;;  %v12058_v60 = vor.u32 %v14132_v55, %v12055_v54  ;;  %7828 = vmatpush.bf16.msrb.mxu2 %v12634_v44  ;;  %v11166_v30 = vor.u32 %v13913_v40, %v11165_v38  ;;  %v11709_v55 = vld [vmem:[#allocation11 + $0x510] sm:$0xf] }
 0x442   :  { %v12599_v57 = vld [vmem:[#allocation11 + $0xc28] sm:$0xf0]  ;;  %7817 = vmatmul.bf16.vlgmr.msrb.gmra.mxu1 %v15020_v50  ;;  %v11133_v44 = vld [vmem:[#allocation11 + $0x90] sm:$0xf] }
 0x443   :  { %v14124_v0 = vld [vmem:[#allocation11 + $0x78c] sm:$0xf]  ;;  %7861 = vmatpush.bf16.msra.mxu1 %v11550_v29  ;;  %v12602_v58 = vor.u32 %v14268_v25, %v12599_v57  ;;  %7783 = vmatpush.bf16.msra.mxu3 %v12058_v60  ;;  %v14049_v29 = vld [vmem:[#allocation11 + $0x52c] sm:$0xf0]  ;;  %v11134_v60 = vor.u32 %v13905_v26, %v11133_v44  ;;  %v7612_v24 = vpop.f32.mrf.mxu1 }
 0x444   :  { %v12023_v35 = vld [vmem:[#allocation11 + $0x7a8] sm:$0xf0]  ;;  %v11710_v25 = vor.u32 %v14049_v29, %v11709_v55  ;;  %v13961_v3 = vld [vmem:[#allocation11 + $0x26c] sm:$0xf0] }
 0x445   :  { %7849 = vmatpush.bf16.msra.mxu0 %v11262_v62  ;;  %v12026_v13 = vor.u32 %v14124_v0, %v12023_v35  ;;  %v14116_v18 = vld [vmem:[#allocation11 + $0x74c] sm:$0xf]  ;;  %7829 = vmatpush.bf16.msrb.mxu2 %v12602_v58  ;;  %v11677_v62 = vld [vmem:[#allocation11 + $0x4d0] sm:$0xf]  ;;  %v11390_v0 = vor.u32 %v13969_v16, %v11389_v31 }
 0x446   :  { %v11991_v43 = vld [vmem:[#allocation11 + $0x768] sm:$0xf0]  ;;  %v11101_v35 = vld [vmem:[#allocation11 + $0x50] sm:$0xf] }
 0x447   :  { %7862 = vmatpush.bf16.msra.mxu1 %v11518_v2  ;;  %7784 = vmatpush.bf16.msra.mxu3 %v12026_v13  ;;  %v11994_v63 = vor.u32 %v14116_v18, %v11991_v43  ;;  %v14108_v6 = vld [vmem:[#allocation11 + $0x70c] sm:$0xf]  ;;  %v7599_v49 = vpop.f32.mrf.mxu0  ;;  %v11357_v58 = vld [vmem:[#allocation11 + $0x250] sm:$0xf] }
 0x448   :  { %7830 = vmatmul.bf16.vlgmr.msrb.gmra.mxu2 %v15028_v15  ;;  %v11959_v41 = vld [vmem:[#allocation11 + $0x728] sm:$0xf0]  ;;  %v11645_v11 = vld [vmem:[#allocation11 + $0x490] sm:$0xf] }
 0x449   :  { %7874 = vmatpush.bf16.msra.mxu2 %v11806_v5  ;;  %7850 = vmatpush.bf16.msra.mxu0 %v11230_v17  ;;  %v11962_v46 = vor.u32 %v14108_v6, %v11959_v41  ;;  %v14100_v54 = vld [vmem:[#allocation11 + $0x6cc] sm:$0xf]  ;;  %v11678_v5 = vor.u32 %v14041_v51, %v11677_v62  ;;  %v11102_v17 = vor.u32 %v13897_v12, %v11101_v35  ;;  %v14033_v39 = vld [vmem:[#allocation11 + $0x4ac] sm:$0xf0]  ;;  %v15090_v22 = vpop.f32.mrf.mxu2 }
 0x44a   :  { %v11927_v37 = vld [vmem:[#allocation11 + $0x6e8] sm:$0xf0]  ;;  %v11069_v43 = vld [vmem:[#allocation11 + $0x10] sm:$0xf] }
 0x44b   :  { %7863 = vmatpush.bf16.msra.mxu1 %v11486_v19  ;;  %7785 = vmatpush.bf16.msra.mxu3 %v11994_v63  ;;  %v11930_v57 = vor.u32 %v14100_v54, %v11927_v37  ;;  %v14092_v28 = vld [vmem:[#allocation11 + $0x68c] sm:$0xf]  ;;  %v11358_v19 = vor.u32 %v13961_v3, %v11357_v58  ;;  %v13889_v52 = vld [vmem:[#allocation11 + $0x2c] sm:$0xf0] }
 0x44c   :  { %v11895_v2 = vld [vmem:[#allocation11 + $0x6a8] sm:$0xf0]  ;;  %v11325_v4 = vld [vmem:[#allocation11 + $0x210] sm:$0xf] }
 0x44d   :  { %7875 = vmatpush.bf16.msra.mxu2 %v11774_v34  ;;  %7851 = vmatpush.bf16.msra.mxu0 %v11198_v14  ;;  %v11898_v13 = vor.u32 %v14092_v28, %v11895_v2  ;;  %v14084_v21 = vld [vmem:[#allocation11 + $0x64c] sm:$0xf]  ;;  %v13953_v23 = vld [vmem:[#allocation11 + $0x22c] sm:$0xf0]  ;;  %v11646_v14 = vor.u32 %v14033_v39, %v11645_v11 }
 0x44e   :  { %v11863_v18 = vld [vmem:[#allocation11 + $0x668] sm:$0xf0]  ;;  %v12317_v34 = vld [vmem:[#allocation11 + $0x9d0] sm:$0xf]  ;;  %v11326_v40 = vor.u32 %v13953_v23, %v11325_v4  ;;  %v15095_v23 = vld [vmem:[#allocation13] sm:$0xff] }
 0x44f   :  { %7864 = vmatpush.bf16.msra.mxu1 %v11454_v56  ;;  %7786 = vmatpush.bf16.msra.mxu3 %v11962_v46  ;;  %v14201_v63 = vld [vmem:[#allocation11 + $0x9ec] sm:$0xf0]  ;;  %v11866_v6 = vor.u32 %v14084_v21, %v11863_v18  ;;  %v11070_v56 = vor.u32 %v13889_v52, %v11069_v43  ;;  %v14076_v32 = vld [vmem:[#allocation11 + $0x60c] sm:$0xf] }
 0x450   :  { %v12573_v27 = vld [vmem:[#allocation11 + $0xbd0] sm:$0xf]  ;;  %v12318_v42 = vor.u32 %v14201_v63, %v12317_v34  ;;  %v14388_v48 = vld [vmem:[#allocation11 + $0xfcc] sm:$0xf]  ;;  %v4858_v34 = vperm.slane %v15095_v23, 2 }
 0x451   :  { %7876 = vmatpush.bf16.msra.mxu2 %v11742_v33  ;;  %7852 = vmatpush.bf16.msra.mxu0 %v11166_v30  ;;  %v14265_v1 = vld [vmem:[#allocation11 + $0xbec] sm:$0xf0]  ;;  %v11831_v33 = vld [vmem:[#allocation11 + $0x628] sm:$0xf0]  ;;  %v7625_v51 = vpop.f32.mrf.mxu2 }
 0x452   :  { %v11613_v41 = vld [vmem:[#allocation11 + $0x450] sm:$0xf]  ;;  %v12574_v46 = vor.u32 %v14265_v1, %v12573_v27  ;;  %v13079_v30 = vld [vmem:[#allocation11 + $0xfe8] sm:$0xf0]  ;;  %v11834_v44 = vor.u32 %v14076_v32, %v11831_v33 }
 0x453   :  { %7865 = vmatpush.bf16.msra.mxu1 %v11422_v36  ;;  %7787 = vmatpush.bf16.msra.mxu3 %v11930_v57  ;;  %v14025_v38 = vld [vmem:[#allocation11 + $0x46c] sm:$0xf0]  ;;  %v13082_v16 = vor.u32 %v14388_v48, %v13079_v30  ;;  %v14380_v62 = vld [vmem:[#allocation11 + $0xf8c] sm:$0xf] }
 0x454   :  { %v12285_v55 = vld [vmem:[#allocation11 + $0x990] sm:$0xf]  ;;  %v11614_v54 = vor.u32 %v14025_v38, %v11613_v41  ;;  %v13015_v21 = vld [vmem:[#allocation11 + $0xf68] sm:$0xf0] }
 0x455   :  { %7877 = vmatpush.bf16.msra.mxu2 %v11710_v25  ;;  %7853 = vmatpush.bf16.msra.mxu0 %v11134_v60  ;;  %v14193_v29 = vld [vmem:[#allocation11 + $0x9ac] sm:$0xf0]  ;;  %v12983_v41 = vld [vmem:[#allocation11 + $0xf28] sm:$0xf0] }
 0x456   :  { %v12541_v36 = vld [vmem:[#allocation11 + $0xb90] sm:$0xf]  ;;  %v12286_v25 = vor.u32 %v14193_v29, %v12285_v55 }
 0x457   :  { %7866 = vmatpush.bf16.msra.mxu1 %v11390_v0  ;;  %7788 = vmatpush.bf16.msra.mxu3 %v11898_v13  ;;  %v14257_v37 = vld [vmem:[#allocation11 + $0xbac] sm:$0xf0]  ;;  %v13047_v0 = vld [vmem:[#allocation11 + $0xfa8] sm:$0xf0] }
 0x458   :  { %v11581_v26 = vld [vmem:[#allocation11 + $0x410] sm:$0xf]  ;;  %v12542_v28 = vor.u32 %v14257_v37, %v12541_v36  ;;  %v13050_v24 = vor.u32 %v14380_v62, %v13047_v0  ;;  %v14356_v37 = vld [vmem:[#allocation11 + $0xecc] sm:$0xf] }
 0x459   :  { %7878 = vmatpush.bf16.msra.mxu2 %v11678_v5  ;;  %7854 = vmatpush.bf16.msra.mxu0 %v11102_v17  ;;  %v14017_v31 = vld [vmem:[#allocation11 + $0x42c] sm:$0xf0]  ;;  %v14372_v17 = vld [vmem:[#allocation11 + $0xf4c] sm:$0xf] }
 0x45a   :  { %v12829_v57 = vld [vmem:[#allocation11 + $0xdd0] sm:$0xf]  ;;  %v11582_v12 = vor.u32 %v14017_v31, %v11581_v26  ;;  %v13018_v63 = vor.u32 %v14372_v17, %v13015_v21  ;;  %v12951_v31 = vld [vmem:[#allocation11 + $0xee8] sm:$0xf0] }
 0x45b   :  { %7867 = vmatpush.bf16.msra.mxu1 %v11358_v19  ;;  %7789 = vmatpush.bf16.msra.mxu3 %v11866_v6  ;;  %v14329_v60 = vld [vmem:[#allocation11 + $0xdec] sm:$0xf0]  ;;  %v14364_v6 = vld [vmem:[#allocation11 + $0xf0c] sm:$0xf]  ;;  %v12954_v51 = vor.u32 %v14356_v37, %v12951_v31 }
 0x45c   :  { %v12253_v2 = vld [vmem:[#allocation11 + $0x950] sm:$0xf]  ;;  %v12830_v3 = vor.u32 %v14329_v60, %v12829_v57  ;;  %v12986_v55 = vor.u32 %v14364_v6, %v12983_v41  ;;  %v11295_v41 = vld [vmem:[#allocation11 + $0x1f0] sm:$0xf0]  ;;  %v12855_v37 = vld [vmem:[#allocation11 + $0xe28] sm:$0xf0] }
 0x45d   :  { %7879 = vmatpush.bf16.msra.mxu2 %v11646_v14  ;;  %7855 = vmatpush.bf16.msra.mxu0 %v11070_v56  ;;  %v14185_v35 = vld [vmem:[#allocation11 + $0x96c] sm:$0xf0] }
 0x45e   :  { %v12509_v49 = vld [vmem:[#allocation11 + $0xb50] sm:$0xf]  ;;  %v12254_v5 = vor.u32 %v14185_v35, %v12253_v2  ;;  %v14348_v35 = vld [vmem:[#allocation11 + $0xe8c] sm:$0xf] }
 0x45f   :  { %7868 = vmatpush.bf16.msra.mxu1 %v11326_v40  ;;  %v14249_v58 = vld [vmem:[#allocation11 + $0xb6c] sm:$0xf0]  ;;  %7790 = vmatpush.bf16.msra.mxu3 %v11834_v44 }
 0x460   :  { %7856 = vmatmul.bf16.vlgmr.msra.gmra.mxu0 %v14987_v59  ;;  %v12797_v11 = vld [vmem:[#allocation11 + $0xd90] sm:$0xf]  ;;  %v12510_v39 = vor.u32 %v14249_v58, %v12509_v49  ;;  %v12919_v58 = vld [vmem:[#allocation11 + $0xea8] sm:$0xf0] }
 0x461   :  { %7900 = vmatpush.bf16.msrb.mxu0 %v12318_v42  ;;  %7880 = vmatpush.bf16.msra.mxu2 %v11614_v54  ;;  %v14321_v13 = vld [vmem:[#allocation11 + $0xdac] sm:$0xf0]  ;;  %v7649_v42 = vpop.f32.mrf.mxu0 }
 0x462   :  { %7869 = vmatmul.bf16.vlgmr.msra.gmra.mxu1 %v14989_v61  ;;  %v12221_v18 = vld [vmem:[#allocation11 + $0x910] sm:$0xf]  ;;  %7791 = vmatmul.bf16.vlgmr.msra.gmra.mxu3 %v14999_v8  ;;  %v12798_v4 = vor.u32 %v14321_v13, %v12797_v11  ;;  %v7650_v48 = vadd.f32 %v7649_v42, %v4858_v34  ;;  %v12887_v34 = vld [vmem:[#allocation11 + $0xe68] sm:$0xf0]  ;;  %v14005_v42 = vld [vmem:[#allocation11 + $0x3d4] sm:$0xf] }
 0x463   :  { %7913 = vmatpush.bf16.msrb.mxu1 %v12574_v46  ;;  %7835 = vmatpush.bf16.msrb.mxu3 %v13082_v16  ;;  %v14177_v19 = vld [vmem:[#allocation11 + $0x92c] sm:$0xf0]  ;;  %v7662_v46 = vpop.f32.mrf.mxu1 }
 0x464   :  { %v12477_v43 = vld [vmem:[#allocation11 + $0xb10] sm:$0xf]  ;;  %v12222_v14 = vor.u32 %v14177_v19, %v12221_v18  ;;  %v7663_v44 = vadd.f32 %v7662_v46, %v7650_v48  ;;  %v12922_v19 = vor.u32 %v14348_v35, %v12919_v58 }
 0x465   :  { %7901 = vmatpush.bf16.msrb.mxu0 %v12286_v25  ;;  %7881 = vmatpush.bf16.msra.mxu2 %v11582_v12  ;;  %v14241_v52 = vld [vmem:[#allocation11 + $0xb2c] sm:$0xf0]  ;;  %v7532_v12 = vpop.f32.mrf.mxu3 }
 0x466   :  { %v12765_v27 = vld [vmem:[#allocation11 + $0xd50] sm:$0xf]  ;;  %v12478_v56 = vor.u32 %v14241_v52, %v12477_v43 }
 0x467   :  { %7914 = vmatpush.bf16.msrb.mxu1 %v12542_v28  ;;  %7836 = vmatpush.bf16.msrb.mxu3 %v13050_v24  ;;  %v14313_v1 = vld [vmem:[#allocation11 + $0xd6c] sm:$0xf0] }
 0x468   :  { %7882 = vmatmul.bf16.vlgmr.msra.gmra.mxu2 %v14997_v20  ;;  %v12189_v38 = vld [vmem:[#allocation11 + $0x8d0] sm:$0xf]  ;;  %v12766_v30 = vor.u32 %v14313_v1, %v12765_v27 }
 0x469   :  { %7926 = vmatpush.bf16.msrb.mxu2 %v12830_v3  ;;  %7902 = vmatpush.bf16.msrb.mxu0 %v12254_v5  ;;  %v14169_v40 = vld [vmem:[#allocation11 + $0x8ec] sm:$0xf0]  ;;  %v15100_v5 = vadd.f32 %v7532_v12, %v15077_v7  ;;  %v7651_v11 = vpop.f32.mrf.mxu0  ;;  %v7675_v1 = vpop.f32.mrf.mxu2  ;;  %v14069_v12 = vld [vmem:[#allocation11 + $0x5d4] sm:$0xf] }
 0x46a   :  { %v12445_v32 = vld [vmem:[#allocation11 + $0xad0] sm:$0xf]  ;;  %v12190_v29 = vor.u32 %v14169_v40, %v12189_v38  ;;  %v15102_v38 = vadd.f32 %v7675_v1, %v7663_v44  ;;  %v13933_v44 = vld [vmem:[#allocation11 + $0x194] sm:$0xf] }
 0x46b   :  { %7915 = vmatpush.bf16.msrb.mxu1 %v12510_v39  ;;  %v14233_v33 = vld [vmem:[#allocation11 + $0xaec] sm:$0xf0]  ;;  %7837 = vmatpush.bf16.msrb.mxu3 %v13018_v63  ;;  %v7664_v39 = vpop.f32.mrf.mxu1 }
 0x46c   :  { %v12733_v54 = vld [vmem:[#allocation11 + $0xd10] sm:$0xf]  ;;  %v12446_v26 = vor.u32 %v14233_v33, %v12445_v32  ;;  %v11551_v32 = vld [vmem:[#allocation11 + $0x3f0] sm:$0xf0] }
 0x46d   :  { %7927 = vmatpush.bf16.msrb.mxu2 %v12798_v4  ;;  %7903 = vmatpush.bf16.msrb.mxu0 %v12222_v14  ;;  %v14305_v36 = vld [vmem:[#allocation11 + $0xd2c] sm:$0xf0]  ;;  %v14340_v4 = vld [vmem:[#allocation11 + $0xe4c] sm:$0xf]  ;;  %v11554_v31 = vor.u32 %v14005_v42, %v11551_v32 }
 0x46e   :  { %v12157_v16 = vld [vmem:[#allocation11 + $0x890] sm:$0xf]  ;;  %v12734_v62 = vor.u32 %v14305_v36, %v12733_v54  ;;  %v12890_v33 = vor.u32 %v14340_v4, %v12887_v34  ;;  %v14332_v36 = vld [vmem:[#allocation11 + $0xe0c] sm:$0xf]  ;;  %v14061_v34 = vld [vmem:[#allocation11 + $0x594] sm:$0xf] }
 0x46f   :  { %7916 = vmatpush.bf16.msrb.mxu1 %v12478_v56  ;;  %v14161_v25 = vld [vmem:[#allocation11 + $0x8ac] sm:$0xf0]  ;;  %7838 = vmatpush.bf16.msrb.mxu3 %v12986_v55  ;;  %v13941_v56 = vld [vmem:[#allocation11 + $0x1d4] sm:$0xf]  ;;  %v7534_v55 = vpop.f32.mrf.mxu3 }
 0x470   :  { %v12413_v57 = vld [vmem:[#allocation11 + $0xa90] sm:$0xf]  ;;  %v12158_v28 = vor.u32 %v14161_v25, %v12157_v16  ;;  %v11298_v54 = vor.u32 %v13941_v56, %v11295_v41  ;;  %v11263_v25 = vld [vmem:[#allocation11 + $0x1b0] sm:$0xf0] }
 0x471   :  { %v14225_v60 = vld [vmem:[#allocation11 + $0xaac] sm:$0xf0]  ;;  %7928 = vmatpush.bf16.msrb.mxu2 %v12766_v30  ;;  %7904 = vmatpush.bf16.msrb.mxu0 %v12190_v29  ;;  %v11266_v35 = vor.u32 %v13933_v44, %v11263_v25  ;;  %v11199_v56 = vld [vmem:[#allocation11 + $0x130] sm:$0xf0] }
 0x472   :  { %v12701_v0 = vld [vmem:[#allocation11 + $0xcd0] sm:$0xf]  ;;  %v12414_v49 = vor.u32 %v14225_v60, %v12413_v57  ;;  %v13997_v60 = vld [vmem:[#allocation11 + $0x394] sm:$0xf] }
 0x473   :  { %v14297_v2 = vld [vmem:[#allocation11 + $0xcec] sm:$0xf0]  ;;  %7917 = vmatpush.bf16.msrb.mxu1 %v12446_v26  ;;  %7839 = vmatpush.bf16.msrb.mxu3 %v12954_v51  ;;  %v12858_v51 = vor.u32 %v14332_v36, %v12855_v37  ;;  %v13981_v41 = vld [vmem:[#allocation11 + $0x314] sm:$0xf] }
 0x474   :  { %v12125_v3 = vld [vmem:[#allocation11 + $0x850] sm:$0xf]  ;;  %v12702_v21 = vor.u32 %v14297_v2, %v12701_v0  ;;  %v11167_v36 = vld [vmem:[#allocation11 + $0xf0] sm:$0xf0] }
 0x475   :  { %v14153_v24 = vld [vmem:[#allocation11 + $0x86c] sm:$0xf0]  ;;  %7929 = vmatpush.bf16.msrb.mxu2 %v12734_v62  ;;  %7905 = vmatpush.bf16.msrb.mxu0 %v12158_v28  ;;  %v11519_v62 = vld [vmem:[#allocation11 + $0x3b0] sm:$0xf0] }
 0x476   :  { %v12381_v13 = vld [vmem:[#allocation11 + $0xa50] sm:$0xf]  ;;  %v12126_v43 = vor.u32 %v14153_v24, %v12125_v3  ;;  %v7677_v3 = vpop.f32.mrf.mxu2  ;;  %v11522_v24 = vor.u32 %v13997_v60, %v11519_v62 }
 0x477   :  { %v14217_v17 = vld [vmem:[#allocation11 + $0xa6c] sm:$0xf0]  ;;  %7918 = vmatpush.bf16.msrb.mxu1 %v12414_v49  ;;  %7840 = vmatpush.bf16.msrb.mxu3 %v12922_v19  ;;  %v11807_v49 = vld [vmem:[#allocation11 + $0x5f0] sm:$0xf0] }
 0x478   :  { %v12669_v18 = vld [vmem:[#allocation11 + $0xc90] sm:$0xf]  ;;  %v12382_v63 = vor.u32 %v14217_v17, %v12381_v13  ;;  %v13925_v13 = vld [vmem:[#allocation11 + $0x154] sm:$0xf]  ;;  %v11810_v19 = vor.u32 %v14069_v12, %v11807_v49 }
 0x479   :  { %v14289_v52 = vld [vmem:[#allocation11 + $0xcac] sm:$0xf0]  ;;  %7930 = vmatpush.bf16.msrb.mxu2 %v12702_v21  ;;  %7906 = vmatpush.bf16.msrb.mxu0 %v12126_v43  ;;  %v11231_v17 = vld [vmem:[#allocation11 + $0x170] sm:$0xf0]  ;;  %v7584_v43 = vpop.f32.mrf.mxu3 }
 0x47a   :  { %v12093_v14 = vld [vmem:[#allocation11 + $0x810] sm:$0xf]  ;;  %v12670_v40 = vor.u32 %v14289_v52, %v12669_v18  ;;  %v13989_v21 = vld [vmem:[#allocation11 + $0x354] sm:$0xf]  ;;  %v11234_v4 = vor.u32 %v13925_v13, %v11231_v17 }
 0x47b   :  { %v14145_v27 = vld [vmem:[#allocation11 + $0x82c] sm:$0xf0]  ;;  %7919 = vmatpush.bf16.msrb.mxu1 %v12382_v63  ;;  %7841 = vmatpush.bf16.msrb.mxu3 %v12890_v33  ;;  %v11487_v18 = vld [vmem:[#allocation11 + $0x370] sm:$0xf0] }
 0x47c   :  { %v12349_v7 = vld [vmem:[#allocation11 + $0xa10] sm:$0xf]  ;;  %v12094_v48 = vor.u32 %v14145_v27, %v12093_v14  ;;  %v11775_v63 = vld [vmem:[#allocation11 + $0x5b0] sm:$0xf0]  ;;  %v7585_v27 = vadd.f32 %v7584_v43, %v15082_v45  ;;  %v15114_v25 = vpop.f32.mrf.mxu1 }
 0x47d   :  { %v14209_v6 = vld [vmem:[#allocation11 + $0xa2c] sm:$0xf0]  ;;  %7931 = vmatpush.bf16.msrb.mxu2 %v12670_v40  ;;  %v11455_v40 = vld [vmem:[#allocation11 + $0x330] sm:$0xf0]  ;;  %v11778_v32 = vor.u32 %v14061_v34, %v11775_v63 }
 0x47e   :  { %v12637_v46 = vld [vmem:[#allocation11 + $0xc50] sm:$0xf]  ;;  %v12350_v29 = vor.u32 %v14209_v6, %v12349_v7  ;;  %7907 = vmatpush.bf16.msrb.mxu0 %v12094_v48  ;;  %v11490_v7 = vor.u32 %v13989_v21, %v11487_v18  ;;  %v13917_v6 = vld [vmem:[#allocation11 + $0x114] sm:$0xf]  ;;  %v7598_v42 = vadd.f32 %v15086_v9, %v7585_v27  ;;  %v11458_v55 = vor.u32 %v13981_v41, %v11455_v40 }
 0x47f   :  { %v14281_v30 = vld [vmem:[#allocation11 + $0xc6c] sm:$0xf0]  ;;  %7842 = vmatpush.bf16.msrb.mxu3 %v12858_v51  ;;  %v11202_v48 = vor.u32 %v13917_v6, %v11199_v56  ;;  %v11423_v9 = vld [vmem:[#allocation11 + $0x2f0] sm:$0xf0] }
 0x480   :  { %v12061_v26 = vld [vmem:[#allocation11 + $0x7d0] sm:$0xf]  ;;  %v12638_v57 = vor.u32 %v14281_v30, %v12637_v46  ;;  %7920 = vmatpush.bf16.msrb.mxu1 %v12350_v29  ;;  %v14053_v46 = vld [vmem:[#allocation11 + $0x554] sm:$0xf]  ;;  %v7611_v37 = vadd.f32 %v15088_v47, %v7598_v42 }
 0x481   :  { %v14137_v16 = vld [vmem:[#allocation11 + $0x7ec] sm:$0xf0]  ;;  %7908 = vmatmul.bf16.vlgmr.msrb.gmra.mxu0 %v15017_v53  ;;  %v11743_v30 = vld [vmem:[#allocation11 + $0x570] sm:$0xf0] }
 0x482   :  { %v12605_v28 = vld [vmem:[#allocation11 + $0xc10] sm:$0xf]  ;;  %7952 = vmatpush.bf16.msra.mxu0 %v11298_v54  ;;  %v12062_v2 = vor.u32 %v14137_v16, %v12061_v26  ;;  %7932 = vmatpush.bf16.msrb.mxu2 %v12638_v57  ;;  %v13909_v54 = vld [vmem:[#allocation11 + $0xd4] sm:$0xf]  ;;  %v11746_v16 = vor.u32 %v14053_v46, %v11743_v30  ;;  %v7624_v44 = vadd.f32 %v15090_v22, %v7611_v37  ;;  %v7586_v57 = vpop.f32.mrf.mxu3 }
 0x483   :  { %v14273_v0 = vld [vmem:[#allocation11 + $0xc2c] sm:$0xf0]  ;;  %7921 = vmatmul.bf16.vlgmr.msrb.gmra.mxu1 %v15020_v50  ;;  %7843 = vmatmul.bf16.vlgmr.msrb.gmra.mxu3 %v15050_v10  ;;  %v13973_v26 = vld [vmem:[#allocation11 + $0x2d4] sm:$0xf]  ;;  %v11170_v62 = vor.u32 %v13909_v54, %v11167_v36 }
 0x484   :  { %v12029_v58 = vld [vmem:[#allocation11 + $0x790] sm:$0xf]  ;;  %7965 = vmatpush.bf16.msra.mxu1 %v11554_v31  ;;  %v12606_v39 = vor.u32 %v14273_v0, %v12605_v28  ;;  %7887 = vmatpush.bf16.msra.mxu3 %v12062_v2  ;;  %v15111_v31 = vpop.f32.mrf.mxu0  ;;  %v14045_v51 = vld [vmem:[#allocation11 + $0x514] sm:$0xf]  ;;  %v11426_v47 = vor.u32 %v13973_v26, %v11423_v9 }
 0x485   :  { %v14129_v11 = vld [vmem:[#allocation11 + $0x7ac] sm:$0xf0]  ;;  %v11711_v28 = vld [vmem:[#allocation11 + $0x530] sm:$0xf0] }
 0x486   :  { %7953 = vmatpush.bf16.msra.mxu0 %v11266_v35  ;;  %v12030_v52 = vor.u32 %v14129_v11, %v12029_v58  ;;  %v11997_v14 = vld [vmem:[#allocation11 + $0x750] sm:$0xf]  ;;  %7933 = vmatpush.bf16.msrb.mxu2 %v12606_v39  ;;  %v13901_v35 = vld [vmem:[#allocation11 + $0x94] sm:$0xf]  ;;  %v11714_v3 = vor.u32 %v14045_v51, %v11711_v28 }
 0x487   :  { %v14121_v1 = vld [vmem:[#allocation11 + $0x76c] sm:$0xf0]  ;;  %v11135_v12 = vld [vmem:[#allocation11 + $0xb0] sm:$0xf0] }
 0x488   :  { %7966 = vmatpush.bf16.msra.mxu1 %v11522_v24  ;;  %7888 = vmatpush.bf16.msra.mxu3 %v12030_v52  ;;  %v11998_v33 = vor.u32 %v14121_v1, %v11997_v14  ;;  %v11965_v45 = vld [vmem:[#allocation11 + $0x710] sm:$0xf]  ;;  %v13965_v49 = vld [vmem:[#allocation11 + $0x294] sm:$0xf]  ;;  %v11138_v24 = vor.u32 %v13901_v35, %v11135_v12  ;;  %v7716_v14 = vpop.f32.mrf.mxu1 }
 0x489   :  { %7934 = vmatmul.bf16.vlgmr.msrb.gmra.mxu2 %v15028_v15  ;;  %v14113_v29 = vld [vmem:[#allocation11 + $0x72c] sm:$0xf0]  ;;  %v11391_v58 = vld [vmem:[#allocation11 + $0x2b0] sm:$0xf0] }
 0x48a   :  { %7978 = vmatpush.bf16.msra.mxu2 %v11810_v19  ;;  %7954 = vmatpush.bf16.msra.mxu0 %v11234_v4  ;;  %v11966_v60 = vor.u32 %v14113_v29, %v11965_v45  ;;  %v11933_v0 = vld [vmem:[#allocation11 + $0x6d0] sm:$0xf]  ;;  %v14037_v11 = vld [vmem:[#allocation11 + $0x4d4] sm:$0xf]  ;;  %v11394_v39 = vor.u32 %v13965_v49, %v11391_v58  ;;  %v7636_v27 = vpop.f32.mrf.mxu3 }
 0x48b   :  { %v14105_v2 = vld [vmem:[#allocation11 + $0x6ec] sm:$0xf0]  ;;  %v11679_v13 = vld [vmem:[#allocation11 + $0x4f0] sm:$0xf0]  ;;  %v15116_v40 = vadd.f32 %v7636_v27, %v7624_v44 }
 0x48c   :  { %7967 = vmatpush.bf16.msra.mxu1 %v11490_v7  ;;  %7889 = vmatpush.bf16.msra.mxu3 %v11998_v33  ;;  %v11934_v22 = vor.u32 %v14105_v2, %v11933_v0  ;;  %v11901_v17 = vld [vmem:[#allocation11 + $0x690] sm:$0xf]  ;;  %v13893_v18 = vld [vmem:[#allocation11 + $0x54] sm:$0xf]  ;;  %v7703_v4 = vpop.f32.mrf.mxu0  ;;  %v11682_v34 = vor.u32 %v14037_v11, %v11679_v13 }
 0x48d   :  { %v14097_v21 = vld [vmem:[#allocation11 + $0x6ac] sm:$0xf0]  ;;  %v11103_v19 = vld [vmem:[#allocation11 + $0x70] sm:$0xf0] }
 0x48e   :  { %7979 = vmatpush.bf16.msra.mxu2 %v11778_v32  ;;  %7955 = vmatpush.bf16.msra.mxu0 %v11202_v48  ;;  %v13957_v43 = vld [vmem:[#allocation11 + $0x254] sm:$0xf]  ;;  %v11902_v7 = vor.u32 %v14097_v21, %v11901_v17  ;;  %v11106_v1 = vor.u32 %v13893_v18, %v11103_v19  ;;  %v11869_v56 = vld [vmem:[#allocation11 + $0x650] sm:$0xf] }
 0x48f   :  { %v11359_v52 = vld [vmem:[#allocation11 + $0x270] sm:$0xf0]  ;;  %v14089_v41 = vld [vmem:[#allocation11 + $0x66c] sm:$0xf0] }
 0x490   :  { %7968 = vmatpush.bf16.msra.mxu1 %v11458_v55  ;;  %7890 = vmatpush.bf16.msra.mxu3 %v11966_v60  ;;  %v14029_v63 = vld [vmem:[#allocation11 + $0x494] sm:$0xf]  ;;  %v11362_v42 = vor.u32 %v13957_v43, %v11359_v52  ;;  %v15118_v55 = vpop.f32.mrf.mxu2  ;;  %v11870_v37 = vor.u32 %v14089_v41, %v11869_v56  ;;  %v11837_v60 = vld [vmem:[#allocation11 + $0x610] sm:$0xf] }
 0x491   :  { %v11647_v6 = vld [vmem:[#allocation11 + $0x4b0] sm:$0xf0]  ;;  %v13085_v51 = vld [vmem:[#allocation11 + $0xfd0] sm:$0xf] }
 0x492   :  { %7980 = vmatpush.bf16.msra.mxu2 %v11746_v16  ;;  %7956 = vmatpush.bf16.msra.mxu0 %v11170_v62  ;;  %v13885_v32 = vld [vmem:[#allocation11 + $0x14] sm:$0xf]  ;;  %v11650_v29 = vor.u32 %v14029_v63, %v11647_v6  ;;  %v14081_v62 = vld [vmem:[#allocation11 + $0x62c] sm:$0xf0]  ;;  %v7638_v58 = vpop.f32.mrf.mxu3 }
 0x493   :  { %v11071_v33 = vld [vmem:[#allocation11 + $0x30] sm:$0xf0]  ;;  %v14393_v0 = vld [vmem:[#allocation11 + $0xfec] sm:$0xf0] }
 0x494   :  { %7969 = vmatpush.bf16.msra.mxu1 %v11426_v47  ;;  %7891 = vmatpush.bf16.msra.mxu3 %v11934_v22  ;;  %v13949_v48 = vld [vmem:[#allocation11 + $0x214] sm:$0xf]  ;;  %v11074_v26 = vor.u32 %v13885_v32, %v11071_v33  ;;  %v13086_v11 = vor.u32 %v14393_v0, %v13085_v51  ;;  %v13053_v21 = vld [vmem:[#allocation11 + $0xf90] sm:$0xf] }
 0x495   :  { %v11327_v46 = vld [vmem:[#allocation11 + $0x230] sm:$0xf0]  ;;  %v14385_v19 = vld [vmem:[#allocation11 + $0xfac] sm:$0xf0] }
 0x496   :  { %7981 = vmatpush.bf16.msra.mxu2 %v11714_v3  ;;  %7957 = vmatpush.bf16.msra.mxu0 %v11138_v24  ;;  %v14197_v30 = vld [vmem:[#allocation11 + $0x9d4] sm:$0xf]  ;;  %v11330_v44 = vor.u32 %v13949_v48, %v11327_v46  ;;  %v11838_v3 = vor.u32 %v14081_v62, %v11837_v60  ;;  %v13021_v41 = vld [vmem:[#allocation11 + $0xf50] sm:$0xf] }
 0x497   :  { %v12319_v45 = vld [vmem:[#allocation11 + $0x9f0] sm:$0xf0]  ;;  %v14377_v32 = vld [vmem:[#allocation11 + $0xf6c] sm:$0xf0] }
 0x498   :  { %7970 = vmatpush.bf16.msra.mxu1 %v11394_v39  ;;  %v14261_v54 = vld [vmem:[#allocation11 + $0xbd4] sm:$0xf]  ;;  %7892 = vmatpush.bf16.msra.mxu3 %v11902_v7  ;;  %v12322_v57 = vor.u32 %v14197_v30, %v12319_v45  ;;  %v7729_v4 = vpop.f32.mrf.mxu2  ;;  %v13054_v7 = vor.u32 %v14385_v19, %v13053_v21  ;;  %v12957_v58 = vld [vmem:[#allocation11 + $0xed0] sm:$0xf] }
 0x499   :  { %v12575_v36 = vld [vmem:[#allocation11 + $0xbf0] sm:$0xf0]  ;;  %v12925_v4 = vld [vmem:[#allocation11 + $0xe90] sm:$0xf] }
 0x49a   :  { %7982 = vmatpush.bf16.msra.mxu2 %v11682_v34  ;;  %7958 = vmatpush.bf16.msra.mxu0 %v11106_v1  ;;  %v14021_v9 = vld [vmem:[#allocation11 + $0x454] sm:$0xf]  ;;  %v12578_v28 = vor.u32 %v14261_v54, %v12575_v36  ;;  %v13022_v54 = vor.u32 %v14377_v32, %v13021_v41 }
 0x49b   :  { %v11615_v16 = vld [vmem:[#allocation11 + $0x470] sm:$0xf0] }
 0x49c   :  { %7971 = vmatpush.bf16.msra.mxu1 %v11362_v42  ;;  %v14189_v47 = vld [vmem:[#allocation11 + $0x994] sm:$0xf]  ;;  %v11618_v35 = vor.u32 %v14021_v9, %v11615_v16  ;;  %7893 = vmatpush.bf16.msra.mxu3 %v11870_v37  ;;  %v12989_v9 = vld [vmem:[#allocation11 + $0xf10] sm:$0xf] }
 0x49d   :  { %v12287_v2 = vld [vmem:[#allocation11 + $0x9b0] sm:$0xf0] }
 0x49e   :  { %7983 = vmatpush.bf16.msra.mxu2 %v11650_v29  ;;  %v14253_v12 = vld [vmem:[#allocation11 + $0xb94] sm:$0xf]  ;;  %7959 = vmatpush.bf16.msra.mxu0 %v11074_v26  ;;  %v12290_v13 = vor.u32 %v14189_v47, %v12287_v2  ;;  %v4859_v29 = vperm.slane %v15095_v23, 3  ;;  %v7766_v47 = vpop.f32.mrf.mxu1 }
 0x49f   :  { %v12543_v49 = vld [vmem:[#allocation11 + $0xbb0] sm:$0xf0] }
 0x4a0   :  { %v14013_v22 = vld [vmem:[#allocation11 + $0x414] sm:$0xf]  ;;  %7972 = vmatpush.bf16.msra.mxu1 %v11330_v44  ;;  %v12546_v18 = vor.u32 %v14253_v12, %v12543_v49  ;;  %7894 = vmatpush.bf16.msra.mxu3 %v11838_v3  ;;  %v14369_v44 = vld [vmem:[#allocation11 + $0xf2c] sm:$0xf0] }
 0x4a1   :  { %v11583_v24 = vld [vmem:[#allocation11 + $0x430] sm:$0xf0]  ;;  %7960 = vmatmul.bf16.vlgmr.msra.gmra.mxu0 %v14987_v59  ;;  %v12990_v2 = vor.u32 %v14369_v44, %v12989_v9  ;;  %v13946_v44 = vld [vmem:[#allocation11 + $0x1f4] sm:$0xf0] }
 0x4a2   :  { %8004 = vmatpush.bf16.msrb.mxu0 %v12322_v57  ;;  %v14325_v17 = vld [vmem:[#allocation11 + $0xdd4] sm:$0xf]  ;;  %7984 = vmatpush.bf16.msra.mxu2 %v11618_v35  ;;  %v11586_v34 = vor.u32 %v14013_v22, %v11583_v24  ;;  %v14361_v22 = vld [vmem:[#allocation11 + $0xeec] sm:$0xf0] }
 0x4a3   :  { %v12831_v39 = vld [vmem:[#allocation11 + $0xdf0] sm:$0xf0]  ;;  %7973 = vmatmul.bf16.vlgmr.msra.gmra.mxu1 %v14989_v61  ;;  %7895 = vmatmul.bf16.vlgmr.msra.gmra.mxu3 %v14999_v8 }
 0x4a4   :  { %8017 = vmatpush.bf16.msrb.mxu1 %v12578_v28  ;;  %v14181_v43 = vld [vmem:[#allocation11 + $0x954] sm:$0xf]  ;;  %v12834_v27 = vor.u32 %v14325_v17, %v12831_v39  ;;  %7939 = vmatpush.bf16.msrb.mxu3 %v13086_v11  ;;  %v7753_v28 = vpop.f32.mrf.mxu0  ;;  %v7688_v32 = vpop.f32.mrf.mxu3 }
 0x4a5   :  { %v12255_v52 = vld [vmem:[#allocation11 + $0x970] sm:$0xf0]  ;;  %v7754_v23 = vadd.f32 %v7753_v28, %v4859_v29  ;;  %v7689_v29 = vadd.f32 %v7688_v32, %v15102_v38 }
 0x4a6   :  { %v14245_v63 = vld [vmem:[#allocation11 + $0xb54] sm:$0xf]  ;;  %8005 = vmatpush.bf16.msrb.mxu0 %v12290_v13  ;;  %v12258_v1 = vor.u32 %v14181_v43, %v12255_v52  ;;  %7985 = vmatpush.bf16.msra.mxu2 %v11586_v34 }
 0x4a7   :  { %v12511_v14 = vld [vmem:[#allocation11 + $0xb70] sm:$0xf0]  ;;  %v7767_v13 = vadd.f32 %v7766_v47, %v7754_v23 }
 0x4a8   :  { %v14317_v6 = vld [vmem:[#allocation11 + $0xd94] sm:$0xf]  ;;  %8018 = vmatpush.bf16.msrb.mxu1 %v12546_v18  ;;  %v12514_v42 = vor.u32 %v14245_v63, %v12511_v14  ;;  %7940 = vmatpush.bf16.msrb.mxu3 %v13054_v7  ;;  %v12958_v18 = vor.u32 %v14361_v22, %v12957_v58  ;;  %v14353_v63 = vld [vmem:[#allocation11 + $0xeac] sm:$0xf0] }
 0x4a9   :  { %v12799_v56 = vld [vmem:[#allocation11 + $0xdb0] sm:$0xf0]  ;;  %7986 = vmatmul.bf16.vlgmr.msra.gmra.mxu2 %v14997_v20  ;;  %v7779_v28 = vpop.f32.mrf.mxu2  ;;  %v14337_v58 = vld [vmem:[#allocation11 + $0xe2c] sm:$0xf0] }
 0x4aa   :  { %v14173_v33 = vld [vmem:[#allocation11 + $0x914] sm:$0xf]  ;;  %8030 = vmatpush.bf16.msrb.mxu2 %v12834_v27  ;;  %v12802_v45 = vor.u32 %v14317_v6, %v12799_v56  ;;  %8006 = vmatpush.bf16.msrb.mxu0 %v12258_v1 }
 0x4ab   :  { %v12223_v48 = vld [vmem:[#allocation11 + $0x930] sm:$0xf0] }
 0x4ac   :  { %v14237_v46 = vld [vmem:[#allocation11 + $0xb14] sm:$0xf]  ;;  %v12226_v36 = vor.u32 %v14173_v33, %v12223_v48  ;;  %8019 = vmatpush.bf16.msrb.mxu1 %v12514_v42  ;;  %7941 = vmatpush.bf16.msrb.mxu3 %v13022_v54  ;;  %v7755_v6 = vpop.f32.mrf.mxu0  ;;  %v7768_v42 = vpop.f32.mrf.mxu1  ;;  %v12926_v33 = vor.u32 %v14353_v63, %v12925_v4  ;;  %v11813_v63 = vld [vmem:[#allocation11 + $0x5d8] sm:$0xf] }
 0x4ad   :  { %v12479_v30 = vld [vmem:[#allocation11 + $0xb30] sm:$0xf0]  ;;  %v11237_v6 = vld [vmem:[#allocation11 + $0x158] sm:$0xf] }
 0x4ae   :  { %v14309_v37 = vld [vmem:[#allocation11 + $0xd54] sm:$0xf]  ;;  %v12482_v16 = vor.u32 %v14237_v46, %v12479_v30  ;;  %8031 = vmatpush.bf16.msrb.mxu2 %v12802_v45  ;;  %8007 = vmatpush.bf16.msrb.mxu0 %v12226_v36  ;;  %v12893_v30 = vld [vmem:[#allocation11 + $0xe50] sm:$0xf]  ;;  %v13994_v42 = vld [vmem:[#allocation11 + $0x374] sm:$0xf0] }
 0x4af   :  { %v12767_v26 = vld [vmem:[#allocation11 + $0xd70] sm:$0xf0]  ;;  %v14345_v45 = vld [vmem:[#allocation11 + $0xe6c] sm:$0xf0] }
 0x4b0   :  { %v14165_v57 = vld [vmem:[#allocation11 + $0x8d4] sm:$0xf]  ;;  %v12770_v0 = vor.u32 %v14309_v37, %v12767_v26  ;;  %8020 = vmatpush.bf16.msrb.mxu1 %v12482_v16  ;;  %7942 = vmatpush.bf16.msrb.mxu3 %v12990_v2  ;;  %v11301_v16 = vld [vmem:[#allocation11 + $0x1d8] sm:$0xf]  ;;  %v15127_v2 = vadd.f32 %v7779_v28, %v7767_v13  ;;  %v7690_v13 = vpop.f32.mrf.mxu3 }
 0x4b1   :  { %v12191_v60 = vld [vmem:[#allocation11 + $0x8f0] sm:$0xf0]  ;;  %v7781_v32 = vpop.f32.mrf.mxu2  ;;  %v13906_v13 = vld [vmem:[#allocation11 + $0xb4] sm:$0xf0] }
 0x4b2   :  { %v14229_v62 = vld [vmem:[#allocation11 + $0xad4] sm:$0xf]  ;;  %v12194_v35 = vor.u32 %v14165_v57, %v12191_v60  ;;  %8032 = vmatpush.bf16.msrb.mxu2 %v12770_v0  ;;  %v7702_v57 = vadd.f32 %v15111_v31, %v7689_v29  ;;  %v12894_v0 = vor.u32 %v14345_v45, %v12893_v30  ;;  %v11781_v30 = vld [vmem:[#allocation11 + $0x598] sm:$0xf] }
 0x4b3   :  { %v12447_v51 = vld [vmem:[#allocation11 + $0xaf0] sm:$0xf0]  ;;  %v14066_v45 = vld [vmem:[#allocation11 + $0x5b4] sm:$0xf0] }
 0x4b4   :  { %v14301_v12 = vld [vmem:[#allocation11 + $0xd14] sm:$0xf]  ;;  %v12450_v3 = vor.u32 %v14229_v62, %v12447_v51  ;;  %8008 = vmatpush.bf16.msrb.mxu0 %v12194_v35  ;;  %7943 = vmatpush.bf16.msrb.mxu3 %v12958_v18  ;;  %v11557_v62 = vld [vmem:[#allocation11 + $0x3d8] sm:$0xf]  ;;  %v7715_v31 = vadd.f32 %v15114_v25, %v7702_v57 }
 0x4b5   :  { %v12735_v49 = vld [vmem:[#allocation11 + $0xd30] sm:$0xf0]  ;;  %v14010_v51 = vld [vmem:[#allocation11 + $0x3f4] sm:$0xf0] }
 0x4b6   :  { %v14157_v24 = vld [vmem:[#allocation11 + $0x894] sm:$0xf]  ;;  %v12738_v21 = vor.u32 %v14301_v12, %v12735_v49  ;;  %8021 = vmatpush.bf16.msrb.mxu1 %v12450_v3  ;;  %v11302_v12 = vor.u32 %v13946_v44, %v11301_v16  ;;  %v12861_v49 = vld [vmem:[#allocation11 + $0xe10] sm:$0xf]  ;;  %v11558_v22 = vor.u32 %v14010_v51, %v11557_v62  ;;  %v14002_v18 = vld [vmem:[#allocation11 + $0x3b4] sm:$0xf0]  ;;  %v11782_v44 = vor.u32 %v14066_v45, %v11781_v30 }
 0x4b7   :  { %v12159_v11 = vld [vmem:[#allocation11 + $0x8b0] sm:$0xf0]  ;;  %v13986_v16 = vld [vmem:[#allocation11 + $0x334] sm:$0xf0] }
 0x4b8   :  { %v14221_v17 = vld [vmem:[#allocation11 + $0xa94] sm:$0xf]  ;;  %v12162_v19 = vor.u32 %v14157_v24, %v12159_v11  ;;  %8033 = vmatpush.bf16.msrb.mxu2 %v12738_v21  ;;  %7944 = vmatpush.bf16.msrb.mxu3 %v12926_v33  ;;  %v11269_v11 = vld [vmem:[#allocation11 + $0x198] sm:$0xf] }
 0x4b9   :  { %v12415_v39 = vld [vmem:[#allocation11 + $0xab0] sm:$0xf0]  ;;  %v11525_v21 = vld [vmem:[#allocation11 + $0x398] sm:$0xf] }
 0x4ba   :  { %v14293_v43 = vld [vmem:[#allocation11 + $0xcd4] sm:$0xf]  ;;  %v12418_v34 = vor.u32 %v14221_v17, %v12415_v39  ;;  %8009 = vmatpush.bf16.msrb.mxu0 %v12162_v19  ;;  %v13938_v17 = vld [vmem:[#allocation11 + $0x1b4] sm:$0xf0]  ;;  %v15131_v19 = vadd.f32 %v15118_v55, %v7715_v31 }
 0x4bb   :  { %v12703_v52 = vld [vmem:[#allocation11 + $0xcf0] sm:$0xf0]  ;;  %v11749_v62 = vld [vmem:[#allocation11 + $0x558] sm:$0xf] }
 0x4bc   :  { %v14149_v14 = vld [vmem:[#allocation11 + $0x854] sm:$0xf]  ;;  %v12706_v56 = vor.u32 %v14293_v43, %v12703_v52  ;;  %8022 = vmatpush.bf16.msrb.mxu1 %v12418_v34  ;;  %7945 = vmatpush.bf16.msrb.mxu3 %v12894_v0  ;;  %v12862_v43 = vor.u32 %v14337_v58, %v12861_v49  ;;  %v11270_v34 = vor.u32 %v13938_v17, %v11269_v11  ;;  %v14058_v51 = vld [vmem:[#allocation11 + $0x574] sm:$0xf0] }
 0x4bd   :  { %v12127_v27 = vld [vmem:[#allocation11 + $0x870] sm:$0xf0]  ;;  %v11750_v49 = vor.u32 %v14058_v51, %v11749_v62  ;;  %v15137_v58 = vpop.f32.mrf.mxu0  ;;  %v14050_v11 = vld [vmem:[#allocation11 + $0x534] sm:$0xf0] }
 0x4be   :  { %v14213_v7 = vld [vmem:[#allocation11 + $0xa54] sm:$0xf]  ;;  %v12130_v48 = vor.u32 %v14149_v14, %v12127_v27  ;;  %8034 = vmatpush.bf16.msrb.mxu2 %v12706_v56  ;;  %v14074_v14 = vld [vmem:[#allocation11 + $0x5f4] sm:$0xf0] }
 0x4bf   :  { %v12383_v1 = vld [vmem:[#allocation11 + $0xa70] sm:$0xf0]  ;;  %v13930_v56 = vld [vmem:[#allocation11 + $0x174] sm:$0xf0]  ;;  %v11814_v33 = vor.u32 %v14074_v14, %v11813_v63 }
 0x4c0   :  { %v14285_v41 = vld [vmem:[#allocation11 + $0xc94] sm:$0xf]  ;;  %v12386_v54 = vor.u32 %v14213_v7, %v12383_v1  ;;  %8010 = vmatpush.bf16.msrb.mxu0 %v12130_v48  ;;  %v11526_v7 = vor.u32 %v14002_v18, %v11525_v21  ;;  %7946 = vmatpush.bf16.msrb.mxu3 %v12862_v43  ;;  %v11141_v18 = vld [vmem:[#allocation11 + $0x98] sm:$0xf] }
 0x4c1   :  { %v12671_v46 = vld [vmem:[#allocation11 + $0xcb0] sm:$0xf0]  ;;  %v11397_v43 = vld [vmem:[#allocation11 + $0x298] sm:$0xf] }
 0x4c2   :  { %v14141_v36 = vld [vmem:[#allocation11 + $0x814] sm:$0xf]  ;;  %v12674_v60 = vor.u32 %v14285_v41, %v12671_v46  ;;  %8023 = vmatpush.bf16.msrb.mxu1 %v12386_v54  ;;  %v11493_v41 = vld [vmem:[#allocation11 + $0x358] sm:$0xf]  ;;  %v11238_v46 = vor.u32 %v13930_v56, %v11237_v6 }
 0x4c3   :  { %v12095_v37 = vld [vmem:[#allocation11 + $0x830] sm:$0xf0]  ;;  %v11494_v54 = vor.u32 %v13994_v42, %v11493_v41  ;;  %7947 = vmatmul.bf16.vlgmr.msrb.gmra.mxu3 %v15050_v10  ;;  %v11685_v63 = vld [vmem:[#allocation11 + $0x4d8] sm:$0xf] }
 0x4c4   :  { %v14205_v26 = vld [vmem:[#allocation11 + $0xa14] sm:$0xf]  ;;  %v12098_v23 = vor.u32 %v14141_v36, %v12095_v37  ;;  %8035 = vmatpush.bf16.msrb.mxu2 %v12674_v60  ;;  %v11205_v37 = vld [vmem:[#allocation11 + $0x118] sm:$0xf] }
 0x4c5   :  { %v12351_v9 = vld [vmem:[#allocation11 + $0xa30] sm:$0xf0]  ;;  %v14042_v14 = vld [vmem:[#allocation11 + $0x4f4] sm:$0xf0] }
 0x4c6   :  { %v14277_v38 = vld [vmem:[#allocation11 + $0xc54] sm:$0xf]  ;;  %v12354_v35 = vor.u32 %v14205_v26, %v12351_v9  ;;  %8011 = vmatpush.bf16.msrb.mxu0 %v12098_v23  ;;  %v13922_v26 = vld [vmem:[#allocation11 + $0x134] sm:$0xf0]  ;;  %v11686_v42 = vor.u32 %v14042_v14, %v11685_v63 }
 0x4c7   :  { %v12639_v47 = vld [vmem:[#allocation11 + $0xc70] sm:$0xf0]  ;;  %v11461_v9 = vld [vmem:[#allocation11 + $0x318] sm:$0xf]  ;;  %v11206_v60 = vor.u32 %v13922_v26, %v11205_v37 }
 0x4c8   :  { %v14133_v3 = vld [vmem:[#allocation11 + $0x7d4] sm:$0xf]  ;;  %v12642_v39 = vor.u32 %v14277_v38, %v12639_v47  ;;  %8024 = vmatpush.bf16.msrb.mxu1 %v12354_v35  ;;  %v11462_v0 = vor.u32 %v13986_v16, %v11461_v9  ;;  %v11173_v38 = vld [vmem:[#allocation11 + $0xd8] sm:$0xf] }
 0x4c9   :  { %v12063_v24 = vld [vmem:[#allocation11 + $0x7f0] sm:$0xf0]  ;;  %8012 = vmatmul.bf16.vlgmr.msrb.gmra.mxu0 %v15017_v53  ;;  %v13914_v47 = vld [vmem:[#allocation11 + $0xf4] sm:$0xf0] }
 0x4ca   :  { %v14269_v52 = vld [vmem:[#allocation11 + $0xc14] sm:$0xf]  ;;  %8056 = vmatpush.bf16.msra.mxu0 %v11302_v12  ;;  %v12066_v25 = vor.u32 %v14133_v3, %v12063_v24  ;;  %8036 = vmatpush.bf16.msrb.mxu2 %v12642_v39  ;;  %v11429_v35 = vld [vmem:[#allocation11 + $0x2d8] sm:$0xf]  ;;  %v15139_v3 = vpop.f32.mrf.mxu1 }
 0x4cb   :  { %v12607_v4 = vld [vmem:[#allocation11 + $0xc30] sm:$0xf0]  ;;  %8025 = vmatmul.bf16.vlgmr.msrb.gmra.mxu1 %v15020_v50  ;;  %v13978_v12 = vld [vmem:[#allocation11 + $0x2f4] sm:$0xf0] }
 0x4cc   :  { %v14125_v27 = vld [vmem:[#allocation11 + $0x794] sm:$0xf]  ;;  %8069 = vmatpush.bf16.msra.mxu1 %v11558_v22  ;;  %v12610_v55 = vor.u32 %v14269_v52, %v12607_v4  ;;  %7991 = vmatpush.bf16.msra.mxu3 %v12066_v25  ;;  %v11174_v22 = vor.u32 %v13914_v47, %v11173_v38  ;;  %v11717_v24 = vld [vmem:[#allocation11 + $0x518] sm:$0xf]  ;;  %v11430_v39 = vor.u32 %v13978_v12, %v11429_v35 }
 0x4cd   :  { %v12031_v1 = vld [vmem:[#allocation11 + $0x7b0] sm:$0xf0]  ;;  %v13970_v52 = vld [vmem:[#allocation11 + $0x2b4] sm:$0xf0]  ;;  %v11718_v4 = vor.u32 %v14050_v11, %v11717_v24 }
 0x4ce   :  { %8057 = vmatpush.bf16.msra.mxu0 %v11270_v34  ;;  %v12034_v48 = vor.u32 %v14125_v27, %v12031_v1  ;;  %v14117_v29 = vld [vmem:[#allocation11 + $0x754] sm:$0xf]  ;;  %8037 = vmatpush.bf16.msrb.mxu2 %v12610_v55  ;;  %v11142_v34 = vor.u32 %v13906_v13, %v11141_v18  ;;  %v11109_v6 = vld [vmem:[#allocation11 + $0x58] sm:$0xf] }
 0x4cf   :  { %v11999_v36 = vld [vmem:[#allocation11 + $0x770] sm:$0xf0]  ;;  %v13898_v56 = vld [vmem:[#allocation11 + $0x74] sm:$0xf0] }
 0x4d0   :  { %8070 = vmatpush.bf16.msra.mxu1 %v11526_v7  ;;  %7992 = vmatpush.bf16.msra.mxu3 %v12034_v48  ;;  %v12002_v57 = vor.u32 %v14117_v29, %v11999_v36  ;;  %v14109_v28 = vld [vmem:[#allocation11 + $0x714] sm:$0xf]  ;;  %v11398_v7 = vor.u32 %v13970_v52, %v11397_v43  ;;  %v11365_v55 = vld [vmem:[#allocation11 + $0x258] sm:$0xf]  ;;  %v11110_v30 = vor.u32 %v13898_v56, %v11109_v6  ;;  %v7740_v36 = vpop.f32.mrf.mxu3 }
 0x4d1   :  { %8038 = vmatmul.bf16.vlgmr.msrb.gmra.mxu2 %v15028_v15  ;;  %v11967_v23 = vld [vmem:[#allocation11 + $0x730] sm:$0xf0]  ;;  %v13962_v41 = vld [vmem:[#allocation11 + $0x274] sm:$0xf0] }
 0x4d2   :  { %8082 = vmatpush.bf16.msra.mxu2 %v11814_v33  ;;  %8058 = vmatpush.bf16.msra.mxu0 %v11238_v46  ;;  %v11970_v31 = vor.u32 %v14109_v28, %v11967_v23  ;;  %v14101_v17 = vld [vmem:[#allocation11 + $0x6d4] sm:$0xf]  ;;  %v11653_v32 = vld [vmem:[#allocation11 + $0x498] sm:$0xf]  ;;  %v7807_v33 = vpop.f32.mrf.mxu0  ;;  %v7820_v48 = vpop.f32.mrf.mxu1  ;;  %v11366_v37 = vor.u32 %v13962_v41, %v11365_v55 }
 0x4d3   :  { %v11935_v21 = vld [vmem:[#allocation11 + $0x6f0] sm:$0xf0]  ;;  %v14034_v45 = vld [vmem:[#allocation11 + $0x4b4] sm:$0xf0]  ;;  %v15144_v23 = vpop.f32.mrf.mxu2 }
 0x4d4   :  { %8071 = vmatpush.bf16.msra.mxu1 %v11494_v54  ;;  %7993 = vmatpush.bf16.msra.mxu3 %v12002_v57  ;;  %v11938_v25 = vor.u32 %v14101_v17, %v11935_v21  ;;  %v14093_v27 = vld [vmem:[#allocation11 + $0x694] sm:$0xf]  ;;  %v11077_v26 = vld [vmem:[#allocation11 + $0x18] sm:$0xf]  ;;  %v11654_v51 = vor.u32 %v14034_v45, %v11653_v32 }
 0x4d5   :  { %v11903_v1 = vld [vmem:[#allocation11 + $0x6b0] sm:$0xf0]  ;;  %v13890_v9 = vld [vmem:[#allocation11 + $0x34] sm:$0xf0] }
 0x4d6   :  { %8083 = vmatpush.bf16.msra.mxu2 %v11782_v44  ;;  %8059 = vmatpush.bf16.msra.mxu0 %v11206_v60  ;;  %v11906_v46 = vor.u32 %v14093_v27, %v11903_v1  ;;  %v14085_v29 = vld [vmem:[#allocation11 + $0x654] sm:$0xf]  ;;  %v11333_v16 = vld [vmem:[#allocation11 + $0x218] sm:$0xf]  ;;  %v15142_v44 = vadd.f32 %v7740_v36, %v15131_v19  ;;  %v11078_v47 = vor.u32 %v13890_v9, %v11077_v26 }
 0x4d7   :  { %v11871_v54 = vld [vmem:[#allocation11 + $0x670] sm:$0xf0]  ;;  %v13954_v57 = vld [vmem:[#allocation11 + $0x234] sm:$0xf0] }
 0x4d8   :  { %8072 = vmatpush.bf16.msra.mxu1 %v11462_v0  ;;  %7994 = vmatpush.bf16.msra.mxu3 %v11970_v31  ;;  %v12325_v60 = vld [vmem:[#allocation11 + $0x9d8] sm:$0xf]  ;;  %v11874_v38 = vor.u32 %v14085_v29, %v11871_v54  ;;  %v14077_v19 = vld [vmem:[#allocation11 + $0x614] sm:$0xf] }
 0x4d9   :  { %v14202_v62 = vld [vmem:[#allocation11 + $0x9f4] sm:$0xf0]  ;;  %v14389_v24 = vld [vmem:[#allocation11 + $0xfd4] sm:$0xf] }
 0x4da   :  { %8084 = vmatpush.bf16.msra.mxu2 %v11750_v49  ;;  %8060 = vmatpush.bf16.msra.mxu0 %v11174_v22  ;;  %v12581_v28 = vld [vmem:[#allocation11 + $0xbd8] sm:$0xf]  ;;  %v11334_v49 = vor.u32 %v13954_v57, %v11333_v16  ;;  %v12326_v31 = vor.u32 %v14202_v62, %v12325_v60  ;;  %v11839_v22 = vld [vmem:[#allocation11 + $0x630] sm:$0xf0] }
 0x4db   :  { %v14266_v0 = vld [vmem:[#allocation11 + $0xbf4] sm:$0xf0]  ;;  %v13087_v17 = vld [vmem:[#allocation11 + $0xff0] sm:$0xf0]  ;;  %v11842_v52 = vor.u32 %v14077_v19, %v11839_v22  ;;  %v7833_v48 = vpop.f32.mrf.mxu2 }
 0x4dc   :  { %8073 = vmatpush.bf16.msra.mxu1 %v11430_v39  ;;  %7995 = vmatpush.bf16.msra.mxu3 %v11938_v25  ;;  %v11621_v35 = vld [vmem:[#allocation11 + $0x458] sm:$0xf]  ;;  %v12582_v11 = vor.u32 %v14266_v0, %v12581_v28  ;;  %v13090_v63 = vor.u32 %v14389_v24, %v13087_v17  ;;  %v14381_v1 = vld [vmem:[#allocation11 + $0xf94] sm:$0xf] }
 0x4dd   :  { %v14026_v12 = vld [vmem:[#allocation11 + $0x474] sm:$0xf0]  ;;  %v13055_v56 = vld [vmem:[#allocation11 + $0xfb0] sm:$0xf0]  ;;  %v7857_v17 = vpop.f32.mrf.mxu0 }
 0x4de   :  { %8085 = vmatpush.bf16.msra.mxu2 %v11718_v4  ;;  %8061 = vmatpush.bf16.msra.mxu0 %v11142_v34  ;;  %v12293_v39 = vld [vmem:[#allocation11 + $0x998] sm:$0xf]  ;;  %v11622_v18 = vor.u32 %v14026_v12, %v11621_v35  ;;  %v7742_v34 = vpop.f32.mrf.mxu3  ;;  %v14373_v36 = vld [vmem:[#allocation11 + $0xf54] sm:$0xf] }
 0x4df   :  { %v14194_v21 = vld [vmem:[#allocation11 + $0x9b4] sm:$0xf0]  ;;  %v13023_v26 = vld [vmem:[#allocation11 + $0xf70] sm:$0xf0] }
 0x4e0   :  { %8074 = vmatpush.bf16.msra.mxu1 %v11398_v7  ;;  %7996 = vmatpush.bf16.msra.mxu3 %v11906_v46  ;;  %v12549_v13 = vld [vmem:[#allocation11 + $0xb98] sm:$0xf]  ;;  %v12294_v14 = vor.u32 %v14194_v21, %v12293_v39  ;;  %v13026_v0 = vor.u32 %v14373_v36, %v13023_v26  ;;  %v14365_v12 = vld [vmem:[#allocation11 + $0xf14] sm:$0xf] }
 0x4e1   :  { %v14258_v43 = vld [vmem:[#allocation11 + $0xbb4] sm:$0xf0] }
 0x4e2   :  { %8086 = vmatpush.bf16.msra.mxu2 %v11686_v42  ;;  %8062 = vmatpush.bf16.msra.mxu0 %v11110_v30  ;;  %v11589_v4 = vld [vmem:[#allocation11 + $0x418] sm:$0xf]  ;;  %v12550_v6 = vor.u32 %v14258_v43, %v12549_v13  ;;  %v13058_v30 = vor.u32 %v14381_v1, %v13055_v56 }
 0x4e3   :  { %v14018_v25 = vld [vmem:[#allocation11 + $0x434] sm:$0xf0] }
 0x4e4   :  { %8075 = vmatpush.bf16.msra.mxu1 %v11366_v37  ;;  %7997 = vmatpush.bf16.msra.mxu3 %v11874_v38  ;;  %v12837_v27 = vld [vmem:[#allocation11 + $0xdd8] sm:$0xf]  ;;  %v11590_v42 = vor.u32 %v14018_v25, %v11589_v4  ;;  %v14357_v25 = vld [vmem:[#allocation11 + $0xed4] sm:$0xf] }
 0x4e5   :  { %v14330_v7 = vld [vmem:[#allocation11 + $0xdf4] sm:$0xf0]  ;;  %v7859_v36 = vpop.f32.mrf.mxu0 }
 0x4e6   :  { %8087 = vmatpush.bf16.msra.mxu2 %v11654_v51  ;;  %8063 = vmatpush.bf16.msra.mxu0 %v11078_v47  ;;  %v12261_v55 = vld [vmem:[#allocation11 + $0x958] sm:$0xf]  ;;  %v12838_v46 = vor.u32 %v14330_v7, %v12837_v27  ;;  %v15149_v51 = vld [vmem:[#allocation13] sm:$0xff] }
 0x4e7   :  { %v14186_v41 = vld [vmem:[#allocation11 + $0x974] sm:$0xf0]  ;;  %v4860_v28 = vperm.slane %v15149_v51, 4 }
 0x4e8   :  { %8076 = vmatpush.bf16.msra.mxu1 %v11334_v49  ;;  %v12517_v32 = vld [vmem:[#allocation11 + $0xb58] sm:$0xf]  ;;  %7998 = vmatpush.bf16.msra.mxu3 %v11842_v52  ;;  %v12262_v45 = vor.u32 %v14186_v41, %v12261_v55 }
 0x4e9   :  { %8064 = vmatmul.bf16.vlgmr.msra.gmra.mxu0 %v14987_v59  ;;  %v14250_v33 = vld [vmem:[#allocation11 + $0xb74] sm:$0xf0]  ;;  %v7858_v21 = vadd.f32 %v7857_v17, %v4860_v28  ;;  %v12895_v28 = vld [vmem:[#allocation11 + $0xe70] sm:$0xf0]  ;;  %v11559_v17 = vld [vmem:[#allocation11 + $0x3f8] sm:$0xf0] }
 0x4ea   :  { %8108 = vmatpush.bf16.msrb.mxu0 %v12326_v31  ;;  %8088 = vmatpush.bf16.msra.mxu2 %v11622_v18  ;;  %v12805_v29 = vld [vmem:[#allocation11 + $0xd98] sm:$0xf]  ;;  %v12518_v37 = vor.u32 %v14250_v33, %v12517_v32  ;;  %v12991_v31 = vld [vmem:[#allocation11 + $0xf30] sm:$0xf0]  ;;  %v7870_v18 = vpop.f32.mrf.mxu1 }
 0x4eb   :  { %8077 = vmatmul.bf16.vlgmr.msra.gmra.mxu1 %v14989_v61  ;;  %v14322_v54 = vld [vmem:[#allocation11 + $0xdb4] sm:$0xf0]  ;;  %7999 = vmatmul.bf16.vlgmr.msra.gmra.mxu3 %v14999_v8  ;;  %v12994_v13 = vor.u32 %v14365_v12, %v12991_v31  ;;  %v7871_v7 = vadd.f32 %v7870_v18, %v7858_v21  ;;  %v14349_v33 = vld [vmem:[#allocation11 + $0xe94] sm:$0xf]  ;;  %v7883_v21 = vpop.f32.mrf.mxu2 }
 0x4ec   :  { %8121 = vmatpush.bf16.msrb.mxu1 %v12582_v11  ;;  %8043 = vmatpush.bf16.msrb.mxu3 %v13090_v63  ;;  %v12229_v9 = vld [vmem:[#allocation11 + $0x918] sm:$0xf]  ;;  %v12806_v62 = vor.u32 %v14322_v54, %v12805_v29  ;;  %v12959_v63 = vld [vmem:[#allocation11 + $0xef0] sm:$0xf0] }
 0x4ed   :  { %v14178_v16 = vld [vmem:[#allocation11 + $0x934] sm:$0xf0]  ;;  %v12962_v55 = vor.u32 %v14357_v25, %v12959_v63  ;;  %v12863_v63 = vld [vmem:[#allocation11 + $0xe30] sm:$0xf0] }
 0x4ee   :  { %8109 = vmatpush.bf16.msrb.mxu0 %v12294_v14  ;;  %8089 = vmatpush.bf16.msra.mxu2 %v11590_v42  ;;  %v12485_v57 = vld [vmem:[#allocation11 + $0xb18] sm:$0xf]  ;;  %v12230_v38 = vor.u32 %v14178_v16, %v12229_v9 }
 0x4ef   :  { %v14242_v60 = vld [vmem:[#allocation11 + $0xb34] sm:$0xf0] }
 0x4f0   :  { %8122 = vmatpush.bf16.msrb.mxu1 %v12550_v6  ;;  %8044 = vmatpush.bf16.msrb.mxu3 %v13058_v30  ;;  %v12773_v47 = vld [vmem:[#allocation11 + $0xd58] sm:$0xf]  ;;  %v12486_v49 = vor.u32 %v14242_v60, %v12485_v57 }
 0x4f1   :  { %v14314_v35 = vld [vmem:[#allocation11 + $0xd74] sm:$0xf0]  ;;  %8090 = vmatmul.bf16.vlgmr.msra.gmra.mxu2 %v14997_v20 }
 0x4f2   :  { %8134 = vmatpush.bf16.msrb.mxu2 %v12838_v46  ;;  %8110 = vmatpush.bf16.msrb.mxu0 %v12262_v45  ;;  %v12197_v19 = vld [vmem:[#allocation11 + $0x8d8] sm:$0xf]  ;;  %v12774_v39 = vor.u32 %v14314_v35, %v12773_v47  ;;  %v12927_v46 = vld [vmem:[#allocation11 + $0xeb0] sm:$0xf0]  ;;  %v7872_v9 = vpop.f32.mrf.mxu1 }
 0x4f3   :  { %v14170_v22 = vld [vmem:[#allocation11 + $0x8f4] sm:$0xf0]  ;;  %v12930_v16 = vor.u32 %v14349_v33, %v12927_v46  ;;  %v11239_v9 = vld [vmem:[#allocation11 + $0x178] sm:$0xf0] }
 0x4f4   :  { %8123 = vmatpush.bf16.msrb.mxu1 %v12518_v37  ;;  %v12453_v24 = vld [vmem:[#allocation11 + $0xad8] sm:$0xf]  ;;  %8045 = vmatpush.bf16.msrb.mxu3 %v13026_v0  ;;  %v12198_v43 = vor.u32 %v14170_v22, %v12197_v19  ;;  %v7792_v0 = vpop.f32.mrf.mxu3  ;;  %v13942_v19 = vld [vmem:[#allocation11 + $0x1dc] sm:$0xf] }
 0x4f5   :  { %v14234_v11 = vld [vmem:[#allocation11 + $0xaf4] sm:$0xf0]  ;;  %v11303_v22 = vld [vmem:[#allocation11 + $0x1f8] sm:$0xf0] }
 0x4f6   :  { %8135 = vmatpush.bf16.msrb.mxu2 %v12806_v62  ;;  %8111 = vmatpush.bf16.msrb.mxu0 %v12230_v38  ;;  %v12741_v52 = vld [vmem:[#allocation11 + $0xd18] sm:$0xf]  ;;  %v12454_v34 = vor.u32 %v14234_v11, %v12453_v24  ;;  %v14341_v62 = vld [vmem:[#allocation11 + $0xe54] sm:$0xf]  ;;  %v14006_v11 = vld [vmem:[#allocation11 + $0x3dc] sm:$0xf]  ;;  %v11306_v25 = vor.u32 %v13942_v19, %v11303_v22 }
 0x4f7   :  { %v14306_v4 = vld [vmem:[#allocation11 + $0xd34] sm:$0xf0]  ;;  %v12898_v18 = vor.u32 %v14341_v62, %v12895_v28  ;;  %v11207_v19 = vld [vmem:[#allocation11 + $0x138] sm:$0xf0] }
 0x4f8   :  { %8124 = vmatpush.bf16.msrb.mxu1 %v12486_v49  ;;  %v12165_v14 = vld [vmem:[#allocation11 + $0x898] sm:$0xf]  ;;  %v12742_v56 = vor.u32 %v14306_v4, %v12741_v52  ;;  %8046 = vmatpush.bf16.msrb.mxu3 %v12994_v13  ;;  %v7793_v49 = vadd.f32 %v7792_v0, %v15127_v2  ;;  %v15155_v4 = vadd.f32 %v7883_v21, %v7871_v7  ;;  %v13982_v22 = vld [vmem:[#allocation11 + $0x31c] sm:$0xf] }
 0x4f9   :  { %v14162_v27 = vld [vmem:[#allocation11 + $0x8b4] sm:$0xf0]  ;;  %v14054_v21 = vld [vmem:[#allocation11 + $0x55c] sm:$0xf] }
 0x4fa   :  { %v12421_v1 = vld [vmem:[#allocation11 + $0xa98] sm:$0xf]  ;;  %8136 = vmatpush.bf16.msrb.mxu2 %v12774_v39  ;;  %8112 = vmatpush.bf16.msrb.mxu0 %v12198_v43  ;;  %v12166_v41 = vor.u32 %v14162_v27, %v12165_v14  ;;  %v7806_v39 = vadd.f32 %v15137_v58, %v7793_v49  ;;  %v11562_v27 = vor.u32 %v14006_v11, %v11559_v17 }
 0x4fb   :  { %v14226_v6 = vld [vmem:[#allocation11 + $0xab4] sm:$0xf0] }
 0x4fc   :  { %v12709_v42 = vld [vmem:[#allocation11 + $0xcd8] sm:$0xf]  ;;  %8125 = vmatpush.bf16.msrb.mxu1 %v12454_v34  ;;  %v12422_v48 = vor.u32 %v14226_v6, %v12421_v1  ;;  %8047 = vmatpush.bf16.msrb.mxu3 %v12962_v55  ;;  %v14333_v34 = vld [vmem:[#allocation11 + $0xe14] sm:$0xf]  ;;  %v13934_v6 = vld [vmem:[#allocation11 + $0x19c] sm:$0xf]  ;;  %v7819_v58 = vadd.f32 %v15139_v3, %v7806_v39  ;;  %v7794_v46 = vpop.f32.mrf.mxu3 }
 0x4fd   :  { %v14298_v32 = vld [vmem:[#allocation11 + $0xcf4] sm:$0xf0]  ;;  %v12866_v7 = vor.u32 %v14333_v34, %v12863_v63  ;;  %v13974_v34 = vld [vmem:[#allocation11 + $0x2dc] sm:$0xf] }
 0x4fe   :  { %v12133_v30 = vld [vmem:[#allocation11 + $0x858] sm:$0xf]  ;;  %8137 = vmatpush.bf16.msrb.mxu2 %v12742_v56  ;;  %v12710_v37 = vor.u32 %v14298_v32, %v12709_v42  ;;  %8113 = vmatpush.bf16.msrb.mxu0 %v12166_v41  ;;  %v11271_v56 = vld [vmem:[#allocation11 + $0x1b8] sm:$0xf0] }
 0x4ff   :  { %v14154_v45 = vld [vmem:[#allocation11 + $0x874] sm:$0xf0]  ;;  %v13998_v41 = vld [vmem:[#allocation11 + $0x39c] sm:$0xf] }
 0x500   :  { %v12389_v29 = vld [vmem:[#allocation11 + $0xa58] sm:$0xf]  ;;  %v12134_v57 = vor.u32 %v14154_v45, %v12133_v30  ;;  %8126 = vmatpush.bf16.msrb.mxu1 %v12422_v48  ;;  %8048 = vmatpush.bf16.msrb.mxu3 %v12930_v16  ;;  %v11527_v42 = vld [vmem:[#allocation11 + $0x3b8] sm:$0xf0]  ;;  %v15159_v48 = vadd.f32 %v15144_v23, %v7819_v58  ;;  %v11274_v45 = vor.u32 %v13934_v6, %v11271_v56 }
 0x501   :  { %v14218_v54 = vld [vmem:[#allocation11 + $0xa74] sm:$0xf0]  ;;  %v11530_v36 = vor.u32 %v13998_v41, %v11527_v42  ;;  %v11495_v23 = vld [vmem:[#allocation11 + $0x378] sm:$0xf0] }
 0x502   :  { %v12677_v26 = vld [vmem:[#allocation11 + $0xc98] sm:$0xf]  ;;  %v12390_v38 = vor.u32 %v14218_v54, %v12389_v29  ;;  %8138 = vmatpush.bf16.msrb.mxu2 %v12710_v37  ;;  %8114 = vmatpush.bf16.msrb.mxu0 %v12134_v57  ;;  %v14070_v29 = vld [vmem:[#allocation11 + $0x5dc] sm:$0xf] }
 0x503   :  { %v14290_v60 = vld [vmem:[#allocation11 + $0xcb4] sm:$0xf0]  ;;  %v11815_v54 = vld [vmem:[#allocation11 + $0x5f8] sm:$0xf0] }
 0x504   :  { %v12101_v47 = vld [vmem:[#allocation11 + $0x818] sm:$0xf]  ;;  %v12678_v24 = vor.u32 %v14290_v60, %v12677_v26  ;;  %8127 = vmatpush.bf16.msrb.mxu1 %v12390_v38  ;;  %8049 = vmatpush.bf16.msrb.mxu3 %v12898_v18  ;;  %v13926_v26 = vld [vmem:[#allocation11 + $0x15c] sm:$0xf]  ;;  %v7885_v60 = vpop.f32.mrf.mxu2  ;;  %v11818_v62 = vor.u32 %v14070_v29, %v11815_v54 }
 0x505   :  { %v14146_v35 = vld [vmem:[#allocation11 + $0x834] sm:$0xf0]  ;;  %v13990_v57 = vld [vmem:[#allocation11 + $0x35c] sm:$0xf]  ;;  %v11242_v0 = vor.u32 %v13926_v26, %v11239_v9 }
 0x506   :  { %v12357_v12 = vld [vmem:[#allocation11 + $0xa18] sm:$0xf]  ;;  %v12102_v13 = vor.u32 %v14146_v35, %v12101_v47  ;;  %8139 = vmatpush.bf16.msrb.mxu2 %v12678_v24  ;;  %v14062_v38 = vld [vmem:[#allocation11 + $0x59c] sm:$0xf] }
 0x507   :  { %v14210_v31 = vld [vmem:[#allocation11 + $0xa34] sm:$0xf0]  ;;  %v11783_v47 = vld [vmem:[#allocation11 + $0x5b8] sm:$0xf0] }
 0x508   :  { %v12645_v43 = vld [vmem:[#allocation11 + $0xc58] sm:$0xf]  ;;  %v12358_v2 = vor.u32 %v14210_v31, %v12357_v12  ;;  %8115 = vmatpush.bf16.msrb.mxu0 %v12102_v13  ;;  %8050 = vmatpush.bf16.msrb.mxu3 %v12866_v7  ;;  %v11498_v12 = vor.u32 %v13990_v57, %v11495_v23  ;;  %v13918_v31 = vld [vmem:[#allocation11 + $0x11c] sm:$0xf]  ;;  %v11786_v11 = vor.u32 %v14062_v38, %v11783_v47 }
 0x509   :  { %v14282_v52 = vld [vmem:[#allocation11 + $0xc74] sm:$0xf0]  ;;  %v11463_v24 = vld [vmem:[#allocation11 + $0x338] sm:$0xf0]  ;;  %v11210_v39 = vor.u32 %v13918_v31, %v11207_v19  ;;  %v7844_v19 = vpop.f32.mrf.mxu3 }
 0x50a   :  { %v12069_v14 = vld [vmem:[#allocation11 + $0x7d8] sm:$0xf]  ;;  %v12646_v55 = vor.u32 %v14282_v52, %v12645_v43  ;;  %8128 = vmatpush.bf16.msrb.mxu1 %v12358_v2  ;;  %v11751_v18 = vld [vmem:[#allocation11 + $0x578] sm:$0xf0]  ;;  %v11466_v43 = vor.u32 %v13982_v22, %v11463_v24 }
 0x50b   :  { %v14138_v1 = vld [vmem:[#allocation11 + $0x7f4] sm:$0xf0]  ;;  %8116 = vmatmul.bf16.vlgmr.msrb.gmra.mxu0 %v15017_v53  ;;  %8051 = vmatmul.bf16.vlgmr.msrb.gmra.mxu3 %v15050_v10  ;;  %v13910_v2 = vld [vmem:[#allocation11 + $0xdc] sm:$0xf] }
 0x50c   :  { %v12613_v32 = vld [vmem:[#allocation11 + $0xc18] sm:$0xf]  ;;  %8160 = vmatpush.bf16.msra.mxu0 %v11306_v25  ;;  %v12070_v30 = vor.u32 %v14138_v1, %v12069_v14  ;;  %8140 = vmatpush.bf16.msrb.mxu2 %v12646_v55  ;;  %v11175_v25 = vld [vmem:[#allocation11 + $0xf8] sm:$0xf0]  ;;  %v15165_v14 = vpop.f32.mrf.mxu0  ;;  %v15167_v1 = vpop.f32.mrf.mxu1 }
 0x50d   :  { %v14274_v33 = vld [vmem:[#allocation11 + $0xc34] sm:$0xf0]  ;;  %8129 = vmatmul.bf16.vlgmr.msrb.gmra.mxu1 %v15020_v50  ;;  %v11431_v63 = vld [vmem:[#allocation11 + $0x2f8] sm:$0xf0]  ;;  %v11178_v56 = vor.u32 %v13910_v2, %v11175_v25  ;;  %v15172_v25 = vpop.f32.mrf.mxu2 }
 0x50e   :  { %v12037_v3 = vld [vmem:[#allocation11 + $0x798] sm:$0xf]  ;;  %8173 = vmatpush.bf16.msra.mxu1 %v11562_v27  ;;  %v12614_v16 = vor.u32 %v14274_v33, %v12613_v32  ;;  %8095 = vmatpush.bf16.msra.mxu3 %v12070_v30  ;;  %v11754_v27 = vor.u32 %v14054_v21, %v11751_v18  ;;  %v14046_v58 = vld [vmem:[#allocation11 + $0x51c] sm:$0xf]  ;;  %v11434_v42 = vor.u32 %v13974_v34, %v11431_v63 }
 0x50f   :  { %v14130_v37 = vld [vmem:[#allocation11 + $0x7b4] sm:$0xf0]  ;;  %v11719_v55 = vld [vmem:[#allocation11 + $0x538] sm:$0xf0] }
 0x510   :  { %8161 = vmatpush.bf16.msra.mxu0 %v11274_v45  ;;  %v12038_v28 = vor.u32 %v14130_v37, %v12037_v3  ;;  %v12005_v35 = vld [vmem:[#allocation11 + $0x758] sm:$0xf]  ;;  %8141 = vmatpush.bf16.msrb.mxu2 %v12614_v16  ;;  %v13902_v32 = vld [vmem:[#allocation11 + $0x9c] sm:$0xf]  ;;  %v11722_v45 = vor.u32 %v14046_v58, %v11719_v55 }
 0x511   :  { %v14122_v49 = vld [vmem:[#allocation11 + $0x774] sm:$0xf0]  ;;  %v11143_v33 = vld [vmem:[#allocation11 + $0xb8] sm:$0xf0] }
 0x512   :  { %8174 = vmatpush.bf16.msra.mxu1 %v11530_v36  ;;  %8096 = vmatpush.bf16.msra.mxu3 %v12038_v28  ;;  %v12006_v17 = vor.u32 %v14122_v49, %v12005_v35  ;;  %v11973_v13 = vld [vmem:[#allocation11 + $0x718] sm:$0xf]  ;;  %v13966_v46 = vld [vmem:[#allocation11 + $0x29c] sm:$0xf]  ;;  %v11146_v54 = vor.u32 %v13902_v32, %v11143_v33 }
 0x513   :  { %8142 = vmatmul.bf16.vlgmr.msrb.gmra.mxu2 %v15028_v15  ;;  %v14114_v52 = vld [vmem:[#allocation11 + $0x734] sm:$0xf0]  ;;  %v11399_v30 = vld [vmem:[#allocation11 + $0x2b8] sm:$0xf0] }
 0x514   :  { %8186 = vmatpush.bf16.msra.mxu2 %v11818_v62  ;;  %8162 = vmatpush.bf16.msra.mxu0 %v11242_v0  ;;  %v11974_v6 = vor.u32 %v14114_v52, %v11973_v13  ;;  %v11941_v41 = vld [vmem:[#allocation11 + $0x6d8] sm:$0xf]  ;;  %v14038_v3 = vld [vmem:[#allocation11 + $0x4dc] sm:$0xf]  ;;  %v11402_v26 = vor.u32 %v13966_v46, %v11399_v30  ;;  %v7911_v62 = vpop.f32.mrf.mxu0  ;;  %v7924_v38 = vpop.f32.mrf.mxu1 }
 0x515   :  { %v14106_v7 = vld [vmem:[#allocation11 + $0x6f4] sm:$0xf0]  ;;  %v11687_v36 = vld [vmem:[#allocation11 + $0x4f8] sm:$0xf0] }
 0x516   :  { %8175 = vmatpush.bf16.msra.mxu1 %v11498_v12  ;;  %8097 = vmatpush.bf16.msra.mxu3 %v12006_v17  ;;  %v11942_v29 = vor.u32 %v14106_v7, %v11941_v41  ;;  %v11909_v37 = vld [vmem:[#allocation11 + $0x698] sm:$0xf]  ;;  %v13894_v16 = vld [vmem:[#allocation11 + $0x5c] sm:$0xf]  ;;  %v11690_v28 = vor.u32 %v14038_v3, %v11687_v36  ;;  %v7846_v36 = vpop.f32.mrf.mxu3 }
 0x517   :  { %v14098_v9 = vld [vmem:[#allocation11 + $0x6b4] sm:$0xf0]  ;;  %v11111_v57 = vld [vmem:[#allocation11 + $0x78] sm:$0xf0] }
 0x518   :  { %8187 = vmatpush.bf16.msra.mxu2 %v11786_v11  ;;  %8163 = vmatpush.bf16.msra.mxu0 %v11210_v39  ;;  %v13958_v23 = vld [vmem:[#allocation11 + $0x25c] sm:$0xf]  ;;  %v11910_v47 = vor.u32 %v14098_v9, %v11909_v37  ;;  %v11114_v35 = vor.u32 %v13894_v16, %v11111_v57  ;;  %v11877_v49 = vld [vmem:[#allocation11 + $0x658] sm:$0xf]  ;;  %v15170_v39 = vadd.f32 %v7844_v19, %v15159_v48 }
 0x519   :  { %v11367_v60 = vld [vmem:[#allocation11 + $0x278] sm:$0xf0]  ;;  %v14090_v31 = vld [vmem:[#allocation11 + $0x674] sm:$0xf0] }
 0x51a   :  { %8176 = vmatpush.bf16.msra.mxu1 %v11466_v43  ;;  %8098 = vmatpush.bf16.msra.mxu3 %v11974_v6  ;;  %v14030_v0 = vld [vmem:[#allocation11 + $0x49c] sm:$0xf]  ;;  %v11370_v22 = vor.u32 %v13958_v23, %v11367_v60  ;;  %v11878_v34 = vor.u32 %v14090_v31, %v11877_v49  ;;  %v11845_v48 = vld [vmem:[#allocation11 + $0x618] sm:$0xf] }
 0x51b   :  { %v11655_v12 = vld [vmem:[#allocation11 + $0x4b8] sm:$0xf0]  ;;  %v14082_v55 = vld [vmem:[#allocation11 + $0x634] sm:$0xf0] }
 0x51c   :  { %8188 = vmatpush.bf16.msra.mxu2 %v11754_v27  ;;  %8164 = vmatpush.bf16.msra.mxu0 %v11178_v56  ;;  %v13886_v24 = vld [vmem:[#allocation11 + $0x1c] sm:$0xf]  ;;  %v11658_v43 = vor.u32 %v14030_v0, %v11655_v12  ;;  %v13093_v41 = vld [vmem:[#allocation11 + $0xfd8] sm:$0xf] }
 0x51d   :  { %v11079_v11 = vld [vmem:[#allocation11 + $0x38] sm:$0xf0]  ;;  %v14394_v7 = vld [vmem:[#allocation11 + $0xff4] sm:$0xf0] }
 0x51e   :  { %8177 = vmatpush.bf16.msra.mxu1 %v11434_v42  ;;  %8099 = vmatpush.bf16.msra.mxu3 %v11942_v29  ;;  %v13950_v17 = vld [vmem:[#allocation11 + $0x21c] sm:$0xf]  ;;  %v11082_v63 = vor.u32 %v13886_v24, %v11079_v11  ;;  %v11846_v29 = vor.u32 %v14082_v55, %v11845_v48  ;;  %v13094_v37 = vor.u32 %v14394_v7, %v13093_v41  ;;  %v13061_v57 = vld [vmem:[#allocation11 + $0xf98] sm:$0xf] }
 0x51f   :  { %v11335_v21 = vld [vmem:[#allocation11 + $0x238] sm:$0xf0]  ;;  %v14386_v60 = vld [vmem:[#allocation11 + $0xfb4] sm:$0xf0] }
 0x520   :  { %8189 = vmatpush.bf16.msra.mxu2 %v11722_v45  ;;  %8165 = vmatpush.bf16.msra.mxu0 %v11146_v54  ;;  %v14198_v18 = vld [vmem:[#allocation11 + $0x9dc] sm:$0xf]  ;;  %v11338_v56 = vor.u32 %v13950_v17, %v11335_v21  ;;  %v13062_v49 = vor.u32 %v14386_v60, %v13061_v57  ;;  %v13029_v24 = vld [vmem:[#allocation11 + $0xf58] sm:$0xf] }
 0x521   :  { %v12327_v13 = vld [vmem:[#allocation11 + $0x9f8] sm:$0xf0]  ;;  %v14378_v17 = vld [vmem:[#allocation11 + $0xf74] sm:$0xf0] }
 0x522   :  { %8178 = vmatpush.bf16.msra.mxu1 %v11402_v26  ;;  %v14262_v52 = vld [vmem:[#allocation11 + $0xbdc] sm:$0xf]  ;;  %8100 = vmatpush.bf16.msra.mxu3 %v11910_v47  ;;  %v12330_v58 = vor.u32 %v14198_v18, %v12327_v13 }
 0x523   :  { %v12583_v2 = vld [vmem:[#allocation11 + $0xbf8] sm:$0xf0] }
 0x524   :  { %8190 = vmatpush.bf16.msra.mxu2 %v11690_v28  ;;  %8166 = vmatpush.bf16.msra.mxu0 %v11114_v35  ;;  %v14022_v27 = vld [vmem:[#allocation11 + $0x45c] sm:$0xf]  ;;  %v12586_v42 = vor.u32 %v14262_v52, %v12583_v2  ;;  %v7937_v35 = vpop.f32.mrf.mxu2  ;;  %v13030_v52 = vor.u32 %v14378_v17, %v13029_v24 }
 0x525   :  { %v11623_v6 = vld [vmem:[#allocation11 + $0x478] sm:$0xf0] }
 0x526   :  { %8179 = vmatpush.bf16.msra.mxu1 %v11370_v22  ;;  %v14190_v32 = vld [vmem:[#allocation11 + $0x99c] sm:$0xf]  ;;  %v11626_v46 = vor.u32 %v14022_v27, %v11623_v6  ;;  %8101 = vmatpush.bf16.msra.mxu3 %v11878_v34  ;;  %v12997_v27 = vld [vmem:[#allocation11 + $0xf18] sm:$0xf] }
 0x527   :  { %v12295_v33 = vld [vmem:[#allocation11 + $0x9b8] sm:$0xf0] }
 0x528   :  { %8191 = vmatpush.bf16.msra.mxu2 %v11658_v43  ;;  %v14254_v30 = vld [vmem:[#allocation11 + $0xb9c] sm:$0xf]  ;;  %8167 = vmatpush.bf16.msra.mxu0 %v11082_v63  ;;  %v12298_v26 = vor.u32 %v14190_v32, %v12295_v33  ;;  %v4861_v43 = vperm.slane %v15149_v51, 5  ;;  %v7974_v32 = vpop.f32.mrf.mxu1 }
 0x529   :  { %v12551_v45 = vld [vmem:[#allocation11 + $0xbb8] sm:$0xf0] }
 0x52a   :  { %v14014_v54 = vld [vmem:[#allocation11 + $0x41c] sm:$0xf]  ;;  %8180 = vmatpush.bf16.msra.mxu1 %v11338_v56  ;;  %v12554_v23 = vor.u32 %v14254_v30, %v12551_v45  ;;  %8102 = vmatpush.bf16.msra.mxu3 %v11846_v29  ;;  %v14370_v56 = vld [vmem:[#allocation11 + $0xf34] sm:$0xf0] }
 0x52b   :  { %v11591_v3 = vld [vmem:[#allocation11 + $0x438] sm:$0xf0]  ;;  %8168 = vmatmul.bf16.vlgmr.msra.gmra.mxu0 %v14987_v59  ;;  %v12998_v33 = vor.u32 %v14370_v56, %v12997_v27  ;;  %v12965_v29 = vld [vmem:[#allocation11 + $0xed8] sm:$0xf] }
 0x52c   :  { %8212 = vmatpush.bf16.msrb.mxu0 %v12330_v58  ;;  %v14326_v9 = vld [vmem:[#allocation11 + $0xddc] sm:$0xf]  ;;  %8192 = vmatpush.bf16.msra.mxu2 %v11626_v46  ;;  %v11594_v0 = vor.u32 %v14014_v54, %v11591_v3  ;;  %v14362_v54 = vld [vmem:[#allocation11 + $0xef4] sm:$0xf0]  ;;  %v7987_v56 = vpop.f32.mrf.mxu2 }
 0x52d   :  { %v12839_v16 = vld [vmem:[#allocation11 + $0xdf8] sm:$0xf0]  ;;  %8181 = vmatmul.bf16.vlgmr.msra.gmra.mxu1 %v14989_v61  ;;  %8103 = vmatmul.bf16.vlgmr.msra.gmra.mxu3 %v14999_v8  ;;  %v12966_v57 = vor.u32 %v14362_v54, %v12965_v29 }
 0x52e   :  { %8225 = vmatpush.bf16.msrb.mxu1 %v12586_v42  ;;  %v14182_v62 = vld [vmem:[#allocation11 + $0x95c] sm:$0xf]  ;;  %v12842_v12 = vor.u32 %v14326_v9, %v12839_v16  ;;  %8147 = vmatpush.bf16.msrb.mxu3 %v13094_v37  ;;  %v7961_v42 = vpop.f32.mrf.mxu0 }
 0x52f   :  { %v12263_v28 = vld [vmem:[#allocation11 + $0x978] sm:$0xf0]  ;;  %v7962_v51 = vadd.f32 %v7961_v42, %v4861_v43 }
 0x530   :  { %v14246_v38 = vld [vmem:[#allocation11 + $0xb5c] sm:$0xf]  ;;  %8213 = vmatpush.bf16.msrb.mxu0 %v12298_v26  ;;  %v12266_v31 = vor.u32 %v14182_v62, %v12263_v28  ;;  %8193 = vmatpush.bf16.msra.mxu2 %v11594_v0  ;;  %v12933_v28 = vld [vmem:[#allocation11 + $0xe98] sm:$0xf] }
 0x531   :  { %v12519_v47 = vld [vmem:[#allocation11 + $0xb78] sm:$0xf0]  ;;  %v7975_v37 = vadd.f32 %v7974_v32, %v7962_v51  ;;  %v14402_v51 = vld [vmem:[#allocation14 + $0x38] sm:$0xff]  ;;  %v12869_v32 = vld [vmem:[#allocation11 + $0xe18] sm:$0xf] }
 0x532   :  { %v14318_v19 = vld [vmem:[#allocation11 + $0xd9c] sm:$0xf]  ;;  %8226 = vmatpush.bf16.msrb.mxu1 %v12554_v23  ;;  %v12522_v11 = vor.u32 %v14246_v38, %v12519_v47  ;;  %8148 = vmatpush.bf16.msrb.mxu3 %v13062_v49  ;;  %v14354_v38 = vld [vmem:[#allocation11 + $0xeb4] sm:$0xf0] }
 0x533   :  { %v12807_v22 = vld [vmem:[#allocation11 + $0xdb8] sm:$0xf0]  ;;  %8194 = vmatmul.bf16.vlgmr.msra.gmra.mxu2 %v14997_v20  ;;  %v12934_v24 = vor.u32 %v14354_v38, %v12933_v28  ;;  %v15181_v42 = vadd.f32 %v7987_v56, %v7975_v37  ;;  %v14408_v28 = vld [vmem:[#allocation14 + $0x68] sm:$0xff] }
 0x534   :  { %v14174_v21 = vld [vmem:[#allocation11 + $0x91c] sm:$0xf]  ;;  %8238 = vmatpush.bf16.msrb.mxu2 %v12842_v12  ;;  %v12810_v61 = vor.u32 %v14318_v19, %v12807_v22  ;;  %8214 = vmatpush.bf16.msrb.mxu0 %v12266_v31  ;;  %v7976_v22 = vpop.f32.mrf.mxu1 }
 0x535   :  { %v12231_v59 = vld [vmem:[#allocation11 + $0x938] sm:$0xf0] }
 0x536   :  { %v14238_v18 = vld [vmem:[#allocation11 + $0xb1c] sm:$0xf]  ;;  %v12234_v2 = vor.u32 %v14174_v21, %v12231_v59  ;;  %8227 = vmatpush.bf16.msrb.mxu1 %v12522_v11  ;;  %8149 = vmatpush.bf16.msrb.mxu3 %v13030_v52  ;;  %v7963_v31 = vpop.f32.mrf.mxu0  ;;  %v12901_v59 = vld [vmem:[#allocation11 + $0xe58] sm:$0xf] }
 0x537   :  { %v12487_v13 = vld [vmem:[#allocation11 + $0xb38] sm:$0xf0] }
 0x538   :  { %v14310_v34 = vld [vmem:[#allocation11 + $0xd5c] sm:$0xf]  ;;  %v12490_v6 = vor.u32 %v14238_v18, %v12487_v13  ;;  %8239 = vmatpush.bf16.msrb.mxu2 %v12810_v61  ;;  %8215 = vmatpush.bf16.msrb.mxu0 %v12234_v2  ;;  %v7896_v18 = vpop.f32.mrf.mxu3  ;;  %v14346_v61 = vld [vmem:[#allocation11 + $0xe74] sm:$0xf0] }
 0x539   :  { %v12775_v63 = vld [vmem:[#allocation11 + $0xd78] sm:$0xf0]  ;;  %v7897_v2 = vadd.f32 %v7896_v18, %v15155_v4  ;;  %v14338_v4 = vld [vmem:[#allocation11 + $0xe34] sm:$0xf0] }
 0x53a   :  { %v14166_v58 = vld [vmem:[#allocation11 + $0x8dc] sm:$0xf]  ;;  %v12778_v7 = vor.u32 %v14310_v34, %v12775_v63  ;;  %8228 = vmatpush.bf16.msrb.mxu1 %v12490_v6  ;;  %8150 = vmatpush.bf16.msrb.mxu3 %v12998_v33  ;;  %v14410_v33 = vld [vmem:[#allocation14 + $0x78] sm:$0xff]  ;;  %v12870_v29 = vor.u32 %v14338_v4, %v12869_v32  ;;  %v14395_v32 = vld [vmem:[#allocation14] sm:$0xff] }
 0x53b   :  { %v12199_v48 = vld [vmem:[#allocation11 + $0x8f8] sm:$0xf0]  ;;  %v7910_v6 = vadd.f32 %v15165_v14, %v7897_v2  ;;  %v14403_v4 = vld [vmem:[#allocation14 + $0x40] sm:$0xff] }
 0x53c   :  { %v14230_v55 = vld [vmem:[#allocation11 + $0xadc] sm:$0xf]  ;;  %v12202_v46 = vor.u32 %v14166_v58, %v12199_v48  ;;  %8240 = vmatpush.bf16.msrb.mxu2 %v12778_v7  ;;  %v12902_v58 = vor.u32 %v14346_v61, %v12901_v59 }
 0x53d   :  { %v12455_v41 = vld [vmem:[#allocation11 + $0xaf8] sm:$0xf0] }
 0x53e   :  { %v14302_v30 = vld [vmem:[#allocation11 + $0xd1c] sm:$0xf]  ;;  %v12458_v20 = vor.u32 %v14230_v55, %v12455_v41  ;;  %8216 = vmatpush.bf16.msrb.mxu0 %v12202_v46  ;;  %8151 = vmatpush.bf16.msrb.mxu3 %v12966_v57 }
 0x53f   :  { %v12743_v45 = vld [vmem:[#allocation11 + $0xd38] sm:$0xf0] }
 0x540   :  { %v14158_v3 = vld [vmem:[#allocation11 + $0x89c] sm:$0xf]  ;;  %v12746_v16 = vor.u32 %v14302_v30, %v12743_v45  ;;  %8229 = vmatpush.bf16.msrb.mxu1 %v12458_v20  ;;  %v7923_v45 = vadd.f32 %v15167_v1, %v7910_v6  ;;  %v14396_v6 = vld [vmem:[#allocation14 + $0x8] sm:$0xff] }
 0x541   :  { %v12167_v36 = vld [vmem:[#allocation11 + $0x8b8] sm:$0xf0] }
 0x542   :  { %v14222_v26 = vld [vmem:[#allocation11 + $0xa9c] sm:$0xf]  ;;  %v12170_v23 = vor.u32 %v14158_v3, %v12167_v36  ;;  %8241 = vmatpush.bf16.msrb.mxu2 %v12746_v16  ;;  %8152 = vmatpush.bf16.msrb.mxu3 %v12934_v24  ;;  %v15185_v3 = vadd.f32 %v15172_v25, %v7923_v45  ;;  %v7898_v36 = vpop.f32.mrf.mxu3 }
 0x543   :  { %v12423_v9 = vld [vmem:[#allocation11 + $0xab8] sm:$0xf0]  ;;  %v14412_v36 = vld [vmem:[#allocation14 + $0x88] sm:$0xff] }
 0x544   :  { %v14294_v60 = vld [vmem:[#allocation11 + $0xcdc] sm:$0xf]  ;;  %v12426_v0 = vor.u32 %v14222_v26, %v12423_v9  ;;  %8217 = vmatpush.bf16.msrb.mxu0 %v12170_v23  ;;  %v7989_v23 = vpop.f32.mrf.mxu2 }
 0x545   :  { %v12711_v62 = vld [vmem:[#allocation11 + $0xcf8] sm:$0xf0] }
 0x546   :  { %v14150_v47 = vld [vmem:[#allocation11 + $0x85c] sm:$0xf]  ;;  %v12714_v19 = vor.u32 %v14294_v60, %v12711_v62  ;;  %8230 = vmatpush.bf16.msrb.mxu1 %v12426_v0  ;;  %8153 = vmatpush.bf16.msrb.mxu3 %v12902_v58  ;;  %v14418_v60 = vld [vmem:[#allocation14 + $0xb8] sm:$0xff]  ;;  %v14400_v62 = vld [vmem:[#allocation14 + $0x28] sm:$0xff]  ;;  %v15191_v31 = vpop.f32.mrf.mxu0 }
 0x547   :  { %v12135_v35 = vld [vmem:[#allocation11 + $0x878] sm:$0xf0]  ;;  %v14404_v58 = vld [vmem:[#allocation14 + $0x48] sm:$0xff] }
 0x548   :  { %v14214_v12 = vld [vmem:[#allocation11 + $0xa5c] sm:$0xf]  ;;  %v12138_v11 = vor.u32 %v14150_v47, %v12135_v35  ;;  %8242 = vmatpush.bf16.msrb.mxu2 %v12714_v19  ;;  %v14399_v35 = vld [vmem:[#allocation14 + $0x20] sm:$0xff]  ;;  %v14416_v19 = vld [vmem:[#allocation14 + $0xa8] sm:$0xff]  ;;  %v15193_v22 = vpop.f32.mrf.mxu1 }
 0x549   :  { %v12391_v49 = vld [vmem:[#allocation11 + $0xa78] sm:$0xf0] }
 0x54a   :  { %v14286_v17 = vld [vmem:[#allocation11 + $0xc9c] sm:$0xf]  ;;  %v12394_v13 = vor.u32 %v14214_v12, %v12391_v49  ;;  %8218 = vmatpush.bf16.msrb.mxu0 %v12138_v11  ;;  %8154 = vmatpush.bf16.msrb.mxu3 %v12870_v29  ;;  %v14398_v11 = vld [vmem:[#allocation14 + $0x18] sm:$0xff]  ;;  %v15195_v56 = vpop.f32.mrf.mxu3 }
 0x54b   :  { %v12679_v21 = vld [vmem:[#allocation11 + $0xcb8] sm:$0xf0] }
 0x54c   :  { %v14142_v43 = vld [vmem:[#allocation11 + $0x81c] sm:$0xf]  ;;  %v12682_v27 = vor.u32 %v14286_v17, %v12679_v21  ;;  %8231 = vmatpush.bf16.msrb.mxu1 %v12394_v13  ;;  %v14406_v17 = vld [vmem:[#allocation14 + $0x58] sm:$0xff] }
 0x54d   :  { %v12103_v52 = vld [vmem:[#allocation11 + $0x838] sm:$0xf0]  ;;  %8155 = vmatmul.bf16.vlgmr.msrb.gmra.mxu3 %v15050_v10 }
 0x54e   :  { %v14206_v34 = vld [vmem:[#allocation11 + $0xa1c] sm:$0xf]  ;;  %v12106_v48 = vor.u32 %v14142_v43, %v12103_v52  ;;  %8243 = vmatpush.bf16.msrb.mxu2 %v12682_v27  ;;  %v8015_v2 = vpop.f32.mrf.mxu0 }
 0x54f   :  { %v12359_v63 = vld [vmem:[#allocation11 + $0xa38] sm:$0xf0] }
 0x550   :  { %v14278_v55 = vld [vmem:[#allocation11 + $0xc5c] sm:$0xf]  ;;  %v12362_v7 = vor.u32 %v14206_v34, %v12359_v63  ;;  %8219 = vmatpush.bf16.msrb.mxu0 %v12106_v48  ;;  %v14414_v34 = vld [vmem:[#allocation14 + $0x98] sm:$0xff]  ;;  %v8028_v63 = vpop.f32.mrf.mxu1 }
 0x551   :  { %v12647_v41 = vld [vmem:[#allocation11 + $0xc78] sm:$0xf0] }
 0x552   :  { %v14134_v46 = vld [vmem:[#allocation11 + $0x7dc] sm:$0xf]  ;;  %v12650_v14 = vor.u32 %v14278_v55, %v12647_v41  ;;  %8232 = vmatpush.bf16.msrb.mxu1 %v12362_v7 }
 0x553   :  { %v12071_v30 = vld [vmem:[#allocation11 + $0x7f8] sm:$0xf0]  ;;  %8220 = vmatmul.bf16.vlgmr.msrb.gmra.mxu0 %v15017_v53 }
 0x554   :  { %v14270_v20 = vld [vmem:[#allocation11 + $0xc1c] sm:$0xf]  ;;  %8796 = vmatpush.bf16.msra.mxu0 %v14402_v51  ;;  %v12074_v37 = vor.u32 %v14134_v46, %v12071_v30  ;;  %8244 = vmatpush.bf16.msrb.mxu2 %v12650_v14  ;;  %v15197_v7 = vpop.f32.mrf.mxu2  ;;  %v14434_v46 = vld [vmem:[#allocation14 + $0x138] sm:$0xff]  ;;  %v8265_v14 = vmax.f32 %v15116_v40, 0.0  ;;  %v14411_v40 = vld [vmem:[#allocation14 + $0x80] sm:$0xff] }
 0x555   :  { %v12615_v54 = vld [vmem:[#allocation11 + $0xc38] sm:$0xf0]  ;;  %8233 = vmatmul.bf16.vlgmr.msrb.gmra.mxu1 %v15020_v50  ;;  %v14407_v50 = vld [vmem:[#allocation14 + $0x60] sm:$0xff] }
 0x556   :  { %v14401_v26 = vld [vmem:[#allocation14 + $0x30] sm:$0xff]  ;;  %8809 = vmatpush.bf16.msra.mxu1 %v14410_v33  ;;  %v12618_v1 = vor.u32 %v14270_v20, %v12615_v54  ;;  %8199 = vmatpush.bf16.msra.mxu3 %v12074_v37  ;;  %v8264_v33 = vmax.f32 %v15100_v5, 0.0  ;;  %v14442_v54 = vld [vmem:[#allocation14 + $0x178] sm:$0xff] }
 0x557   :  { %v14409_v9 = vld [vmem:[#allocation14 + $0x70] sm:$0xff] }
 0x558   :  { %v14126_v16 = vld [vmem:[#allocation11 + $0x79c] sm:$0xf]  ;;  %8797 = vmatpush.bf16.msra.mxu0 %v14401_v26  ;;  %8245 = vmatpush.bf16.msrb.mxu2 %v12618_v1  ;;  %v8272_v26 = vpack.c.bf16 %v8264_v33, %v8264_v33  ;;  %v14436_v33 = vld [vmem:[#allocation14 + $0x148] sm:$0xff] }
 0x559   :  { %v12039_v57 = vld [vmem:[#allocation11 + $0x7b8] sm:$0xf0] }
 0x55a   :  { %v12042_v25 = vor.u32 %v14126_v16, %v12039_v57  ;;  %8810 = vmatpush.bf16.msra.mxu1 %v14409_v9  ;;  %v14118_v0 = vld [vmem:[#allocation11 + $0x75c] sm:$0xf]  ;;  %v7950_v9 = vpop.f32.mrf.mxu3  ;;  %v8273_v57 = vpack.c.bf16 %v8265_v14, %v8265_v14 }
 0x55b   :  { %v12007_v38 = vld [vmem:[#allocation11 + $0x778] sm:$0xf0]  ;;  %8246 = vmatmul.bf16.vlgmr.msrb.gmra.mxu2 %v15028_v15  ;;  %v14415_v15 = vld [vmem:[#allocation14 + $0xa0] sm:$0xff] }
 0x55c   :  { %8822 = vmatpush.bf16.msra.mxu2 %v14418_v60  ;;  %v14417_v47 = vld [vmem:[#allocation14 + $0xb0] sm:$0xff]  ;;  %8200 = vmatpush.bf16.msra.mxu3 %v12042_v25  ;;  %v12010_v53 = vor.u32 %v14118_v0, %v12007_v38  ;;  %v8266_v25 = vmax.f32 %v15142_v44, 0.0  ;;  %v14432_v0 = vld [vmem:[#allocation14 + $0x128] sm:$0xff] }
 0x55d   :  { %8798 = vmatpush.bf16.msra.mxu0 %v14400_v62  ;;  %v14110_v12 = vld [vmem:[#allocation11 + $0x71c] sm:$0xf]  ;;  %v8041_v62 = vpop.f32.mrf.mxu2 }
 0x55e   :  { %8811 = vmatpush.bf16.msra.mxu1 %v14408_v28  ;;  %v11975_v49 = vld [vmem:[#allocation11 + $0x738] sm:$0xf0] }
 0x55f   :  { %v11978_v24 = vor.u32 %v14110_v12, %v11975_v49  ;;  %v14102_v21 = vld [vmem:[#allocation11 + $0x6dc] sm:$0xf]  ;;  %v14431_v49 = vld [vmem:[#allocation14 + $0x120] sm:$0xff] }
 0x560   :  { %8823 = vmatpush.bf16.msra.mxu2 %v14417_v47  ;;  %8201 = vmatpush.bf16.msra.mxu3 %v12010_v53  ;;  %v11943_v59 = vld [vmem:[#allocation11 + $0x6f8] sm:$0xf0]  ;;  %v14440_v53 = vld [vmem:[#allocation14 + $0x168] sm:$0xff] }
 0x561   :  { %8799 = vmatpush.bf16.msra.mxu0 %v14399_v35  ;;  %v11946_v18 = vor.u32 %v14102_v21, %v11943_v59  ;;  %v14397_v13 = vld [vmem:[#allocation14 + $0x10] sm:$0xff]  ;;  %v8274_v35 = vpack.c.bf16 %v8266_v25, %v8266_v25  ;;  %v14422_v25 = vld [vmem:[#allocation14 + $0xd8] sm:$0xff] }
 0x562   :  { %8812 = vmatpush.bf16.msra.mxu1 %v14407_v50  ;;  %v14405_v61 = vld [vmem:[#allocation14 + $0x50] sm:$0xff]  ;;  %v15203_v50 = vld [vmem:[#allocation13] sm:$0xff] }
 0x563   :  { %v14094_v43 = vld [vmem:[#allocation11 + $0x69c] sm:$0xf]  ;;  %v4862_v44 = vperm.slane %v15203_v50, 6 }
 0x564   :  { %8824 = vmatpush.bf16.msra.mxu2 %v14416_v19  ;;  %8202 = vmatpush.bf16.msra.mxu3 %v11978_v24  ;;  %v11911_v52 = vld [vmem:[#allocation11 + $0x6b8] sm:$0xf0] }
 0x565   :  { %8800 = vmatpush.bf16.msra.mxu0 %v14398_v11  ;;  %v11914_v27 = vor.u32 %v14094_v43, %v11911_v52  ;;  %v14086_v48 = vld [vmem:[#allocation11 + $0x65c] sm:$0xf]  ;;  %v14439_v11 = vld [vmem:[#allocation14 + $0x160] sm:$0xff] }
 0x566   :  { %8813 = vmatpush.bf16.msra.mxu1 %v14406_v17  ;;  %v11879_v55 = vld [vmem:[#allocation11 + $0x678] sm:$0xf0]  ;;  %v8065_v17 = vpop.f32.mrf.mxu0 }
 0x567   :  { %v14413_v41 = vld [vmem:[#allocation14 + $0x90] sm:$0xff]  ;;  %v11882_v51 = vor.u32 %v14086_v48, %v11879_v55  ;;  %v8066_v21 = vadd.f32 %v8065_v17, %v4862_v44  ;;  %v14428_v55 = vld [vmem:[#allocation14 + $0x108] sm:$0xff] }
 0x568   :  { %8825 = vmatpush.bf16.msra.mxu2 %v14415_v15  ;;  %8203 = vmatpush.bf16.msra.mxu3 %v11946_v18  ;;  %v14078_v30 = vld [vmem:[#allocation11 + $0x61c] sm:$0xf]  ;;  %v8078_v59 = vpop.f32.mrf.mxu1  ;;  %v14430_v15 = vld [vmem:[#allocation14 + $0x118] sm:$0xff] }
 0x569   :  { %8801 = vmatpush.bf16.msra.mxu0 %v14397_v13  ;;  %v11847_v45 = vld [vmem:[#allocation11 + $0x638] sm:$0xf0]  ;;  %v8079_v43 = vadd.f32 %v8078_v59, %v8066_v21  ;;  %v4863_v59 = vperm.slane %v15203_v50, 7 }
 0x56a   :  { %8814 = vmatpush.bf16.msra.mxu1 %v14405_v61  ;;  %v14390_v29 = vld [vmem:[#allocation11 + $0xfdc] sm:$0xf]  ;;  %v11850_v37 = vor.u32 %v14078_v30, %v11847_v45  ;;  %v14438_v61 = vld [vmem:[#allocation14 + $0x158] sm:$0xff]  ;;  %v14427_v45 = vld [vmem:[#allocation14 + $0x100] sm:$0xff] }
 0x56b   :  { %v13095_v20 = vld [vmem:[#allocation11 + $0xff8] sm:$0xf0] }
 0x56c   :  { %8826 = vmatpush.bf16.msra.mxu2 %v14414_v34  ;;  %8204 = vmatpush.bf16.msra.mxu3 %v11914_v27  ;;  %v13098_v16 = vor.u32 %v14390_v29, %v13095_v20  ;;  %v14433_v5 = vld [vmem:[#allocation14 + $0x130] sm:$0xff] }
 0x56d   :  { %8802 = vmatpush.bf16.msra.mxu0 %v14396_v6  ;;  %v14382_v1 = vld [vmem:[#allocation11 + $0xf9c] sm:$0xf] }
 0x56e   :  { %8815 = vmatpush.bf16.msra.mxu1 %v14404_v58  ;;  %v13063_v23 = vld [vmem:[#allocation11 + $0xfb8] sm:$0xf0]  ;;  %v8067_v6 = vpop.f32.mrf.mxu0 }
 0x56f   :  { %v14441_v60 = vld [vmem:[#allocation14 + $0x170] sm:$0xff]  ;;  %v13066_v28 = vor.u32 %v14382_v1, %v13063_v23 }
 0x570   :  { %8827 = vmatpush.bf16.msra.mxu2 %v14413_v41  ;;  %8205 = vmatpush.bf16.msra.mxu3 %v11882_v51  ;;  %v14374_v38 = vld [vmem:[#allocation11 + $0xf5c] sm:$0xf]  ;;  %v8080_v58 = vpop.f32.mrf.mxu1  ;;  %v7949_v41 = vadd.f32 %v15195_v56, %v15185_v3  ;;  %v8000_v51 = vpop.f32.mrf.mxu3 }
 0x571   :  { %8803 = vmatpush.bf16.msra.mxu0 %v14395_v32  ;;  %v13031_v47 = vld [vmem:[#allocation11 + $0xf78] sm:$0xf0] }
 0x572   :  { %8816 = vmatpush.bf16.msra.mxu1 %v14403_v4  ;;  %v13034_v12 = vor.u32 %v14374_v38, %v13031_v47  ;;  %v14366_v19 = vld [vmem:[#allocation11 + $0xf1c] sm:$0xf]  ;;  %v8268_v14 = vmax.f32 %v7949_v41, 0.0 }
 0x573   :  { %v12999_v24 = vld [vmem:[#allocation11 + $0xf38] sm:$0xf0] }
 0x574   :  { %8828 = vmatpush.bf16.msra.mxu2 %v14412_v36  ;;  %8804 = vmatmul.bf16.vlgmr.msra.gmra.mxu0 %v8272_v26  ;;  %v14358_v18 = vld [vmem:[#allocation11 + $0xedc] sm:$0xf]  ;;  %v14435_v36 = vld [vmem:[#allocation14 + $0x140] sm:$0xff]  ;;  %v8276_v56 = vpack.c.bf16 %v8268_v14, %v8268_v14  ;;  %v14426_v26 = vld [vmem:[#allocation14 + $0xf8] sm:$0xff] }
 0x575   :  { %8848 = vmatpush.bf16.msrb.mxu0 %v14434_v46  ;;  %8206 = vmatpush.bf16.msra.mxu3 %v11850_v37  ;;  %v12967_v13 = vld [vmem:[#allocation11 + $0xef8] sm:$0xf0]  ;;  %v8091_v46 = vpop.f32.mrf.mxu2 }
 0x576   :  { %8861 = vmatpush.bf16.msrb.mxu1 %v14442_v54  ;;  %v12970_v52 = vor.u32 %v14358_v18, %v12967_v13  ;;  %v14429_v2 = vld [vmem:[#allocation14 + $0x110] sm:$0xff]  ;;  %v15208_v29 = vadd.f32 %v8091_v46, %v8079_v43 }
 0x577   :  { %8817 = vmatmul.bf16.vlgmr.msra.gmra.mxu1 %v8273_v57  ;;  %v14350_v34 = vld [vmem:[#allocation11 + $0xe9c] sm:$0xf]  ;;  %v14424_v57 = vld [vmem:[#allocation14 + $0xe8] sm:$0xff] }
 0x578   :  { %8207 = vmatmul.bf16.vlgmr.msra.gmra.mxu3 %v14999_v8  ;;  %8829 = vmatpush.bf16.msra.mxu2 %v14411_v40  ;;  %v13002_v8 = vor.u32 %v14366_v19, %v12999_v24  ;;  %v12935_v63 = vld [vmem:[#allocation11 + $0xeb8] sm:$0xf0]  ;;  %v8002_v37 = vpop.f32.mrf.mxu3  ;;  %v14423_v40 = vld [vmem:[#allocation14 + $0xe0] sm:$0xff]  ;;  %v8267_v19 = vmax.f32 %v15170_v39, 0.0  ;;  %v14444_v39 = vld [vmem:[#allocation14 + $0x188] sm:$0xff] }
 0x579   :  { %8251 = vmatpush.bf16.msrb.mxu3 %v13098_v16  ;;  %8849 = vmatpush.bf16.msrb.mxu0 %v14433_v5  ;;  %v14437_v27 = vld [vmem:[#allocation14 + $0x150] sm:$0xff]  ;;  %v12938_v48 = vor.u32 %v14350_v34, %v12935_v63  ;;  %v8001_v5 = vadd.f32 %v8000_v51, %v15181_v42  ;;  %v14450_v42 = vld [vmem:[#allocation14 + $0x1b8] sm:$0xff]  ;;  %v14443_v34 = vld [vmem:[#allocation14 + $0x180] sm:$0xff] }
 0x57a   :  { %8862 = vmatpush.bf16.msrb.mxu1 %v14441_v60  ;;  %v14342_v32 = vld [vmem:[#allocation11 + $0xe5c] sm:$0xf]  ;;  %v8275_v21 = vpack.c.bf16 %v8267_v19, %v8267_v19  ;;  %v14456_v37 = vld [vmem:[#allocation14 + $0x1e8] sm:$0xff] }
 0x57b   :  { %8830 = vmatmul.bf16.vlgmr.msra.gmra.mxu2 %v8274_v35  ;;  %v12903_v4 = vld [vmem:[#allocation11 + $0xe78] sm:$0xf0]  ;;  %v8014_v23 = vadd.f32 %v15191_v31, %v8001_v5  ;;  %v14420_v31 = vld [vmem:[#allocation14 + $0xc8] sm:$0xff] }
 0x57c   :  { %v12906_v30 = vor.u32 %v14342_v32, %v12903_v4  ;;  %v14334_v20 = vld [vmem:[#allocation11 + $0xe1c] sm:$0xf]  ;;  %8874 = vmatpush.bf16.msrb.mxu2 %v14450_v42 }
 0x57d   :  { %8252 = vmatpush.bf16.msrb.mxu3 %v13066_v28  ;;  %8850 = vmatpush.bf16.msrb.mxu0 %v14432_v0  ;;  %v12871_v54 = vld [vmem:[#allocation11 + $0xe38] sm:$0xf0]  ;;  %v8093_v9 = vpop.f32.mrf.mxu2  ;;  %v8027_v62 = vadd.f32 %v15193_v22, %v8014_v23  ;;  %v14419_v22 = vld [vmem:[#allocation14 + $0xc0] sm:$0xff] }
 0x57e   :  { %8863 = vmatpush.bf16.msrb.mxu1 %v14440_v53  ;;  %v12874_v3 = vor.u32 %v14334_v20, %v12871_v54  ;;  %v14425_v16 = vld [vmem:[#allocation14 + $0xf0] sm:$0xff]  ;;  %v14473_v9 = vld [vmem:[#allocation16] ss:$0 sm:$0xff] }
 0x57f   :  { %v8040_v38 = vadd.f32 %v15197_v7, %v8027_v62  ;;  %v14447_v7 = vld [vmem:[#allocation14 + $0x1a0] sm:$0xff]  ;;  %v14453_v5 = vld [vmem:[#allocation14 + $0x1d0] sm:$0xff] }
 0x581   :  { %8253 = vmatpush.bf16.msrb.mxu3 %v13034_v12  ;;  %8851 = vmatpush.bf16.msrb.mxu0 %v14431_v49  ;;  %v14449_v12 = vld [vmem:[#allocation14 + $0x1b0] sm:$0xff] }
 0x582   :  { %8864 = vmatpush.bf16.msrb.mxu1 %v14439_v11  ;;  %8875 = vmatpush.bf16.msrb.mxu2 %v14449_v12  ;;  %v14448_v11 = vld [vmem:[#allocation14 + $0x1a8] sm:$0xff] }
 0x585   :  { %8254 = vmatpush.bf16.msrb.mxu3 %v13002_v8  ;;  %8852 = vmatpush.bf16.msrb.mxu0 %v14430_v15  ;;  %v14446_v8 = vld [vmem:[#allocation14 + $0x198] sm:$0xff]  ;;  %v14445_v15 = vld [vmem:[#allocation14 + $0x190] sm:$0xff] }
 0x586   :  { %8865 = vmatpush.bf16.msrb.mxu1 %v14438_v61  ;;  %8876 = vmatpush.bf16.msrb.mxu2 %v14448_v11 }
 0x588   :  { %v8117_v1 = vpop.f32.mrf.mxu0 }
 0x589   :  { %8255 = vmatpush.bf16.msrb.mxu3 %v12970_v52  ;;  %8853 = vmatpush.bf16.msrb.mxu0 %v14429_v2 }
 0x58a   :  { %8866 = vmatpush.bf16.msrb.mxu1 %v14437_v27  ;;  %v8130_v60 = vpop.f32.mrf.mxu1  ;;  %8877 = vmatpush.bf16.msrb.mxu2 %v14447_v7 }
 0x58d   :  { %8256 = vmatpush.bf16.msrb.mxu3 %v12938_v48  ;;  %8854 = vmatpush.bf16.msrb.mxu0 %v14428_v55 }
 0x58e   :  { %8867 = vmatpush.bf16.msrb.mxu1 %v14436_v33  ;;  %v8052_v47 = vpop.f32.mrf.mxu3  ;;  %8878 = vmatpush.bf16.msrb.mxu2 %v14446_v8 }
 0x58f   :  { %v8053_v53 = vadd.f32 %v8052_v47, %v8040_v38 }
 0x590   :  { %v8119_v28 = vpop.f32.mrf.mxu0 }
 0x591   :  { %8257 = vmatpush.bf16.msrb.mxu3 %v12906_v30  ;;  %8855 = vmatpush.bf16.msrb.mxu0 %v14427_v45  ;;  %v8269_v35 = vmax.f32 %v8053_v53, 0.0  ;;  %v14458_v45 = vld [vmem:[#allocation14 + $0x1f8] sm:$0xff]  ;;  %v14451_v28 = vld [vmem:[#allocation14 + $0x1c0] sm:$0xff] }
 0x592   :  { %8868 = vmatpush.bf16.msrb.mxu1 %v14435_v36  ;;  %v8132_v0 = vpop.f32.mrf.mxu1  ;;  %8879 = vmatpush.bf16.msrb.mxu2 %v14445_v15  ;;  %v14457_v36 = vld [vmem:[#allocation14 + $0x1f0] sm:$0xff] }
 0x593   :  { %v8277_v49 = vpack.c.bf16 %v8269_v35, %v8269_v35 }
 0x594   :  { %8856 = vmatmul.bf16.vlgmr.msrb.gmra.mxu0 %v8276_v56 }
 0x595   :  { %8258 = vmatpush.bf16.msrb.mxu3 %v12874_v3  ;;  %8869 = vmatmul.bf16.vlgmr.msrb.gmra.mxu1 %v8277_v49 }
 0x596   :  { %v8143_v44 = vpop.f32.mrf.mxu2  ;;  %v8054_v24 = vpop.f32.mrf.mxu3  ;;  %8880 = vmatpush.bf16.msrb.mxu2 %v14444_v39 }
 0x598   :  { %8259 = vmatmul.bf16.vlgmr.msrb.gmra.mxu3 %v15050_v10  ;;  %v14421_v10 = vld [vmem:[#allocation14 + $0xd0] sm:$0xff] }
 0x599   :  { %8835 = vmatpush.bf16.msra.mxu3 %v14426_v26 }
 0x59a   :  { %8881 = vmatpush.bf16.msrb.mxu2 %v14443_v34 }
 0x59d   :  { %8836 = vmatpush.bf16.msra.mxu3 %v14425_v16  ;;  %v14454_v16 = vld [vmem:[#allocation14 + $0x1d8] sm:$0xff] }
 0x59e   :  { %v8145_v17 = vpop.f32.mrf.mxu2 }
 0x5a1   :  { %8837 = vmatpush.bf16.msra.mxu3 %v14424_v57 }
 0x5a5   :  { %8838 = vmatpush.bf16.msra.mxu3 %v14423_v40  ;;  %v14452_v40 = vld [vmem:[#allocation14 + $0x1c8] sm:$0xff] }
 0x5a8   :  { %v8169_v18 = vpop.f32.mrf.mxu0 }
 0x5a9   :  { %8839 = vmatpush.bf16.msra.mxu3 %v14422_v25  ;;  %v8170_v13 = vadd.f32 %v8169_v18, %v4863_v59 }
 0x5aa   :  { %v8182_v61 = vpop.f32.mrf.mxu1 }
 0x5ab   :  { %v8183_v43 = vadd.f32 %v8182_v61, %v8170_v13 }
 0x5ad   :  { %8840 = vmatpush.bf16.msra.mxu3 %v14421_v10 }
 0x5b0   :  { %v8171_v52 = vpop.f32.mrf.mxu0  ;;  %v8104_v63 = vpop.f32.mrf.mxu3 }
 0x5b1   :  { %8841 = vmatpush.bf16.msra.mxu3 %v14420_v31  ;;  %v8105_v50 = vadd.f32 %v8104_v63, %v15208_v29  ;;  %v14455_v29 = vld [vmem:[#allocation14 + $0x1e0] sm:$0xff] }
 0x5b2   :  { %v8184_v2 = vpop.f32.mrf.mxu1 }
 0x5b3   :  { %v8118_v41 = vadd.f32 %v8117_v1, %v8105_v50 }
 0x5b5   :  { %8842 = vmatpush.bf16.msra.mxu3 %v14419_v22  ;;  %v8131_v32 = vadd.f32 %v8130_v60, %v8118_v41 }
 0x5b6   :  { %v8195_v27 = vpop.f32.mrf.mxu2 }
 0x5b7   :  { %v8196_v6 = vadd.f32 %v8195_v27, %v8183_v43  ;;  %v8144_v46 = vadd.f32 %v8143_v44, %v8131_v32 }
 0x5b8   :  { %8843 = vmatmul.bf16.vlgmr.msra.gmra.mxu3 %v8275_v21  ;;  %v8106_v58 = vpop.f32.mrf.mxu3 }
 0x5b9   :  { %8887 = vmatpush.bf16.msrb.mxu3 %v14458_v45 }
 0x5bd   :  { %8888 = vmatpush.bf16.msrb.mxu3 %v14457_v36 }
 0x5be   :  { %v8197_v48 = vpop.f32.mrf.mxu2 }
 0x5c1   :  { %8889 = vmatpush.bf16.msrb.mxu3 %v14456_v37 }
 0x5c5   :  { %8890 = vmatpush.bf16.msrb.mxu3 %v14455_v29 }
 0x5c9   :  { %8891 = vmatpush.bf16.msrb.mxu3 %v14454_v16 }
 0x5cd   :  { %8892 = vmatpush.bf16.msrb.mxu3 %v14453_v5 }
 0x5d0   :  { %v8221_v55 = vpop.f32.mrf.mxu0  ;;  %v8156_v30 = vpop.f32.mrf.mxu3 }
 0x5d1   :  { %v8157_v14 = vadd.f32 %v8156_v30, %v8144_v46  ;;  %8893 = vmatpush.bf16.msrb.mxu3 %v14452_v40 }
 0x5d2   :  { %v8234_v51 = vpop.f32.mrf.mxu1 }
 0x5d3   :  { %v8270_v20 = vmax.f32 %v8157_v14, 0.0 }
 0x5d5   :  { %v8278_v3 = vpack.c.bf16 %v8270_v20, %v8270_v20  ;;  %8894 = vmatpush.bf16.msrb.mxu3 %v14451_v28 }
 0x5d7   :  { %8882 = vmatmul.bf16.vlgmr.msrb.gmra.mxu2 %v8278_v3 }
 0x5d8   :  { %v8223_v4 = vpop.f32.mrf.mxu0  ;;  %v8158_v56 = vpop.f32.mrf.mxu3 }
 0x5da   :  { %v8236_v33 = vpop.f32.mrf.mxu1 }
 0x5de   :  { %v8247_v54 = vpop.f32.mrf.mxu2 }
 0x5e6   :  { %v8249_v26 = vpop.f32.mrf.mxu2 }
 0x5f1   :  { %v8805_v57 = vpop.f32.mrf.mxu0 }
 0x5f2   :  { %v8806_v1 = vadd.f32 %v14473_v9, %v8805_v57 }
 0x5f4   :  { %v8818_v23 = vpop.f32.mrf.mxu1 }
 0x5f5   :  { %v8819_v60 = vadd.f32 %v8818_v23, %v8806_v1 }
 0x5f9   :  { %v8807_v25 = vpop.f32.mrf.mxu0 }
 0x5fb   :  { %v8208_v0 = vpop.f32.mrf.mxu3 }
 0x5fc   :  { %v8820_v62 = vpop.f32.mrf.mxu1  ;;  %v8209_v53 = vadd.f32 %v8208_v0, %v8196_v6 }
 0x5fe   :  { %v8831_v38 = vpop.f32.mrf.mxu2  ;;  %v8222_v44 = vadd.f32 %v8221_v55, %v8209_v53 }
 0x5ff   :  { %v8832_v10 = vadd.f32 %v8831_v38, %v8819_v60 }
 0x600   :  { %v8235_v31 = vadd.f32 %v8234_v51, %v8222_v44 }
 0x602   :  { %v8248_v49 = vadd.f32 %v8247_v54, %v8235_v31 }
 0x603   :  { %v8210_v47 = vpop.f32.mrf.mxu3 }
 0x606   :  { %v8833_v42 = vpop.f32.mrf.mxu2 }
 0x611   :  { %v8857_v35 = vpop.f32.mrf.mxu0 }
 0x612   :  { %v8870_v17 = vpop.f32.mrf.mxu1 }
 0x619   :  { %v8859_v12 = vpop.f32.mrf.mxu0 }
 0x61a   :  { %v8872_v21 = vpop.f32.mrf.mxu1 }
 0x61b   :  { %v8260_v22 = vpop.f32.mrf.mxu3 }
 0x61c   :  { %v8261_v19 = vadd.f32 %v8260_v22, %v8248_v49 }
 0x61e   :  { %v8271_v24 = vmax.f32 %v8261_v19, 0.0 }
 0x620   :  { %v8279_v11 = vpack.c.bf16 %v8271_v24, %v8271_v24 }
 0x622   :  { %8895 = vmatmul.bf16.vlgmr.msrb.gmra.mxu3 %v8279_v11 }
 0x623   :  { %v8262_v7 = vpop.f32.mrf.mxu3 }
 0x63b   :  { %v8844_v59 = vpop.f32.mrf.mxu3 }
 0x63c   :  { %v8845_v8 = vadd.f32 %v8844_v59, %v8832_v10 }
 0x63e   :  { %v8858_v15 = vadd.f32 %v8857_v35, %v8845_v8 }
 0x640   :  { %v8871_v18 = vadd.f32 %v8870_v17, %v8858_v15 }
 0x643   :  { %v8846_v13 = vpop.f32.mrf.mxu3 }
 0x65a   :  { %v8883_v61 = vpop.f32.mrf.mxu2 }
 0x65b   :  { %v8884_v39 = vadd.f32 %v8883_v61, %v8871_v18 }
 0x662   :  { %v8885_v43 = vpop.f32.mrf.mxu2 }
 0x6a5   :  { %v8896_v52 = vpop.f32.mrf.mxu3 }
 0x6a6   :  { %v8897_v2 = vadd.f32 %v8896_v52, %v8884_v39 }
 0x6a8   :  { %8900 = vmax.xlane.f32.xlu0 %v8897_v2 }
 0x6ad   :  { %v8898_v34 = vpop.f32.mrf.mxu3 }
 0x71b   :  { %v8901_v63 = vpop.xlane.xlu0 %8900 }
 0x71c   :  { %v8902_v27 = vsub.f32 %v8897_v2, %v8901_v63 }
 0x71e   :  { %v8903_v6 = vmul.f32 1.442695, %v8902_v27 }
 0x720   :  { %14474 = vpow2.f32 %v8903_v6 }
 0x726   :  { %v14475_v58 = vpop.eup %14474 }
 0x727   :  { %8905 = vadd.xlane.f32.xlu0 %v14475_v58 }
 0x79a   :  { %v8906_v48 = vpop.xlane.xlu0 %8905 }
 0x79b   :  { %14476 = vrcp.f32 %v8906_v48 }
 0x7a1   :  { %v14477_v50 = vpop.eup %14476 }
 0x7a2   :  { %v8908_v55 = vmul.f32 %v14477_v50, %v14475_v58 }
 0x7a4   :  { %8909 = vst [vmem:[#allocation17] sm:$0xff] %v8908_v55 }
 0x7a5   :  { %8920 = dma.vmem_to_hbm [thread:$0]  %s8916_s8, 128, %s8918_s30, [#allocation4]  }
 0x7a6   :  { %14733 = dma.done.wait [#allocation4], 128  }
 0x7a7   :  { %14734 = vsyncadd [#allocation4], 4294967168 }
 0x7a8   :  { %8925 = vsyncpa [#allocation3], 1 }
 0x7a9   :  { %8926 = vsyncpa [#allocation6], 1 }
 0x7aa   :  { %8927 = vsyncpa [#allocation9], 1 }
 0x7ab   :  { %8928 = vsyncpa [#allocation12], 1 }
 0x7ac   :  { %8929 = vsyncpa [#allocation15], 1 }
 0x7ad   :  { %8930 = vsyncpa [#allocation4], 1 }

</bundles_post_ra>
